<compile_context>
chip_gen: v5e
topology: v5e:2x2
jax: 0.10.0
libtpu: 0.0.40
codegen_flags: <defaults>
</compile_context>

<pallas_src>
import functools

import jax
import jax.numpy as jnp
from jax import lax
from jax.experimental import pallas as pl
from jax.experimental.pallas import tpu as pltpu


# ------------------------------- helpers ----------------------------------- #

def _round_up(x, m):
    return (x + m - 1) // m * m


def _group_onehot(cpad, cg):
    """One-hot channel->group matrix [cpad, cpad//cg] (contiguous groups of cg)."""
    gpad = cpad // cg
    return (jnp.arange(cpad)[:, None] // cg == jnp.arange(gpad)[None, :]).astype(jnp.float32)


def _vmem_limit_bytes():
    """Per-generation scoped-VMEM limit: ~85% of physical, capped at 100 MiB.
    => ~54 MiB on v7x (64 MiB VMEM), 100 MiB on v5e/v6e (128 MiB VMEM)."""
    cap = 64 * 1024 * 1024
    try:
        info = pltpu.get_tpu_info()
        cap = int(getattr(info, "vmem_capacity_bytes", cap) or cap)
    except Exception:
        pass
    return max(32 * 1024 * 1024, min(int(cap * 0.85), 100 * 1024 * 1024))


def _max_b_tile_for_vmem(hw, hpwp, cin, cout, cb, vmem_limit):
    """Rough per-sample VMEM footprint -> largest batch tile that fits the budget."""
    cpad1 = 3 * cb
    stream1 = hpwp * cin * 2 + hw * cout * (4 + 4 + 2)            # k1: haloed input + 3 outputs
    stream2 = hpwp * cout * 2 + hw * cout * 4 + hw * cout * 4     # k2: haloed f1 + residual + out
    stream = 2 * max(stream1, stream2)                            # double-buffered by the pipeline
    temps = 3 * hw * cpad1 * 4                                    # y / yn / tap working set (f32)
    per_sample = stream + temps
    return max(1, (vmem_limit * 3 // 5) // max(per_sample, 1))


# --------------------------- in-kernel math --------------------------------- #

def _sigmoid(x):
    """Exact, overflow-safe sigmoid (EUP exp + select/divide); applied slab-wise only."""
    e = jnp.exp(-jnp.abs(x))
    return jnp.where(x >= 0, 1.0 / (1.0 + e), e / (1.0 + e))


def _elu(v):
    # exp(v)-1 instead of expm1: the accuracy delta is ~1e-7 in f32, far below the
    # bf16-matmul noise floor at the tolerances used here.
    return jnp.where(v > 0, v, jnp.exp(v) - 1.0)


def _conv3x3_taps(xp, w_ref, h, w):
    """In-VMEM im2col.  xp: [bt, h+2, w+2, cin] haloed bf16 block; w_ref: Ref[9, cin, cpad]
    bf16.  Returns the conv output [bt*h*w, cpad] in f32 as nine accumulated MXU
    matmuls - the 9x patch tensor never exists in HBM."""
    bt, _, _, cin = xp.shape
    acc = None
    for kh in range(3):
        for kw in range(3):
            tap = xp[:, kh:kh + h, kw:kw + w, :].reshape(bt * h * w, cin)
            y = jnp.dot(tap, w_ref[kh * 3 + kw], preferred_element_type=jnp.float32)
            acc = y if acc is None else acc + y
    return acc


def _groupnorm(y, gmat, gmat_t, gamma, beta, cnt, eps):
    """Per-sample GroupNorm of y: [bt, hw, cpad] (f32); gamma/beta: [1, cpad].
    Channel sum / sum-of-squares stay as two reductions: a stacked single-pass
    variant needs a full-size [.., 2*cpad] temp that costs more VMEM/VPU than the
    extra sweep saves (the y*y temp feeds its reduction directly)."""
    ch_sum = jnp.sum(y, axis=1)                                           # [bt, cpad]
    ch_sq = jnp.sum(y * y, axis=1)                                        # [bt, cpad]
    mean_g = jnp.dot(ch_sum, gmat, preferred_element_type=jnp.float32) / cnt   # [bt, G]
    esq_g = jnp.dot(ch_sq, gmat, preferred_element_type=jnp.float32) / cnt
    var_g = jnp.maximum(esq_g - mean_g * mean_g, 0.0)                     # biased var (torch GN)
    mean_c = jnp.dot(mean_g, gmat_t, preferred_element_type=jnp.float32)  # [bt, cpad]
    var_c = jnp.dot(var_g, gmat_t, preferred_element_type=jnp.float32)
    scale = lax.rsqrt(var_c + eps) * gamma                                # [bt, cpad]
    shift = beta - mean_c * scale
    return y * scale[:, None, :] + shift[:, None, :]


# ----------------------------- Pallas kernels ------------------------------ #

def _fused_conv_gn_kernel(xp_ref, w_ref, b_ref, gmat_ref, gmat_t_ref, gamma_ref, beta_ref,
                          res_ref, gate_ref, c1_ref, *, h, w, cb, cout, cg, eps):
    """Fused (res 1x1 | gate 3x3 | c1 3x3) conv + bias + per-branch GroupNorm + activation.

    Fused matmul column layout (each branch slab 128-aligned, zero-padded to cb):
      [0,    cb)   residual  GN(conv1x1)          -> res_ref  (f32, first cout cols)
      [cb,  2cb)   gate      sigmoid(GN(conv3x3)) -> gate_ref (f32, module output g)
      [2cb, 3cb)   c1        ELU(GN(conv3x3))     -> c1_ref   (bf16, kernel-2 input)
    """
    bt = xp_ref.shape[0]
    hw = h * w
    cpad = w_ref.shape[-1]

    xp = xp_ref[...]                                              # [bt, h+2, w+2, cin] bf16
    y = _conv3x3_taps(xp, w_ref, h, w).reshape(bt, hw, cpad) + b_ref[...]
    yn = _groupnorm(y, gmat_ref[...], gmat_t_ref[...], gamma_ref[...], beta_ref[...],
                    float(hw * cg), eps)

    # Slab-wise activations on 128-aligned static slices: no iota, no selects, and the
    # transcendentals run only over the cout real columns of their own branch.
    res_ref[...] = yn[:, :, 0:cout]
    gate_ref[...] = _sigmoid(yn[:, :, cb:cb + cout])
    c1_ref[...] = _elu(yn[:, :, 2 * cb:2 * cb + cout]).astype(jnp.bfloat16)


def _conv_gn_res_elu_kernel(f1p_ref, res_ref, w_ref, b_ref, gmat_ref, gmat_t_ref,
                            gamma_ref, beta_ref, f_ref, *, h, w, cout, cg, eps):
    """c2 conv + bias + GroupNorm + residual add + ELU.  The residual input is the
    out_ch-wide slab emitted by kernel 1 (no column mask needed)."""
    bt = f1p_ref.shape[0]
    hw = h * w
    cpad = w_ref.shape[-1]

    xp = f1p_ref[...]                                             # [bt, h+2, w+2, cout] bf16
    y = _conv3x3_taps(xp, w_ref, h, w).reshape(bt, hw, cpad) + b_ref[...]
    yn = _groupnorm(y, gmat_ref[...], gmat_t_ref[...], gamma_ref[...], beta_ref[...],
                    float(hw * cg), eps)
    f_ref[...] = _elu(yn[:, :, 0:cout] + res_ref[...])


# ----------------------------- kernel wrappers ------------------------------ #

def fused_conv_gn_call(xp, w_f, b_f, gmat, gmat_t, gamma_f, beta_f,
                       *, h, w, cout, cb, cg, b_tile, vmem_limit, eps=1e-5):
    N, Hp, Wp, Cin = xp.shape
    Cpad = w_f.shape[-1]
    G = gmat.shape[-1]
    hw = h * w
    kernel = functools.partial(_fused_conv_gn_kernel, h=h, w=w, cb=cb, cout=cout, cg=cg, eps=eps)
    return pl.pallas_call(
        kernel,
        out_shape=(jax.ShapeDtypeStruct((N, hw, cout), jnp.float32),    # residual slab
                   jax.ShapeDtypeStruct((N, hw, cout), jnp.float32),    # gate (module output g)
                   jax.ShapeDtypeStruct((N, hw, cout), jnp.bfloat16)),  # c1   (kernel-2 input)
        grid=(N // b_tile,),
        in_specs=[
            pl.BlockSpec((b_tile, Hp, Wp, Cin), lambda n: (n, 0, 0, 0)),
            pl.BlockSpec((9, Cin, Cpad), lambda n: (0, 0, 0)),
            pl.BlockSpec((1, Cpad), lambda n: (0, 0)),
            pl.BlockSpec((Cpad, G), lambda n: (0, 0)),
            pl.BlockSpec((G, Cpad), lambda n: (0, 0)),
            pl.BlockSpec((1, Cpad), lambda n: (0, 0)),
            pl.BlockSpec((1, Cpad), lambda n: (0, 0)),
        ],
        out_specs=(
            pl.BlockSpec((b_tile, hw, cout), lambda n: (n, 0, 0)),
            pl.BlockSpec((b_tile, hw, cout), lambda n: (n, 0, 0)),
            pl.BlockSpec((b_tile, hw, cout), lambda n: (n, 0, 0)),
        ),
        compiler_params=pltpu.CompilerParams(
            dimension_semantics=("parallel",),
            vmem_limit_bytes=vmem_limit),
    )(xp, w_f, b_f, gmat, gmat_t, gamma_f, beta_f)


def conv_gn_res_elu_call(f1p, resid, w2, b2, gmat, gmat_t, gamma2, beta2,
                         *, h, w, cout, cg, b_tile, vmem_limit, eps=1e-5):
    N, Hp, Wp, C = f1p.shape
    Cpad = w2.shape[-1]
    G = gmat.shape[-1]
    hw = h * w
    kernel = functools.partial(_conv_gn_res_elu_kernel, h=h, w=w, cout=cout, cg=cg, eps=eps)
    return pl.pallas_call(
        kernel,
        out_shape=jax.ShapeDtypeStruct((N, hw, cout), jnp.float32),
        grid=(N // b_tile,),
        in_specs=[
            pl.BlockSpec((b_tile, Hp, Wp, C), lambda n: (n, 0, 0, 0)),
            pl.BlockSpec((b_tile, hw, cout), lambda n: (n, 0, 0)),      # residual slab only
            pl.BlockSpec((9, C, Cpad), lambda n: (0, 0, 0)),
            pl.BlockSpec((1, Cpad), lambda n: (0, 0)),
            pl.BlockSpec((Cpad, G), lambda n: (0, 0)),
            pl.BlockSpec((G, Cpad), lambda n: (0, 0)),
            pl.BlockSpec((1, Cpad), lambda n: (0, 0)),
            pl.BlockSpec((1, Cpad), lambda n: (0, 0)),
        ],
        out_specs=pl.BlockSpec((b_tile, hw, cout), lambda n: (n, 0, 0)),
        compiler_params=pltpu.CompilerParams(
            dimension_semantics=("parallel",),
            vmem_limit_bytes=vmem_limit),
    )(f1p, resid, w2, b2, gmat, gmat_t, gamma2, beta2)


# --------------------------------- glue ------------------------------------ #

def _taps_from_conv3(w):
    """[Cout, Cin, 3, 3] (torch layout) -> [9, Cin, Cout] matching the in-kernel tap order."""
    return jnp.transpose(w, (2, 3, 1, 0)).reshape(9, w.shape[1], w.shape[0])


def _slab_vec(vecs, cb):
    """Pack per-branch [cout] vectors into 128-aligned slabs of width cb -> [1, len(vecs)*cb]."""
    out = jnp.zeros((1, len(vecs) * cb), jnp.float32)
    for i, v in enumerate(vecs):
        out = out.at[0, i * cb:i * cb + v.shape[0]].set(v)
    return out


def spectral_normalize(w, n_iter=5):
    """Deterministic power-iteration spectral normalization of torch-layout conv weight."""
    # TODO(synk): torch's spectral_norm uses a random persistent u vector; this deterministic
    #             init will not bit-match a real checkpoint (parameter preprocessing only).
    cout = w.shape[0]
    wm = w.reshape(cout, -1)
    u = jnp.ones((cout,), jnp.float32) / jnp.sqrt(float(cout))
    v = None
    for _ in range(n_iter):
        v = wm.T @ u
        v = v / (jnp.linalg.norm(v) + 1e-12)
        u = wm @ v
        u = u / (jnp.linalg.norm(u) + 1e-12)
    sigma = u @ (wm @ v)
    return w / sigma


# --------------------------- GatedConv forward ------------------------------ #

def init_gated_conv_params(key, in_ch, out_ch):
    ks = jax.random.split(key, 16)
    scale3 = 1.0 / jnp.sqrt(9.0 * in_ch)
    scale3b = 1.0 / jnp.sqrt(9.0 * out_ch)
    scale1 = 1.0 / jnp.sqrt(1.0 * in_ch)

    def gn_params(k1, k2, c):
        return (1.0 + 0.1 * jax.random.normal(k1, (c,), jnp.float32),
                0.1 * jax.random.normal(k2, (c,), jnp.float32))

    p = {}
    # gate_conv: ConvUnit(in_ch, out_ch, 3, stride=1, act=False)
    p['gate_w'] = spectral_normalize(scale3 * jax.random.normal(ks[0], (out_ch, in_ch, 3, 3), jnp.float32))
    p['gate_b'] = scale3 * jax.random.normal(ks[1], (out_ch,), jnp.float32)
    p['gate_gamma'], p['gate_beta'] = gn_params(ks[2], ks[3], out_ch)
    # feat_conv: DoubleConv(in_ch, out_ch)
    p['c1_w'] = spectral_normalize(scale3 * jax.random.normal(ks[4], (out_ch, in_ch, 3, 3), jnp.float32))
    p['c1_b'] = scale3 * jax.random.normal(ks[5], (out_ch,), jnp.float32)
    p['c1_gamma'], p['c1_beta'] = gn_params(ks[6], ks[7], out_ch)
    p['c2_w'] = spectral_normalize(scale3b * jax.random.normal(ks[8], (out_ch, out_ch, 3, 3), jnp.float32))
    p['c2_b'] = scale3b * jax.random.normal(ks[9], (out_ch,), jnp.float32)
    p['c2_gamma'], p['c2_beta'] = gn_params(ks[10], ks[11], out_ch)
    # residual 1x1 conv (in_ch != out_ch)
    p['res_w'] = spectral_normalize(scale1 * jax.random.normal(ks[12], (out_ch, in_ch, 1, 1), jnp.float32))
    p['res_b'] = scale1 * jax.random.normal(ks[13], (out_ch,), jnp.float32)
    p['res_gamma'], p['res_beta'] = gn_params(ks[14], ks[15], out_ch)
    return p


def gated_conv_forward(x_nchw, params, out_ch, b_tile=None):
    """Returns (f, g), both NCHW, matching GatedConv(dir=None).forward(x)."""
    assert out_ch % 4 == 0
    cg = 4                                                         # GroupNorm(out_ch // 4, out_ch)

    x = jnp.transpose(x_nchw, (0, 2, 3, 1)).astype(jnp.float32)    # NHWC
    N, H, W, Cin = x.shape
    HW = H * W
    assert HW % 16 == 0, "H*W must be a multiple of 16 (bf16 sublane tiling)"

    cb = _round_up(out_ch, 128)     # per-branch slab width (pad-free when out_ch % 128 == 0)
    cpad1 = 3 * cb                  # fused kernel-1 matmul width (res | gate | c1)
    cpad2 = cb                      # kernel-2 matmul width
    vmem_limit = _vmem_limit_bytes()

    if b_tile is None:
        b_tile = max(1, 2048 // HW)                                # ~2048 matmul rows per grid step
        if N >= 2:
            b_tile = min(b_tile, N // 2)                           # >=2 grid steps (v7x: 2 TCs)
        b_tile = min(b_tile, _max_b_tile_for_vmem(HW, (H + 2) * (W + 2), Cin, out_ch, cb,
                                                  vmem_limit))
        b_tile = max(1, min(b_tile, N))
        while N % b_tile:
            b_tile -= 1

    # ---- pallas_call 1: fused (res 1x1 | gate 3x3 | c1 3x3) conv + GN + slab activations ----
    xp = jnp.pad(x, ((0, 0), (1, 1), (1, 1), (0, 0))).astype(jnp.bfloat16)   # haloed NHWC input
    w_f = jnp.zeros((9, Cin, cpad1), jnp.float32)
    w_f = w_f.at[4, :, 0:out_ch].set(jnp.transpose(params['res_w'][:, :, 0, 0]))  # 1x1 = centre tap
    w_f = w_f.at[:, :, cb:cb + out_ch].set(_taps_from_conv3(params['gate_w']))
    w_f = w_f.at[:, :, 2 * cb:2 * cb + out_ch].set(_taps_from_conv3(params['c1_w']))
    w_f = w_f.astype(jnp.bfloat16)
    b_f = _slab_vec([params['res_b'], params['gate_b'], params['c1_b']], cb)
    gamma_f = _slab_vec([params['res_gamma'], params['gate_gamma'], params['c1_gamma']], cb)
    beta_f = _slab_vec([params['res_beta'], params['gate_beta'], params['c1_beta']], cb)
    gmat1 = _group_onehot(cpad1, cg)

    res1, g, f1 = fused_conv_gn_call(
        xp, w_f, b_f, gmat1, jnp.transpose(gmat1), gamma_f, beta_f,
        h=H, w=W, cout=out_ch, cb=cb, cg=cg, b_tile=b_tile, vmem_limit=vmem_limit)

    # ---- pallas_call 2: c2 conv + GN + residual add + ELU (reads only the residual slab) ----
    f1p = jnp.pad(f1.reshape(N, H, W, out_ch), ((0, 0), (1, 1), (1, 1), (0, 0)))   # bf16 halo pad
    w2 = jnp.zeros((9, out_ch, cpad2), jnp.float32)
    w2 = w2.at[:, :, 0:out_ch].set(_taps_from_conv3(params['c2_w'])).astype(jnp.bfloat16)
    b2 = _slab_vec([params['c2_b']], cpad2)
    gamma2 = _slab_vec([params['c2_gamma']], cpad2)
    beta2 = _slab_vec([params['c2_beta']], cpad2)
    gmat2 = _group_onehot(cpad2, cg)

    f = conv_gn_res_elu_call(
        f1p, res1, w2, b2, gmat2, jnp.transpose(gmat2), gamma2, beta2,
        h=H, w=W, cout=out_ch, cg=cg, b_tile=b_tile, vmem_limit=vmem_limit)

    # TODO(synk): return NHWC (or fold these transposes into the consumer) to drop the final
    #             layout copies; NCHW kept here to mirror the torch module's output convention.
    f_nchw = jnp.transpose(f.reshape(N, H, W, out_ch), (0, 3, 1, 2))
    g_nchw = jnp.transpose(g.reshape(N, H, W, out_ch), (0, 3, 1, 2))
    return f_nchw, g_nchw


# ------------------------------ JAX reference ------------------------------- #

def _ref_conv(x_nhwc, w, b, pad, dt):
    return lax.conv_general_dilated(
        x_nhwc.astype(dt), jnp.transpose(w, (2, 3, 1, 0)).astype(dt),
        window_strides=(1, 1), padding=((pad, pad), (pad, pad)),
        dimension_numbers=('NHWC', 'HWIO', 'NHWC'),
        preferred_element_type=jnp.float32) + b


def _ref_gn(x, gamma, beta, groups, eps=1e-5):
    N, H, W, C = x.shape
    xg = x.reshape(N, H, W, groups, C // groups)
    mean = xg.mean(axis=(1, 2, 4), keepdims=True)
    var = ((xg - mean) ** 2).mean(axis=(1, 2, 4), keepdims=True)
    xn = ((xg - mean) / jnp.sqrt(var + eps)).reshape(N, H, W, C)
    return xn * gamma + beta


def _ref_elu(x):
    return jnp.where(x > 0, x, jnp.expm1(x))


def gated_conv_reference(x_nchw, p, out_ch, matmul_dtype=jnp.float32):
    """f32 reference; matmul_dtype=bfloat16 mirrors the kernel's bf16 MXU inputs exactly."""
    groups = out_ch // 4
    x = jnp.transpose(x_nchw, (0, 2, 3, 1)).astype(jnp.float32)
    g = jax.nn.sigmoid(_ref_gn(_ref_conv(x, p['gate_w'], p['gate_b'], 1, matmul_dtype),
                               p['gate_gamma'], p['gate_beta'], groups))
    h = _ref_elu(_ref_gn(_ref_conv(x, p['c1_w'], p['c1_b'], 1, matmul_dtype),
                         p['c1_gamma'], p['c1_beta'], groups))
    h = _ref_gn(_ref_conv(h, p['c2_w'], p['c2_b'], 1, matmul_dtype),
                p['c2_gamma'], p['c2_beta'], groups)
    r = _ref_gn(_ref_conv(x, p['res_w'], p['res_b'], 0, matmul_dtype),
                p['res_gamma'], p['res_beta'], groups)
    f = _ref_elu(h + r)
    return jnp.transpose(f, (0, 3, 1, 2)), jnp.transpose(g, (0, 3, 1, 2))


# ---------------------------------- main ------------------------------------ #

if __name__ == "__main__":
    key = jax.random.PRNGKey(0)
    k_x, k_p = jax.random.split(key)

    N, Cin, Cout, H, W = 2, 4, 8, 16, 16
    x = jax.random.normal(k_x, (N, Cin, H, W), jnp.float32)   # NCHW, PyTorch convention
    params = init_gated_conv_params(k_p, Cin, Cout)

    f, g = gated_conv_forward(x, params, Cout)
    f = jax.block_until_ready(f)
    g = jax.block_until_ready(g)
    assert f.shape == (N, Cout, H, W) and g.shape == (N, Cout, H, W)

    # Tight check against a reference using the same bf16-rounded matmul inputs / f32 accumulation.
    f_rb, g_rb = gated_conv_reference(x, params, Cout, matmul_dtype=jnp.bfloat16)
    assert jnp.allclose(f, f_rb, atol=1e-2, rtol=1e-2), "feature branch mismatch (bf16-faithful ref)"
    assert jnp.allclose(g, g_rb, atol=1e-2, rtol=1e-2), "gate branch mismatch (bf16-faithful ref)"

    # Loose sanity check against the all-f32 reference (bf16 MXU inputs => ~1e-2 error budget).
    f_r32, g_r32 = gated_conv_reference(x, params, Cout, matmul_dtype=jnp.float32)
    assert jnp.allclose(f, f_r32, atol=5e-2, rtol=5e-2), "feature branch mismatch (f32 ref)"
    assert jnp.allclose(g, g_r32, atol=5e-2, rtol=5e-2), "gate branch mismatch (f32 ref)"

    print("KERNEL_OK")
</pallas_src>

<mosaic_0001>
module attributes {stable_mosaic.version = 11 : i64} {
  func.func @_fused_conv_gn_kernel(%arg0: i32, %arg1: memref<1x18x18x4xbf16, #tpu.memory_space<vmem>>, %arg2: memref<9x4x384xbf16, #tpu.memory_space<vmem>>, %arg3: memref<1x384xf32, #tpu.memory_space<vmem>>, %arg4: memref<384x96xf32, #tpu.memory_space<vmem>>, %arg5: memref<96x384xf32, #tpu.memory_space<vmem>>, %arg6: memref<1x384xf32, #tpu.memory_space<vmem>>, %arg7: memref<1x384xf32, #tpu.memory_space<vmem>>, %arg8: memref<1x256x8xf32, #tpu.memory_space<vmem>>, %arg9: memref<1x256x8xf32, #tpu.memory_space<vmem>>, %arg10: memref<1x256x8xbf16, #tpu.memory_space<vmem>>) attributes {dimension_semantics = [#tpu.dimension_semantics<parallel>], iteration_bounds = array<i64: 2>, scalar_prefetch = 0 : i64, scratch_operands = 0 : i64, tpu.core_type = #tpu.core_type<tc>, window_params = [{transform_indices = @transform_0, window_bounds = array<i64: 1, 18, 18, 4>}, {pipeline_mode = #tpu.pipeline_mode<synchronous>, transform_indices = @transform_1, window_bounds = array<i64: 9, 4, 384>}, {pipeline_mode = #tpu.pipeline_mode<synchronous>, transform_indices = @transform_2, window_bounds = array<i64: 1, 384>}, {pipeline_mode = #tpu.pipeline_mode<synchronous>, transform_indices = @transform_3, window_bounds = array<i64: 384, 96>}, {pipeline_mode = #tpu.pipeline_mode<synchronous>, transform_indices = @transform_4, window_bounds = array<i64: 96, 384>}, {pipeline_mode = #tpu.pipeline_mode<synchronous>, transform_indices = @transform_5, window_bounds = array<i64: 1, 384>}, {pipeline_mode = #tpu.pipeline_mode<synchronous>, transform_indices = @transform_6, window_bounds = array<i64: 1, 384>}, {transform_indices = @transform_7, window_bounds = array<i64: 1, 256, 8>}, {transform_indices = @transform_8, window_bounds = array<i64: 1, 256, 8>}, {transform_indices = @transform_9, window_bounds = array<i64: 1, 256, 8>}]} {
    %c0 = arith.constant 0 : index
    %c0_0 = arith.constant 0 : index
    %c0_1 = arith.constant 0 : index
    %c0_2 = arith.constant 0 : index
    %0 = vector.load %arg1[%c0, %c0_0, %c0_1, %c0_2] : memref<1x18x18x4xbf16, #tpu.memory_space<vmem>>, vector<1x18x18x4xbf16>
    %1 = vector.extract_strided_slice %0 {offsets = [0, 0, 0, 0], sizes = [1, 16, 16, 4], strides = [1, 1, 1, 1]} : vector<1x18x18x4xbf16> to vector<1x16x16x4xbf16>
    %2 = vector.shape_cast %1 : vector<1x16x16x4xbf16> to vector<256x4xbf16>
    %c0_3 = arith.constant 0 : index
    %c0_4 = arith.constant 0 : index
    %c0_5 = arith.constant 0 : index
    %3 = vector.load %arg2[%c0_3, %c0_4, %c0_5] : memref<9x4x384xbf16, #tpu.memory_space<vmem>>, vector<1x4x384xbf16>
    %4 = vector.shape_cast %3 : vector<1x4x384xbf16> to vector<4x384xbf16>
    %cst = arith.constant dense<0.000000e+00> : vector<256x384xf32>
    %5 = tpu.matmul %2, %4, %cst {dimension_numbers = #tpu.dot_dimension_numbers<[1], [0], [0], [1], [0, 0, 1, 1], [], []>} : vector<256x4xbf16>, vector<4x384xbf16>, vector<256x384xf32> -> vector<256x384xf32>
    %6 = vector.extract_strided_slice %0 {offsets = [0, 0, 1, 0], sizes = [1, 16, 16, 4], strides = [1, 1, 1, 1]} : vector<1x18x18x4xbf16> to vector<1x16x16x4xbf16>
    %7 = vector.shape_cast %6 : vector<1x16x16x4xbf16> to vector<256x4xbf16>
    %c1 = arith.constant 1 : index
    %c0_6 = arith.constant 0 : index
    %c0_7 = arith.constant 0 : index
    %8 = vector.load %arg2[%c1, %c0_6, %c0_7] : memref<9x4x384xbf16, #tpu.memory_space<vmem>>, vector<1x4x384xbf16>
    %9 = vector.shape_cast %8 : vector<1x4x384xbf16> to vector<4x384xbf16>
    %cst_8 = arith.constant dense<0.000000e+00> : vector<256x384xf32>
    %10 = tpu.matmul %7, %9, %cst_8 {dimension_numbers = #tpu.dot_dimension_numbers<[1], [0], [0], [1], [0, 0, 1, 1], [], []>} : vector<256x4xbf16>, vector<4x384xbf16>, vector<256x384xf32> -> vector<256x384xf32>
    %11 = arith.addf %5, %10 : vector<256x384xf32>
    %12 = vector.extract_strided_slice %0 {offsets = [0, 0, 2, 0], sizes = [1, 16, 16, 4], strides = [1, 1, 1, 1]} : vector<1x18x18x4xbf16> to vector<1x16x16x4xbf16>
    %13 = vector.shape_cast %12 : vector<1x16x16x4xbf16> to vector<256x4xbf16>
    %c2 = arith.constant 2 : index
    %c0_9 = arith.constant 0 : index
    %c0_10 = arith.constant 0 : index
    %14 = vector.load %arg2[%c2, %c0_9, %c0_10] : memref<9x4x384xbf16, #tpu.memory_space<vmem>>, vector<1x4x384xbf16>
    %15 = vector.shape_cast %14 : vector<1x4x384xbf16> to vector<4x384xbf16>
    %cst_11 = arith.constant dense<0.000000e+00> : vector<256x384xf32>
    %16 = tpu.matmul %13, %15, %cst_11 {dimension_numbers = #tpu.dot_dimension_numbers<[1], [0], [0], [1], [0, 0, 1, 1], [], []>} : vector<256x4xbf16>, vector<4x384xbf16>, vector<256x384xf32> -> vector<256x384xf32>
    %17 = arith.addf %11, %16 : vector<256x384xf32>
    %18 = vector.extract_strided_slice %0 {offsets = [0, 1, 0, 0], sizes = [1, 16, 16, 4], strides = [1, 1, 1, 1]} : vector<1x18x18x4xbf16> to vector<1x16x16x4xbf16>
    %19 = vector.shape_cast %18 : vector<1x16x16x4xbf16> to vector<256x4xbf16>
    %c3 = arith.constant 3 : index
    %c0_12 = arith.constant 0 : index
    %c0_13 = arith.constant 0 : index
    %20 = vector.load %arg2[%c3, %c0_12, %c0_13] : memref<9x4x384xbf16, #tpu.memory_space<vmem>>, vector<1x4x384xbf16>
    %21 = vector.shape_cast %20 : vector<1x4x384xbf16> to vector<4x384xbf16>
    %cst_14 = arith.constant dense<0.000000e+00> : vector<256x384xf32>
    %22 = tpu.matmul %19, %21, %cst_14 {dimension_numbers = #tpu.dot_dimension_numbers<[1], [0], [0], [1], [0, 0, 1, 1], [], []>} : vector<256x4xbf16>, vector<4x384xbf16>, vector<256x384xf32> -> vector<256x384xf32>
    %23 = arith.addf %17, %22 : vector<256x384xf32>
    %24 = vector.extract_strided_slice %0 {offsets = [0, 1, 1, 0], sizes = [1, 16, 16, 4], strides = [1, 1, 1, 1]} : vector<1x18x18x4xbf16> to vector<1x16x16x4xbf16>
    %25 = vector.shape_cast %24 : vector<1x16x16x4xbf16> to vector<256x4xbf16>
    %c4 = arith.constant 4 : index
    %c0_15 = arith.constant 0 : index
    %c0_16 = arith.constant 0 : index
    %26 = vector.load %arg2[%c4, %c0_15, %c0_16] : memref<9x4x384xbf16, #tpu.memory_space<vmem>>, vector<1x4x384xbf16>
    %27 = vector.shape_cast %26 : vector<1x4x384xbf16> to vector<4x384xbf16>
    %cst_17 = arith.constant dense<0.000000e+00> : vector<256x384xf32>
    %28 = tpu.matmul %25, %27, %cst_17 {dimension_numbers = #tpu.dot_dimension_numbers<[1], [0], [0], [1], [0, 0, 1, 1], [], []>} : vector<256x4xbf16>, vector<4x384xbf16>, vector<256x384xf32> -> vector<256x384xf32>
    %29 = arith.addf %23, %28 : vector<256x384xf32>
    %30 = vector.extract_strided_slice %0 {offsets = [0, 1, 2, 0], sizes = [1, 16, 16, 4], strides = [1, 1, 1, 1]} : vector<1x18x18x4xbf16> to vector<1x16x16x4xbf16>
    %31 = vector.shape_cast %30 : vector<1x16x16x4xbf16> to vector<256x4xbf16>
    %c5 = arith.constant 5 : index
    %c0_18 = arith.constant 0 : index
    %c0_19 = arith.constant 0 : index
    %32 = vector.load %arg2[%c5, %c0_18, %c0_19] : memref<9x4x384xbf16, #tpu.memory_space<vmem>>, vector<1x4x384xbf16>
    %33 = vector.shape_cast %32 : vector<1x4x384xbf16> to vector<4x384xbf16>
    %cst_20 = arith.constant dense<0.000000e+00> : vector<256x384xf32>
    %34 = tpu.matmul %31, %33, %cst_20 {dimension_numbers = #tpu.dot_dimension_numbers<[1], [0], [0], [1], [0, 0, 1, 1], [], []>} : vector<256x4xbf16>, vector<4x384xbf16>, vector<256x384xf32> -> vector<256x384xf32>
    %35 = arith.addf %29, %34 : vector<256x384xf32>
    %36 = vector.extract_strided_slice %0 {offsets = [0, 2, 0, 0], sizes = [1, 16, 16, 4], strides = [1, 1, 1, 1]} : vector<1x18x18x4xbf16> to vector<1x16x16x4xbf16>
    %37 = vector.shape_cast %36 : vector<1x16x16x4xbf16> to vector<256x4xbf16>
    %c6 = arith.constant 6 : index
    %c0_21 = arith.constant 0 : index
    %c0_22 = arith.constant 0 : index
    %38 = vector.load %arg2[%c6, %c0_21, %c0_22] : memref<9x4x384xbf16, #tpu.memory_space<vmem>>, vector<1x4x384xbf16>
    %39 = vector.shape_cast %38 : vector<1x4x384xbf16> to vector<4x384xbf16>
    %cst_23 = arith.constant dense<0.000000e+00> : vector<256x384xf32>
    %40 = tpu.matmul %37, %39, %cst_23 {dimension_numbers = #tpu.dot_dimension_numbers<[1], [0], [0], [1], [0, 0, 1, 1], [], []>} : vector<256x4xbf16>, vector<4x384xbf16>, vector<256x384xf32> -> vector<256x384xf32>
    %41 = arith.addf %35, %40 : vector<256x384xf32>
    %42 = vector.extract_strided_slice %0 {offsets = [0, 2, 1, 0], sizes = [1, 16, 16, 4], strides = [1, 1, 1, 1]} : vector<1x18x18x4xbf16> to vector<1x16x16x4xbf16>
    %43 = vector.shape_cast %42 : vector<1x16x16x4xbf16> to vector<256x4xbf16>
    %c7 = arith.constant 7 : index
    %c0_24 = arith.constant 0 : index
    %c0_25 = arith.constant 0 : index
    %44 = vector.load %arg2[%c7, %c0_24, %c0_25] : memref<9x4x384xbf16, #tpu.memory_space<vmem>>, vector<1x4x384xbf16>
    %45 = vector.shape_cast %44 : vector<1x4x384xbf16> to vector<4x384xbf16>
    %cst_26 = arith.constant dense<0.000000e+00> : vector<256x384xf32>
    %46 = tpu.matmul %43, %45, %cst_26 {dimension_numbers = #tpu.dot_dimension_numbers<[1], [0], [0], [1], [0, 0, 1, 1], [], []>} : vector<256x4xbf16>, vector<4x384xbf16>, vector<256x384xf32> -> vector<256x384xf32>
    %47 = arith.addf %41, %46 : vector<256x384xf32>
    %48 = vector.extract_strided_slice %0 {offsets = [0, 2, 2, 0], sizes = [1, 16, 16, 4], strides = [1, 1, 1, 1]} : vector<1x18x18x4xbf16> to vector<1x16x16x4xbf16>
    %49 = vector.shape_cast %48 : vector<1x16x16x4xbf16> to vector<256x4xbf16>
    %c8 = arith.constant 8 : index
    %c0_27 = arith.constant 0 : index
    %c0_28 = arith.constant 0 : index
    %50 = vector.load %arg2[%c8, %c0_27, %c0_28] : memref<9x4x384xbf16, #tpu.memory_space<vmem>>, vector<1x4x384xbf16>
    %51 = vector.shape_cast %50 : vector<1x4x384xbf16> to vector<4x384xbf16>
    %cst_29 = arith.constant dense<0.000000e+00> : vector<256x384xf32>
    %52 = tpu.matmul %49, %51, %cst_29 {dimension_numbers = #tpu.dot_dimension_numbers<[1], [0], [0], [1], [0, 0, 1, 1], [], []>} : vector<256x4xbf16>, vector<4x384xbf16>, vector<256x384xf32> -> vector<256x384xf32>
    %53 = arith.addf %47, %52 : vector<256x384xf32>
    %54 = vector.shape_cast %53 : vector<256x384xf32> to vector<1x256x384xf32>
    %c0_30 = arith.constant 0 : index
    %c0_31 = arith.constant 0 : index
    %55 = vector.load %arg3[%c0_30, %c0_31] : memref<1x384xf32, #tpu.memory_space<vmem>>, vector<1x384xf32>
    %56 = vector.shape_cast %55 : vector<1x384xf32> to vector<1x1x384xf32>
    %57 = vector.broadcast %56 : vector<1x1x384xf32> to vector<1x256x384xf32>
    %58 = arith.addf %54, %57 : vector<1x256x384xf32>
    %c0_32 = arith.constant 0 : index
    %c0_33 = arith.constant 0 : index
    %59 = vector.load %arg4[%c0_32, %c0_33] : memref<384x96xf32, #tpu.memory_space<vmem>>, vector<384x96xf32>
    %c0_34 = arith.constant 0 : index
    %c0_35 = arith.constant 0 : index
    %60 = vector.load %arg5[%c0_34, %c0_35] : memref<96x384xf32, #tpu.memory_space<vmem>>, vector<96x384xf32>
    %c0_36 = arith.constant 0 : index
    %c0_37 = arith.constant 0 : index
    %61 = vector.load %arg6[%c0_36, %c0_37] : memref<1x384xf32, #tpu.memory_space<vmem>>, vector<1x384xf32>
    %c0_38 = arith.constant 0 : index
    %c0_39 = arith.constant 0 : index
    %62 = vector.load %arg7[%c0_38, %c0_39] : memref<1x384xf32, #tpu.memory_space<vmem>>, vector<1x384xf32>
    %cst_40 = arith.constant dense<0.000000e+00> : vector<1x384xf32>
    %63 = vector.multi_reduction <add>, %58, %cst_40 [1] : vector<1x256x384xf32> to vector<1x384xf32>
    %64 = arith.mulf %58, %58 : vector<1x256x384xf32>
    %cst_41 = arith.constant dense<0.000000e+00> : vector<1x384xf32>
    %65 = vector.multi_reduction <add>, %64, %cst_41 [1] : vector<1x256x384xf32> to vector<1x384xf32>
    %cst_42 = arith.constant dense<0.000000e+00> : vector<1x96xf32>
    %66 = tpu.matmul %63, %59, %cst_42 {dimension_numbers = #tpu.dot_dimension_numbers<[1], [0], [0], [1], [0, 0, 1, 1], [], []>} : vector<1x384xf32>, vector<384x96xf32>, vector<1x96xf32> -> vector<1x96xf32>
    %cst_43 = arith.constant 1.024000e+03 : f32
    %67 = vector.broadcast %cst_43 : f32 to vector<1x96xf32>
    %68 = arith.divf %66, %67 : vector<1x96xf32>
    %cst_44 = arith.constant dense<0.000000e+00> : vector<1x96xf32>
    %69 = tpu.matmul %65, %59, %cst_44 {dimension_numbers = #tpu.dot_dimension_numbers<[1], [0], [0], [1], [0, 0, 1, 1], [], []>} : vector<1x384xf32>, vector<384x96xf32>, vector<1x96xf32> -> vector<1x96xf32>
    %cst_45 = arith.constant 1.024000e+03 : f32
    %70 = vector.broadcast %cst_45 : f32 to vector<1x96xf32>
    %71 = arith.divf %69, %70 : vector<1x96xf32>
    %72 = arith.mulf %68, %68 : vector<1x96xf32>
    %73 = arith.subf %71, %72 : vector<1x96xf32>
    %cst_46 = arith.constant 0.000000e+00 : f32
    %74 = vector.broadcast %cst_46 : f32 to vector<1x96xf32>
    %75 = arith.maximumf %73, %74 : vector<1x96xf32>
    %cst_47 = arith.constant dense<0.000000e+00> : vector<1x384xf32>
    %76 = tpu.matmul %68, %60, %cst_47 {dimension_numbers = #tpu.dot_dimension_numbers<[1], [0], [0], [1], [0, 0, 1, 1], [], []>} : vector<1x96xf32>, vector<96x384xf32>, vector<1x384xf32> -> vector<1x384xf32>
    %cst_48 = arith.constant dense<0.000000e+00> : vector<1x384xf32>
    %77 = tpu.matmul %75, %60, %cst_48 {dimension_numbers = #tpu.dot_dimension_numbers<[1], [0], [0], [1], [0, 0, 1, 1], [], []>} : vector<1x96xf32>, vector<96x384xf32>, vector<1x384xf32> -> vector<1x384xf32>
    %cst_49 = arith.constant 9.99999974E-6 : f32
    %78 = vector.broadcast %cst_49 : f32 to vector<1x384xf32>
    %79 = arith.addf %77, %78 : vector<1x384xf32>
    %80 = math.rsqrt %79 : vector<1x384xf32>
    %81 = arith.mulf %80, %61 : vector<1x384xf32>
    %82 = arith.mulf %76, %81 : vector<1x384xf32>
    %83 = arith.subf %62, %82 : vector<1x384xf32>
    %84 = vector.shape_cast %81 : vector<1x384xf32> to vector<1x1x384xf32>
    %85 = vector.broadcast %84 : vector<1x1x384xf32> to vector<1x256x384xf32>
    %86 = arith.mulf %58, %85 : vector<1x256x384xf32>
    %87 = vector.shape_cast %83 : vector<1x384xf32> to vector<1x1x384xf32>
    %88 = vector.broadcast %87 : vector<1x1x384xf32> to vector<1x256x384xf32>
    %89 = arith.addf %86, %88 : vector<1x256x384xf32>
    %90 = vector.extract_strided_slice %89 {offsets = [0, 0, 0], sizes = [1, 256, 8], strides = [1, 1, 1]} : vector<1x256x384xf32> to vector<1x256x8xf32>
    %c0_50 = arith.constant 0 : index
    %c0_51 = arith.constant 0 : index
    %c0_52 = arith.constant 0 : index
    %91 = vector.load %arg8[%c0_50, %c0_51, %c0_52] : memref<1x256x8xf32, #tpu.memory_space<vmem>>, vector<1x256x8xf32>
    tpu.vector_store %arg8[%c0_50, %c0_51, %c0_52], %90 {strides = array<i32>} : memref<1x256x8xf32, #tpu.memory_space<vmem>>, vector<1x256x8xf32>,
    %92 = vector.extract_strided_slice %89 {offsets = [0, 0, 128], sizes = [1, 256, 8], strides = [1, 1, 1]} : vector<1x256x384xf32> to vector<1x256x8xf32>
    %93 = math.absf %92 : vector<1x256x8xf32>
    %cst_53 = arith.constant 0.000000e+00 : f32
    %94 = vector.broadcast %cst_53 : f32 to vector<1x256x8xf32>
    %95 = arith.subf %94, %93 : vector<1x256x8xf32>
    %96 = math.exp %95 : vector<1x256x8xf32>
    %cst_54 = arith.constant 0.000000e+00 : f32
    %97 = vector.broadcast %cst_54 : f32 to vector<1x256x8xf32>
    %98 = arith.cmpf oge, %92, %97 : vector<1x256x8xf32>
    %cst_55 = arith.constant 1.000000e+00 : f32
    %99 = vector.broadcast %cst_55 : f32 to vector<1x256x8xf32>
    %100 = arith.addf %99, %96 : vector<1x256x8xf32>
    %cst_56 = arith.constant 1.000000e+00 : f32
    %101 = vector.broadcast %cst_56 : f32 to vector<1x256x8xf32>
    %102 = arith.divf %101, %100 : vector<1x256x8xf32>
    %cst_57 = arith.constant 1.000000e+00 : f32
    %103 = vector.broadcast %cst_57 : f32 to vector<1x256x8xf32>
    %104 = arith.addf %103, %96 : vector<1x256x8xf32>
    %105 = arith.divf %96, %104 : vector<1x256x8xf32>
    %106 = arith.select %98, %102, %105 : vector<1x256x8xi1>, vector<1x256x8xf32>
    %c0_58 = arith.constant 0 : index
    %c0_59 = arith.constant 0 : index
    %c0_60 = arith.constant 0 : index
    %107 = vector.load %arg9[%c0_58, %c0_59, %c0_60] : memref<1x256x8xf32, #tpu.memory_space<vmem>>, vector<1x256x8xf32>
    tpu.vector_store %arg9[%c0_58, %c0_59, %c0_60], %106 {strides = array<i32>} : memref<1x256x8xf32, #tpu.memory_space<vmem>>, vector<1x256x8xf32>,
    %108 = vector.extract_strided_slice %89 {offsets = [0, 0, 256], sizes = [1, 256, 8], strides = [1, 1, 1]} : vector<1x256x384xf32> to vector<1x256x8xf32>
    %cst_61 = arith.constant 0.000000e+00 : f32
    %109 = vector.broadcast %cst_61 : f32 to vector<1x256x8xf32>
    %110 = arith.cmpf ogt, %108, %109 : vector<1x256x8xf32>
    %111 = math.exp %108 : vector<1x256x8xf32>
    %cst_62 = arith.constant 1.000000e+00 : f32
    %112 = vector.broadcast %cst_62 : f32 to vector<1x256x8xf32>
    %113 = arith.subf %111, %112 : vector<1x256x8xf32>
    %114 = arith.select %110, %108, %113 : vector<1x256x8xi1>, vector<1x256x8xf32>
    %115 = arith.truncf %114 : vector<1x256x8xf32> to vector<1x256x8xbf16>
    %c0_63 = arith.constant 0 : index
    %c0_64 = arith.constant 0 : index
    %c0_65 = arith.constant 0 : index
    %116 = vector.load %arg10[%c0_63, %c0_64, %c0_65] : memref<1x256x8xbf16, #tpu.memory_space<vmem>>, vector<1x256x8xbf16>
    tpu.vector_store %arg10[%c0_63, %c0_64, %c0_65], %115 {strides = array<i32>} : memref<1x256x8xbf16, #tpu.memory_space<vmem>>, vector<1x256x8xbf16>,
    return
  }
  func.func @transform_0(%arg0: i32) -> (i32, i32, i32, i32) {
    %c0_i32 = arith.constant 0 : i32
    %c0_i32_0 = arith.constant 0 : i32
    %c0_i32_1 = arith.constant 0 : i32
    %c0_i32_2 = arith.constant 0 : i32
    return %arg0, %c0_i32, %c0_i32_0, %c0_i32_1 : i32, i32, i32, i32
  }
  func.func @transform_1(%arg0: i32) -> (i32, i32, i32) {
    %c0_i32 = arith.constant 0 : i32
    %c0_i32_0 = arith.constant 0 : i32
    %c0_i32_1 = arith.constant 0 : i32
    %c0_i32_2 = arith.constant 0 : i32
    return %c0_i32, %c0_i32_0, %c0_i32_1 : i32, i32, i32
  }
  func.func @transform_2(%arg0: i32) -> (i32, i32) {
    %c0_i32 = arith.constant 0 : i32
    %c0_i32_0 = arith.constant 0 : i32
    %c0_i32_1 = arith.constant 0 : i32
    return %c0_i32, %c0_i32_0 : i32, i32
  }
  func.func @transform_3(%arg0: i32) -> (i32, i32) {
    %c0_i32 = arith.constant 0 : i32
    %c0_i32_0 = arith.constant 0 : i32
    %c0_i32_1 = arith.constant 0 : i32
    return %c0_i32, %c0_i32_0 : i32, i32
  }
  func.func @transform_4(%arg0: i32) -> (i32, i32) {
    %c0_i32 = arith.constant 0 : i32
    %c0_i32_0 = arith.constant 0 : i32
    %c0_i32_1 = arith.constant 0 : i32
    return %c0_i32, %c0_i32_0 : i32, i32
  }
  func.func @transform_5(%arg0: i32) -> (i32, i32) {
    %c0_i32 = arith.constant 0 : i32
    %c0_i32_0 = arith.constant 0 : i32
    %c0_i32_1 = arith.constant 0 : i32
    return %c0_i32, %c0_i32_0 : i32, i32
  }
  func.func @transform_6(%arg0: i32) -> (i32, i32) {
    %c0_i32 = arith.constant 0 : i32
    %c0_i32_0 = arith.constant 0 : i32
    %c0_i32_1 = arith.constant 0 : i32
    return %c0_i32, %c0_i32_0 : i32, i32
  }
  func.func @transform_7(%arg0: i32) -> (i32, i32, i32) {
    %c0_i32 = arith.constant 0 : i32
    %c0_i32_0 = arith.constant 0 : i32
    %c0_i32_1 = arith.constant 0 : i32
    return %arg0, %c0_i32, %c0_i32_0 : i32, i32, i32
  }
  func.func @transform_8(%arg0: i32) -> (i32, i32, i32) {
    %c0_i32 = arith.constant 0 : i32
    %c0_i32_0 = arith.constant 0 : i32
    %c0_i32_1 = arith.constant 0 : i32
    return %arg0, %c0_i32, %c0_i32_0 : i32, i32, i32
  }
  func.func @transform_9(%arg0: i32) -> (i32, i32, i32) {
    %c0_i32 = arith.constant 0 : i32
    %c0_i32_0 = arith.constant 0 : i32
    %c0_i32_1 = arith.constant 0 : i32
    return %arg0, %c0_i32, %c0_i32_0 : i32, i32, i32
  }
}

</mosaic_0001>

<bundles_post_ra>
// kernel: tpu_custom_call.1
= control target key start
LH: loop header
LB: loop body
LE: loop exit
PB: predicated region body
PF: predicated region fallthrough
CT: control target
= control target key end

     0   :  { %s7642_s30 = smov 0   ;;  %s14684_s0 = inlined_call_operand.vmem [shape: bf16[2,18,18,4], index: 0, kind: input, shape index: {}]   ;;  %s14685_s1 = inlined_call_operand.vmem [shape: bf16[9,4,384], index: 1, kind: input, shape index: {}]   ;;  %s14686_s2 = inlined_call_operand.vmem [shape: f32[1,384], index: 2, kind: input, shape index: {}]   ;;  %s14687_s3 = inlined_call_operand.vmem [shape: f32[384,96], index: 3, kind: input, shape index: {}]   ;;  %s14688_s4 = inlined_call_operand.vmem [shape: f32[96,384], index: 4, kind: input, shape index: {}]   ;;  %s14689_s5 = inlined_call_operand.vmem [shape: f32[1,384], index: 5, kind: input, shape index: {}]   ;;  %s14690_s6 = inlined_call_operand.vmem [shape: f32[1,384], index: 6, kind: input, shape index: {}]   ;;  %s14691_s7 = inlined_call_operand.vmem [shape: f32[2,256,8], index: 7, kind: output, shape index: {0}]   ;;  %s14692_s8 = inlined_call_operand.vmem [shape: f32[2,256,8], index: 8, kind: output, shape index: {1}]   ;;  %s14693_s9 = inlined_call_operand.vmem [shape: bf16[2,256,8], index: 9, kind: output, shape index: {2}]  }
   0x1 LB: > { %s6717_s10 = sadd.s32 4294967295, %s7589_s30   ;;  %p6721_p0 = scmp.ge.s32.totalorder %s7589_s30, 1  ;;  %s7589_s30 = sphi %s7642_s30, %s20_s30  }
   0x2   : > { %p292_p1 = scmp.lt.s32.totalorder %s7589_s30, 3 }
   0x4   : > { %p293_p2 = pnand %p6721_p0, %p292_p1 }
   0x6   : > { %296 = sbr.rel (%p293_p2) target bundleno = 2754 (0xac2), region = 48 }
   0xb   : > { %v6729_v0 = vld [vmem:[%s14685_s1 + $0x6] sm:$0x3f]  ;;  %p338_p3 = scmp.lt.s32.totalorder %s6717_s10, 1  ;;  %vm905_vm0 = vcmask 1041408   ;;  %v413_v1 = vld [vmem:[%s14685_s1] sm:$0x3f] }
   0xc   : > { %852 = vst [vmem:[#allocation1] ss:$4 sm:$0xff] %v6729_v0  ;;  %vm414_vm1 = vsmask.f32 3328  ;;  %vm415_vm2 = vsmask.f32 7440 }
   0xd   : > { %s16751_s10 = smov (!%p338_p3, %s6717_s10), 1  ;;  %vm7683_vm3 = vmor %vm414_vm1, %vm415_vm2  ;;  %v15122_v27 = vmov 0  ;;  %vm856_vm4 = vcmask 31744   ;;  %vm1601_vm5 = vcmask 1042432   ;;  %vm1602_vm6 = vcmask 1046532  }
   0xe   : > { %s7320_s13 = smul.u32 216, %s16751_s10  ;;  %v15123_v27 = vsel %vm7683_vm3, 4294967295, %v15122_v27  ;;  %vm8175_vm7 = vmor %vm1601_vm5, %vm1602_vm6  ;;  %vm5188_vm9 = vcmask 785408   ;;  %vm5363_vm1 = vcmask 1040384   ;;  %s7299_s22 = sshll.u32 %s16751_s10, 8 }
   0xf   : > { %15124 = vst [vmem:[#allocation2_spill] sm:$0xff] %v15123_v27  ;;  %s12626_s25 = scalar_lea.vmem %s14691_s7, %s7299_s22  ;;  %s14065_s28 = scalar_lea.vmem %s14692_s8, %s7299_s22 }
  0x10   : > { %s7662_s18 = scalar_lea.vmem %s14684_s0, %s7320_s13  ;;  %s7301_s29 = sshll.u32 %s16751_s10, 7 }
  0x11   : > { %v7665_v2 = vld [vmem:[%s7662_s18] sm:$0xf]  ;;  %v7668_v3 = vld [vmem:[%s7662_s18 + $0x4] sm:$0xf]  ;;  %v7671_v4 = vld [vmem:[%s7662_s18 + $0x8] sm:$0x1]  ;;  %s14523_s12 = scalar_lea.vmem %s14693_s9, %s7301_s29 }
  0x12   : > { %v418_v10 = vshrl.u32 %v7665_v2, 16  ;;  %v421_v12 = vshll.u32 %v7665_v2, 16  ;;  %v427_v13 = vshll.u32 %v7668_v3, 16  ;;  %v431_v14 = vshrl.u32 %v7668_v3, 16  ;;  %v362_v20 = vld [vmem:[%s7662_s18 + $0xc] sm:$0xf] }
  0x13   : > { %v853_v5 = vld.sshfl [vmem:[#allocation1] sm:$0xff pattern:$0x73625140]  ;;  %v854_v6 = vld.sshfl [vmem:[#allocation1 + $0x8] sm:$0xff pattern:$0x73625140] }
  0x14   : > { %v906_v7 = vsel %vm905_vm0, %v853_v5, 0  ;;  %v908_v8 = vsel %vm905_vm0, %v854_v6, 0  ;;  %v855_v9 = vld.sshfl [vmem:[#allocation1 + $0x10] sm:$0xff pattern:$0x73625140]  ;;  %v420_v15 = vrot.slane %v418_v10, 4 }
  0x15   : > { %919 = vmatpush.bf16.msra.mxu0 %v906_v7  ;;  %1008 = vmatpush.bf16.msra.mxu1 %v908_v8  ;;  %v910_v11 = vsel %vm905_vm0, %v855_v9, 0  ;;  %1260 = vst [vmem:[#allocation1] ss:$4 sm:$0xff] %v413_v1  ;;  %v437_v16 = vshll.u32 %v7671_v4, 16  ;;  %v423_v17 = vrot.slane %v421_v12, 5  ;;  %v429_v18 = vrot.slane %v427_v13, 5 }
  0x16   : > { %1097 = vmatpush.bf16.msra.mxu2 %v910_v11  ;;  %v433_v19 = vrot.slane %v431_v14, 4  ;;  %v363_v22 = vld [vmem:[%s7662_s18 + $0x10] sm:$0xf]  ;;  %v442_v25 = vshrl.u32 %v362_v20, 16  ;;  %v445_v26 = vshll.u32 %v362_v20, 16  ;;  %v7302_v41 = vld [vmem:[%s7662_s18] sm:$0xff] }
  0x17   : > { %v439_v21 = vrot.slane %v437_v16, 5  ;;  %v424_v23 = vor.u32 %v423_v17, %v420_v15  ;;  %v451_v28 = vshll.u32 %v363_v22, 16  ;;  %v455_v29 = vshrl.u32 %v363_v22, 16  ;;  %v364_v32 = vld [vmem:[%s7662_s18 + $0x14] sm:$0x1]  ;;  %v7706_v5 = vld [vmem:[%s7662_s18 + $0xc] sm:$0xff] }
  0x18   : > { %v434_v24 = vor.u32 %v433_v19, %v429_v18  ;;  %v444_v33 = vrot.slane %v442_v25, 4  ;;  %v447_v34 = vrot.slane %v445_v26, 5  ;;  %v461_v46 = vshll.u32 %v364_v32, 16  ;;  %v365_v48 = vld [vmem:[%s7662_s18 + $0x18] sm:$0xf] }
  0x19   : > { %v425_v30 = vrot.slane %v424_v23, 4  ;;  %v453_v36 = vrot.slane %v451_v28, 5  ;;  %v457_v37 = vrot.slane %v455_v29, 4  ;;  %v366_v52 = vld [vmem:[%s7662_s18 + $0x1c] sm:$0xf]  ;;  %v466_v53 = vshrl.u32 %v365_v48, 16 }
  0x1a   : > { %v435_v31 = vrot.slane %v434_v24, 4  ;;  %v448_v44 = vor.u32 %v447_v34, %v444_v33  ;;  %v463_v51 = vrot.slane %v461_v46, 5  ;;  %v469_v54 = vshll.u32 %v365_v48, 16  ;;  %v367_v63 = vld [vmem:[%s7662_s18 + $0x20] sm:$0x1]  ;;  %v7733_v34 = vld [vmem:[%s7662_s18 + $0x18] sm:$0xff] }
  0x1b   : > { %v430_v39 = vsel %vm7683_vm3, %v425_v30, %v429_v18  ;;  %v458_v45 = vor.u32 %v457_v37, %v453_v36  ;;  %v475_v55 = vshll.u32 %v366_v52, 16  ;;  %v479_v56 = vshrl.u32 %v366_v52, 16  ;;  %v368_v13 = vld [vmem:[%s7662_s18 + $0x24] sm:$0xf]  ;;  %v369_v14 = vld [vmem:[%s7662_s18 + $0x28] sm:$0xf] }
  0x1c   : > { %v1261_v35 = vld.sshfl [vmem:[#allocation1] sm:$0xff pattern:$0x73625140]  ;;  %v440_v40 = vsel %vm7683_vm3, %v435_v31, %v439_v21  ;;  %v803_v42 = vunpack.c.l.b16 %v430_v39  ;;  %v449_v49 = vrot.slane %v448_v44, 4  ;;  %v468_v59 = vrot.slane %v466_v53, 4 }
  0x1d   : > { %v1312_v38 = vsel %vm905_vm0, %v1261_v35, 0  ;;  %v804_v43 = vunpack.c.l.b16 %v440_v40  ;;  %v459_v50 = vrot.slane %v458_v45, 4  ;;  %v471_v60 = vrot.slane %v469_v54, 5  ;;  %v1262_v15 = vld.sshfl [vmem:[#allocation1 + $0x8] sm:$0xff pattern:$0x73625140] }
  0x1e   : > { %1325 = vmatpush.bf16.msra.mxu3 %v1312_v38  ;;  %v454_v57 = vsel %vm7683_vm3, %v449_v49, %v453_v36  ;;  %v477_v0 = vrot.slane %v475_v55, 5  ;;  %v481_v1 = vrot.slane %v479_v56, 4  ;;  %v485_v6 = vshll.u32 %v367_v63, 16  ;;  %v1263_v16 = vld.sshfl [vmem:[#allocation1 + $0x10] sm:$0xff pattern:$0x73625140] }
  0x1f   : > { %v835_v47 = vpack.c.b16 %v804_v43, %v803_v42  ;;  %v464_v58 = vsel %vm7683_vm3, %v459_v50, %v463_v51  ;;  %v805_v61 = vunpack.c.l.b16 %v454_v57  ;;  %v472_v8 = vor.u32 %v471_v60, %v468_v59  ;;  %v6906_v19 = vld [vmem:[%s14685_s1 + $0xc] sm:$0x3f]  ;;  %v7748_v44 = vld [vmem:[%s7662_s18 + $0x34] sm:$0xf]  ;;  %v7761_v59 = vld [vmem:[%s7662_s18 + $0x24] sm:$0xff] }
  0x20   : > { %v806_v62 = vunpack.c.l.b16 %v464_v58  ;;  %v482_v9 = vor.u32 %v481_v1, %v477_v0  ;;  %v487_v10 = vrot.slane %v485_v6, 5  ;;  %v1314_v17 = vsel %vm905_vm0, %v1262_v15, 0  ;;  %1767 = vst [vmem:[#allocation1] ss:$4 sm:$0xff] %v6906_v19  ;;  %v7730_v33 = vld [vmem:[%s7662_s18 + $0x2c] sm:$0x1] }
  0x21   : > { %6842 = vmatmul.msk.bf16.vlgmr.msra.gmra.mxu3 %vm856_vm4, %v7302_v41  ;;  %6730 = vmatmul.msk.bf16.vlgmr.msra.gmra.mxu0 %vm856_vm4, %v835_v47  ;;  %v473_v11 = vrot.slane %v472_v8, 4  ;;  %v1316_v18 = vsel %vm905_vm0, %v1263_v16, 0  ;;  %v490_v20 = vshrl.u32 %v368_v13, 16  ;;  %v493_v21 = vshll.u32 %v368_v13, 16  ;;  %v371_v43 = vld [vmem:[%s7662_s18 + $0x30] sm:$0xf] }
  0x22   : > { %6746 = vmatmul.msk.bf16.vlgmr.msra.gmra.mxu1 %vm856_vm4, %v835_v47  ;;  %6762 = vmatmul.msk.bf16.vlgmr.msra.gmra.mxu2 %vm856_vm4, %v835_v47  ;;  %v7708_v7 = vpack.c.b16 %v806_v62, %v805_v61  ;;  %v483_v12 = vrot.slane %v482_v9, 4  ;;  %v499_v22 = vshll.u32 %v369_v14, 16  ;;  %v503_v23 = vshrl.u32 %v369_v14, 16  ;;  %v7758_v58 = vld [vmem:[%s7662_s18 + $0x38] sm:$0x1] }
  0x23   : > { %1414 = vmatpush.bf16.msrb.mxu0 %v1314_v17  ;;  %1503 = vmatpush.bf16.msrb.mxu1 %v1316_v18  ;;  %v478_v24 = vsel %vm7683_vm3, %v473_v11, %v477_v0  ;;  %v492_v26 = vrot.slane %v490_v20, 4  ;;  %v495_v28 = vrot.slane %v493_v21, 5  ;;  %v509_v38 = vshll.u32 %v7730_v33, 16  ;;  %v374_v0 = vld [vmem:[%s7662_s18 + $0x3c] sm:$0xf] }
  0x24   : > { %15125 = vst [vmem:[#allocation3_spill] sm:$0xff] %v7708_v7  ;;  %v488_v25 = vsel %vm7683_vm3, %v483_v12, %v487_v10  ;;  %v807_v29 = vunpack.c.l.b16 %v478_v24  ;;  %v501_v31 = vrot.slane %v499_v22, 5  ;;  %v505_v32 = vrot.slane %v503_v23, 4  ;;  %v7774_v1 = vld [vmem:[%s7662_s18 + $0x40] sm:$0xf]  ;;  %v7788_v23 = vld [vmem:[%s7662_s18 + $0x30] sm:$0xff] }
  0x25   : > { %v808_v30 = vunpack.c.l.b16 %v488_v25  ;;  %v496_v36 = vor.u32 %v495_v28, %v492_v26  ;;  %v511_v41 = vrot.slane %v509_v38, 5  ;;  %v514_v48 = vshrl.u32 %v371_v43, 16  ;;  %v7785_v22 = vld [vmem:[%s7662_s18 + $0x44] sm:$0x1] }
  0x26   : > { %v506_v37 = vor.u32 %v505_v32, %v501_v31  ;;  %v517_v49 = vshll.u32 %v371_v43, 16  ;;  %v523_v50 = vshll.u32 %v7748_v44, 16  ;;  %v527_v51 = vshrl.u32 %v7748_v44, 16  ;;  %v7802_v32 = vld [vmem:[%s7662_s18 + $0x48] sm:$0xf] }
  0x27   : > { %v7735_v35 = vpack.c.b16 %v808_v30, %v807_v29  ;;  %v497_v39 = vrot.slane %v496_v36, 4  ;;  %v1768_v42 = vld.sshfl [vmem:[#allocation1] sm:$0xff pattern:$0x73625140]  ;;  %v516_v54 = vrot.slane %v514_v48, 4  ;;  %v533_v63 = vshll.u32 %v7758_v58, 16 }
  0x28   : > { %v507_v40 = vrot.slane %v506_v37, 4  ;;  %v1819_v45 = vsel %vm905_vm0, %v1768_v42, 0  ;;  %v519_v55 = vrot.slane %v517_v49, 5  ;;  %v525_v56 = vrot.slane %v523_v50, 5  ;;  %v7805_v36 = vld [vmem:[%s7662_s18 + $0x4c] sm:$0xf] }
  0x29   : > { %15126 = vst [vmem:[#allocation4_spill] sm:$0xff] %v7735_v35  ;;  %1832 = vmatpush.bf16.msrb.mxu2 %v1819_v45  ;;  %v502_v46 = vsel %vm7683_vm3, %v497_v39, %v501_v31  ;;  %v529_v57 = vrot.slane %v527_v51, 4  ;;  %v535_v9 = vrot.slane %v533_v63, 5  ;;  %v538_v10 = vshrl.u32 %v374_v0, 16  ;;  %v7816_v50 = vld [vmem:[%s7662_s18 + $0x50] sm:$0x1] }
  0x2a   : > { %v512_v47 = vsel %vm7683_vm3, %v507_v40, %v511_v41  ;;  %v809_v52 = vunpack.c.l.b16 %v502_v46  ;;  %v520_v61 = vor.u32 %v519_v55, %v516_v54  ;;  %v541_v11 = vshll.u32 %v374_v0, 16  ;;  %v7819_v51 = vld [vmem:[%s7662_s18 + $0x3c] sm:$0xff]  ;;  %v7836_v63 = vld [vmem:[%s7662_s18 + $0x58] sm:$0xf] }
  0x2b   : > { %v810_v53 = vunpack.c.l.b16 %v512_v47  ;;  %v530_v62 = vor.u32 %v529_v57, %v525_v56  ;;  %v547_v12 = vshll.u32 %v7774_v1, 16  ;;  %v551_v13 = vshrl.u32 %v7774_v1, 16 }
  0x2c   : > { %v521_v6 = vrot.slane %v520_v61, 4  ;;  %v540_v16 = vrot.slane %v538_v10, 4  ;;  %v543_v17 = vrot.slane %v541_v11, 5  ;;  %v557_v26 = vshll.u32 %v7785_v22, 16 }
  0x2d   : > { %v7763_v60 = vpack.c.b16 %v810_v53, %v809_v52  ;;  %v531_v8 = vrot.slane %v530_v62, 4  ;;  %v549_v18 = vrot.slane %v547_v12, 5  ;;  %v553_v19 = vrot.slane %v551_v13, 4  ;;  %v7833_v62 = vld [vmem:[%s7662_s18 + $0x54] sm:$0xf] }
  0x2e   : > { %v526_v14 = vsel %vm7683_vm3, %v521_v6, %v525_v56  ;;  %v544_v24 = vor.u32 %v543_v17, %v540_v16  ;;  %v559_v31 = vrot.slane %v557_v26, 5  ;;  %v562_v39 = vshrl.u32 %v7802_v32, 16  ;;  %v7862_v26 = vld [vmem:[%s7662_s18 + $0x60] sm:$0xf] }
  0x2f   : > { %15127 = vst [vmem:[#allocation5_spill] sm:$0xff] %v7763_v60  ;;  %v536_v15 = vsel %vm7683_vm3, %v531_v8, %v535_v9  ;;  %v811_v20 = vunpack.c.l.b16 %v526_v14  ;;  %v554_v25 = vor.u32 %v553_v19, %v549_v18  ;;  %v565_v40 = vshll.u32 %v7802_v32, 16  ;;  %v7850_v19 = vld [vmem:[%s7662_s18 + $0x48] sm:$0xff] }
  0x30   : > { %v812_v21 = vunpack.c.l.b16 %v536_v15  ;;  %v545_v29 = vrot.slane %v544_v24, 4  ;;  %v571_v41 = vshll.u32 %v7805_v36, 16  ;;  %v575_v42 = vshrl.u32 %v7805_v36, 16 }
  0x31   : > { %6843 = vmatmul.msk.bf16.gmra.mxu3 %vm856_vm4, %v7706_v5  ;;  %6731 = vmatmul.msk.bf16.gmra.mxu0 %vm856_vm4, %v7708_v7  ;;  %v555_v30 = vrot.slane %v554_v25, 4  ;;  %v564_v46 = vrot.slane %v562_v39, 4  ;;  %v567_v47 = vrot.slane %v565_v40, 5  ;;  %v581_v55 = vshll.u32 %v7816_v50, 16 }
  0x32   : > { %6747 = vmatmul.msk.bf16.gmra.mxu1 %vm856_vm4, %v7708_v7  ;;  %6763 = vmatmul.msk.bf16.gmra.mxu2 %vm856_vm4, %v7708_v7  ;;  %v7791_v28 = vpack.c.b16 %v812_v21, %v811_v20  ;;  %v550_v37 = vsel %vm7683_vm3, %v545_v29, %v549_v18  ;;  %v573_v48 = vrot.slane %v571_v41, 5  ;;  %v577_v49 = vrot.slane %v575_v42, 4  ;;  %v7847_v18 = vld [vmem:[%s7662_s18 + $0x5c] sm:$0x1]  ;;  %v7865_v29 = vld [vmem:[%s7662_s18 + $0x64] sm:$0xf] }
  0x33   : > { %v560_v38 = vsel %vm7683_vm3, %v555_v30, %v559_v31  ;;  %v813_v43 = vunpack.c.l.b16 %v550_v37  ;;  %v568_v53 = vor.u32 %v567_v47, %v564_v46  ;;  %v583_v61 = vrot.slane %v581_v55, 5  ;;  %v7881_v55 = vld [vmem:[%s7662_s18 + $0x54] sm:$0xff] }
  0x34   : > { %15128 = vst [vmem:[#allocation6_spill] sm:$0xff] %v7791_v28  ;;  %v814_v45 = vunpack.c.l.b16 %v560_v38  ;;  %v578_v54 = vor.u32 %v577_v49, %v573_v48  ;;  %v586_v8 = vshrl.u32 %v7833_v62, 16  ;;  %v589_v9 = vshll.u32 %v7833_v62, 16 }
  0x35   : > { %v569_v56 = vrot.slane %v568_v53, 4  ;;  %v595_v10 = vshll.u32 %v7836_v63, 16  ;;  %v599_v11 = vshrl.u32 %v7836_v63, 16  ;;  %v605_v25 = vshll.u32 %v7847_v18, 16 }
  0x36   : > { %v7821_v52 = vpack.c.b16 %v814_v45, %v813_v43  ;;  %v579_v57 = vrot.slane %v578_v54, 4  ;;  %v588_v14 = vrot.slane %v586_v8, 4  ;;  %v591_v15 = vrot.slane %v589_v9, 5  ;;  %v7878_v54 = vld [vmem:[%s7662_s18 + $0x68] sm:$0x1] }
  0x37   : > { %v574_v0 = vsel %vm7683_vm3, %v569_v56, %v573_v48  ;;  %v597_v16 = vrot.slane %v595_v10, 5  ;;  %v601_v17 = vrot.slane %v599_v11, 4  ;;  %v607_v37 = vrot.slane %v605_v25, 5  ;;  %v7895_v10 = vld [vmem:[%s7662_s18 + $0x6c] sm:$0xf] }
  0x38   : > { %15129 = vst [vmem:[#allocation7_spill] sm:$0xff] %v7821_v52  ;;  %v584_v6 = vsel %vm7683_vm3, %v579_v57, %v583_v61  ;;  %v815_v12 = vunpack.c.l.b16 %v574_v0  ;;  %v592_v21 = vor.u32 %v591_v15, %v588_v14  ;;  %v610_v38 = vshrl.u32 %v7862_v26, 16  ;;  %v7898_v11 = vld [vmem:[%s7662_s18 + $0x70] sm:$0xf] }
  0x39   : > { %v816_v13 = vunpack.c.l.b16 %v584_v6  ;;  %v602_v24 = vor.u32 %v601_v17, %v597_v16  ;;  %v613_v39 = vshll.u32 %v7862_v26, 16  ;;  %v619_v40 = vshll.u32 %v7865_v29, 16 }
  0x3a   : > { %v593_v30 = vrot.slane %v592_v21, 4  ;;  %v623_v41 = vshrl.u32 %v7865_v29, 16  ;;  %v612_v45 = vrot.slane %v610_v38, 4  ;;  %v629_v61 = vshll.u32 %v7878_v54, 16  ;;  %v7909_v38 = vld [vmem:[%s7662_s18 + $0x74] sm:$0x1] }
  0x3b   : > { %v7852_v20 = vpack.c.b16 %v816_v13, %v815_v12  ;;  %v603_v31 = vrot.slane %v602_v24, 4  ;;  %v615_v46 = vrot.slane %v613_v39, 5  ;;  %v621_v47 = vrot.slane %v619_v40, 5  ;;  %v7912_v39 = vld [vmem:[%s7662_s18 + $0x60] sm:$0xff] }
  0x3c   : > { %v598_v42 = vsel %vm7683_vm3, %v593_v30, %v597_v16  ;;  %v625_v48 = vrot.slane %v623_v41, 4  ;;  %v631_v9 = vrot.slane %v629_v61, 5  ;;  %v634_v14 = vshrl.u32 %v7895_v10, 16 }
  0x3d   : > { %15130 = vst [vmem:[#allocation8_spill] sm:$0xff] %v7852_v20  ;;  %v608_v43 = vsel %vm7683_vm3, %v603_v31, %v607_v37  ;;  %v817_v49 = vunpack.c.l.b16 %v598_v42  ;;  %v616_v56 = vor.u32 %v615_v46, %v612_v45  ;;  %v637_v15 = vshll.u32 %v7895_v10, 16 }
  0x3e   : > { %v818_v53 = vunpack.c.l.b16 %v608_v43  ;;  %v626_v57 = vor.u32 %v625_v48, %v621_v47  ;;  %v643_v16 = vshll.u32 %v7898_v11, 16  ;;  %v647_v17 = vshrl.u32 %v7898_v11, 16 }
  0x3f   : > { %v617_v6 = vrot.slane %v616_v56, 4  ;;  %v636_v25 = vrot.slane %v634_v14, 4  ;;  %v639_v30 = vrot.slane %v637_v15, 5  ;;  %v653_v43 = vshll.u32 %v7909_v38, 16  ;;  %v7928_v56 = vld [vmem:[%s7662_s18 + $0x78] sm:$0xf] }
  0x40   : > { %v7884_v0 = vpack.c.b16 %v818_v53, %v817_v49  ;;  %v627_v8 = vrot.slane %v626_v57, 4  ;;  %v645_v31 = vrot.slane %v643_v16, 5  ;;  %v649_v37 = vrot.slane %v647_v17, 4  ;;  %v7931_v57 = vld [vmem:[%s7662_s18 + $0x7c] sm:$0xf] }
  0x41   : > { %6844 = vmatmul.msk.bf16.gmra.mxu3 %vm856_vm4, %v7733_v34  ;;  %6732 = vmatmul.msk.bf16.gmra.mxu0 %vm856_vm4, %v7735_v35  ;;  %v622_v12 = vsel %vm7683_vm3, %v617_v6, %v621_v47  ;;  %v640_v41 = vor.u32 %v639_v30, %v636_v25  ;;  %v655_v49 = vrot.slane %v653_v43, 5  ;;  %v658_v14 = vshrl.u32 %v7928_v56, 16 }
  0x42   : > { %6748 = vmatmul.msk.bf16.gmra.mxu1 %vm856_vm4, %v7735_v35  ;;  %6764 = vmatmul.msk.bf16.gmra.mxu2 %vm856_vm4, %v7735_v35  ;;  %15131 = vst [vmem:[#allocation9_spill] sm:$0xff] %v7884_v0  ;;  %v632_v13 = vsel %vm7683_vm3, %v627_v8, %v631_v9  ;;  %v819_v21 = vunpack.c.l.b16 %v622_v12  ;;  %v650_v42 = vor.u32 %v649_v37, %v645_v31  ;;  %v661_v15 = vshll.u32 %v7928_v56, 16  ;;  %v7991_v35 = vld [vmem:[%s7662_s18 + $0x8c] sm:$0x1] }
  0x43   : > { %v820_v24 = vunpack.c.l.b16 %v632_v13  ;;  %v641_v47 = vrot.slane %v640_v41, 4  ;;  %v667_v16 = vshll.u32 %v7931_v57, 16  ;;  %v671_v17 = vshrl.u32 %v7931_v57, 16  ;;  %15138 = vst [vmem:[#allocation16_spill] sm:$0xff] %v7991_v35 }
  0x44   : > { %v651_v48 = vrot.slane %v650_v42, 4  ;;  %v660_v25 = vrot.slane %v658_v14, 4  ;;  %v663_v30 = vrot.slane %v661_v15, 5  ;;  %v7948_v42 = vld [vmem:[%s7662_s18 + $0x80] sm:$0x1] }
  0x45   : > { %v7914_v40 = vpack.c.b16 %v820_v24, %v819_v21  ;;  %v646_v8 = vsel %vm7683_vm3, %v641_v47, %v645_v31  ;;  %v669_v31 = vrot.slane %v667_v16, 5  ;;  %v673_v37 = vrot.slane %v671_v17, 4  ;;  %v7965_v15 = vld [vmem:[%s7662_s18 + $0x84] sm:$0xf] }
  0x46   : > { %v656_v9 = vsel %vm7683_vm3, %v651_v48, %v655_v49  ;;  %v821_v21 = vunpack.c.l.b16 %v646_v8  ;;  %v664_v8 = vor.u32 %v663_v30, %v660_v25  ;;  %v677_v14 = vshll.u32 %v7948_v42, 16  ;;  %15136 = vst [vmem:[#allocation14_spill] sm:$0xff] %v7965_v15 }
  0x47   : > { %15132 = vst [vmem:[#allocation10_spill] sm:$0xff] %v7914_v40  ;;  %v822_v24 = vunpack.c.l.b16 %v656_v9  ;;  %v674_v9 = vor.u32 %v673_v37, %v669_v31  ;;  %v682_v25 = vshrl.u32 %v7965_v15, 16  ;;  %v685_v37 = vshll.u32 %v7965_v15, 16  ;;  %v8120_v15 = vld [vmem:[%s7662_s18 + $0xb0] sm:$0x1] }
  0x48   : > { %v665_v16 = vrot.slane %v664_v8, 4  ;;  %15170 = vst [vmem:[#allocation48_spill] sm:$0xff] %v8120_v15 }
  0x49   : > { %v7957_v48 = vpack.c.b16 %v822_v24, %v821_v21  ;;  %v675_v17 = vrot.slane %v674_v9, 4  ;;  %v679_v21 = vrot.slane %v677_v14, 5  ;;  %v687_v14 = vrot.slane %v685_v37, 5 }
  0x4a   : > { %v670_v8 = vsel %vm7683_vm3, %v665_v16, %v669_v31  ;;  %v701_v16 = vshll.u32 %v7991_v35, 16  ;;  %v8039_v35 = vld [vmem:[%s7662_s18 + $0x84] sm:$0xff] }
  0x4b   : > { %15135 = vst [vmem:[#allocation13_spill] sm:$0xff] %v7957_v48  ;;  %v680_v9 = vsel %vm7683_vm3, %v675_v17, %v679_v21 }
  0x4c   : > { %v703_v37 = vrot.slane %v701_v16, 5  ;;  %15150 = vst [vmem:[#allocation28_spill] sm:$0xff] %v8039_v35 }
  0x51   : > { %6845 = vmatmul.msk.bf16.gmra.mxu3 %vm856_vm4, %v7761_v59  ;;  %6733 = vmatmul.msk.bf16.gmra.mxu0 %vm856_vm4, %v7763_v60 }
  0x52   : > { %6749 = vmatmul.msk.bf16.gmra.mxu1 %vm856_vm4, %v7763_v60  ;;  %6765 = vmatmul.msk.bf16.gmra.mxu2 %vm856_vm4, %v7763_v60  ;;  %v824_v60 = vunpack.c.l.b16 %v680_v9 }
  0x61   : > { %6846 = vmatmul.msk.bf16.gmra.mxu3 %vm856_vm4, %v7788_v23  ;;  %6734 = vmatmul.msk.bf16.gmra.mxu0 %vm856_vm4, %v7791_v28 }
  0x62   : > { %6750 = vmatmul.msk.bf16.gmra.mxu1 %vm856_vm4, %v7791_v28  ;;  %6766 = vmatmul.msk.bf16.gmra.mxu2 %vm856_vm4, %v7791_v28  ;;  %v823_v28 = vunpack.c.l.b16 %v670_v8 }
  0x64   : > { %v8001_v21 = vpack.c.b16 %v824_v60, %v823_v28  ;;  %v8014_v60 = vld [vmem:[%s7662_s18 + $0x90] sm:$0xf]  ;;  %v8017_v28 = vld [vmem:[%s7662_s18 + $0x94] sm:$0xf] }
  0x65   : > { %15143 = vst [vmem:[#allocation21_spill] sm:$0xff] %v8014_v60  ;;  %v719_v16 = vshrl.u32 %v8017_v28, 16 }
  0x66   : > { %15141 = vst [vmem:[#allocation19_spill] sm:$0xff] %v8001_v21 }
  0x67   : > { %15144 = vst [vmem:[#allocation22_spill] sm:$0xff] %v8017_v28 }
  0x71   : > { %6847 = vmatmul.msk.bf16.gmra.mxu3 %vm856_vm4, %v7819_v51  ;;  %6735 = vmatmul.msk.bf16.gmra.mxu0 %vm856_vm4, %v7821_v52 }
  0x72   : > { %6751 = vmatmul.msk.bf16.gmra.mxu1 %vm856_vm4, %v7821_v52  ;;  %6767 = vmatmul.msk.bf16.gmra.mxu2 %vm856_vm4, %v7821_v52 }
  0x81   : > { %6848 = vmatmul.msk.bf16.gmra.mxu3 %vm856_vm4, %v7850_v19  ;;  %6736 = vmatmul.msk.bf16.gmra.mxu0 %vm856_vm4, %v7852_v20 }
  0x82   : > { %6752 = vmatmul.msk.bf16.gmra.mxu1 %vm856_vm4, %v7852_v20  ;;  %6768 = vmatmul.msk.bf16.gmra.mxu2 %vm856_vm4, %v7852_v20 }
  0x91   : > { %6849 = vmatmul.msk.bf16.gmra.mxu3 %vm856_vm4, %v7881_v55  ;;  %6737 = vmatmul.msk.bf16.gmra.mxu0 %vm856_vm4, %v7884_v0 }
  0x92   : > { %6753 = vmatmul.msk.bf16.gmra.mxu1 %vm856_vm4, %v7884_v0  ;;  %6769 = vmatmul.msk.bf16.gmra.mxu2 %vm856_vm4, %v7884_v0 }
  0x9e   : > { %v921_v45 = vpop.f32.mrf.mxu0 }
  0x9f   : > { %v7917_v46 = vpop.f32.mrf.mxu1 }
  0xa1   : > { %6850 = vmatmul.msk.bf16.gmra.mxu3 %vm856_vm4, %v7912_v39  ;;  %6738 = vmatmul.msk.bf16.gmra.mxu0 %vm856_vm4, %v7914_v40 }
  0xa2   : > { %6754 = vmatmul.msk.bf16.gmra.mxu1 %vm856_vm4, %v7914_v40  ;;  %6770 = vmatmul.msk.bf16.gmra.mxu2 %vm856_vm4, %v7914_v40 }
  0xa4   : > { %v1327_v53 = vpop.f32.mrf.mxu3 }
  0xa5   : > { %v7933_v61 = vadd.f32 %v1327_v53, %v921_v45  ;;  %v7935_v6 = vpop.f32.mrf.mxu2  ;;  %v7953_v45 = vld [vmem:[%s7662_s18 + $0x6c] sm:$0xff] }
  0xa6   : > { %15133 = vst [vmem:[#allocation11_spill] sm:$0xff] %v7935_v6  ;;  %v923_v12 = vpop.f32.mrf.mxu0 }
  0xa7   : > { %v7941_v13 = vpop.f32.mrf.mxu1 }
  0xac   : > { %v1329_v41 = vpop.f32.mrf.mxu3 }
  0xad   : > { %v7950_v43 = vadd.f32 %v1329_v41, %v923_v12  ;;  %v7955_v47 = vpop.f32.mrf.mxu2  ;;  %v7972_v12 = vld [vmem:[%s7662_s18 + $0x88] sm:$0xf] }
  0xae   : > { %15134 = vst [vmem:[#allocation12_spill] sm:$0xff] %v7955_v47  ;;  %v926_v49 = vpop.f32.mrf.mxu0  ;;  %v691_v41 = vshll.u32 %v7972_v12, 16  ;;  %v695_v40 = vshrl.u32 %v7972_v12, 16 }
  0xaf   : > { %v7959_v53 = vpop.f32.mrf.mxu1 }
  0xb0   : > { %v697_v52 = vrot.slane %v695_v40, 4 }
  0xb1   : > { %6851 = vmatmul.msk.bf16.gmra.mxu3 %vm856_vm4, %v7953_v45  ;;  %6739 = vmatmul.msk.bf16.gmra.mxu0 %vm856_vm4, %v7957_v48 }
  0xb2   : > { %6755 = vmatmul.msk.bf16.gmra.mxu1 %vm856_vm4, %v7957_v48  ;;  %6771 = vmatmul.msk.bf16.gmra.mxu2 %vm856_vm4, %v7957_v48 }
  0xb4   : > { %v1332_v24 = vpop.f32.mrf.mxu3 }
  0xb5   : > { %v7977_v30 = vadd.f32 %v1332_v24, %v926_v49  ;;  %v7982_v0 = vpop.f32.mrf.mxu2  ;;  %v684_v49 = vrot.slane %v682_v25, 4  ;;  %v693_v24 = vrot.slane %v691_v41, 5 }
  0xb6   : > { %15137 = vst [vmem:[#allocation15_spill] sm:$0xff] %v7982_v0  ;;  %v928_v20 = vpop.f32.mrf.mxu0  ;;  %v7996_v0 = vld [vmem:[%s7662_s18 + $0x78] sm:$0xff] }
  0xb7   : > { %v7984_v48 = vpop.f32.mrf.mxu1  ;;  %15139 = vst [vmem:[#allocation17_spill] sm:$0xff] %v7996_v0  ;;  %v688_v6 = vor.u32 %v687_v14, %v684_v49  ;;  %v698_v31 = vor.u32 %v697_v52, %v693_v24  ;;  %v706_v49 = vshrl.u32 %v8014_v60, 16  ;;  %v709_v14 = vshll.u32 %v8014_v60, 16 }
  0xbc   : > { %v1334_v7 = vpop.f32.mrf.mxu3 }
  0xbd   : > { %v7993_v47 = vadd.f32 %v1334_v7, %v928_v20  ;;  %v7999_v17 = vpop.f32.mrf.mxu2  ;;  %v689_v7 = vrot.slane %v688_v6, 4  ;;  %v699_v20 = vrot.slane %v698_v31, 4  ;;  %v715_v31 = vshll.u32 %v8017_v28, 16 }
  0xbe   : > { %15140 = vst [vmem:[#allocation18_spill] sm:$0xff] %v7999_v17  ;;  %v931_v40 = vpop.f32.mrf.mxu0 }
  0xbf   : > { %v8003_v25 = vpop.f32.mrf.mxu1  ;;  %v694_v6 = vsel %vm7683_vm3, %v689_v7, %v693_v24  ;;  %v704_v8 = vsel %vm7683_vm3, %v699_v20, %v703_v37  ;;  %v708_v24 = vrot.slane %v706_v49, 4  ;;  %v711_v7 = vrot.slane %v709_v14, 5  ;;  %v8034_v37 = vld [vmem:[%s7662_s18 + $0x98] sm:$0x1] }
  0xc0   : > { %15142 = vst [vmem:[#allocation20_spill] sm:$0xff] %v8003_v25  ;;  %v826_v17 = vunpack.c.l.b16 %v704_v8  ;;  %v721_v20 = vrot.slane %v719_v16, 4  ;;  %v725_v8 = vshll.u32 %v8034_v37, 16  ;;  %v8057_v16 = vld [vmem:[%s7662_s18 + $0x9c] sm:$0xf] }
  0xc1   : > { %6852 = vmatmul.msk.bf16.gmra.mxu3 %vm856_vm4, %v7996_v0  ;;  %6740 = vmatmul.msk.bf16.gmra.mxu0 %vm856_vm4, %v8001_v21  ;;  %15148 = vst [vmem:[#allocation26_spill] sm:$0xff] %v8034_v37 }
  0xc2   : > { %6756 = vmatmul.msk.bf16.gmra.mxu1 %vm856_vm4, %v8001_v21  ;;  %6772 = vmatmul.msk.bf16.gmra.mxu2 %vm856_vm4, %v8001_v21  ;;  %v825_v21 = vunpack.c.l.b16 %v694_v6  ;;  %15154 = vst [vmem:[#allocation32_spill] sm:$0xff] %v8057_v16 }
  0xc4   : > { %v1337_v52 = vpop.f32.mrf.mxu3  ;;  %v8043_v28 = vpack.c.b16 %v826_v17, %v825_v21  ;;  %v727_v17 = vrot.slane %v725_v8, 5 }
  0xc5   : > { %v8019_v41 = vadd.f32 %v1337_v52, %v931_v40  ;;  %v8025_v9 = vpop.f32.mrf.mxu2 }
  0xc6   : > { %15146 = vst [vmem:[#allocation24_spill] sm:$0xff] %v8025_v9  ;;  %v933_v40 = vpop.f32.mrf.mxu0 }
  0xc7   : > { %15145 = vst [vmem:[#allocation23_spill] sm:$0xff] %v8019_v41  ;;  %v8031_v52 = vpop.f32.mrf.mxu1  ;;  %v717_v41 = vrot.slane %v715_v31, 5 }
  0xc8   : > { %15147 = vst [vmem:[#allocation25_spill] sm:$0xff] %v8031_v52  ;;  %v712_v52 = vor.u32 %v711_v7, %v708_v24 }
  0xc9   : > { %15152 = vst [vmem:[#allocation30_spill] sm:$0xff] %v8043_v28  ;;  %v722_v6 = vor.u32 %v721_v20, %v717_v41 }
  0xcb   : > { %v723_v31 = vrot.slane %v722_v6, 4 }
  0xcc   : > { %v1339_v9 = vpop.f32.mrf.mxu3 }
  0xcd   : > { %v8036_v25 = vadd.f32 %v1339_v9, %v933_v40  ;;  %v8041_v60 = vpop.f32.mrf.mxu2  ;;  %v713_v9 = vrot.slane %v712_v52, 4  ;;  %v8060_v40 = vld [vmem:[%s7662_s18 + $0xa0] sm:$0xf]  ;;  %v728_v52 = vsel %vm7683_vm3, %v723_v31, %v727_v17  ;;  %v8077_v17 = vld [vmem:[%s7662_s18 + $0xa4] sm:$0x1] }
  0xce   : > { %15151 = vst [vmem:[#allocation29_spill] sm:$0xff] %v8041_v60  ;;  %v936_v49 = vpop.f32.mrf.mxu0  ;;  %v733_v60 = vshll.u32 %v8057_v16, 16 }
  0xcf   : > { %15149 = vst [vmem:[#allocation27_spill] sm:$0xff] %v8036_v25  ;;  %v8046_v14 = vpop.f32.mrf.mxu1  ;;  %v718_v20 = vsel %vm7683_vm3, %v713_v9, %v717_v41 }
  0xd0   : > { %15153 = vst [vmem:[#allocation31_spill] sm:$0xff] %v8046_v14  ;;  %v735_v41 = vrot.slane %v733_v60, 5  ;;  %v749_v60 = vshll.u32 %v8077_v17, 16 }
  0xd1   : > { %6853 = vmatmul.msk.bf16.gmra.mxu3 %vm856_vm4, %v8039_v35  ;;  %6741 = vmatmul.msk.bf16.gmra.mxu0 %vm856_vm4, %v8043_v28  ;;  %15155 = vst [vmem:[#allocation33_spill] sm:$0xff] %v8060_v40  ;;  %v8082_v35 = vld [vmem:[%s7662_s18 + $0x90] sm:$0xff] }
  0xd2   : > { %6757 = vmatmul.msk.bf16.gmra.mxu1 %vm856_vm4, %v8043_v28  ;;  %6773 = vmatmul.msk.bf16.gmra.mxu2 %vm856_vm4, %v8043_v28  ;;  %v730_v28 = vshrl.u32 %v8057_v16, 16  ;;  %15159 = vst [vmem:[#allocation37_spill] sm:$0xff] %v8077_v17 }
  0xd3   : > { %15161 = vst [vmem:[#allocation39_spill] sm:$0xff] %v8082_v35 }
  0xd4   : > { %v1342_v21 = vpop.f32.mrf.mxu3  ;;  %v732_v14 = vrot.slane %v730_v28, 4 }
  0xd5   : > { %v8062_v24 = vadd.f32 %v1342_v21, %v936_v49  ;;  %v8064_v7 = vpop.f32.mrf.mxu2  ;;  %v739_v49 = vshll.u32 %v8060_v40, 16  ;;  %v743_v21 = vshrl.u32 %v8060_v40, 16 }
  0xd6   : > { %15157 = vst [vmem:[#allocation35_spill] sm:$0xff] %v8064_v7  ;;  %v938_v6 = vpop.f32.mrf.mxu0  ;;  %v827_v7 = vunpack.c.l.b16 %v718_v20  ;;  %v736_v28 = vor.u32 %v735_v41, %v732_v14 }
  0xd7   : > { %15156 = vst [vmem:[#allocation34_spill] sm:$0xff] %v8062_v24  ;;  %v8070_v8 = vpop.f32.mrf.mxu1  ;;  %v828_v24 = vunpack.c.l.b16 %v728_v52  ;;  %v741_v9 = vrot.slane %v739_v49, 5  ;;  %v745_v37 = vrot.slane %v743_v21, 4  ;;  %v8094_v49 = vld [vmem:[%s7662_s18 + $0xa8] sm:$0xf] }
  0xd8   : > { %15158 = vst [vmem:[#allocation36_spill] sm:$0xff] %v8070_v8  ;;  %v737_v14 = vrot.slane %v736_v28, 4  ;;  %v754_v21 = vshrl.u32 %v8094_v49, 16 }
  0xd9   : > { %v8086_v25 = vpack.c.b16 %v828_v24, %v827_v7  ;;  %v746_v52 = vor.u32 %v745_v37, %v741_v9  ;;  %15165 = vst [vmem:[#allocation43_spill] sm:$0xff] %v8094_v49  ;;  %v8101_v24 = vld [vmem:[%s7662_s18 + $0xac] sm:$0xf]  ;;  %v751_v7 = vrot.slane %v749_v60, 5 }
  0xda   : > { %15166 = vst [vmem:[#allocation44_spill] sm:$0xff] %v8101_v24  ;;  %v742_v28 = vsel %vm7683_vm3, %v737_v14, %v741_v9  ;;  %v773_v14 = vshll.u32 %v8120_v15, 16  ;;  %v8166_v15 = vld [vmem:[%s7662_s18 + $0xbc] sm:$0x1] }
  0xdb   : > { %15163 = vst [vmem:[#allocation41_spill] sm:$0xff] %v8086_v25  ;;  %v747_v37 = vrot.slane %v746_v52, 4 }
  0xdc   : > { %v1344_v31 = vpop.f32.mrf.mxu3 }
  0xdd   : > { %v8079_v8 = vadd.f32 %v1344_v31, %v938_v6  ;;  %v8084_v16 = vpop.f32.mrf.mxu2  ;;  %v757_v31 = vshll.u32 %v8094_v49, 16  ;;  %v752_v52 = vsel %vm7683_vm3, %v747_v37, %v751_v7 }
  0xde   : > { %15162 = vst [vmem:[#allocation40_spill] sm:$0xff] %v8084_v16  ;;  %v941_v40 = vpop.f32.mrf.mxu0  ;;  %v763_v16 = vshll.u32 %v8101_v24, 16 }
  0xdf   : > { %15160 = vst [vmem:[#allocation38_spill] sm:$0xff] %v8079_v8  ;;  %v8088_v20 = vpop.f32.mrf.mxu1  ;;  %v759_v60 = vrot.slane %v757_v31, 5  ;;  %v830_v8 = vunpack.c.l.b16 %v752_v52  ;;  %v1606_v31 = vrot.slane %v7668_v3, 5 }
  0xe0   : > { %15164 = vst [vmem:[#allocation42_spill] sm:$0xff] %v8088_v20  ;;  %v767_v20 = vshrl.u32 %v8101_v24, 16 }
  0xe1   : > { %6854 = vmatmul.msk.bf16.gmra.mxu3 %vm856_vm4, %v8082_v35  ;;  %6742 = vmatmul.msk.bf16.gmra.mxu0 %vm856_vm4, %v8086_v25 }
  0xe2   : > { %6758 = vmatmul.msk.bf16.gmra.mxu1 %vm856_vm4, %v8086_v25  ;;  %6774 = vmatmul.msk.bf16.gmra.mxu2 %vm856_vm4, %v8086_v25  ;;  %v769_v49 = vrot.slane %v767_v20, 4 }
  0xe4   : > { %v1347_v6 = vpop.f32.mrf.mxu3 }
  0xe5   : > { %v8106_v41 = vadd.f32 %v1347_v6, %v941_v40  ;;  %v8111_v17 = vpop.f32.mrf.mxu2  ;;  %v756_v40 = vrot.slane %v754_v21, 4  ;;  %v765_v6 = vrot.slane %v763_v16, 5  ;;  %v775_v21 = vrot.slane %v773_v14, 5 }
  0xe6   : > { %15168 = vst [vmem:[#allocation46_spill] sm:$0xff] %v8111_v17  ;;  %v943_v35 = vpop.f32.mrf.mxu0  ;;  %v8125_v17 = vld [vmem:[%s7662_s18 + $0x9c] sm:$0xff] }
  0xe7   : > { %15167 = vst [vmem:[#allocation45_spill] sm:$0xff] %v8106_v41  ;;  %v8113_v25 = vpop.f32.mrf.mxu1  ;;  %v829_v41 = vunpack.c.l.b16 %v742_v28  ;;  %v770_v9 = vor.u32 %v769_v49, %v765_v6  ;;  %v8146_v49 = vld [vmem:[%s7662_s18 + $0xb8] sm:$0xf] }
  0xe8   : > { %15169 = vst [vmem:[#allocation47_spill] sm:$0xff] %v8113_v25  ;;  %v760_v25 = vor.u32 %v759_v60, %v756_v40  ;;  %v787_v14 = vshll.u32 %v8146_v49, 16 }
  0xe9   : > { %15171 = vst [vmem:[#allocation49_spill] sm:$0xff] %v8125_v17  ;;  %v8130_v7 = vpack.c.b16 %v830_v8, %v829_v41  ;;  %v8143_v8 = vld [vmem:[%s7662_s18 + $0xb4] sm:$0xf] }
  0xea   : > { %15175 = vst [vmem:[#allocation53_spill] sm:$0xff] %v8143_v8  ;;  %v778_v60 = vshrl.u32 %v8143_v8, 16 }
  0xeb   : > { %15173 = vst [vmem:[#allocation51_spill] sm:$0xff] %v8130_v7 }
  0xec   : > { %v1349_v24 = vpop.f32.mrf.mxu3  ;;  %15176 = vst [vmem:[#allocation54_spill] sm:$0xff] %v8146_v49 }
  0xed   : > { %v8122_v0 = vadd.f32 %v1349_v24, %v943_v35  ;;  %v8128_v37 = vpop.f32.mrf.mxu2  ;;  %v761_v35 = vrot.slane %v760_v25, 4  ;;  %v771_v24 = vrot.slane %v770_v9, 4  ;;  %v781_v9 = vshll.u32 %v8143_v8, 16 }
  0xee   : > { %15172 = vst [vmem:[#allocation50_spill] sm:$0xff] %v8128_v37  ;;  %v946_v16 = vpop.f32.mrf.mxu0 }
  0xef   : > { %v8132_v20 = vpop.f32.mrf.mxu1  ;;  %v766_v25 = vsel %vm7683_vm3, %v761_v35, %v765_v6  ;;  %v776_v52 = vsel %vm7683_vm3, %v771_v24, %v775_v21  ;;  %v6890_v6 = vrot.slane %v7665_v2, 9  ;;  %v1608_v35 = vrot.slane %v1606_v31, 4 }
  0xf0   : > { %15174 = vst [vmem:[#allocation52_spill] sm:$0xff] %v8132_v20  ;;  %v1609_v24 = vrot.slane %v7671_v4, 5  ;;  %v831_v21 = vunpack.c.l.b16 %v766_v25  ;;  %v783_v37 = vrot.slane %v781_v9, 5  ;;  %v15182_v2 = vmov 0 }
  0xf1   : > { %6855 = vmatmul.msk.bf16.gmra.mxu3 %vm856_vm4, %v8125_v17  ;;  %6743 = vmatmul.msk.bf16.gmra.mxu0 %vm856_vm4, %v8130_v7  ;;  %v8173_v17 = vld [vmem:[%s7662_s18 + $0xa8] sm:$0xff]  ;;  %v15183_v2 = vsel %vm8175_vm7, 4294967295, %v15182_v2 }
  0xf2   : > { %6759 = vmatmul.msk.bf16.gmra.mxu1 %vm856_vm4, %v8130_v7  ;;  %6775 = vmatmul.msk.bf16.gmra.mxu2 %vm856_vm4, %v8130_v7  ;;  %v791_v7 = vshrl.u32 %v8146_v49, 16  ;;  %15184 = vst [vmem:[#allocation60_spill] sm:$0xff] %v15183_v2 }
  0xf4   : > { %v1352_v41 = vpop.f32.mrf.mxu3  ;;  %v793_v20 = vrot.slane %v791_v7, 4  ;;  %v1769_v7 = vld.sshfl [vmem:[#allocation1 + $0x8] sm:$0xff pattern:$0x73625140] }
  0xf5   : > { %v8149_v28 = vadd.f32 %v1352_v41, %v946_v16  ;;  %v8155_v40 = vpop.f32.mrf.mxu2  ;;  %v832_v41 = vunpack.c.l.b16 %v776_v52 }
  0xf6   : > { %15178 = vst [vmem:[#allocation56_spill] sm:$0xff] %v8155_v40  ;;  %v948_v3 = vpop.f32.mrf.mxu0  ;;  %v780_v40 = vrot.slane %v778_v60, 4  ;;  %v1607_v60 = vsel %vm8175_vm7, %v6890_v6, %v1606_v31 }
  0xf7   : > { %15177 = vst [vmem:[#allocation55_spill] sm:$0xff] %v8149_v28  ;;  %v8161_v16 = vpop.f32.mrf.mxu1  ;;  %v789_v28 = vrot.slane %v787_v14, 5 }
  0xf8   : > { %15179 = vst [vmem:[#allocation57_spill] sm:$0xff] %v8161_v16  ;;  %v8170_v16 = vpack.c.b16 %v832_v41, %v831_v21  ;;  %v784_v25 = vor.u32 %v783_v37, %v780_v40  ;;  %v1821_v21 = vsel %vm905_vm0, %v1769_v7, 0  ;;  %v1718_v41 = vunpack.c.l.b16 %v1607_v60 }
  0xf9   : > { %v794_v52 = vor.u32 %v793_v20, %v789_v28  ;;  %1921 = vmatpush.bf16.msrb.mxu3 %v1821_v21 }
  0xfa   : > { %15181 = vst [vmem:[#allocation59_spill] sm:$0xff] %v8170_v16  ;;  %v785_v20 = vrot.slane %v784_v25, 4 }
  0xfb   : > { %v795_v31 = vrot.slane %v794_v52, 4  ;;  %v8212_v52 = vld [vmem:[%s7662_s18 + $0xb4] sm:$0xff] }
  0xfc   : > { %v1354_v8 = vpop.f32.mrf.mxu3  ;;  %v790_v60 = vsel %vm7683_vm3, %v785_v20, %v789_v28 }
  0xfd   : > { %v8168_v49 = vadd.f32 %v1354_v8, %v948_v3  ;;  %v8179_v4 = vpop.f32.mrf.mxu2  ;;  %v1610_v8 = vsel %vm8175_vm7, %v1608_v35, %v1609_v24  ;;  %v797_v3 = vshll.u32 %v8166_v15, 16  ;;  %v833_v21 = vunpack.c.l.b16 %v790_v60 }
  0xfe   : > { %15185 = vst [vmem:[#allocation61_spill] sm:$0xff] %v8179_v4  ;;  %v951_v9 = vpop.f32.mrf.mxu0 }
  0xff   : > { %15180 = vst [vmem:[#allocation58_spill] sm:$0xff] %v8168_v49  ;;  %v8185_v14 = vpop.f32.mrf.mxu1  ;;  %v1719_v49 = vunpack.c.l.b16 %v1610_v8  ;;  %v799_v40 = vrot.slane %v797_v3, 5 }
 0x101   : > { %6856 = vmatmul.msk.bf16.gmra.mxu3 %vm856_vm4, %v8173_v17  ;;  %v8191_v37 = vpack.c.b16 %v1719_v49, %v1718_v41  ;;  %6744 = vmatmul.msk.bf16.gmra.mxu0 %vm856_vm4, %v8170_v16  ;;  %v800_v8 = vsel %vm7683_vm3, %v795_v31, %v799_v40 }
 0x102   : > { %6760 = vmatmul.msk.bf16.gmra.mxu1 %vm856_vm4, %v8170_v16  ;;  %6776 = vmatmul.msk.bf16.gmra.mxu2 %vm856_vm4, %v8170_v16  ;;  %v834_v41 = vunpack.c.l.b16 %v800_v8 }
 0x103   : > { %15186 = vst [vmem:[#allocation62_spill] sm:$0xff] %v8191_v37 }
 0x104   : > { %v1357_v6 = vpop.f32.mrf.mxu3  ;;  %v8216_v3 = vpack.c.b16 %v834_v41, %v833_v21  ;;  %v7530_v21 = vld [vmem:[%s7662_s18 + $0x10] sm:$0xf] }
 0x105   : > { %v8199_v35 = vadd.f32 %v1357_v6, %v951_v9  ;;  %v8201_v24 = vpop.f32.mrf.mxu2  ;;  %v1613_v41 = vrot.slane %v7530_v21, 5 }
 0x106   : > { %15187 = vst [vmem:[#allocation63_spill] sm:$0xff] %v8201_v24  ;;  %v953_v49 = vpop.f32.mrf.mxu0 }
 0x107   : > { %v8203_v7 = vpop.f32.mrf.mxu1  ;;  %15189 = vst [vmem:[#allocation65_spill] sm:$0xff] %v8216_v3 }
 0x10c   : > { %v1359_v16 = vpop.f32.mrf.mxu3 }
 0x10d   : > { %v8209_v25 = vadd.f32 %v1359_v16, %v953_v49  ;;  %v8214_v9 = vpop.f32.mrf.mxu2 }
 0x10e   : > { %15188 = vst [vmem:[#allocation64_spill] sm:$0xff] %v8214_v9  ;;  %v956_v6 = vpop.f32.mrf.mxu0 }
 0x10f   : > { %v8218_v24 = vpop.f32.mrf.mxu1 }
 0x111   : > { %6857 = vmatmul.msk.bf16.gmra.mxu3 %vm856_vm4, %v8212_v52  ;;  %6745 = vmatmul.msk.bf16.gmra.mxu0 %vm856_vm4, %v8216_v3 }
 0x112   : > { %6761 = vmatmul.msk.bf16.gmra.mxu1 %vm856_vm4, %v8216_v3  ;;  %6777 = vmatmul.msk.bf16.gmra.mxu2 %vm856_vm4, %v8216_v3 }
 0x114   : > { %v1362_v28 = vpop.f32.mrf.mxu3 }
 0x115   : > { %v8228_v16 = vadd.f32 %v1362_v28, %v956_v6  ;;  %v8230_v20 = vpop.f32.mrf.mxu2  ;;  %v7531_v6 = vld [vmem:[%s7662_s18] sm:$0xff]  ;;  %v7532_v28 = vld [vmem:[%s7662_s18 + $0xc] sm:$0xf] }
 0x116   : > { %15191 = vst [vmem:[#allocation67_spill] sm:$0xff] %v8230_v20  ;;  %v958_v31 = vpop.f32.mrf.mxu0  ;;  %v6891_v3 = vrot.slane %v7532_v28, 9  ;;  %v1615_v20 = vrot.slane %v1613_v41, 4 }
 0x117   : > { %15190 = vst [vmem:[#allocation66_spill] sm:$0xff] %v8228_v16  ;;  %v8232_v40 = vpop.f32.mrf.mxu1 }
 0x118   : > { %15192 = vst [vmem:[#allocation68_spill] sm:$0xff] %v8232_v40 }
 0x11c   : > { %v1364_v49 = vpop.f32.mrf.mxu3 }
 0x11d   : > { %v8234_v60 = vadd.f32 %v1364_v49, %v958_v31  ;;  %v8236_v8 = vpop.f32.mrf.mxu2  ;;  %v7533_v31 = vld [vmem:[%s7662_s18 + $0x14] sm:$0x1] }
 0x11e   : > { %15194 = vst [vmem:[#allocation70_spill] sm:$0xff] %v8236_v8  ;;  %v961_v27 = vpop.f32.mrf.mxu0  ;;  %v1616_v49 = vrot.slane %v7533_v31, 5 }
 0x11f   : > { %15193 = vst [vmem:[#allocation69_spill] sm:$0xff] %v8234_v60  ;;  %v8239_v9 = vpop.f32.mrf.mxu1 }
 0x120   : > { %15195 = vst [vmem:[#allocation71_spill] sm:$0xff] %v8239_v9  ;;  %v1614_v9 = vsel %vm8175_vm7, %v6891_v3, %v1613_v41 }
 0x121   : > { %6923 = vmatmul.msk.bf16.vlgmr.msrb.gmra.mxu3 %vm856_vm4, %v8191_v37  ;;  %6858 = vmatmul.msk.bf16.vlgmr.msrb.gmra.mxu0 %vm856_vm4, %v7531_v6  ;;  %v1720_v40 = vunpack.c.l.b16 %v1614_v9  ;;  %v7535_v9 = vld [vmem:[%s7662_s18 + $0x18] sm:$0xf] }
 0x122   : > { %6874 = vmatmul.msk.bf16.vlgmr.msrb.gmra.mxu1 %vm856_vm4, %v7531_v6  ;;  %6907 = vmatmul.msk.bf16.vlgmr.msrb.gmra.mxu2 %vm856_vm4, %v8191_v37  ;;  %v1617_v6 = vsel %vm8175_vm7, %v1615_v20, %v1616_v49 }
 0x123   : > { %v1721_v31 = vunpack.c.l.b16 %v1617_v6 }
 0x124   : > { %v1367_v21 = vpop.f32.mrf.mxu3 }
 0x125   : > { %v8250_v8 = vadd.f32 %v1367_v21, %v961_v27  ;;  %v8252_v4 = vpop.f32.mrf.mxu2  ;;  %v8262_v27 = vpack.c.b16 %v1721_v31, %v1720_v40  ;;  %v7536_v40 = vld [vmem:[%s7662_s18 + $0x20] sm:$0x1] }
 0x126   : > { %15197 = vst [vmem:[#allocation73_spill] sm:$0xff] %v8252_v4  ;;  %v963_v28 = vpop.f32.mrf.mxu0  ;;  %v7534_v4 = vld [vmem:[%s7662_s18 + $0x1c] sm:$0xf]  ;;  %v1623_v49 = vrot.slane %v7536_v40, 5 }
 0x127   : > { %15196 = vst [vmem:[#allocation72_spill] sm:$0xff] %v8250_v8  ;;  %v8258_v60 = vpop.f32.mrf.mxu1  ;;  %v1620_v8 = vrot.slane %v7534_v4, 5 }
 0x128   : > { %15199 = vst [vmem:[#allocation75_spill] sm:$0xff] %v8262_v27 }
 0x129   : > { %v1622_v20 = vrot.slane %v1620_v8, 4 }
 0x12c   : > { %v1369_v16 = vpop.f32.mrf.mxu3 }
 0x12d   : > { %v8260_v37 = vadd.f32 %v1369_v16, %v963_v28  ;;  %v8264_v21 = vpop.f32.mrf.mxu2  ;;  %v6892_v16 = vrot.slane %v7535_v9, 9 }
 0x12e   : > { %15200 = vst [vmem:[#allocation76_spill] sm:$0xff] %v8264_v21  ;;  %v966_v3 = vpop.f32.mrf.mxu0 }
 0x12f   : > { %15198 = vst [vmem:[#allocation74_spill] sm:$0xff] %v8260_v37  ;;  %v8267_v41 = vpop.f32.mrf.mxu1  ;;  %v1621_v31 = vsel %vm8175_vm7, %v6892_v16, %v1620_v8  ;;  %v7537_v8 = vld [vmem:[%s7662_s18 + $0x28] sm:$0xf] }
 0x130   : > { %15201 = vst [vmem:[#allocation77_spill] sm:$0xff] %v8267_v41  ;;  %v1770_v41 = vld.sshfl [vmem:[#allocation1 + $0x10] sm:$0xff pattern:$0x73625140]  ;;  %v1722_v37 = vunpack.c.l.b16 %v1621_v31  ;;  %v1627_v16 = vrot.slane %v7537_v8, 5  ;;  %v1630_v31 = vrot.slane %v7730_v33, 5 }
 0x131   : > { %6924 = vmatmul.msk.bf16.gmra.mxu3 %vm856_vm4, %v8262_v27  ;;  %6859 = vmatmul.msk.bf16.gmra.mxu0 %vm856_vm4, %v7706_v5  ;;  %v1823_v40 = vsel %vm905_vm0, %v1770_v41, 0  ;;  %v6955_v41 = vld [vmem:[%s14685_s1 + $0x12] sm:$0x3f] }
 0x132   : > { %6875 = vmatmul.msk.bf16.gmra.mxu1 %vm856_vm4, %v7706_v5  ;;  %6908 = vmatmul.msk.bf16.gmra.mxu2 %vm856_vm4, %v8262_v27  ;;  %v1624_v5 = vsel %vm8175_vm7, %v1622_v20, %v1623_v49  ;;  %2196 = vst [vmem:[#allocation1] ss:$4 sm:$0xff] %v6955_v41 }
 0x133   : > { %v1723_v27 = vunpack.c.l.b16 %v1624_v5  ;;  %2010 = vmatpush.bf16.msra.mxu0 %v1823_v40 }
 0x134   : > { %v1372_v4 = vpop.f32.mrf.mxu3 }
 0x135   : > { %v8279_v6 = vadd.f32 %v1372_v4, %v966_v3  ;;  %v8281_v28 = vpop.f32.mrf.mxu2 }
 0x136   : > { %15203 = vst [vmem:[#allocation79_spill] sm:$0xff] %v8281_v28  ;;  %v968_v21 = vpop.f32.mrf.mxu0  ;;  %v8292_v28 = vpack.c.b16 %v1723_v27, %v1722_v37  ;;  %v7538_v37 = vld [vmem:[%s7662_s18 + $0x24] sm:$0xf] }
 0x137   : > { %15202 = vst [vmem:[#allocation78_spill] sm:$0xff] %v8279_v6  ;;  %v8287_v9 = vpop.f32.mrf.mxu1  ;;  %v6893_v27 = vrot.slane %v7538_v37, 9 }
 0x138   : > { %15204 = vst [vmem:[#allocation80_spill] sm:$0xff] %v8292_v28 }
 0x139   : > { %v1628_v8 = vsel %vm8175_vm7, %v6893_v27, %v1627_v16  ;;  %v2197_v37 = vld.sshfl [vmem:[#allocation1] sm:$0xff pattern:$0x73625140] }
 0x13a   : > { %v2203_v33 = vsel %vm905_vm0, %v2197_v37, 0 }
 0x13b   : > { %2216 = vmatpush.bf16.msra.mxu1 %v2203_v33 }
 0x13c   : > { %v1374_v3 = vpop.f32.mrf.mxu3 }
 0x13d   : > { %v8290_v4 = vadd.f32 %v1374_v3, %v968_v21  ;;  %v8294_v6 = vpop.f32.mrf.mxu2  ;;  %v1629_v21 = vrot.slane %v1627_v16, 4  ;;  %v1634_v16 = vrot.slane %v7748_v44, 5  ;;  %v1637_v44 = vrot.slane %v7758_v58, 5 }
 0x13e   : > { %15205 = vst [vmem:[#allocation81_spill] sm:$0xff] %v8294_v6  ;;  %v971_v20 = vpop.f32.mrf.mxu0 }
 0x13f   : > { %v8297_v49 = vpop.f32.mrf.mxu1  ;;  %v1631_v41 = vsel %vm8175_vm7, %v1629_v21, %v1630_v31  ;;  %v2198_v31 = vld.sshfl [vmem:[#allocation1 + $0x8] sm:$0xff pattern:$0x73625140] }
 0x140   : > { %15206 = vst [vmem:[#allocation82_spill] sm:$0xff] %v8297_v49  ;;  %v1724_v49 = vunpack.c.l.b16 %v1628_v8  ;;  %v1636_v8 = vrot.slane %v1634_v16, 4 }
 0x141   : > { %6925 = vmatmul.msk.bf16.gmra.mxu3 %vm856_vm4, %v8292_v28  ;;  %6860 = vmatmul.msk.bf16.gmra.mxu0 %vm856_vm4, %v7733_v34 }
 0x142   : > { %6876 = vmatmul.msk.bf16.gmra.mxu1 %vm856_vm4, %v7733_v34  ;;  %6909 = vmatmul.msk.bf16.gmra.mxu2 %vm856_vm4, %v8292_v28  ;;  %v1725_v28 = vunpack.c.l.b16 %v1631_v41 }
 0x144   : > { %v1377_v5 = vpop.f32.mrf.mxu3 }
 0x145   : > { %v8312_v40 = vadd.f32 %v1377_v5, %v971_v20  ;;  %v8314_v3 = vpop.f32.mrf.mxu2 }
 0x146   : > { %15208 = vst [vmem:[#allocation84_spill] sm:$0xff] %v8314_v3  ;;  %v973_v34 = vpop.f32.mrf.mxu0  ;;  %v8325_v3 = vpack.c.b16 %v1725_v28, %v1724_v49  ;;  %v7539_v28 = vld [vmem:[%s7662_s18 + $0x30] sm:$0xf] }
 0x147   : > { %15207 = vst [vmem:[#allocation83_spill] sm:$0xff] %v8312_v40  ;;  %v8320_v6 = vpop.f32.mrf.mxu1  ;;  %v6894_v49 = vrot.slane %v7539_v28, 9 }
 0x148   : > { %15209 = vst [vmem:[#allocation85_spill] sm:$0xff] %v8320_v6  ;;  %v2205_v6 = vsel %vm905_vm0, %v2198_v31, 0 }
 0x149   : > { %15210 = vst [vmem:[#allocation86_spill] sm:$0xff] %v8325_v3  ;;  %2305 = vmatpush.bf16.msra.mxu2 %v2205_v6  ;;  %v1635_v6 = vsel %vm8175_vm7, %v6894_v49, %v1634_v16  ;;  %v7540_v49 = vld [vmem:[%s7662_s18 + $0x3c] sm:$0xf] }
 0x14a   : > { %v1726_v31 = vunpack.c.l.b16 %v1635_v6  ;;  %v1644_v6 = vrot.slane %v7785_v22, 5 }
 0x14c   : > { %v1379_v20 = vpop.f32.mrf.mxu3 }
 0x14d   : > { %v8323_v5 = vadd.f32 %v1379_v20, %v973_v34  ;;  %v8327_v40 = vpop.f32.mrf.mxu2 }
 0x14e   : > { %15211 = vst [vmem:[#allocation87_spill] sm:$0xff] %v8327_v40  ;;  %v976_v27 = vpop.f32.mrf.mxu0 }
 0x14f   : > { %v8330_v21 = vpop.f32.mrf.mxu1 }
 0x150   : > { %15212 = vst [vmem:[#allocation88_spill] sm:$0xff] %v8330_v21 }
 0x151   : > { %6926 = vmatmul.msk.bf16.gmra.mxu3 %vm856_vm4, %v8325_v3  ;;  %6861 = vmatmul.msk.bf16.gmra.mxu0 %vm856_vm4, %v7761_v59 }
 0x152   : > { %6877 = vmatmul.msk.bf16.gmra.mxu1 %vm856_vm4, %v7761_v59  ;;  %6910 = vmatmul.msk.bf16.gmra.mxu2 %vm856_vm4, %v8325_v3  ;;  %v1638_v59 = vsel %vm8175_vm7, %v1636_v8, %v1637_v44  ;;  %v6895_v8 = vrot.slane %v7540_v49, 9 }
 0x153   : > { %v1727_v58 = vunpack.c.l.b16 %v1638_v59 }
 0x154   : > { %v1382_v41 = vpop.f32.mrf.mxu3 }
 0x155   : > { %v8343_v34 = vadd.f32 %v1382_v41, %v976_v27  ;;  %v8345_v37 = vpop.f32.mrf.mxu2  ;;  %v8355_v21 = vpack.c.b16 %v1727_v58, %v1726_v31  ;;  %v1641_v41 = vrot.slane %v7774_v1, 5 }
 0x156   : > { %15213 = vst [vmem:[#allocation89_spill] sm:$0xff] %v8345_v37  ;;  %v978_v33 = vpop.f32.mrf.mxu0 }
 0x157   : > { %v8351_v20 = vpop.f32.mrf.mxu1  ;;  %15214 = vst [vmem:[#allocation90_spill] sm:$0xff] %v8355_v21  ;;  %v1643_v44 = vrot.slane %v1641_v41, 4  ;;  %v1642_v31 = vsel %vm8175_vm7, %v6895_v8, %v1641_v41  ;;  %v6896_v41 = vrot.slane %v7802_v32, 9  ;;  %v1651_v8 = vrot.slane %v7816_v50, 5 }
 0x158   : > { %v1728_v49 = vunpack.c.l.b16 %v1642_v31 }
 0x159   : > { %v1645_v58 = vsel %vm8175_vm7, %v1643_v44, %v1644_v6 }
 0x15c   : > { %v1384_v28 = vpop.f32.mrf.mxu3 }
 0x15d   : > { %v8353_v40 = vadd.f32 %v1384_v28, %v978_v33  ;;  %v8357_v27 = vpop.f32.mrf.mxu2 }
 0x15e   : > { %15215 = vst [vmem:[#allocation91_spill] sm:$0xff] %v8357_v27  ;;  %v981_v37 = vpop.f32.mrf.mxu0  ;;  %v1729_v27 = vunpack.c.l.b16 %v1645_v58 }
 0x15f   : > { %v8360_v16 = vpop.f32.mrf.mxu1 }
 0x160   : > { %15216 = vst [vmem:[#allocation92_spill] sm:$0xff] %v8360_v16 }
 0x161   : > { %6927 = vmatmul.msk.bf16.gmra.mxu3 %vm856_vm4, %v8355_v21  ;;  %6862 = vmatmul.msk.bf16.gmra.mxu0 %vm856_vm4, %v7788_v23 }
 0x162   : > { %6878 = vmatmul.msk.bf16.gmra.mxu1 %vm856_vm4, %v7788_v23  ;;  %6911 = vmatmul.msk.bf16.gmra.mxu2 %vm856_vm4, %v8355_v21  ;;  %v8384_v21 = vpack.c.b16 %v1729_v27, %v1728_v49 }
 0x164   : > { %v1387_v1 = vpop.f32.mrf.mxu3  ;;  %15219 = vst [vmem:[#allocation95_spill] sm:$0xff] %v8384_v21 }
 0x165   : > { %v8372_v59 = vadd.f32 %v1387_v1, %v981_v37  ;;  %v8374_v33 = vpop.f32.mrf.mxu2  ;;  %v1648_v1 = vrot.slane %v7805_v36, 5 }
 0x166   : > { %15218 = vst [vmem:[#allocation94_spill] sm:$0xff] %v8374_v33  ;;  %v983_v23 = vpop.f32.mrf.mxu0 }
 0x167   : > { %15217 = vst [vmem:[#allocation93_spill] sm:$0xff] %v8372_v59  ;;  %v8380_v28 = vpop.f32.mrf.mxu1  ;;  %v1650_v27 = vrot.slane %v1648_v1, 4  ;;  %v1649_v31 = vsel %vm8175_vm7, %v6896_v41, %v1648_v1  ;;  %v6897_v1 = vrot.slane %v7833_v62, 9 }
 0x168   : > { %v1730_v32 = vunpack.c.l.b16 %v1649_v31 }
 0x169   : > { %v1652_v58 = vsel %vm8175_vm7, %v1650_v27, %v1651_v8  ;;  %v1658_v27 = vrot.slane %v7847_v18, 5 }
 0x16a   : > { %v1731_v49 = vunpack.c.l.b16 %v1652_v58 }
 0x16c   : > { %v1389_v22 = vpop.f32.mrf.mxu3 }
 0x16d   : > { %v8382_v16 = vadd.f32 %v1389_v22, %v983_v23  ;;  %v8386_v37 = vpop.f32.mrf.mxu2 }
 0x16e   : > { %15220 = vst [vmem:[#allocation96_spill] sm:$0xff] %v8386_v37  ;;  %v986_v33 = vpop.f32.mrf.mxu0  ;;  %v8413_v37 = vpack.c.b16 %v1731_v49, %v1730_v32 }
 0x16f   : > { %v8389_v59 = vpop.f32.mrf.mxu1 }
 0x170   : > { %15223 = vst [vmem:[#allocation99_spill] sm:$0xff] %v8413_v37 }
 0x171   : > { %6928 = vmatmul.msk.bf16.gmra.mxu3 %vm856_vm4, %v8384_v21  ;;  %6863 = vmatmul.msk.bf16.gmra.mxu0 %vm856_vm4, %v7819_v51 }
 0x172   : > { %6879 = vmatmul.msk.bf16.gmra.mxu1 %vm856_vm4, %v7819_v51  ;;  %6912 = vmatmul.msk.bf16.gmra.mxu2 %vm856_vm4, %v8384_v21 }
 0x174   : > { %v1392_v36 = vpop.f32.mrf.mxu3 }
 0x175   : > { %v8401_v44 = vadd.f32 %v1392_v36, %v986_v33  ;;  %v8403_v6 = vpop.f32.mrf.mxu2  ;;  %v1655_v36 = vrot.slane %v7836_v63, 5 }
 0x176   : > { %15222 = vst [vmem:[#allocation98_spill] sm:$0xff] %v8403_v6  ;;  %v988_v51 = vpop.f32.mrf.mxu0 }
 0x177   : > { %15221 = vst [vmem:[#allocation97_spill] sm:$0xff] %v8401_v44  ;;  %v8409_v23 = vpop.f32.mrf.mxu1  ;;  %v1657_v41 = vrot.slane %v1655_v36, 4  ;;  %v1656_v58 = vsel %vm8175_vm7, %v6897_v1, %v1655_v36  ;;  %v6898_v36 = vrot.slane %v7862_v26, 9 }
 0x178   : > { %v1732_v62 = vunpack.c.l.b16 %v1656_v58 }
 0x17c   : > { %v1394_v50 = vpop.f32.mrf.mxu3 }
 0x17d   : > { %v8411_v22 = vadd.f32 %v1394_v50, %v988_v51  ;;  %v8415_v33 = vpop.f32.mrf.mxu2  ;;  %v1659_v51 = vsel %vm8175_vm7, %v1657_v41, %v1658_v27  ;;  %v1665_v41 = vrot.slane %v7878_v54, 5 }
 0x17e   : > { %15224 = vst [vmem:[#allocation100_spill] sm:$0xff] %v8415_v33  ;;  %v991_v6 = vpop.f32.mrf.mxu0  ;;  %v1733_v49 = vunpack.c.l.b16 %v1659_v51 }
 0x17f   : > { %v8418_v44 = vpop.f32.mrf.mxu1 }
 0x180   : > { %v8442_v33 = vpack.c.b16 %v1733_v49, %v1732_v62 }
 0x181   : > { %6929 = vmatmul.msk.bf16.gmra.mxu3 %vm856_vm4, %v8413_v37  ;;  %6864 = vmatmul.msk.bf16.gmra.mxu0 %vm856_vm4, %v7850_v19 }
 0x182   : > { %6880 = vmatmul.msk.bf16.gmra.mxu1 %vm856_vm4, %v7850_v19  ;;  %6913 = vmatmul.msk.bf16.gmra.mxu2 %vm856_vm4, %v8413_v37  ;;  %15227 = vst [vmem:[#allocation103_spill] sm:$0xff] %v8442_v33 }
 0x184   : > { %v1397_v63 = vpop.f32.mrf.mxu3 }
 0x185   : > { %v8430_v8 = vadd.f32 %v1397_v63, %v991_v6  ;;  %v8432_v31 = vpop.f32.mrf.mxu2  ;;  %v1662_v63 = vrot.slane %v7865_v29, 5 }
 0x186   : > { %15226 = vst [vmem:[#allocation102_spill] sm:$0xff] %v8432_v31  ;;  %v993_v19 = vpop.f32.mrf.mxu0 }
 0x187   : > { %15225 = vst [vmem:[#allocation101_spill] sm:$0xff] %v8430_v8  ;;  %v8438_v32 = vpop.f32.mrf.mxu1  ;;  %v1664_v1 = vrot.slane %v1662_v63, 4  ;;  %v1663_v51 = vsel %vm8175_vm7, %v6898_v36, %v1662_v63  ;;  %v6899_v63 = vrot.slane %v7895_v10, 9 }
 0x188   : > { %v1734_v26 = vunpack.c.l.b16 %v1663_v51 }
 0x18c   : > { %v1399_v18 = vpop.f32.mrf.mxu3 }
 0x18d   : > { %v8440_v50 = vadd.f32 %v1399_v18, %v993_v19  ;;  %v8444_v6 = vpop.f32.mrf.mxu2  ;;  %v1666_v19 = vsel %vm8175_vm7, %v1664_v1, %v1665_v41  ;;  %v1672_v1 = vrot.slane %v7909_v38, 5 }
 0x18e   : > { %15228 = vst [vmem:[#allocation104_spill] sm:$0xff] %v8444_v6  ;;  %v996_v31 = vpop.f32.mrf.mxu0  ;;  %v1735_v49 = vunpack.c.l.b16 %v1666_v19 }
 0x18f   : > { %v8447_v8 = vpop.f32.mrf.mxu1 }
 0x190   : > { %v8471_v6 = vpack.c.b16 %v1735_v49, %v1734_v26 }
 0x191   : > { %6930 = vmatmul.msk.bf16.gmra.mxu3 %vm856_vm4, %v8442_v33  ;;  %6865 = vmatmul.msk.bf16.gmra.mxu0 %vm856_vm4, %v7881_v55 }
 0x192   : > { %6881 = vmatmul.msk.bf16.gmra.mxu1 %vm856_vm4, %v7881_v55  ;;  %6914 = vmatmul.msk.bf16.gmra.mxu2 %vm856_vm4, %v8442_v33  ;;  %15231 = vst [vmem:[#allocation107_spill] sm:$0xff] %v8471_v6 }
 0x194   : > { %v1402_v29 = vpop.f32.mrf.mxu3 }
 0x195   : > { %v8459_v27 = vadd.f32 %v1402_v29, %v996_v31  ;;  %v8461_v58 = vpop.f32.mrf.mxu2  ;;  %v1669_v29 = vrot.slane %v7898_v11, 5 }
 0x196   : > { %15230 = vst [vmem:[#allocation106_spill] sm:$0xff] %v8461_v58  ;;  %v998_v55 = vpop.f32.mrf.mxu0 }
 0x197   : > { %15229 = vst [vmem:[#allocation105_spill] sm:$0xff] %v8459_v27  ;;  %v8467_v62 = vpop.f32.mrf.mxu1  ;;  %v1671_v36 = vrot.slane %v1669_v29, 4 }
 0x19c   : > { %v1404_v54 = vpop.f32.mrf.mxu3 }
 0x19d   : > { %v8469_v18 = vadd.f32 %v1404_v54, %v998_v55  ;;  %v8473_v31 = vpop.f32.mrf.mxu2  ;;  %v1670_v55 = vsel %vm8175_vm7, %v6899_v63, %v1669_v29  ;;  %v1676_v29 = vrot.slane %v7931_v57, 5  ;;  %v1679_v57 = vrot.slane %v7948_v42, 5 }
 0x19e   : > { %15232 = vst [vmem:[#allocation108_spill] sm:$0xff] %v8473_v31  ;;  %v1416_v58 = vpop.f32.mrf.mxu0 }
 0x19f   : > { %v8476_v27 = vpop.f32.mrf.mxu1  ;;  %v1417_v41 = vadd.f32 %v1416_v58, %v7917_v46  ;;  %v1736_v46 = vunpack.c.l.b16 %v1670_v55 }
 0x1a1   : > { %6931 = vmatmul.msk.bf16.gmra.mxu3 %vm856_vm4, %v8471_v6  ;;  %6866 = vmatmul.msk.bf16.gmra.mxu0 %vm856_vm4, %v7912_v39 }
 0x1a2   : > { %6882 = vmatmul.msk.bf16.gmra.mxu1 %vm856_vm4, %v7912_v39  ;;  %6915 = vmatmul.msk.bf16.gmra.mxu2 %vm856_vm4, %v8471_v6  ;;  %v1673_v39 = vsel %vm8175_vm7, %v1671_v36, %v1672_v1  ;;  %v1678_v1 = vrot.slane %v1676_v29, 4 }
 0x1a3   : > { %v1737_v58 = vunpack.c.l.b16 %v1673_v39 }
 0x1a4   : > { %v1923_v11 = vpop.f32.mrf.mxu3 }
 0x1a5   : > { %v8489_v51 = vadd.f32 %v1923_v11, %v1417_v41  ;;  %v1834_v19 = vpop.f32.mrf.mxu2  ;;  %v8503_v11 = vpack.c.b16 %v1737_v58, %v1736_v46 }
 0x1a6   : > { %v8496_v10 = vadd.f32 %v1834_v19, %v7933_v61  ;;  %v1418_v26 = vpop.f32.mrf.mxu0 }
 0x1a7   : > { %v8498_v38 = vpop.f32.mrf.mxu1  ;;  %v1419_v49 = vadd.f32 %v1418_v26, %v7941_v13  ;;  %15233 = vst [vmem:[#allocation109_spill] sm:$0xff] %v8503_v11  ;;  %v6900_v13 = vrot.slane %v7928_v56, 9 }
 0x1a9   : > { %v1677_v39 = vsel %vm8175_vm7, %v6900_v13, %v1676_v29  ;;  %v1683_v29 = vrot.slane %v7972_v12, 5 }
 0x1ac   : > { %v1925_v54 = vpop.f32.mrf.mxu3 }
 0x1ad   : > { %v8501_v41 = vadd.f32 %v1925_v54, %v1419_v49  ;;  %v1836_v31 = vpop.f32.mrf.mxu2 }
 0x1ae   : > { %v8507_v63 = vadd.f32 %v1836_v31, %v7950_v43  ;;  %v1421_v61 = vpop.f32.mrf.mxu0 }
 0x1af   : > { %v8509_v36 = vpop.f32.mrf.mxu1  ;;  %v1422_v43 = vadd.f32 %v1421_v61, %v7959_v53  ;;  %v1738_v53 = vunpack.c.l.b16 %v1677_v39  ;;  %v15240_v39 = vld [vmem:[#allocation16_spill] sm:$0xff] }
 0x1b0   : > { %v1686_v12 = vrot.slane %v15240_v39, 5 }
 0x1b1   : > { %6932 = vmatmul.msk.bf16.gmra.mxu3 %vm856_vm4, %v8503_v11  ;;  %6867 = vmatmul.msk.bf16.gmra.mxu0 %vm856_vm4, %v7953_v45 }
 0x1b2   : > { %6883 = vmatmul.msk.bf16.gmra.mxu1 %vm856_vm4, %v7953_v45  ;;  %6916 = vmatmul.msk.bf16.gmra.mxu2 %vm856_vm4, %v8503_v11  ;;  %v1680_v45 = vsel %vm8175_vm7, %v1678_v1, %v1679_v57  ;;  %v15238_v57 = vld [vmem:[#allocation17_spill] sm:$0xff] }
 0x1b3   : > { %v1739_v46 = vunpack.c.l.b16 %v1680_v45  ;;  %v15241_v45 = vld [vmem:[#allocation20_spill] sm:$0xff] }
 0x1b4   : > { %v1928_v31 = vpop.f32.mrf.mxu3 }
 0x1b5   : > { %v8522_v19 = vadd.f32 %v1928_v31, %v1422_v43  ;;  %v1839_v55 = vpop.f32.mrf.mxu2  ;;  %v8536_v61 = vpack.c.b16 %v1739_v46, %v1738_v53 }
 0x1b6   : > { %v8529_v56 = vadd.f32 %v1839_v55, %v7977_v30  ;;  %v1423_v26 = vpop.f32.mrf.mxu0  ;;  %v1685_v55 = vrot.slane %v1683_v29, 4 }
 0x1b7   : > { %v8531_v42 = vpop.f32.mrf.mxu1  ;;  %v1424_v58 = vadd.f32 %v1423_v26, %v7984_v48  ;;  %15235 = vst [vmem:[#allocation111_spill] sm:$0xff] %v8536_v61  ;;  %v15239_v48 = vld [vmem:[#allocation14_spill] sm:$0xff] }
 0x1b8   : > { %v6901_v31 = vrot.slane %v15239_v48, 9 }
 0x1bc   : > { %v1930_v49 = vpop.f32.mrf.mxu3 }
 0x1bd   : > { %v8534_v54 = vadd.f32 %v1930_v49, %v1424_v58  ;;  %v1841_v43 = vpop.f32.mrf.mxu2  ;;  %v1684_v58 = vsel %vm8175_vm7, %v6901_v31, %v1683_v29  ;;  %v1687_v49 = vsel %vm8175_vm7, %v1685_v55, %v1686_v12  ;;  %v15249_v29 = vld [vmem:[#allocation22_spill] sm:$0xff] }
 0x1be   : > { %v8540_v13 = vadd.f32 %v1841_v43, %v7993_v47  ;;  %v1426_v30 = vpop.f32.mrf.mxu0  ;;  %v15243_v43 = vld [vmem:[#allocation23_spill] sm:$0xff]  ;;  %v1690_v31 = vrot.slane %v15249_v29, 5 }
 0x1bf   : > { %15234 = vst [vmem:[#allocation110_spill] sm:$0xff] %v8534_v54  ;;  %v8542_v1 = vpop.f32.mrf.mxu1  ;;  %v1427_v47 = vadd.f32 %v1426_v30, %v15241_v45  ;;  %v1740_v30 = vunpack.c.l.b16 %v1684_v58  ;;  %v1741_v45 = vunpack.c.l.b16 %v1687_v49  ;;  %v15246_v54 = vld [vmem:[#allocation25_spill] sm:$0xff]  ;;  %v15253_v58 = vld [vmem:[#allocation28_spill] sm:$0xff]  ;;  %v15255_v49 = vld [vmem:[#allocation26_spill] sm:$0xff] }
 0x1c0   : > { %15236 = vst [vmem:[#allocation112_spill] sm:$0xff] %v8540_v13  ;;  %v15250_v13 = vld [vmem:[#allocation27_spill] sm:$0xff] }
 0x1c1   : > { %15237 = vst [vmem:[#allocation113_spill] sm:$0xff] %v8542_v1  ;;  %6933 = vmatmul.msk.bf16.gmra.mxu3 %vm856_vm4, %v8536_v61  ;;  %6868 = vmatmul.msk.bf16.gmra.mxu0 %vm856_vm4, %v15238_v57 }
 0x1c2   : > { %6884 = vmatmul.msk.bf16.gmra.mxu1 %vm856_vm4, %v15238_v57  ;;  %6917 = vmatmul.msk.bf16.gmra.mxu2 %vm856_vm4, %v8536_v61 }
 0x1c4   : > { %v1933_v26 = vpop.f32.mrf.mxu3 }
 0x1c5   : > { %v8555_v53 = vadd.f32 %v1933_v26, %v1427_v47  ;;  %v1844_v46 = vpop.f32.mrf.mxu2  ;;  %v8569_v26 = vpack.c.b16 %v1741_v45, %v1740_v30 }
 0x1c6   : > { %v8562_v57 = vadd.f32 %v1844_v46, %v15243_v43  ;;  %v1428_v48 = vpop.f32.mrf.mxu0  ;;  %v1693_v43 = vrot.slane %v15255_v49, 5 }
 0x1c7   : > { %15242 = vst [vmem:[#allocation17_spill] sm:$0xff] %v8555_v53  ;;  %v8564_v39 = vpop.f32.mrf.mxu1  ;;  %v1429_v61 = vadd.f32 %v1428_v48, %v15246_v54  ;;  %v15254_v54 = vld [vmem:[#allocation21_spill] sm:$0xff]  ;;  %v15256_v48 = vld [vmem:[#allocation31_spill] sm:$0xff] }
 0x1c8   : > { %15244 = vst [vmem:[#allocation14_spill] sm:$0xff] %v8562_v57  ;;  %v15264_v57 = vld [vmem:[#allocation38_spill] sm:$0xff] }
 0x1c9   : > { %15245 = vst [vmem:[#allocation16_spill] sm:$0xff] %v8564_v39 }
 0x1ca   : > { %15248 = vst [vmem:[#allocation23_spill] sm:$0xff] %v8569_v26 }
 0x1cc   : > { %v1935_v1 = vpop.f32.mrf.mxu3 }
 0x1cd   : > { %v8567_v47 = vadd.f32 %v1935_v1, %v1429_v61  ;;  %v1846_v53 = vpop.f32.mrf.mxu2  ;;  %v6902_v61 = vrot.slane %v15254_v54, 9  ;;  %v1692_v1 = vrot.slane %v1690_v31, 4 }
 0x1ce   : > { %v8573_v55 = vadd.f32 %v1846_v53, %v15250_v13  ;;  %v1431_v12 = vpop.f32.mrf.mxu0 }
 0x1cf   : > { %15247 = vst [vmem:[#allocation20_spill] sm:$0xff] %v8567_v47  ;;  %v8575_v46 = vpop.f32.mrf.mxu1  ;;  %v1432_v13 = vadd.f32 %v1431_v12, %v15256_v48  ;;  %v1691_v29 = vsel %vm8175_vm7, %v6902_v61, %v1690_v31  ;;  %v15258_v47 = vld [vmem:[#allocation34_spill] sm:$0xff]  ;;  %v15263_v31 = vld [vmem:[#allocation33_spill] sm:$0xff] }
 0x1d0   : > { %15251 = vst [vmem:[#allocation25_spill] sm:$0xff] %v8573_v55  ;;  %v1742_v12 = vunpack.c.l.b16 %v1691_v29  ;;  %v15260_v55 = vld [vmem:[#allocation36_spill] sm:$0xff]  ;;  %v1697_v61 = vrot.slane %v15263_v31, 5 }
 0x1d1   : > { %15252 = vst [vmem:[#allocation22_spill] sm:$0xff] %v8575_v46  ;;  %6934 = vmatmul.msk.bf16.gmra.mxu3 %vm856_vm4, %v8569_v26  ;;  %6869 = vmatmul.msk.bf16.gmra.mxu0 %vm856_vm4, %v15253_v58 }
 0x1d2   : > { %6885 = vmatmul.msk.bf16.gmra.mxu1 %vm856_vm4, %v15253_v58  ;;  %6918 = vmatmul.msk.bf16.gmra.mxu2 %vm856_vm4, %v8569_v26  ;;  %v1694_v58 = vsel %vm8175_vm7, %v1692_v1, %v1693_v43 }
 0x1d3   : > { %v1743_v48 = vunpack.c.l.b16 %v1694_v58  ;;  %v15270_v58 = vld [vmem:[#allocation42_spill] sm:$0xff] }
 0x1d4   : > { %v1938_v53 = vpop.f32.mrf.mxu3 }
 0x1d5   : > { %v8588_v30 = vadd.f32 %v1938_v53, %v1432_v13  ;;  %v1849_v45 = vpop.f32.mrf.mxu2  ;;  %v8602_v53 = vpack.c.b16 %v1743_v48, %v1742_v12 }
 0x1d6   : > { %v8595_v54 = vadd.f32 %v1849_v45, %v15258_v47  ;;  %v1433_v46 = vpop.f32.mrf.mxu0  ;;  %v15267_v45 = vld [vmem:[#allocation39_spill] sm:$0xff] }
 0x1d7   : > { %15257 = vst [vmem:[#allocation27_spill] sm:$0xff] %v8588_v30  ;;  %v8597_v49 = vpop.f32.mrf.mxu1  ;;  %v1434_v26 = vadd.f32 %v1433_v46, %v15260_v55  ;;  %v1699_v55 = vrot.slane %v1697_v61, 4  ;;  %v15269_v46 = vld [vmem:[#allocation37_spill] sm:$0xff] }
 0x1d8   : > { %15259 = vst [vmem:[#allocation28_spill] sm:$0xff] %v8597_v49  ;;  %v1700_v29 = vrot.slane %v15269_v46, 5 }
 0x1d9   : > { %15262 = vst [vmem:[#allocation26_spill] sm:$0xff] %v8602_v53 }
 0x1dc   : > { %v1940_v39 = vpop.f32.mrf.mxu3 }
 0x1dd   : > { %v8600_v13 = vadd.f32 %v1940_v39, %v1434_v26  ;;  %v1851_v30 = vpop.f32.mrf.mxu2  ;;  %v15268_v39 = vld [vmem:[#allocation32_spill] sm:$0xff] }
 0x1de   : > { %v8606_v1 = vadd.f32 %v1851_v30, %v15264_v57  ;;  %v1436_v47 = vpop.f32.mrf.mxu0  ;;  %v6903_v26 = vrot.slane %v15268_v39, 9 }
 0x1df   : > { %15261 = vst [vmem:[#allocation21_spill] sm:$0xff] %v8600_v13  ;;  %v8608_v43 = vpop.f32.mrf.mxu1  ;;  %v1437_v57 = vadd.f32 %v1436_v47, %v15270_v58  ;;  %v15272_v13 = vld [vmem:[#allocation45_spill] sm:$0xff] }
 0x1e0   : > { %15265 = vst [vmem:[#allocation31_spill] sm:$0xff] %v8606_v1  ;;  %v1698_v31 = vsel %vm8175_vm7, %v6903_v26, %v1697_v61  ;;  %v15275_v1 = vld [vmem:[#allocation47_spill] sm:$0xff]  ;;  %v15278_v61 = vld [vmem:[#allocation44_spill] sm:$0xff] }
 0x1e1   : > { %15266 = vst [vmem:[#allocation34_spill] sm:$0xff] %v8608_v43  ;;  %6935 = vmatmul.msk.bf16.gmra.mxu3 %vm856_vm4, %v8602_v53  ;;  %6870 = vmatmul.msk.bf16.gmra.mxu0 %vm856_vm4, %v15267_v45  ;;  %v1744_v47 = vunpack.c.l.b16 %v1698_v31  ;;  %v1704_v26 = vrot.slane %v15278_v61, 5 }
 0x1e2   : > { %6886 = vmatmul.msk.bf16.gmra.mxu1 %vm856_vm4, %v15267_v45  ;;  %6919 = vmatmul.msk.bf16.gmra.mxu2 %vm856_vm4, %v8602_v53  ;;  %v1701_v45 = vsel %vm8175_vm7, %v1699_v55, %v1700_v29 }
 0x1e3   : > { %v1745_v58 = vunpack.c.l.b16 %v1701_v45  ;;  %v15284_v45 = vld [vmem:[#allocation52_spill] sm:$0xff] }
 0x1e4   : > { %v1943_v30 = vpop.f32.mrf.mxu3 }
 0x1e5   : > { %v8621_v12 = vadd.f32 %v1943_v30, %v1437_v57  ;;  %v1854_v48 = vpop.f32.mrf.mxu2  ;;  %v8635_v30 = vpack.c.b16 %v1745_v58, %v1744_v47 }
 0x1e6   : > { %v8628_v39 = vadd.f32 %v1854_v48, %v15272_v13  ;;  %v1438_v43 = vpop.f32.mrf.mxu0  ;;  %v15281_v48 = vld [vmem:[#allocation49_spill] sm:$0xff] }
 0x1e7   : > { %15271 = vst [vmem:[#allocation36_spill] sm:$0xff] %v8621_v12  ;;  %v8630_v46 = vpop.f32.mrf.mxu1  ;;  %v1439_v53 = vadd.f32 %v1438_v43, %v15275_v1  ;;  %v1706_v1 = vrot.slane %v1704_v26, 4  ;;  %v15283_v43 = vld [vmem:[#allocation48_spill] sm:$0xff] }
 0x1e8   : > { %15273 = vst [vmem:[#allocation33_spill] sm:$0xff] %v8628_v39  ;;  %v1707_v31 = vrot.slane %v15283_v43, 5  ;;  %v2199_v39 = vld.sshfl [vmem:[#allocation1 + $0x10] sm:$0xff pattern:$0x73625140] }
 0x1e9   : > { %15274 = vst [vmem:[#allocation38_spill] sm:$0xff] %v8630_v46 }
 0x1ea   : > { %15277 = vst [vmem:[#allocation32_spill] sm:$0xff] %v8635_v30 }
 0x1ec   : > { %v1945_v49 = vpop.f32.mrf.mxu3 }
 0x1ed   : > { %v8633_v57 = vadd.f32 %v1945_v49, %v1439_v53  ;;  %v1856_v12 = vpop.f32.mrf.mxu2  ;;  %v15282_v49 = vld [vmem:[#allocation43_spill] sm:$0xff] }
 0x1ee   : > { %v8639_v55 = vadd.f32 %v1856_v12, %v8122_v0  ;;  %v1441_v13 = vpop.f32.mrf.mxu0  ;;  %v6904_v53 = vrot.slane %v15282_v49, 9 }
 0x1ef   : > { %15276 = vst [vmem:[#allocation39_spill] sm:$0xff] %v8633_v57  ;;  %v8641_v29 = vpop.f32.mrf.mxu1  ;;  %v1442_v0 = vadd.f32 %v1441_v13, %v15284_v45  ;;  %v15286_v57 = vld [vmem:[#allocation55_spill] sm:$0xff] }
 0x1f0   : > { %15279 = vst [vmem:[#allocation37_spill] sm:$0xff] %v8639_v55  ;;  %v1705_v61 = vsel %vm8175_vm7, %v6904_v53, %v1704_v26  ;;  %v15287_v55 = vld [vmem:[#allocation57_spill] sm:$0xff]  ;;  %v15289_v26 = vld [vmem:[#allocation54_spill] sm:$0xff] }
 0x1f1   : > { %15280 = vst [vmem:[#allocation42_spill] sm:$0xff] %v8641_v29  ;;  %6936 = vmatmul.msk.bf16.gmra.mxu3 %vm856_vm4, %v8635_v30  ;;  %6871 = vmatmul.msk.bf16.gmra.mxu0 %vm856_vm4, %v15281_v48  ;;  %v1746_v13 = vunpack.c.l.b16 %v1705_v61  ;;  %v1711_v53 = vrot.slane %v15289_v26, 5  ;;  %v2207_v61 = vsel %vm905_vm0, %v2199_v39, 0 }
 0x1f2   : > { %6887 = vmatmul.msk.bf16.gmra.mxu1 %vm856_vm4, %v15281_v48  ;;  %6920 = vmatmul.msk.bf16.gmra.mxu2 %vm856_vm4, %v8635_v30  ;;  %v1708_v48 = vsel %vm8175_vm7, %v1706_v1, %v1707_v31  ;;  %v15290_v1 = vld [vmem:[#allocation58_spill] sm:$0xff] }
 0x1f3   : > { %v1747_v45 = vunpack.c.l.b16 %v1708_v48  ;;  %2394 = vmatpush.bf16.msra.mxu3 %v2207_v61 }
 0x1f4   : > { %v1948_v12 = vpop.f32.mrf.mxu3 }
 0x1f5   : > { %v8654_v47 = vadd.f32 %v1948_v12, %v1442_v0  ;;  %v1859_v58 = vpop.f32.mrf.mxu2  ;;  %v8668_v12 = vpack.c.b16 %v1747_v45, %v1746_v13 }
 0x1f6   : > { %v8661_v49 = vadd.f32 %v1859_v58, %v15286_v57  ;;  %v1443_v29 = vpop.f32.mrf.mxu0 }
 0x1f7   : > { %15285 = vst [vmem:[#allocation45_spill] sm:$0xff] %v8654_v47  ;;  %v8663_v43 = vpop.f32.mrf.mxu1  ;;  %v1444_v30 = vadd.f32 %v1443_v29, %v15287_v55  ;;  %v1713_v55 = vrot.slane %v1711_v53, 4  ;;  %v1714_v29 = vrot.slane %v8166_v15, 5 }
 0x1f8   : > { %15288 = vst [vmem:[#allocation47_spill] sm:$0xff] %v8668_v12 }
 0x1fc   : > { %v1950_v46 = vpop.f32.mrf.mxu3 }
 0x1fd   : > { %v8666_v0 = vadd.f32 %v1950_v46, %v1444_v30  ;;  %v1861_v47 = vpop.f32.mrf.mxu2  ;;  %v15291_v46 = vld [vmem:[#allocation53_spill] sm:$0xff] }
 0x1fe   : > { %v8672_v31 = vadd.f32 %v1861_v47, %v15290_v1  ;;  %v1446_v57 = vpop.f32.mrf.mxu0  ;;  %v6905_v30 = vrot.slane %v15291_v46, 9 }
 0x1ff   : > { %v8674_v58 = vpop.f32.mrf.mxu1  ;;  %v1447_v47 = vadd.f32 %v1446_v57, %v8185_v14 }
 0x200   : > { %v1712_v45 = vsel %vm8175_vm7, %v6905_v30, %v1711_v53 }
 0x201   : > { %6937 = vmatmul.msk.bf16.gmra.mxu3 %vm856_vm4, %v8668_v12  ;;  %6872 = vmatmul.msk.bf16.gmra.mxu0 %vm856_vm4, %v8173_v17  ;;  %v1748_v14 = vunpack.c.l.b16 %v1712_v45 }
 0x202   : > { %6888 = vmatmul.msk.bf16.gmra.mxu1 %vm856_vm4, %v8173_v17  ;;  %6921 = vmatmul.msk.bf16.gmra.mxu2 %vm856_vm4, %v8668_v12  ;;  %v1715_v17 = vsel %vm8175_vm7, %v1713_v55, %v1714_v29 }
 0x203   : > { %v1749_v57 = vunpack.c.l.b16 %v1715_v17 }
 0x204   : > { %v1953_v39 = vpop.f32.mrf.mxu3 }
 0x205   : > { %v8688_v48 = vadd.f32 %v1953_v39, %v1447_v47  ;;  %v1864_v13 = vpop.f32.mrf.mxu2  ;;  %v8702_v39 = vpack.c.b16 %v1749_v57, %v1748_v14 }
 0x206   : > { %v8695_v26 = vadd.f32 %v1864_v13, %v8199_v35  ;;  %v1448_v1 = vpop.f32.mrf.mxu0 }
 0x207   : > { %15292 = vst [vmem:[#allocation44_spill] sm:$0xff] %v8688_v48  ;;  %v8697_v15 = vpop.f32.mrf.mxu1  ;;  %v1449_v61 = vadd.f32 %v1448_v1, %v8203_v7  ;;  %v15297_v1 = vld [vmem:[#allocation68_spill] sm:$0xff] }
 0x208   : > { %15293 = vst [vmem:[#allocation49_spill] sm:$0xff] %v8702_v39 }
 0x20c   : > { %v1955_v46 = vpop.f32.mrf.mxu3 }
 0x20d   : > { %v8700_v47 = vadd.f32 %v1955_v46, %v1449_v61  ;;  %v1866_v48 = vpop.f32.mrf.mxu2 }
 0x20e   : > { %v8705_v53 = vadd.f32 %v1866_v48, %v8209_v25  ;;  %v1451_v30 = vpop.f32.mrf.mxu0  ;;  %v15295_v48 = vld [vmem:[#allocation66_spill] sm:$0xff] }
 0x20f   : > { %v8707_v55 = vpop.f32.mrf.mxu1  ;;  %v1452_v35 = vadd.f32 %v1451_v30, %v8218_v24  ;;  %v15299_v24 = vld [vmem:[#allocation69_spill] sm:$0xff] }
 0x211   : > { %6938 = vmatmul.msk.bf16.gmra.mxu3 %vm856_vm4, %v8702_v39  ;;  %6873 = vmatmul.msk.bf16.gmra.mxu0 %vm856_vm4, %v8212_v52 }
 0x212   : > { %6889 = vmatmul.msk.bf16.gmra.mxu1 %vm856_vm4, %v8212_v52  ;;  %6922 = vmatmul.msk.bf16.gmra.mxu2 %vm856_vm4, %v8702_v39 }
 0x214   : > { %v1958_v7 = vpop.f32.mrf.mxu3 }
 0x215   : > { %v8718_v25 = vadd.f32 %v1958_v7, %v1452_v35  ;;  %v1869_v29 = vpop.f32.mrf.mxu2  ;;  %v7541_v35 = vld [vmem:[%s7662_s18 + $0xc] sm:$0xff] }
 0x216   : > { %v8721_v13 = vadd.f32 %v1869_v29, %v15295_v48  ;;  %v1453_v45 = vpop.f32.mrf.mxu0  ;;  %v15302_v7 = vld [vmem:[#allocation62_spill] sm:$0xff]  ;;  %v15303_v29 = vld [vmem:[#allocation71_spill] sm:$0xff] }
 0x217   : > { %15294 = vst [vmem:[#allocation43_spill] sm:$0xff] %v8718_v25  ;;  %v8723_v17 = vpop.f32.mrf.mxu1  ;;  %v1454_v14 = vadd.f32 %v1453_v45, %v15297_v1 }
 0x218   : > { %15296 = vst [vmem:[#allocation48_spill] sm:$0xff] %v8723_v17  ;;  %v15308_v17 = vld [vmem:[#allocation74_spill] sm:$0xff] }
 0x21c   : > { %v1960_v57 = vpop.f32.mrf.mxu3 }
 0x21d   : > { %v8726_v52 = vadd.f32 %v1960_v57, %v1454_v14  ;;  %v1871_v61 = vpop.f32.mrf.mxu2  ;;  %v15305_v57 = vld [vmem:[#allocation72_spill] sm:$0xff] }
 0x21e   : > { %v8729_v46 = vadd.f32 %v1871_v61, %v15299_v24  ;;  %v1456_v30 = vpop.f32.mrf.mxu0 }
 0x21f   : > { %15298 = vst [vmem:[#allocation52_spill] sm:$0xff] %v8726_v52  ;;  %v8731_v2 = vpop.f32.mrf.mxu1  ;;  %v1457_v48 = vadd.f32 %v1456_v30, %v15303_v29 }
 0x220   : > { %15300 = vst [vmem:[#allocation55_spill] sm:$0xff] %v8729_v46 }
 0x221   : > { %15301 = vst [vmem:[#allocation57_spill] sm:$0xff] %v8731_v2  ;;  %6992 = vmatmul.msk.bf16.vlgmr.msra.gmra.mxu3 %vm856_vm4, %v7541_v35  ;;  %6939 = vmatmul.msk.bf16.vlgmr.msra.gmra.mxu0 %vm856_vm4, %v15302_v7 }
 0x222   : > { %6960 = vmatmul.msk.bf16.vlgmr.msra.gmra.mxu1 %vm856_vm4, %v7541_v35  ;;  %6976 = vmatmul.msk.bf16.vlgmr.msra.gmra.mxu2 %vm856_vm4, %v7541_v35 }
 0x224   : > { %v1963_v45 = vpop.f32.mrf.mxu3 }
 0x225   : > { %v8740_v1 = vadd.f32 %v1963_v45, %v1457_v48  ;;  %v1874_v14 = vpop.f32.mrf.mxu2  ;;  %v7542_v48 = vld [vmem:[%s7662_s18 + $0x18] sm:$0xff]  ;;  %v15311_v45 = vld [vmem:[#allocation75_spill] sm:$0xff] }
 0x226   : > { %v8743_v61 = vadd.f32 %v1874_v14, %v15305_v57  ;;  %v1458_v24 = vpop.f32.mrf.mxu0  ;;  %v15312_v14 = vld [vmem:[#allocation77_spill] sm:$0xff] }
 0x227   : > { %15304 = vst [vmem:[#allocation54_spill] sm:$0xff] %v8740_v1  ;;  %v8745_v52 = vpop.f32.mrf.mxu1  ;;  %v1459_v2 = vadd.f32 %v1458_v24, %v8258_v60 }
 0x228   : > { %15306 = vst [vmem:[#allocation58_spill] sm:$0xff] %v8745_v52 }
 0x22c   : > { %v1965_v7 = vpop.f32.mrf.mxu3 }
 0x22d   : > { %v8748_v46 = vadd.f32 %v1965_v7, %v1459_v2  ;;  %v1876_v25 = vpop.f32.mrf.mxu2 }
 0x22e   : > { %v8751_v30 = vadd.f32 %v1876_v25, %v15308_v17  ;;  %v1461_v35 = vpop.f32.mrf.mxu0  ;;  %v15314_v17 = vld [vmem:[#allocation78_spill] sm:$0xff] }
 0x22f   : > { %15307 = vst [vmem:[#allocation53_spill] sm:$0xff] %v8748_v46  ;;  %v8753_v29 = vpop.f32.mrf.mxu1  ;;  %v1462_v60 = vadd.f32 %v1461_v35, %v15312_v14 }
 0x230   : > { %15309 = vst [vmem:[#allocation66_spill] sm:$0xff] %v8751_v30 }
 0x231   : > { %15310 = vst [vmem:[#allocation68_spill] sm:$0xff] %v8753_v29  ;;  %6993 = vmatmul.msk.bf16.gmra.mxu3 %vm856_vm4, %v7542_v48  ;;  %6940 = vmatmul.msk.bf16.gmra.mxu0 %vm856_vm4, %v15311_v45  ;;  %v7008_v29 = vld [vmem:[%s14685_s1 + $0x18] sm:$0x3f] }
 0x232   : > { %6961 = vmatmul.msk.bf16.gmra.mxu1 %vm856_vm4, %v7542_v48  ;;  %6977 = vmatmul.msk.bf16.gmra.mxu2 %vm856_vm4, %v7542_v48  ;;  %2602 = vst [vmem:[#allocation1] ss:$4 sm:$0xff] %v7008_v29 }
 0x234   : > { %v1968_v2 = vpop.f32.mrf.mxu3 }
 0x235   : > { %v8762_v57 = vadd.f32 %v1968_v2, %v1462_v60  ;;  %v1879_v25 = vpop.f32.mrf.mxu2 }
 0x236   : > { %v8765_v24 = vadd.f32 %v1879_v25, %v15314_v17  ;;  %v1463_v7 = vpop.f32.mrf.mxu0 }
 0x237   : > { %15313 = vst [vmem:[#allocation69_spill] sm:$0xff] %v8762_v57  ;;  %v8767_v46 = vpop.f32.mrf.mxu1  ;;  %v1464_v35 = vadd.f32 %v1463_v7, %v8287_v9  ;;  %v15320_v9 = vld [vmem:[#allocation80_spill] sm:$0xff]  ;;  %v15321_v7 = vld [vmem:[#allocation82_spill] sm:$0xff] }
 0x238   : > { %15315 = vst [vmem:[#allocation62_spill] sm:$0xff] %v8765_v24 }
 0x239   : > { %15316 = vst [vmem:[#allocation71_spill] sm:$0xff] %v8767_v46  ;;  %v2603_v17 = vld.sshfl [vmem:[#allocation1] sm:$0xff pattern:$0x73625140] }
 0x23a   : > { %v2604_v24 = vld.sshfl [vmem:[#allocation1 + $0x8] sm:$0xff pattern:$0x73625140]  ;;  %v2609_v30 = vsel %vm905_vm0, %v2603_v17, 0 }
 0x23b   : > { %v7543_v46 = vld [vmem:[%s7662_s18 + $0x24] sm:$0xff]  ;;  %v2611_v29 = vsel %vm905_vm0, %v2604_v24, 0  ;;  %2622 = vmatpush.bf16.msrb.mxu0 %v2609_v30 }
 0x23c   : > { %v1970_v14 = vpop.f32.mrf.mxu3  ;;  %2711 = vmatpush.bf16.msrb.mxu1 %v2611_v29 }
 0x23d   : > { %v8773_v48 = vadd.f32 %v1970_v14, %v1464_v35  ;;  %v1881_v60 = vpop.f32.mrf.mxu2 }
 0x23e   : > { %v8776_v2 = vadd.f32 %v1881_v60, %v8290_v4  ;;  %v1466_v57 = vpop.f32.mrf.mxu0 }
 0x23f   : > { %15317 = vst [vmem:[#allocation72_spill] sm:$0xff] %v8773_v48  ;;  %v8778_v25 = vpop.f32.mrf.mxu1  ;;  %v1467_v4 = vadd.f32 %v1466_v57, %v15321_v7  ;;  %v15322_v48 = vld [vmem:[#allocation83_spill] sm:$0xff] }
 0x240   : > { %15318 = vst [vmem:[#allocation74_spill] sm:$0xff] %v8776_v2  ;;  %v15323_v2 = vld [vmem:[#allocation85_spill] sm:$0xff]  ;;  %v2605_v7 = vld.sshfl [vmem:[#allocation1 + $0x10] sm:$0xff pattern:$0x73625140] }
 0x241   : > { %15319 = vst [vmem:[#allocation77_spill] sm:$0xff] %v8778_v25  ;;  %6994 = vmatmul.msk.bf16.gmra.mxu3 %vm856_vm4, %v7543_v46  ;;  %6941 = vmatmul.msk.bf16.gmra.mxu0 %vm856_vm4, %v15320_v9 }
 0x242   : > { %6962 = vmatmul.msk.bf16.gmra.mxu1 %vm856_vm4, %v7543_v46  ;;  %6978 = vmatmul.msk.bf16.gmra.mxu2 %vm856_vm4, %v7543_v46 }
 0x244   : > { %v1973_v35 = vpop.f32.mrf.mxu3 }
 0x245   : > { %v8789_v14 = vadd.f32 %v1973_v35, %v1467_v4  ;;  %v1884_v60 = vpop.f32.mrf.mxu2  ;;  %v7544_v4 = vld [vmem:[%s7662_s18 + $0x30] sm:$0xff] }
 0x246   : > { %v8792_v17 = vadd.f32 %v1884_v60, %v15322_v48  ;;  %v1468_v24 = vpop.f32.mrf.mxu0  ;;  %v2613_v48 = vsel %vm905_vm0, %v2605_v7, 0 }
 0x247   : > { %v8794_v25 = vpop.f32.mrf.mxu1  ;;  %v1469_v9 = vadd.f32 %v1468_v24, %v15323_v2  ;;  %2800 = vmatpush.bf16.msrb.mxu2 %v2613_v48 }
 0x24c   : > { %v1975_v1 = vpop.f32.mrf.mxu3 }
 0x24d   : > { %v8797_v52 = vadd.f32 %v1975_v1, %v1469_v9  ;;  %v1886_v57 = vpop.f32.mrf.mxu2  ;;  %v15326_v1 = vld [vmem:[#allocation88_spill] sm:$0xff] }
 0x24e   : > { %v8800_v46 = vadd.f32 %v1886_v57, %v8323_v5  ;;  %v1471_v30 = vpop.f32.mrf.mxu0 }
 0x24f   : > { %15324 = vst [vmem:[#allocation78_spill] sm:$0xff] %v8797_v52  ;;  %v8802_v29 = vpop.f32.mrf.mxu1  ;;  %v1472_v2 = vadd.f32 %v1471_v30, %v15326_v1 }
 0x250   : > { %15325 = vst [vmem:[#allocation82_spill] sm:$0xff] %v8802_v29 }
 0x251   : > { %6995 = vmatmul.msk.bf16.gmra.mxu3 %vm856_vm4, %v7544_v4  ;;  %6942 = vmatmul.msk.bf16.gmra.mxu0 %vm856_vm4, %v8325_v3 }
 0x252   : > { %6963 = vmatmul.msk.bf16.gmra.mxu1 %vm856_vm4, %v7544_v4  ;;  %6979 = vmatmul.msk.bf16.gmra.mxu2 %vm856_vm4, %v7544_v4 }
 0x254   : > { %v1978_v5 = vpop.f32.mrf.mxu3 }
 0x255   : > { %v8812_v9 = vadd.f32 %v1978_v5, %v1472_v2  ;;  %v1889_v35 = vpop.f32.mrf.mxu2  ;;  %v7545_v2 = vld [vmem:[%s7662_s18 + $0x3c] sm:$0xff] }
 0x256   : > { %v8815_v60 = vadd.f32 %v1889_v35, %v8343_v34  ;;  %v1473_v24 = vpop.f32.mrf.mxu0  ;;  %v15332_v34 = vld [vmem:[#allocation90_spill] sm:$0xff]  ;;  %v15333_v5 = vld [vmem:[#allocation92_spill] sm:$0xff] }
 0x257   : > { %15327 = vst [vmem:[#allocation83_spill] sm:$0xff] %v8812_v9  ;;  %v8817_v57 = vpop.f32.mrf.mxu1  ;;  %v1474_v7 = vadd.f32 %v1473_v24, %v8351_v20  ;;  %v15334_v24 = vld [vmem:[#allocation93_spill] sm:$0xff] }
 0x258   : > { %15328 = vst [vmem:[#allocation85_spill] sm:$0xff] %v8817_v57 }
 0x25c   : > { %v1980_v52 = vpop.f32.mrf.mxu3 }
 0x25d   : > { %v8820_v29 = vadd.f32 %v1980_v52, %v1474_v7  ;;  %v1891_v30 = vpop.f32.mrf.mxu2 }
 0x25e   : > { %v8823_v1 = vadd.f32 %v1891_v30, %v8353_v40  ;;  %v1476_v4 = vpop.f32.mrf.mxu0 }
 0x25f   : > { %15329 = vst [vmem:[#allocation88_spill] sm:$0xff] %v8820_v29  ;;  %v8825_v48 = vpop.f32.mrf.mxu1  ;;  %v1477_v20 = vadd.f32 %v1476_v4, %v15333_v5 }
 0x260   : > { %15330 = vst [vmem:[#allocation114_spill] sm:$0xff] %v8823_v1 }
 0x261   : > { %15331 = vst [vmem:[#allocation115_spill] sm:$0xff] %v8825_v48  ;;  %6996 = vmatmul.msk.bf16.gmra.mxu3 %vm856_vm4, %v7545_v2  ;;  %6943 = vmatmul.msk.bf16.gmra.mxu0 %vm856_vm4, %v15332_v34 }
 0x262   : > { %6964 = vmatmul.msk.bf16.gmra.mxu1 %vm856_vm4, %v7545_v2  ;;  %6980 = vmatmul.msk.bf16.gmra.mxu2 %vm856_vm4, %v7545_v2 }
 0x264   : > { %v1983_v52 = vpop.f32.mrf.mxu3 }
 0x265   : > { %v8834_v35 = vadd.f32 %v1983_v52, %v1477_v20  ;;  %v1894_v40 = vpop.f32.mrf.mxu2  ;;  %v7546_v20 = vld [vmem:[%s7662_s18 + $0x48] sm:$0xff] }
 0x266   : > { %v8837_v7 = vadd.f32 %v1894_v40, %v15334_v24  ;;  %v1478_v30 = vpop.f32.mrf.mxu0 }
 0x267   : > { %v8839_v29 = vpop.f32.mrf.mxu1  ;;  %v1479_v48 = vadd.f32 %v1478_v30, %v8380_v28 }
 0x26c   : > { %v1985_v1 = vpop.f32.mrf.mxu3 }
 0x26d   : > { %v8842_v9 = vadd.f32 %v1985_v1, %v1479_v48  ;;  %v1896_v57 = vpop.f32.mrf.mxu2 }
 0x26e   : > { %v8845_v4 = vadd.f32 %v1896_v57, %v8382_v16  ;;  %v1481_v2 = vpop.f32.mrf.mxu0  ;;  %v15338_v57 = vld [vmem:[#allocation97_spill] sm:$0xff] }
 0x26f   : > { %15335 = vst [vmem:[#allocation92_spill] sm:$0xff] %v8842_v9  ;;  %v8847_v5 = vpop.f32.mrf.mxu1  ;;  %v1482_v28 = vadd.f32 %v1481_v2, %v8389_v59 }
 0x270   : > { %15336 = vst [vmem:[#allocation93_spill] sm:$0xff] %v8845_v4 }
 0x271   : > { %15337 = vst [vmem:[#allocation116_spill] sm:$0xff] %v8847_v5  ;;  %6997 = vmatmul.msk.bf16.gmra.mxu3 %vm856_vm4, %v7546_v20  ;;  %6944 = vmatmul.msk.bf16.gmra.mxu0 %vm856_vm4, %v8384_v21 }
 0x272   : > { %6965 = vmatmul.msk.bf16.gmra.mxu1 %vm856_vm4, %v7546_v20  ;;  %6981 = vmatmul.msk.bf16.gmra.mxu2 %vm856_vm4, %v7546_v20 }
 0x274   : > { %v1988_v1 = vpop.f32.mrf.mxu3 }
 0x275   : > { %v8856_v48 = vadd.f32 %v1988_v1, %v1482_v28  ;;  %v1899_v16 = vpop.f32.mrf.mxu2  ;;  %v7547_v28 = vld [vmem:[%s7662_s18 + $0x54] sm:$0xff] }
 0x276   : > { %v8859_v52 = vadd.f32 %v1899_v16, %v15338_v57  ;;  %v1483_v40 = vpop.f32.mrf.mxu0 }
 0x277   : > { %v8861_v24 = vpop.f32.mrf.mxu1  ;;  %v1484_v30 = vadd.f32 %v1483_v40, %v8409_v23 }
 0x27c   : > { %v1990_v9 = vpop.f32.mrf.mxu3 }
 0x27d   : > { %v8864_v5 = vadd.f32 %v1990_v9, %v1484_v30  ;;  %v1901_v4 = vpop.f32.mrf.mxu2 }
 0x27e   : > { %v8867_v59 = vadd.f32 %v1901_v4, %v8411_v22  ;;  %v1486_v2 = vpop.f32.mrf.mxu0  ;;  %v15342_v4 = vld [vmem:[#allocation101_spill] sm:$0xff] }
 0x27f   : > { %15339 = vst [vmem:[#allocation97_spill] sm:$0xff] %v8864_v5  ;;  %v8869_v20 = vpop.f32.mrf.mxu1  ;;  %v1487_v23 = vadd.f32 %v1486_v2, %v8418_v44 }
 0x280   : > { %15340 = vst [vmem:[#allocation117_spill] sm:$0xff] %v8867_v59 }
 0x281   : > { %15341 = vst [vmem:[#allocation118_spill] sm:$0xff] %v8869_v20  ;;  %6998 = vmatmul.msk.bf16.gmra.mxu3 %vm856_vm4, %v7547_v28  ;;  %6945 = vmatmul.msk.bf16.gmra.mxu0 %vm856_vm4, %v8413_v37 }
 0x282   : > { %6966 = vmatmul.msk.bf16.gmra.mxu1 %vm856_vm4, %v7547_v28  ;;  %6982 = vmatmul.msk.bf16.gmra.mxu2 %vm856_vm4, %v7547_v28 }
 0x284   : > { %v1993_v9 = vpop.f32.mrf.mxu3 }
 0x285   : > { %v8878_v1 = vadd.f32 %v1993_v9, %v1487_v23  ;;  %v1904_v22 = vpop.f32.mrf.mxu2  ;;  %v7548_v23 = vld [vmem:[%s7662_s18 + $0x60] sm:$0xff] }
 0x286   : > { %v8881_v16 = vadd.f32 %v1904_v22, %v15342_v4  ;;  %v1488_v57 = vpop.f32.mrf.mxu0 }
 0x287   : > { %v8883_v40 = vpop.f32.mrf.mxu1  ;;  %v1489_v30 = vadd.f32 %v1488_v57, %v8438_v32 }
 0x28c   : > { %v1995_v5 = vpop.f32.mrf.mxu3 }
 0x28d   : > { %v8886_v20 = vadd.f32 %v1995_v5, %v1489_v30  ;;  %v1906_v59 = vpop.f32.mrf.mxu2 }
 0x28e   : > { %v8889_v44 = vadd.f32 %v1906_v59, %v8440_v50  ;;  %v1491_v2 = vpop.f32.mrf.mxu0  ;;  %v15347_v59 = vld [vmem:[#allocation105_spill] sm:$0xff] }
 0x28f   : > { %15343 = vst [vmem:[#allocation101_spill] sm:$0xff] %v8886_v20  ;;  %v8891_v28 = vpop.f32.mrf.mxu1  ;;  %v1492_v32 = vadd.f32 %v1491_v2, %v8447_v8 }
 0x290   : > { %15344 = vst [vmem:[#allocation119_spill] sm:$0xff] %v8889_v44  ;;  %v15348_v44 = vld [vmem:[#allocation11_spill] sm:$0xff] }
 0x291   : > { %15345 = vst [vmem:[#allocation120_spill] sm:$0xff] %v8891_v28  ;;  %6999 = vmatmul.msk.bf16.gmra.mxu3 %vm856_vm4, %v7548_v23  ;;  %6946 = vmatmul.msk.bf16.gmra.mxu0 %vm856_vm4, %v8442_v33  ;;  %v1506_v8 = vadd.f32 %v8476_v27, %v15348_v44 }
 0x292   : > { %6967 = vmatmul.msk.bf16.gmra.mxu1 %vm856_vm4, %v7548_v23  ;;  %6983 = vmatmul.msk.bf16.gmra.mxu2 %vm856_vm4, %v7548_v23 }
 0x294   : > { %v1998_v5 = vpop.f32.mrf.mxu3 }
 0x295   : > { %v8900_v9 = vadd.f32 %v1998_v5, %v1492_v32  ;;  %v1909_v50 = vpop.f32.mrf.mxu2 }
 0x296   : > { %v8903_v22 = vadd.f32 %v1909_v50, %v15347_v59  ;;  %v1493_v4 = vpop.f32.mrf.mxu0  ;;  %v7549_v59 = vld [vmem:[%s7662_s18 + $0x6c] sm:$0xff] }
 0x297   : > { %15346 = vst [vmem:[#allocation121_spill] sm:$0xff] %v8900_v9  ;;  %v8905_v57 = vpop.f32.mrf.mxu1  ;;  %v1494_v30 = vadd.f32 %v1493_v4, %v8467_v62 }
 0x29c   : > { %v2000_v20 = vpop.f32.mrf.mxu3 }
 0x29d   : > { %v8908_v28 = vadd.f32 %v2000_v20, %v1494_v30  ;;  %v1911_v2 = vpop.f32.mrf.mxu2 }
 0x29e   : > { %v8913_v23 = vadd.f32 %v1911_v2, %v8469_v18  ;;  %v2012_v32 = vpop.f32.mrf.mxu0  ;;  %v15350_v18 = vld [vmem:[#allocation12_spill] sm:$0xff] }
 0x29f   : > { %v2218_v5 = vpop.f32.mrf.mxu1  ;;  %v2094_v9 = vadd.f32 %v2012_v32, %v1506_v8  ;;  %v1508_v20 = vadd.f32 %v8498_v38, %v15350_v18 }
 0x2a0   : > { %v8916_v50 = vadd.f32 %v2218_v5, %v8496_v10 }
 0x2a1   : > { %7000 = vmatmul.msk.bf16.gmra.mxu3 %vm856_vm4, %v7549_v59  ;;  %6947 = vmatmul.msk.bf16.gmra.mxu0 %vm856_vm4, %v8471_v6 }
 0x2a2   : > { %6968 = vmatmul.msk.bf16.gmra.mxu1 %vm856_vm4, %v7549_v59  ;;  %6984 = vmatmul.msk.bf16.gmra.mxu2 %vm856_vm4, %v7549_v59  ;;  %v15352_v59 = vld [vmem:[#allocation15_spill] sm:$0xff] }
 0x2a4   : > { %v2396_v27 = vpop.f32.mrf.mxu3 }
 0x2a5   : > { %v8924_v62 = vadd.f32 %v2396_v27, %v2094_v9  ;;  %v2307_v44 = vpop.f32.mrf.mxu2  ;;  %v1511_v9 = vadd.f32 %v8509_v36, %v15352_v59  ;;  %v15357_v59 = vld [vmem:[#allocation112_spill] sm:$0xff] }
 0x2a6   : > { %v8929_v10 = vadd.f32 %v2307_v44, %v8489_v51  ;;  %v2014_v4 = vpop.f32.mrf.mxu0 }
 0x2a7   : > { %15349 = vst [vmem:[#allocation105_spill] sm:$0xff] %v8924_v62  ;;  %v2220_v30 = vpop.f32.mrf.mxu1  ;;  %v2097_v8 = vadd.f32 %v2014_v4, %v1508_v20  ;;  %v7550_v20 = vld [vmem:[%s7662_s18 + $0x78] sm:$0xff] }
 0x2a8   : > { %v8932_v2 = vadd.f32 %v2220_v30, %v8507_v63 }
 0x2ac   : > { %v2398_v32 = vpop.f32.mrf.mxu3 }
 0x2ad   : > { %v8934_v5 = vadd.f32 %v2398_v32, %v2097_v8  ;;  %v2309_v27 = vpop.f32.mrf.mxu2 }
 0x2ae   : > { %v8939_v38 = vadd.f32 %v2309_v27, %v8501_v41  ;;  %v2017_v18 = vpop.f32.mrf.mxu0  ;;  %v15355_v41 = vld [vmem:[#allocation18_spill] sm:$0xff] }
 0x2af   : > { %15351 = vst [vmem:[#allocation11_spill] sm:$0xff] %v8934_v5  ;;  %v2223_v62 = vpop.f32.mrf.mxu1  ;;  %v2100_v51 = vadd.f32 %v2017_v18, %v1511_v9  ;;  %v1513_v4 = vadd.f32 %v8531_v42, %v15355_v41 }
 0x2b0   : > { %v8942_v44 = vadd.f32 %v2223_v62, %v8529_v56 }
 0x2b1   : > { %7001 = vmatmul.msk.bf16.gmra.mxu3 %vm856_vm4, %v7550_v20  ;;  %6948 = vmatmul.msk.bf16.gmra.mxu0 %vm856_vm4, %v8503_v11 }
 0x2b2   : > { %15353 = vst [vmem:[#allocation12_spill] sm:$0xff] %v8942_v44  ;;  %6969 = vmatmul.msk.bf16.gmra.mxu1 %vm856_vm4, %v7550_v20  ;;  %6985 = vmatmul.msk.bf16.gmra.mxu2 %vm856_vm4, %v7550_v20  ;;  %v15360_v20 = vld [vmem:[#allocation24_spill] sm:$0xff]  ;;  %v15362_v44 = vld [vmem:[#allocation110_spill] sm:$0xff] }
 0x2b4   : > { %v2401_v63 = vpop.f32.mrf.mxu3 }
 0x2b5   : > { %v8950_v36 = vadd.f32 %v2401_v63, %v2100_v51  ;;  %v2312_v30 = vpop.f32.mrf.mxu2  ;;  %v15361_v51 = vld [vmem:[#allocation113_spill] sm:$0xff] }
 0x2b6   : > { %v8955_v56 = vadd.f32 %v2312_v30, %v8522_v19  ;;  %v2019_v62 = vpop.f32.mrf.mxu0  ;;  %v1516_v63 = vadd.f32 %v15361_v51, %v15360_v20  ;;  %v15364_v30 = vld [vmem:[#allocation14_spill] sm:$0xff] }
 0x2b7   : > { %15354 = vst [vmem:[#allocation15_spill] sm:$0xff] %v8950_v36  ;;  %v2225_v8 = vpop.f32.mrf.mxu1  ;;  %v2103_v32 = vadd.f32 %v2019_v62, %v1513_v4  ;;  %v7551_v4 = vld [vmem:[%s7662_s18 + $0x84] sm:$0xff]  ;;  %v15366_v62 = vld [vmem:[#allocation111_spill] sm:$0xff] }
 0x2b8   : > { %15356 = vst [vmem:[#allocation18_spill] sm:$0xff] %v8955_v56  ;;  %v8958_v9 = vadd.f32 %v2225_v8, %v15357_v59 }
 0x2ba   : > { %15358 = vst [vmem:[#allocation112_spill] sm:$0xff] %v8958_v9  ;;  %v15376_v9 = vld [vmem:[#allocation20_spill] sm:$0xff] }
 0x2bc   : > { %v2403_v27 = vpop.f32.mrf.mxu3 }
 0x2bd   : > { %v8960_v18 = vadd.f32 %v2403_v27, %v2103_v32  ;;  %v2314_v36 = vpop.f32.mrf.mxu2 }
 0x2be   : > { %v8965_v42 = vadd.f32 %v2314_v36, %v15362_v44  ;;  %v2022_v41 = vpop.f32.mrf.mxu0  ;;  %v15368_v44 = vld [vmem:[#allocation29_spill] sm:$0xff]  ;;  %v15369_v36 = vld [vmem:[#allocation16_spill] sm:$0xff] }
 0x2bf   : > { %15359 = vst [vmem:[#allocation122_spill] sm:$0xff] %v8960_v18  ;;  %v2228_v5 = vpop.f32.mrf.mxu1  ;;  %v2106_v19 = vadd.f32 %v2022_v41, %v1516_v63  ;;  %v1518_v59 = vadd.f32 %v15369_v36, %v15368_v44 }
 0x2c0   : > { %15363 = vst [vmem:[#allocation24_spill] sm:$0xff] %v8965_v42  ;;  %v8968_v56 = vadd.f32 %v2228_v5, %v15364_v30  ;;  %v15370_v5 = vld [vmem:[#allocation17_spill] sm:$0xff] }
 0x2c1   : > { %7002 = vmatmul.msk.bf16.gmra.mxu3 %vm856_vm4, %v7551_v4  ;;  %6949 = vmatmul.msk.bf16.gmra.mxu0 %vm856_vm4, %v15366_v62  ;;  %v15371_v30 = vld [vmem:[#allocation25_spill] sm:$0xff] }
 0x2c2   : > { %15365 = vst [vmem:[#allocation113_spill] sm:$0xff] %v8968_v56  ;;  %6970 = vmatmul.msk.bf16.gmra.mxu1 %vm856_vm4, %v7551_v4  ;;  %6986 = vmatmul.msk.bf16.gmra.mxu2 %vm856_vm4, %v7551_v4  ;;  %v15374_v4 = vld [vmem:[#allocation35_spill] sm:$0xff] }
 0x2c4   : > { %v2406_v8 = vpop.f32.mrf.mxu3 }
 0x2c5   : > { %v8976_v32 = vadd.f32 %v2406_v8, %v2106_v19  ;;  %v2317_v27 = vpop.f32.mrf.mxu2  ;;  %v15375_v19 = vld [vmem:[#allocation22_spill] sm:$0xff] }
 0x2c6   : > { %v8981_v20 = vadd.f32 %v2317_v27, %v15370_v5  ;;  %v2024_v51 = vpop.f32.mrf.mxu0  ;;  %v1521_v8 = vadd.f32 %v15375_v19, %v15374_v4 }
 0x2c7   : > { %15367 = vst [vmem:[#allocation110_spill] sm:$0xff] %v8976_v32  ;;  %v2230_v63 = vpop.f32.mrf.mxu1  ;;  %v2109_v41 = vadd.f32 %v2024_v51, %v1518_v59  ;;  %v7552_v59 = vld [vmem:[%s7662_s18 + $0x90] sm:$0xff] }
 0x2c8   : > { %v8984_v56 = vadd.f32 %v2230_v63, %v15371_v30  ;;  %v15379_v51 = vld [vmem:[#allocation23_spill] sm:$0xff] }
 0x2ca   : > { %15372 = vst [vmem:[#allocation14_spill] sm:$0xff] %v8984_v56  ;;  %v15390_v56 = vld [vmem:[#allocation21_spill] sm:$0xff] }
 0x2cc   : > { %v2408_v18 = vpop.f32.mrf.mxu3 }
 0x2cd   : > { %v8986_v42 = vadd.f32 %v2408_v18, %v2109_v41  ;;  %v2319_v32 = vpop.f32.mrf.mxu2 }
 0x2ce   : > { %v8991_v44 = vadd.f32 %v2319_v32, %v15376_v9  ;;  %v2027_v36 = vpop.f32.mrf.mxu0  ;;  %v15381_v9 = vld [vmem:[#allocation40_spill] sm:$0xff] }
 0x2cf   : > { %15373 = vst [vmem:[#allocation29_spill] sm:$0xff] %v8986_v42  ;;  %v2233_v62 = vpop.f32.mrf.mxu1  ;;  %v2112_v27 = vadd.f32 %v2027_v36, %v1521_v8  ;;  %v15382_v32 = vld [vmem:[#allocation28_spill] sm:$0xff]  ;;  %v15385_v36 = vld [vmem:[#allocation31_spill] sm:$0xff] }
 0x2d0   : > { %15377 = vst [vmem:[#allocation16_spill] sm:$0xff] %v8991_v44  ;;  %v8994_v5 = vadd.f32 %v2233_v62, %v8595_v54  ;;  %v1523_v41 = vadd.f32 %v15382_v32, %v15381_v9  ;;  %v15383_v54 = vld [vmem:[#allocation27_spill] sm:$0xff] }
 0x2d1   : > { %7003 = vmatmul.msk.bf16.gmra.mxu3 %vm856_vm4, %v7552_v59  ;;  %6950 = vmatmul.msk.bf16.gmra.mxu0 %vm856_vm4, %v15379_v51 }
 0x2d2   : > { %15378 = vst [vmem:[#allocation17_spill] sm:$0xff] %v8994_v5  ;;  %6971 = vmatmul.msk.bf16.gmra.mxu1 %vm856_vm4, %v7552_v59  ;;  %6987 = vmatmul.msk.bf16.gmra.mxu2 %vm856_vm4, %v7552_v59  ;;  %v15388_v59 = vld [vmem:[#allocation46_spill] sm:$0xff] }
 0x2d4   : > { %v2411_v18 = vpop.f32.mrf.mxu3 }
 0x2d5   : > { %v9002_v63 = vadd.f32 %v2411_v18, %v2112_v27  ;;  %v2322_v30 = vpop.f32.mrf.mxu2  ;;  %v15389_v27 = vld [vmem:[#allocation34_spill] sm:$0xff] }
 0x2d6   : > { %v9007_v62 = vadd.f32 %v2322_v30, %v15383_v54  ;;  %v2029_v4 = vpop.f32.mrf.mxu0  ;;  %v1526_v18 = vadd.f32 %v15389_v27, %v15388_v59  ;;  %v15392_v54 = vld [vmem:[#allocation33_spill] sm:$0xff] }
 0x2d7   : > { %15380 = vst [vmem:[#allocation25_spill] sm:$0xff] %v9002_v63  ;;  %v2235_v19 = vpop.f32.mrf.mxu1  ;;  %v2115_v8 = vadd.f32 %v2029_v4, %v1523_v41  ;;  %v7553_v41 = vld [vmem:[%s7662_s18 + $0x9c] sm:$0xff]  ;;  %v15394_v4 = vld [vmem:[#allocation26_spill] sm:$0xff] }
 0x2d8   : > { %15384 = vst [vmem:[#allocation35_spill] sm:$0xff] %v9007_v62  ;;  %v9010_v5 = vadd.f32 %v2235_v19, %v15385_v36 }
 0x2da   : > { %15386 = vst [vmem:[#allocation22_spill] sm:$0xff] %v9010_v5  ;;  %v15402_v5 = vld [vmem:[#allocation39_spill] sm:$0xff] }
 0x2dc   : > { %v2413_v42 = vpop.f32.mrf.mxu3 }
 0x2dd   : > { %v9012_v44 = vadd.f32 %v2413_v42, %v2115_v8  ;;  %v2324_v63 = vpop.f32.mrf.mxu2 }
 0x2de   : > { %v9017_v9 = vadd.f32 %v2324_v63, %v15390_v56  ;;  %v2032_v32 = vpop.f32.mrf.mxu0  ;;  %v15396_v56 = vld [vmem:[#allocation50_spill] sm:$0xff] }
 0x2df   : > { %15387 = vst [vmem:[#allocation20_spill] sm:$0xff] %v9012_v44  ;;  %v2238_v51 = vpop.f32.mrf.mxu1  ;;  %v2118_v30 = vadd.f32 %v2032_v32, %v1526_v18  ;;  %v15397_v63 = vld [vmem:[#allocation38_spill] sm:$0xff] }
 0x2e0   : > { %15391 = vst [vmem:[#allocation40_spill] sm:$0xff] %v9017_v9  ;;  %v9020_v62 = vadd.f32 %v2238_v51, %v15392_v54  ;;  %v1528_v8 = vadd.f32 %v15397_v63, %v15396_v56  ;;  %v15398_v51 = vld [vmem:[#allocation36_spill] sm:$0xff]  ;;  %v15399_v54 = vld [vmem:[#allocation37_spill] sm:$0xff] }
 0x2e1   : > { %7004 = vmatmul.msk.bf16.gmra.mxu3 %vm856_vm4, %v7553_v41  ;;  %6951 = vmatmul.msk.bf16.gmra.mxu0 %vm856_vm4, %v15394_v4 }
 0x2e2   : > { %15393 = vst [vmem:[#allocation28_spill] sm:$0xff] %v9020_v62  ;;  %6972 = vmatmul.msk.bf16.gmra.mxu1 %vm856_vm4, %v7553_v41  ;;  %6988 = vmatmul.msk.bf16.gmra.mxu2 %vm856_vm4, %v7553_v41  ;;  %v15400_v41 = vld [vmem:[#allocation56_spill] sm:$0xff] }
 0x2e4   : > { %v2416_v42 = vpop.f32.mrf.mxu3 }
 0x2e5   : > { %v9028_v19 = vadd.f32 %v2416_v42, %v2118_v30  ;;  %v2327_v36 = vpop.f32.mrf.mxu2  ;;  %v15401_v30 = vld [vmem:[#allocation42_spill] sm:$0xff] }
 0x2e6   : > { %v9033_v59 = vadd.f32 %v2327_v36, %v15398_v51  ;;  %v2034_v27 = vpop.f32.mrf.mxu0  ;;  %v1531_v42 = vadd.f32 %v15401_v30, %v15400_v41 }
 0x2e7   : > { %15395 = vst [vmem:[#allocation27_spill] sm:$0xff] %v9028_v19  ;;  %v2240_v18 = vpop.f32.mrf.mxu1  ;;  %v2121_v32 = vadd.f32 %v2034_v27, %v1528_v8  ;;  %v7554_v8 = vld [vmem:[%s7662_s18 + $0xa8] sm:$0xff]  ;;  %v15404_v27 = vld [vmem:[#allocation32_spill] sm:$0xff] }
 0x2e8   : > { %v9036_v62 = vadd.f32 %v2240_v18, %v15399_v54 }
 0x2ec   : > { %v2418_v44 = vpop.f32.mrf.mxu3 }
 0x2ed   : > { %v9038_v9 = vadd.f32 %v2418_v44, %v2121_v32  ;;  %v2329_v19 = vpop.f32.mrf.mxu2 }
 0x2ee   : > { %v9043_v56 = vadd.f32 %v2329_v19, %v15402_v5  ;;  %v2037_v63 = vpop.f32.mrf.mxu0  ;;  %v15406_v5 = vld [vmem:[#allocation61_spill] sm:$0xff] }
 0x2ef   : > { %v2243_v4 = vpop.f32.mrf.mxu1  ;;  %v2124_v36 = vadd.f32 %v2037_v63, %v1531_v42  ;;  %v1533_v19 = vadd.f32 %v8663_v43, %v15406_v5  ;;  %v15409_v43 = vld [vmem:[#allocation63_spill] sm:$0xff] }
 0x2f0   : > { %v9046_v51 = vadd.f32 %v2243_v4, %v8661_v49  ;;  %v7058_v49 = vld [vmem:[%s14685_s1 + $0x1e] sm:$0x3f] }
 0x2f1   : > { %7005 = vmatmul.msk.bf16.gmra.mxu3 %vm856_vm4, %v7554_v8  ;;  %6952 = vmatmul.msk.bf16.gmra.mxu0 %vm856_vm4, %v15404_v27  ;;  %v15407_v4 = vld [vmem:[#allocation45_spill] sm:$0xff]  ;;  %2992 = vst [vmem:[#allocation1] ss:$4 sm:$0xff] %v7058_v49 }
 0x2f2   : > { %15403 = vst [vmem:[#allocation31_spill] sm:$0xff] %v9046_v51  ;;  %6973 = vmatmul.msk.bf16.gmra.mxu1 %vm856_vm4, %v7554_v8  ;;  %6989 = vmatmul.msk.bf16.gmra.mxu2 %vm856_vm4, %v7554_v8 }
 0x2f4   : > { %v2421_v44 = vpop.f32.mrf.mxu3 }
 0x2f5   : > { %v9054_v18 = vadd.f32 %v2421_v44, %v2124_v36  ;;  %v2332_v32 = vpop.f32.mrf.mxu2  ;;  %v1536_v44 = vadd.f32 %v8674_v58, %v15409_v43 }
 0x2f6   : > { %v9062_v54 = vadd.f32 %v2332_v32, %v15407_v4  ;;  %v2039_v41 = vpop.f32.mrf.mxu0 }
 0x2f7   : > { %15405 = vst [vmem:[#allocation46_spill] sm:$0xff] %v9054_v18  ;;  %v2245_v30 = vpop.f32.mrf.mxu1  ;;  %v2127_v42 = vadd.f32 %v2039_v41, %v1533_v19 }
 0x2f8   : > { %15408 = vst [vmem:[#allocation34_spill] sm:$0xff] %v9062_v54  ;;  %v9065_v63 = vadd.f32 %v2245_v30, %v8672_v31  ;;  %v2993_v18 = vld.sshfl [vmem:[#allocation1] sm:$0xff pattern:$0x73625140]  ;;  %v7555_v31 = vld [vmem:[%s7662_s18 + $0xb4] sm:$0xff] }
 0x2f9   : > { %v2999_v54 = vsel %vm905_vm0, %v2993_v18, 0  ;;  %v15411_v18 = vld [vmem:[#allocation64_spill] sm:$0xff] }
 0x2fa   : > { %3012 = vmatpush.bf16.msrb.mxu3 %v2999_v54  ;;  %v1538_v41 = vadd.f32 %v8697_v15, %v15411_v18  ;;  %v15412_v30 = vld [vmem:[#allocation44_spill] sm:$0xff] }
 0x2fc   : > { %v2423_v36 = vpop.f32.mrf.mxu3 }
 0x2fd   : > { %v9067_v8 = vadd.f32 %v2423_v36, %v2127_v42  ;;  %v2334_v5 = vpop.f32.mrf.mxu2 }
 0x2fe   : > { %v9072_v51 = vadd.f32 %v2334_v5, %v8666_v0  ;;  %v2042_v32 = vpop.f32.mrf.mxu0 }
 0x2ff   : > { %v2248_v4 = vpop.f32.mrf.mxu1  ;;  %v2130_v49 = vadd.f32 %v2042_v32, %v1536_v44 }
 0x300   : > { %v9076_v19 = vadd.f32 %v2248_v4, %v8695_v26  ;;  %v7318_v4 = vld [vmem:[%s7662_s18 + $0xc0] sm:$0xff] }
 0x301   : > { %7006 = vmatmul.msk.bf16.gmra.mxu3 %vm856_vm4, %v7555_v31  ;;  %6953 = vmatmul.msk.bf16.gmra.mxu0 %vm856_vm4, %v8668_v12 }
 0x302   : > { %6974 = vmatmul.msk.bf16.gmra.mxu1 %vm856_vm4, %v7555_v31  ;;  %6990 = vmatmul.msk.bf16.gmra.mxu2 %vm856_vm4, %v7555_v31  ;;  %v15414_v31 = vld [vmem:[#allocation67_spill] sm:$0xff] }
 0x304   : > { %v2426_v0 = vpop.f32.mrf.mxu3 }
 0x305   : > { %v9084_v58 = vadd.f32 %v2426_v0, %v2130_v49  ;;  %v2337_v26 = vpop.f32.mrf.mxu2  ;;  %v1541_v49 = vadd.f32 %v8707_v55, %v15414_v31 }
 0x306   : > { %v9089_v54 = vadd.f32 %v2337_v26, %v15412_v30  ;;  %v2044_v42 = vpop.f32.mrf.mxu0 }
 0x307   : > { %15410 = vst [vmem:[#allocation21_spill] sm:$0xff] %v9084_v58  ;;  %v2250_v36 = vpop.f32.mrf.mxu1  ;;  %v2133_v43 = vadd.f32 %v2044_v42, %v1538_v41  ;;  %v15419_v41 = vld [vmem:[#allocation48_spill] sm:$0xff] }
 0x308   : > { %v9092_v44 = vadd.f32 %v2250_v36, %v8705_v53 }
 0x30c   : > { %v2428_v5 = vpop.f32.mrf.mxu3 }
 0x30d   : > { %v9094_v32 = vadd.f32 %v2428_v5, %v2133_v43  ;;  %v2339_v0 = vpop.f32.mrf.mxu2  ;;  %v15420_v43 = vld [vmem:[#allocation43_spill] sm:$0xff] }
 0x30e   : > { %v9100_v15 = vadd.f32 %v2339_v0, %v8700_v47  ;;  %v2047_v18 = vpop.f32.mrf.mxu0  ;;  %v15418_v47 = vld [vmem:[#allocation70_spill] sm:$0xff]  ;;  %v15421_v0 = vld [vmem:[#allocation55_spill] sm:$0xff] }
 0x30f   : > { %15413 = vst [vmem:[#allocation33_spill] sm:$0xff] %v9094_v32  ;;  %v2253_v26 = vpop.f32.mrf.mxu1  ;;  %v2136_v30 = vadd.f32 %v2047_v18, %v1541_v49  ;;  %v1543_v42 = vadd.f32 %v15419_v41, %v15418_v47  ;;  %v15424_v32 = vld [vmem:[#allocation57_spill] sm:$0xff] }
 0x310   : > { %15415 = vst [vmem:[#allocation50_spill] sm:$0xff] %v9100_v15  ;;  %v9103_v58 = vadd.f32 %v2253_v26, %v8721_v13 }
 0x311   : > { %7007 = vmatmul.msk.bf16.gmra.mxu3 %vm856_vm4, %v7318_v4  ;;  %6954 = vmatmul.msk.bf16.gmra.mxu0 %vm856_vm4, %v8702_v39 }
 0x312   : > { %15416 = vst [vmem:[#allocation38_spill] sm:$0xff] %v9103_v58  ;;  %6975 = vmatmul.msk.bf16.gmra.mxu1 %vm856_vm4, %v7318_v4  ;;  %6991 = vmatmul.msk.bf16.gmra.mxu2 %vm856_vm4, %v7318_v4  ;;  %v15423_v4 = vld [vmem:[#allocation73_spill] sm:$0xff] }
 0x314   : > { %v2431_v53 = vpop.f32.mrf.mxu3 }
 0x315   : > { %v9110_v55 = vadd.f32 %v2431_v53, %v2136_v30  ;;  %v2342_v36 = vpop.f32.mrf.mxu2  ;;  %v1546_v30 = vadd.f32 %v15424_v32, %v15423_v4 }
 0x316   : > { %v9115_v5 = vadd.f32 %v2342_v36, %v15420_v43  ;;  %v2049_v13 = vpop.f32.mrf.mxu0 }
 0x317   : > { %15417 = vst [vmem:[#allocation36_spill] sm:$0xff] %v9110_v55  ;;  %v2255_v31 = vpop.f32.mrf.mxu1  ;;  %v2139_v49 = vadd.f32 %v2049_v13, %v1543_v42  ;;  %v15425_v55 = vld [vmem:[#allocation52_spill] sm:$0xff]  ;;  %v15428_v42 = vld [vmem:[#allocation3_spill] sm:$0xff] }
 0x318   : > { %v9118_v18 = vadd.f32 %v2255_v31, %v15421_v0  ;;  %v15430_v13 = vld [vmem:[#allocation76_spill] sm:$0xff]  ;;  %v15431_v31 = vld [vmem:[#allocation58_spill] sm:$0xff] }
 0x319   : > { %v15432_v0 = vld [vmem:[#allocation54_spill] sm:$0xff] }
 0x31c   : > { %v2433_v26 = vpop.f32.mrf.mxu3 }
 0x31d   : > { %v9120_v58 = vadd.f32 %v2433_v26, %v2139_v49  ;;  %v2344_v53 = vpop.f32.mrf.mxu2  ;;  %v1548_v49 = vadd.f32 %v15431_v31, %v15430_v13 }
 0x31e   : > { %v9125_v15 = vadd.f32 %v2344_v53, %v15425_v55  ;;  %v2052_v47 = vpop.f32.mrf.mxu0 }
 0x31f   : > { %15422 = vst [vmem:[#allocation37_spill] sm:$0xff] %v9120_v58  ;;  %v2258_v41 = vpop.f32.mrf.mxu1  ;;  %v2142_v36 = vadd.f32 %v2052_v47, %v1546_v30  ;;  %v15434_v47 = vld [vmem:[#allocation66_spill] sm:$0xff]  ;;  %v15437_v58 = vld [vmem:[#allocation68_spill] sm:$0xff] }
 0x320   : > { %15426 = vst [vmem:[#allocation56_spill] sm:$0xff] %v9125_v15  ;;  %v9128_v43 = vadd.f32 %v2258_v41, %v8743_v61 }
 0x321   : > { %7059 = vmatmul.msk.bf16.vlgmr.msrb.gmra.mxu3 %vm856_vm4, %v15311_v45  ;;  %7009 = vmatmul.msk.bf16.vlgmr.msrb.gmra.mxu0 %vm856_vm4, %v15428_v42 }
 0x322   : > { %15427 = vst [vmem:[#allocation42_spill] sm:$0xff] %v9128_v43  ;;  %7025 = vmatmul.msk.bf16.vlgmr.msrb.gmra.mxu1 %vm856_vm4, %v15428_v42  ;;  %7041 = vmatmul.msk.bf16.vlgmr.msrb.gmra.mxu2 %vm856_vm4, %v15428_v42  ;;  %v15436_v42 = vld [vmem:[#allocation79_spill] sm:$0xff] }
 0x324   : > { %v2436_v32 = vpop.f32.mrf.mxu3 }
 0x325   : > { %v9138_v55 = vadd.f32 %v2436_v32, %v2142_v36  ;;  %v2347_v61 = vpop.f32.mrf.mxu2  ;;  %v1551_v36 = vadd.f32 %v15437_v58, %v15436_v42  ;;  %v15447_v42 = vld [vmem:[#allocation69_spill] sm:$0xff] }
 0x326   : > { %v9143_v26 = vadd.f32 %v2347_v61, %v15432_v0  ;;  %v2054_v4 = vpop.f32.mrf.mxu0  ;;  %v15440_v0 = vld [vmem:[#allocation62_spill] sm:$0xff] }
 0x327   : > { %15429 = vst [vmem:[#allocation39_spill] sm:$0xff] %v9138_v55  ;;  %v2260_v30 = vpop.f32.mrf.mxu1  ;;  %v2145_v53 = vadd.f32 %v2054_v4, %v1548_v49  ;;  %v15438_v55 = vld [vmem:[#allocation53_spill] sm:$0xff]  ;;  %v15442_v49 = vld [vmem:[#allocation80_spill] sm:$0xff] }
 0x328   : > { %15433 = vst [vmem:[#allocation61_spill] sm:$0xff] %v9143_v26  ;;  %v9146_v41 = vadd.f32 %v2260_v30, %v15434_v47  ;;  %v15443_v4 = vld [vmem:[#allocation4_spill] sm:$0xff]  ;;  %v15446_v30 = vld [vmem:[#allocation71_spill] sm:$0xff] }
 0x32c   : > { %v2438_v45 = vpop.f32.mrf.mxu3 }
 0x32d   : > { %v9148_v43 = vadd.f32 %v2438_v45, %v2145_v53  ;;  %v2349_v32 = vpop.f32.mrf.mxu2 }
 0x32e   : > { %v9153_v15 = vadd.f32 %v2349_v32, %v15438_v55  ;;  %v2057_v13 = vpop.f32.mrf.mxu0  ;;  %v15445_v55 = vld [vmem:[#allocation81_spill] sm:$0xff] }
 0x32f   : > { %15435 = vst [vmem:[#allocation45_spill] sm:$0xff] %v9148_v43  ;;  %v2263_v31 = vpop.f32.mrf.mxu1  ;;  %v2148_v61 = vadd.f32 %v2057_v13, %v1551_v36  ;;  %v1553_v53 = vadd.f32 %v15446_v30, %v15445_v55 }
 0x330   : > { %15439 = vst [vmem:[#allocation63_spill] sm:$0xff] %v9153_v15  ;;  %v9156_v26 = vadd.f32 %v2263_v31, %v15440_v0  ;;  %v15449_v0 = vld [vmem:[#allocation74_spill] sm:$0xff]  ;;  %v15452_v15 = vld [vmem:[#allocation72_spill] sm:$0xff] }
 0x331   : > { %7060 = vmatmul.msk.bf16.gmra.mxu3 %vm856_vm4, %v15442_v49  ;;  %7010 = vmatmul.msk.bf16.gmra.mxu0 %vm856_vm4, %v15443_v4 }
 0x332   : > { %15441 = vst [vmem:[#allocation64_spill] sm:$0xff] %v9156_v26  ;;  %7026 = vmatmul.msk.bf16.gmra.mxu1 %vm856_vm4, %v15443_v4  ;;  %7042 = vmatmul.msk.bf16.gmra.mxu2 %vm856_vm4, %v15443_v4  ;;  %v2994_v26 = vld.sshfl [vmem:[#allocation1 + $0x8] sm:$0xff pattern:$0x73625140] }
 0x333   : > { %v3001_v43 = vsel %vm905_vm0, %v2994_v26, 0  ;;  %v15453_v26 = vld [vmem:[#allocation5_spill] sm:$0xff] }
 0x334   : > { %v2441_v45 = vpop.f32.mrf.mxu3  ;;  %3101 = vmatpush.bf16.msra.mxu0 %v3001_v43 }
 0x335   : > { %v9166_v58 = vadd.f32 %v2441_v45, %v2148_v61  ;;  %v2352_v47 = vpop.f32.mrf.mxu2  ;;  %v15450_v45 = vld [vmem:[#allocation84_spill] sm:$0xff] }
 0x336   : > { %v9171_v36 = vadd.f32 %v2352_v47, %v15447_v42  ;;  %v2059_v32 = vpop.f32.mrf.mxu0 }
 0x337   : > { %15444 = vst [vmem:[#allocation44_spill] sm:$0xff] %v9166_v58  ;;  %v2265_v13 = vpop.f32.mrf.mxu1  ;;  %v2151_v31 = vadd.f32 %v2059_v32, %v1553_v53  ;;  %v15451_v58 = vld [vmem:[#allocation77_spill] sm:$0xff] }
 0x338   : > { %15448 = vst [vmem:[#allocation67_spill] sm:$0xff] %v9171_v36  ;;  %v9174_v49 = vadd.f32 %v2265_v13, %v15449_v0  ;;  %v1556_v55 = vadd.f32 %v15451_v58, %v15450_v45  ;;  %v2995_v13 = vld.sshfl [vmem:[#allocation1 + $0x10] sm:$0xff pattern:$0x73625140] }
 0x339   : > { %v3003_v43 = vsel %vm905_vm0, %v2995_v13, 0 }
 0x33a   : > { %3190 = vmatpush.bf16.msra.mxu1 %v3003_v43  ;;  %v15457_v43 = vld [vmem:[#allocation89_spill] sm:$0xff] }
 0x33c   : > { %v2443_v4 = vpop.f32.mrf.mxu3 }
 0x33d   : > { %v9177_v61 = vadd.f32 %v2443_v4, %v2151_v31  ;;  %v2354_v30 = vpop.f32.mrf.mxu2 }
 0x33e   : > { %v9182_v47 = vadd.f32 %v2354_v30, %v15452_v15  ;;  %v2062_v42 = vpop.f32.mrf.mxu0 }
 0x33f   : > { %v2268_v36 = vpop.f32.mrf.mxu1  ;;  %v2154_v53 = vadd.f32 %v2062_v42, %v1556_v55 }
 0x340   : > { %v9185_v32 = vadd.f32 %v2268_v36, %v8792_v17  ;;  %v15455_v17 = vld [vmem:[#allocation87_spill] sm:$0xff] }
 0x341   : > { %7061 = vmatmul.msk.bf16.gmra.mxu3 %vm856_vm4, %v8325_v3  ;;  %7011 = vmatmul.msk.bf16.gmra.mxu0 %vm856_vm4, %v15453_v26  ;;  %v1558_v58 = vadd.f32 %v8794_v25, %v15455_v17 }
 0x342   : > { %7027 = vmatmul.msk.bf16.gmra.mxu1 %vm856_vm4, %v15453_v26  ;;  %7043 = vmatmul.msk.bf16.gmra.mxu2 %vm856_vm4, %v15453_v26  ;;  %v15458_v26 = vld [vmem:[#allocation82_spill] sm:$0xff] }
 0x344   : > { %v2446_v15 = vpop.f32.mrf.mxu3 }
 0x345   : > { %v9196_v4 = vadd.f32 %v2446_v15, %v2154_v53  ;;  %v2357_v36 = vpop.f32.mrf.mxu2  ;;  %v1561_v53 = vadd.f32 %v15458_v26, %v15457_v43 }
 0x346   : > { %v9201_v31 = vadd.f32 %v2357_v36, %v8789_v14  ;;  %v2064_v0 = vpop.f32.mrf.mxu0 }
 0x347   : > { %15454 = vst [vmem:[#allocation70_spill] sm:$0xff] %v9196_v4  ;;  %v2270_v45 = vpop.f32.mrf.mxu1  ;;  %v2157_v55 = vadd.f32 %v2064_v0, %v1558_v58  ;;  %v15459_v4 = vld [vmem:[#allocation78_spill] sm:$0xff]  ;;  %v15464_v0 = vld [vmem:[#allocation85_spill] sm:$0xff] }
 0x348   : > { %v9204_v30 = vadd.f32 %v2270_v45, %v8800_v46  ;;  %v7107_v46 = vld [vmem:[%s14685_s1 + $0x24] sm:$0x3f] }
 0x349   : > { %3376 = vst [vmem:[#allocation1] ss:$4 sm:$0xff] %v7107_v46  ;;  %v15461_v58 = vld [vmem:[#allocation6_spill] sm:$0xff] }
 0x34c   : > { %v2448_v42 = vpop.f32.mrf.mxu3 }
 0x34d   : > { %v9206_v13 = vadd.f32 %v2448_v42, %v2157_v55  ;;  %v2359_v15 = vpop.f32.mrf.mxu2  ;;  %v15465_v42 = vld [vmem:[#allocation83_spill] sm:$0xff] }
 0x34e   : > { %v9211_v3 = vadd.f32 %v2359_v15, %v15459_v4  ;;  %v2067_v25 = vpop.f32.mrf.mxu0  ;;  %v15463_v4 = vld [vmem:[#allocation91_spill] sm:$0xff] }
 0x34f   : > { %15456 = vst [vmem:[#allocation48_spill] sm:$0xff] %v9206_v13  ;;  %v2273_v17 = vpop.f32.mrf.mxu1  ;;  %v2160_v14 = vadd.f32 %v2067_v25, %v1561_v53  ;;  %v1563_v45 = vadd.f32 %v15464_v0, %v15463_v4  ;;  %v15470_v13 = vld [vmem:[#allocation88_spill] sm:$0xff] }
 0x350   : > { %v9214_v36 = vadd.f32 %v2273_v17, %v8815_v60  ;;  %v15467_v17 = vld [vmem:[#allocation114_spill] sm:$0xff] }
 0x351   : > { %7062 = vmatmul.msk.bf16.gmra.mxu3 %vm856_vm4, %v15332_v34  ;;  %7012 = vmatmul.msk.bf16.gmra.mxu0 %vm856_vm4, %v15461_v58  ;;  %v3377_v34 = vld.sshfl [vmem:[#allocation1] sm:$0xff pattern:$0x73625140] }
 0x352   : > { %15460 = vst [vmem:[#allocation43_spill] sm:$0xff] %v9214_v36  ;;  %7028 = vmatmul.msk.bf16.gmra.mxu1 %vm856_vm4, %v15461_v58  ;;  %7044 = vmatmul.msk.bf16.gmra.mxu2 %vm856_vm4, %v15461_v58  ;;  %v3383_v36 = vsel %vm905_vm0, %v3377_v34, 0  ;;  %v15472_v34 = vld [vmem:[#allocation7_spill] sm:$0xff] }
 0x353   : > { %3396 = vmatpush.bf16.msra.mxu2 %v3383_v36 }
 0x354   : > { %v2451_v26 = vpop.f32.mrf.mxu3 }
 0x355   : > { %v9227_v60 = vadd.f32 %v2451_v26, %v2160_v14  ;;  %v2362_v55 = vpop.f32.mrf.mxu2  ;;  %v15468_v26 = vld [vmem:[#allocation94_spill] sm:$0xff] }
 0x356   : > { %v9232_v43 = vadd.f32 %v2362_v55, %v15465_v42  ;;  %v2069_v53 = vpop.f32.mrf.mxu0 }
 0x357   : > { %15462 = vst [vmem:[#allocation55_spill] sm:$0xff] %v9227_v60  ;;  %v2275_v15 = vpop.f32.mrf.mxu1  ;;  %v2163_v25 = vadd.f32 %v2069_v53, %v1563_v45  ;;  %v15469_v60 = vld [vmem:[#allocation115_spill] sm:$0xff] }
 0x358   : > { %15466 = vst [vmem:[#allocation73_spill] sm:$0xff] %v9232_v43  ;;  %v9235_v46 = vadd.f32 %v2275_v15, %v15467_v17  ;;  %v1566_v4 = vadd.f32 %v15469_v60, %v15468_v26  ;;  %v15475_v26 = vld [vmem:[#allocation93_spill] sm:$0xff] }
 0x35c   : > { %v2453_v58 = vpop.f32.mrf.mxu3 }
 0x35d   : > { %v9238_v14 = vadd.f32 %v2453_v58, %v2163_v25  ;;  %v2364_v0 = vpop.f32.mrf.mxu2  ;;  %v15474_v58 = vld [vmem:[#allocation96_spill] sm:$0xff] }
 0x35e   : > { %v9243_v55 = vadd.f32 %v2364_v0, %v15470_v13  ;;  %v2072_v42 = vpop.f32.mrf.mxu0  ;;  %v1568_v60 = vadd.f32 %v8839_v29, %v15474_v58 }
 0x35f   : > { %v2278_v43 = vpop.f32.mrf.mxu1  ;;  %v2166_v45 = vadd.f32 %v2072_v42, %v1566_v4 }
 0x360   : > { %v9246_v53 = vadd.f32 %v2278_v43, %v8837_v7 }
 0x361   : > { %7063 = vmatmul.msk.bf16.gmra.mxu3 %vm856_vm4, %v8384_v21  ;;  %7013 = vmatmul.msk.bf16.gmra.mxu0 %vm856_vm4, %v15472_v34  ;;  %v15477_v21 = vld [vmem:[#allocation116_spill] sm:$0xff] }
 0x362   : > { %15471 = vst [vmem:[#allocation57_spill] sm:$0xff] %v9246_v53  ;;  %7029 = vmatmul.msk.bf16.gmra.mxu1 %vm856_vm4, %v15472_v34  ;;  %7045 = vmatmul.msk.bf16.gmra.mxu2 %vm856_vm4, %v15472_v34  ;;  %v15476_v34 = vld [vmem:[#allocation98_spill] sm:$0xff] }
 0x364   : > { %v2456_v13 = vpop.f32.mrf.mxu3 }
 0x365   : > { %v9256_v36 = vadd.f32 %v2456_v13, %v2166_v45  ;;  %v2367_v7 = vpop.f32.mrf.mxu2  ;;  %v1571_v45 = vadd.f32 %v15477_v21, %v15476_v34 }
 0x366   : > { %v9261_v43 = vadd.f32 %v2367_v7, %v8834_v35  ;;  %v2074_v15 = vpop.f32.mrf.mxu0 }
 0x367   : > { %15473 = vst [vmem:[#allocation52_spill] sm:$0xff] %v9256_v36  ;;  %v2280_v25 = vpop.f32.mrf.mxu1  ;;  %v2169_v17 = vadd.f32 %v2074_v15, %v1568_v60  ;;  %v15478_v36 = vld [vmem:[#allocation92_spill] sm:$0xff] }
 0x368   : > { %v9264_v4 = vadd.f32 %v2280_v25, %v15475_v26  ;;  %v15480_v60 = vld [vmem:[#allocation8_spill] sm:$0xff] }
 0x36c   : > { %v2458_v0 = vpop.f32.mrf.mxu3 }
 0x36d   : > { %v9266_v42 = vadd.f32 %v2458_v0, %v2169_v17  ;;  %v2369_v13 = vpop.f32.mrf.mxu2 }
 0x36e   : > { %v9271_v53 = vadd.f32 %v2369_v13, %v15478_v36  ;;  %v2077_v29 = vpop.f32.mrf.mxu0  ;;  %v15482_v36 = vld [vmem:[#allocation100_spill] sm:$0xff] }
 0x36f   : > { %v2283_v58 = vpop.f32.mrf.mxu1  ;;  %v2172_v35 = vadd.f32 %v2077_v29, %v1571_v45  ;;  %v1573_v15 = vadd.f32 %v8861_v24, %v15482_v36  ;;  %v15483_v45 = vld [vmem:[#allocation117_spill] sm:$0xff] }
 0x370   : > { %v9274_v7 = vadd.f32 %v2283_v58, %v8859_v52 }
 0x371   : > { %7064 = vmatmul.msk.bf16.gmra.mxu3 %vm856_vm4, %v8413_v37  ;;  %7014 = vmatmul.msk.bf16.gmra.mxu0 %vm856_vm4, %v15480_v60  ;;  %v15485_v37 = vld [vmem:[#allocation118_spill] sm:$0xff] }
 0x372   : > { %15479 = vst [vmem:[#allocation3_spill] sm:$0xff] %v9274_v7  ;;  %7030 = vmatmul.msk.bf16.gmra.mxu1 %vm856_vm4, %v15480_v60  ;;  %7046 = vmatmul.msk.bf16.gmra.mxu2 %vm856_vm4, %v15480_v60  ;;  %v15484_v60 = vld [vmem:[#allocation102_spill] sm:$0xff] }
 0x374   : > { %v2461_v21 = vpop.f32.mrf.mxu3 }
 0x375   : > { %v9284_v34 = vadd.f32 %v2461_v21, %v2172_v35  ;;  %v2372_v52 = vpop.f32.mrf.mxu2  ;;  %v1576_v35 = vadd.f32 %v15485_v37, %v15484_v60 }
 0x376   : > { %v9289_v25 = vadd.f32 %v2372_v52, %v8856_v48  ;;  %v2079_v17 = vpop.f32.mrf.mxu0 }
 0x377   : > { %15481 = vst [vmem:[#allocation76_spill] sm:$0xff] %v9284_v34  ;;  %v2285_v26 = vpop.f32.mrf.mxu1  ;;  %v2175_v0 = vadd.f32 %v2079_v17, %v1573_v15  ;;  %v15486_v34 = vld [vmem:[#allocation97_spill] sm:$0xff] }
 0x378   : > { %v9292_v13 = vadd.f32 %v2285_v26, %v15483_v45  ;;  %v15488_v15 = vld [vmem:[#allocation9_spill] sm:$0xff] }
 0x37c   : > { %v2463_v29 = vpop.f32.mrf.mxu3 }
 0x37d   : > { %v9294_v58 = vadd.f32 %v2463_v29, %v2175_v0  ;;  %v2374_v21 = vpop.f32.mrf.mxu2 }
 0x37e   : > { %v9299_v7 = vadd.f32 %v2374_v21, %v15486_v34  ;;  %v2082_v24 = vpop.f32.mrf.mxu0  ;;  %v15490_v34 = vld [vmem:[#allocation104_spill] sm:$0xff] }
 0x37f   : > { %v2288_v36 = vpop.f32.mrf.mxu1  ;;  %v2178_v48 = vadd.f32 %v2082_v24, %v1576_v35  ;;  %v1578_v17 = vadd.f32 %v8883_v40, %v15490_v34  ;;  %v15491_v35 = vld [vmem:[#allocation119_spill] sm:$0xff] }
 0x380   : > { %v9302_v52 = vadd.f32 %v2288_v36, %v8881_v16 }
 0x381   : > { %7065 = vmatmul.msk.bf16.gmra.mxu3 %vm856_vm4, %v8442_v33  ;;  %7015 = vmatmul.msk.bf16.gmra.mxu0 %vm856_vm4, %v15488_v15  ;;  %v15493_v33 = vld [vmem:[#allocation120_spill] sm:$0xff] }
 0x382   : > { %15487 = vst [vmem:[#allocation58_spill] sm:$0xff] %v9302_v52  ;;  %7031 = vmatmul.msk.bf16.gmra.mxu1 %vm856_vm4, %v15488_v15  ;;  %7047 = vmatmul.msk.bf16.gmra.mxu2 %vm856_vm4, %v15488_v15  ;;  %v15492_v15 = vld [vmem:[#allocation106_spill] sm:$0xff] }
 0x384   : > { %v2466_v37 = vpop.f32.mrf.mxu3 }
 0x385   : > { %v9312_v60 = vadd.f32 %v2466_v37, %v2178_v48  ;;  %v2377_v16 = vpop.f32.mrf.mxu2  ;;  %v1581_v48 = vadd.f32 %v15493_v33, %v15492_v15 }
 0x386   : > { %v9317_v26 = vadd.f32 %v2377_v16, %v8878_v1  ;;  %v2084_v0 = vpop.f32.mrf.mxu0 }
 0x387   : > { %15489 = vst [vmem:[#allocation54_spill] sm:$0xff] %v9312_v60  ;;  %v2290_v45 = vpop.f32.mrf.mxu1  ;;  %v2181_v29 = vadd.f32 %v2084_v0, %v1578_v17  ;;  %v15494_v60 = vld [vmem:[#allocation101_spill] sm:$0xff]  ;;  %v15495_v17 = vld [vmem:[#allocation10_spill] sm:$0xff] }
 0x388   : > { %v9320_v21 = vadd.f32 %v2290_v45, %v15491_v35  ;;  %v15498_v45 = vld [vmem:[#allocation121_spill] sm:$0xff] }
 0x38c   : > { %v2468_v24 = vpop.f32.mrf.mxu3 }
 0x38d   : > { %v9322_v36 = vadd.f32 %v2468_v24, %v2181_v29  ;;  %v2379_v37 = vpop.f32.mrf.mxu2 }
 0x38e   : > { %v9327_v52 = vadd.f32 %v2379_v37, %v15494_v60  ;;  %v2087_v40 = vpop.f32.mrf.mxu0  ;;  %v15497_v60 = vld [vmem:[#allocation108_spill] sm:$0xff] }
 0x38f   : > { %v2293_v34 = vpop.f32.mrf.mxu1  ;;  %v2184_v1 = vadd.f32 %v2087_v40, %v1581_v48  ;;  %v1583_v0 = vadd.f32 %v8905_v57, %v15497_v60 }
 0x390   : > { %v9330_v16 = vadd.f32 %v2293_v34, %v8903_v22 }
 0x391   : > { %7066 = vmatmul.msk.bf16.gmra.mxu3 %vm856_vm4, %v8471_v6  ;;  %7016 = vmatmul.msk.bf16.gmra.mxu0 %vm856_vm4, %v15495_v17 }
 0x392   : > { %7032 = vmatmul.msk.bf16.gmra.mxu1 %vm856_vm4, %v15495_v17  ;;  %7048 = vmatmul.msk.bf16.gmra.mxu2 %vm856_vm4, %v15495_v17 }
 0x394   : > { %v2471_v33 = vpop.f32.mrf.mxu3 }
 0x395   : > { %v9340_v15 = vadd.f32 %v2471_v33, %v2184_v1  ;;  %v2382_v22 = vpop.f32.mrf.mxu2 }
 0x396   : > { %v9345_v29 = vadd.f32 %v2382_v22, %v15498_v45  ;;  %v2089_v35 = vpop.f32.mrf.mxu0 }
 0x397   : > { %15496 = vst [vmem:[#allocation66_spill] sm:$0xff] %v9340_v15  ;;  %v2295_v24 = vpop.f32.mrf.mxu1  ;;  %v2187_v48 = vadd.f32 %v2089_v35, %v1583_v0  ;;  %v15499_v0 = vld [vmem:[#allocation13_spill] sm:$0xff] }
 0x398   : > { %v9348_v37 = vadd.f32 %v2295_v24, %v8913_v23 }
 0x39c   : > { %v2473_v40 = vpop.f32.mrf.mxu3 }
 0x39d   : > { %v9350_v34 = vadd.f32 %v2473_v40, %v2187_v48  ;;  %v2384_v17 = vpop.f32.mrf.mxu2 }
 0x39e   : > { %v9353_v1 = vadd.f32 %v2384_v17, %v8908_v28  ;;  %v2624_v33 = vpop.f32.mrf.mxu0 }
 0x39f   : > { %v2713_v15 = vpop.f32.mrf.mxu1  ;;  %v2882_v57 = vadd.f32 %v2624_v33, %v8916_v50  ;;  %v15501_v50 = vld [vmem:[#allocation105_spill] sm:$0xff]  ;;  %v15505_v33 = vld [vmem:[#allocation11_spill] sm:$0xff] }
 0x3a0   : > { %v9357_v60 = vadd.f32 %v2713_v15, %v8929_v10 }
 0x3a1   : > { %7067 = vmatmul.msk.bf16.gmra.mxu3 %vm856_vm4, %v8503_v11  ;;  %7017 = vmatmul.msk.bf16.gmra.mxu0 %vm856_vm4, %v15499_v0 }
 0x3a2   : > { %7033 = vmatmul.msk.bf16.gmra.mxu1 %vm856_vm4, %v15499_v0  ;;  %7049 = vmatmul.msk.bf16.gmra.mxu2 %vm856_vm4, %v15499_v0 }
 0x3a4   : > { %v3014_v28 = vpop.f32.mrf.mxu3 }
 0x3a5   : > { %v9367_v23 = vadd.f32 %v3014_v28, %v2882_v57  ;;  %v2802_v17 = vpop.f32.mrf.mxu2 }
 0x3a6   : > { %v9370_v22 = vadd.f32 %v2802_v17, %v15501_v50  ;;  %v2626_v10 = vpop.f32.mrf.mxu0  ;;  %v15508_v17 = vld [vmem:[#allocation18_spill] sm:$0xff] }
 0x3a7   : > { %15500 = vst [vmem:[#allocation79_spill] sm:$0xff] %v9367_v23  ;;  %v2715_v15 = vpop.f32.mrf.mxu1  ;;  %v2885_v45 = vadd.f32 %v2626_v10, %v8932_v2  ;;  %v15507_v23 = vld [vmem:[#allocation12_spill] sm:$0xff]  ;;  %v15511_v2 = vld [vmem:[#allocation19_spill] sm:$0xff] }
 0x3a8   : > { %15502 = vst [vmem:[#allocation68_spill] sm:$0xff] %v9370_v22  ;;  %v9374_v35 = vadd.f32 %v2715_v15, %v8939_v38  ;;  %v15510_v22 = vld [vmem:[#allocation111_spill] sm:$0xff] }
 0x3aa   : > { %15503 = vst [vmem:[#allocation53_spill] sm:$0xff] %v9374_v35 }
 0x3ac   : > { %v3016_v24 = vpop.f32.mrf.mxu3 }
 0x3ad   : > { %v9376_v48 = vadd.f32 %v3016_v24, %v2885_v45  ;;  %v2804_v40 = vpop.f32.mrf.mxu2 }
 0x3ae   : > { %v9379_v0 = vadd.f32 %v2804_v40, %v15505_v33  ;;  %v2629_v57 = vpop.f32.mrf.mxu0  ;;  %v15514_v33 = vld [vmem:[#allocation112_spill] sm:$0xff] }
 0x3af   : > { %15504 = vst [vmem:[#allocation62_spill] sm:$0xff] %v9376_v48  ;;  %v2718_v28 = vpop.f32.mrf.mxu1  ;;  %v2888_v11 = vadd.f32 %v2629_v57, %v15507_v23  ;;  %v15513_v23 = vld [vmem:[#allocation15_spill] sm:$0xff] }
 0x3b0   : > { %15506 = vst [vmem:[#allocation81_spill] sm:$0xff] %v9379_v0  ;;  %v9383_v50 = vadd.f32 %v2718_v28, %v15508_v17  ;;  %v15515_v28 = vld [vmem:[#allocation24_spill] sm:$0xff]  ;;  %v15518_v0 = vld [vmem:[#allocation122_spill] sm:$0xff] }
 0x3b1   : > { %7068 = vmatmul.msk.bf16.gmra.mxu3 %vm856_vm4, %v15510_v22  ;;  %7018 = vmatmul.msk.bf16.gmra.mxu0 %vm856_vm4, %v15511_v2 }
 0x3b2   : > { %15509 = vst [vmem:[#allocation71_spill] sm:$0xff] %v9383_v50  ;;  %7034 = vmatmul.msk.bf16.gmra.mxu1 %vm856_vm4, %v15511_v2  ;;  %7050 = vmatmul.msk.bf16.gmra.mxu2 %vm856_vm4, %v15511_v2 }
 0x3b4   : > { %v3019_v38 = vpop.f32.mrf.mxu3 }
 0x3b5   : > { %v9393_v10 = vadd.f32 %v3019_v38, %v2888_v11  ;;  %v2807_v15 = vpop.f32.mrf.mxu2 }
 0x3b6   : > { %v9396_v45 = vadd.f32 %v2807_v15, %v15513_v23  ;;  %v2631_v24 = vpop.f32.mrf.mxu0  ;;  %v15522_v23 = vld [vmem:[#allocation23_spill] sm:$0xff] }
 0x3b7   : > { %15512 = vst [vmem:[#allocation69_spill] sm:$0xff] %v9393_v10  ;;  %v2720_v40 = vpop.f32.mrf.mxu1  ;;  %v2891_v57 = vadd.f32 %v2631_v24, %v15514_v33  ;;  %v15520_v10 = vld [vmem:[#allocation113_spill] sm:$0xff]  ;;  %v15523_v24 = vld [vmem:[#allocation30_spill] sm:$0xff] }
 0x3b8   : > { %v9400_v17 = vadd.f32 %v2720_v40, %v15515_v28 }
 0x3ba   : > { %15516 = vst [vmem:[#allocation74_spill] sm:$0xff] %v9400_v17 }
 0x3bc   : > { %v3021_v22 = vpop.f32.mrf.mxu3 }
 0x3bd   : > { %v9402_v50 = vadd.f32 %v3021_v22, %v2891_v57  ;;  %v2809_v48 = vpop.f32.mrf.mxu2  ;;  %v15527_v57 = vld [vmem:[#allocation14_spill] sm:$0xff] }
 0x3be   : > { %v9405_v2 = vadd.f32 %v2809_v48, %v15518_v0  ;;  %v2634_v11 = vpop.f32.mrf.mxu0 }
 0x3bf   : > { %15517 = vst [vmem:[#allocation84_spill] sm:$0xff] %v9402_v50  ;;  %v2723_v38 = vpop.f32.mrf.mxu1  ;;  %v2894_v35 = vadd.f32 %v2634_v11, %v15520_v10  ;;  %v15525_v10 = vld [vmem:[#allocation110_spill] sm:$0xff]  ;;  %v15528_v11 = vld [vmem:[#allocation16_spill] sm:$0xff] }
 0x3c0   : > { %15519 = vst [vmem:[#allocation77_spill] sm:$0xff] %v9405_v2  ;;  %v9409_v15 = vadd.f32 %v2723_v38, %v8981_v20  ;;  %v15531_v2 = vld [vmem:[#allocation29_spill] sm:$0xff] }
 0x3c1   : > { %7069 = vmatmul.msk.bf16.gmra.mxu3 %vm856_vm4, %v15522_v23  ;;  %7019 = vmatmul.msk.bf16.gmra.mxu0 %vm856_vm4, %v15523_v24 }
 0x3c2   : > { %15521 = vst [vmem:[#allocation72_spill] sm:$0xff] %v9409_v15  ;;  %7035 = vmatmul.msk.bf16.gmra.mxu1 %vm856_vm4, %v15523_v24  ;;  %7051 = vmatmul.msk.bf16.gmra.mxu2 %vm856_vm4, %v15523_v24 }
 0x3c4   : > { %v3024_v0 = vpop.f32.mrf.mxu3 }
 0x3c5   : > { %v9419_v22 = vadd.f32 %v3024_v0, %v2894_v35  ;;  %v2812_v48 = vpop.f32.mrf.mxu2 }
 0x3c6   : > { %v9422_v40 = vadd.f32 %v2812_v48, %v15525_v10  ;;  %v2636_v20 = vpop.f32.mrf.mxu0  ;;  %v15534_v48 = vld [vmem:[#allocation35_spill] sm:$0xff] }
 0x3c7   : > { %15524 = vst [vmem:[#allocation87_spill] sm:$0xff] %v9419_v22  ;;  %v2725_v33 = vpop.f32.mrf.mxu1  ;;  %v2897_v28 = vadd.f32 %v2636_v20, %v15527_v57  ;;  %v15533_v22 = vld [vmem:[#allocation17_spill] sm:$0xff] }
 0x3c8   : > { %15526 = vst [vmem:[#allocation89_spill] sm:$0xff] %v9422_v40  ;;  %v9426_v38 = vadd.f32 %v2725_v33, %v15528_v11  ;;  %v15536_v40 = vld [vmem:[#allocation26_spill] sm:$0xff]  ;;  %v15537_v20 = vld [vmem:[#allocation41_spill] sm:$0xff] }
 0x3c9   : > { %v15540_v11 = vld [vmem:[#allocation22_spill] sm:$0xff] }
 0x3ca   : > { %15529 = vst [vmem:[#allocation82_spill] sm:$0xff] %v9426_v38 }
 0x3cc   : > { %v3026_v23 = vpop.f32.mrf.mxu3 }
 0x3cd   : > { %v9428_v15 = vadd.f32 %v3026_v23, %v2897_v28  ;;  %v2814_v50 = vpop.f32.mrf.mxu2 }
 0x3ce   : > { %v9431_v24 = vadd.f32 %v2814_v50, %v15531_v2  ;;  %v2639_v35 = vpop.f32.mrf.mxu0 }
 0x3cf   : > { %15530 = vst [vmem:[#allocation78_spill] sm:$0xff] %v9428_v15  ;;  %v2728_v0 = vpop.f32.mrf.mxu1  ;;  %v2900_v17 = vadd.f32 %v2639_v35, %v15533_v22  ;;  %v15539_v22 = vld [vmem:[#allocation25_spill] sm:$0xff] }
 0x3d0   : > { %15532 = vst [vmem:[#allocation91_spill] sm:$0xff] %v9431_v24  ;;  %v9435_v10 = vadd.f32 %v2728_v0, %v15534_v48  ;;  %v15541_v0 = vld [vmem:[#allocation40_spill] sm:$0xff] }
 0x3d1   : > { %7070 = vmatmul.msk.bf16.gmra.mxu3 %vm856_vm4, %v15536_v40  ;;  %7020 = vmatmul.msk.bf16.gmra.mxu0 %vm856_vm4, %v15537_v20  ;;  %v15544_v24 = vld [vmem:[#allocation20_spill] sm:$0xff] }
 0x3d2   : > { %15535 = vst [vmem:[#allocation85_spill] sm:$0xff] %v9435_v10  ;;  %7036 = vmatmul.msk.bf16.gmra.mxu1 %vm856_vm4, %v15537_v20  ;;  %7052 = vmatmul.msk.bf16.gmra.mxu2 %vm856_vm4, %v15537_v20 }
 0x3d4   : > { %v3029_v50 = vpop.f32.mrf.mxu3 }
 0x3d5   : > { %v9445_v2 = vadd.f32 %v3029_v50, %v2900_v17  ;;  %v2817_v23 = vpop.f32.mrf.mxu2 }
 0x3d6   : > { %v9448_v33 = vadd.f32 %v2817_v23, %v15539_v22  ;;  %v2641_v57 = vpop.f32.mrf.mxu0  ;;  %v15548_v22 = vld [vmem:[#allocation51_spill] sm:$0xff] }
 0x3d7   : > { %15538 = vst [vmem:[#allocation83_spill] sm:$0xff] %v9445_v2  ;;  %v2730_v28 = vpop.f32.mrf.mxu1  ;;  %v2903_v35 = vadd.f32 %v2641_v57, %v15540_v11  ;;  %v15546_v2 = vld [vmem:[#allocation28_spill] sm:$0xff] }
 0x3d8   : > { %v9452_v48 = vadd.f32 %v2730_v28, %v15541_v0 }
 0x3da   : > { %15542 = vst [vmem:[#allocation114_spill] sm:$0xff] %v9452_v48 }
 0x3dc   : > { %v3031_v40 = vpop.f32.mrf.mxu3 }
 0x3dd   : > { %v9454_v10 = vadd.f32 %v3031_v40, %v2903_v35  ;;  %v2819_v15 = vpop.f32.mrf.mxu2 }
 0x3de   : > { %v9457_v20 = vadd.f32 %v2819_v15, %v15544_v24  ;;  %v2644_v17 = vpop.f32.mrf.mxu0 }
 0x3df   : > { %15543 = vst [vmem:[#allocation94_spill] sm:$0xff] %v9454_v10  ;;  %v2733_v50 = vpop.f32.mrf.mxu1  ;;  %v2906_v38 = vadd.f32 %v2644_v17, %v15546_v2  ;;  %v15550_v2 = vld [vmem:[#allocation27_spill] sm:$0xff] }
 0x3e0   : > { %15545 = vst [vmem:[#allocation115_spill] sm:$0xff] %v9457_v20  ;;  %v9461_v23 = vadd.f32 %v2733_v50, %v9033_v59 }
 0x3e1   : > { %7071 = vmatmul.msk.bf16.gmra.mxu3 %vm856_vm4, %v15404_v27  ;;  %7021 = vmatmul.msk.bf16.gmra.mxu0 %vm856_vm4, %v15548_v22 }
 0x3e2   : > { %15547 = vst [vmem:[#allocation88_spill] sm:$0xff] %v9461_v23  ;;  %7037 = vmatmul.msk.bf16.gmra.mxu1 %vm856_vm4, %v15548_v22  ;;  %7053 = vmatmul.msk.bf16.gmra.mxu2 %vm856_vm4, %v15548_v22 }
 0x3e4   : > { %v3034_v15 = vpop.f32.mrf.mxu3 }
 0x3e5   : > { %v9471_v24 = vadd.f32 %v3034_v15, %v2906_v38  ;;  %v2822_v40 = vpop.f32.mrf.mxu2 }
 0x3e6   : > { %v9474_v57 = vadd.f32 %v2822_v40, %v15550_v2  ;;  %v2646_v59 = vpop.f32.mrf.mxu0  ;;  %v15555_v40 = vld [vmem:[#allocation31_spill] sm:$0xff] }
 0x3e7   : > { %15549 = vst [vmem:[#allocation96_spill] sm:$0xff] %v9471_v24  ;;  %v2735_v28 = vpop.f32.mrf.mxu1  ;;  %v2909_v11 = vadd.f32 %v2646_v59, %v9036_v62  ;;  %v15556_v24 = vld [vmem:[#allocation34_spill] sm:$0xff]  ;;  %v15558_v62 = vld [vmem:[#allocation59_spill] sm:$0xff]  ;;  %v408_v59 = vld [vmem:[%s7662_s18 + $0xc4] sm:$0xf] }
 0x3e8   : > { %15551 = vst [vmem:[#allocation93_spill] sm:$0xff] %v9474_v57  ;;  %v9478_v35 = vadd.f32 %v2735_v28, %v9043_v56  ;;  %v409_v57 = vld [vmem:[%s7662_s18 + $0xc8] sm:$0x1] }
 0x3ea   : > { %15552 = vst [vmem:[#allocation98_spill] sm:$0xff] %v9478_v35 }
 0x3ec   : > { %v3036_v0 = vpop.f32.mrf.mxu3 }
 0x3ed   : > { %v9480_v17 = vadd.f32 %v3036_v0, %v2909_v11  ;;  %v2824_v50 = vpop.f32.mrf.mxu2  ;;  %v15560_v0 = vld [vmem:[#allocation46_spill] sm:$0xff] }
 0x3ee   : > { %v9483_v38 = vadd.f32 %v2824_v50, %v9038_v9  ;;  %v2649_v15 = vpop.f32.mrf.mxu0  ;;  %v407_v9 = vld [vmem:[%s7662_s18 + $0xc0] sm:$0xf] }
 0x3ef   : > { %15553 = vst [vmem:[#allocation116_spill] sm:$0xff] %v9480_v17  ;;  %v2738_v22 = vpop.f32.mrf.mxu1  ;;  %v2912_v2 = vadd.f32 %v2649_v15, %v15555_v40  ;;  %v2576_v11 = vshll.u32 %v407_v9, 16 }
 0x3f0   : > { %15554 = vst [vmem:[#allocation92_spill] sm:$0xff] %v9483_v38  ;;  %v9487_v27 = vadd.f32 %v2738_v22, %v15556_v24  ;;  %v2573_v24 = vshrl.u32 %v407_v9, 16 }
 0x3f1   : > { %7072 = vmatmul.msk.bf16.gmra.mxu3 %vm856_vm4, %v8668_v12  ;;  %7022 = vmatmul.msk.bf16.gmra.mxu0 %vm856_vm4, %v15558_v62  ;;  %v2582_v12 = vshll.u32 %v408_v59, 16  ;;  %v2578_v35 = vrot.slane %v2576_v11, 5 }
 0x3f2   : > { %15557 = vst [vmem:[#allocation100_spill] sm:$0xff] %v9487_v27  ;;  %7038 = vmatmul.msk.bf16.gmra.mxu1 %vm856_vm4, %v15558_v62  ;;  %7054 = vmatmul.msk.bf16.gmra.mxu2 %vm856_vm4, %v15558_v62  ;;  %v2586_v27 = vshrl.u32 %v408_v59, 16  ;;  %v2575_v38 = vrot.slane %v2573_v24, 4 }
 0x3f4   : > { %v3039_v56 = vpop.f32.mrf.mxu3 }
 0x3f5   : > { %v9499_v28 = vadd.f32 %v3039_v56, %v2912_v2  ;;  %v2827_v22 = vpop.f32.mrf.mxu2  ;;  %v2584_v2 = vrot.slane %v2582_v12, 5  ;;  %v2588_v56 = vrot.slane %v2586_v27, 4 }
 0x3f6   : > { %v9502_v50 = vadd.f32 %v2827_v22, %v15560_v0  ;;  %v2651_v15 = vpop.f32.mrf.mxu0  ;;  %v2579_v22 = vor.u32 %v2578_v35, %v2575_v38  ;;  %v2981_v0 = vrot.slane %v408_v59, 5  ;;  %v15562_v35 = vld [vmem:[#allocation65_spill] sm:$0xff] }
 0x3f7   : > { %15559 = vst [vmem:[#allocation117_spill] sm:$0xff] %v9499_v28  ;;  %v2740_v40 = vpop.f32.mrf.mxu1  ;;  %v2915_v17 = vadd.f32 %v2651_v15, %v9065_v63  ;;  %v2589_v15 = vor.u32 %v2588_v56, %v2584_v2  ;;  %v15565_v56 = vld [vmem:[#allocation21_spill] sm:$0xff] }
 0x3f8   : > { %15561 = vst [vmem:[#allocation102_spill] sm:$0xff] %v9502_v50  ;;  %v9506_v62 = vadd.f32 %v2740_v40, %v9072_v51  ;;  %v3378_v50 = vld.sshfl [vmem:[#allocation1 + $0x8] sm:$0xff pattern:$0x73625140]  ;;  %v2592_v51 = vshll.u32 %v409_v57, 16 }
 0x3f9   : > { %v3385_v24 = vsel %vm905_vm0, %v3378_v50, 0 }
 0x3fa   : > { %3485 = vmatpush.bf16.msra.mxu3 %v3385_v24  ;;  %v9584_v24 = vld [vmem:[%s7662_s18 + $0x18] sm:$0xff] }
 0x3fb   : > { %15579 = vst [vmem:[#allocation120_spill] sm:$0xff] %v9584_v24 }
 0x3fc   : > { %v3041_v28 = vpop.f32.mrf.mxu3 }
 0x3fd   : > { %v9509_v23 = vadd.f32 %v3041_v28, %v2915_v17  ;;  %v2829_v10 = vpop.f32.mrf.mxu2  ;;  %v2984_v17 = vrot.slane %v409_v57, 5 }
 0x3fe   : > { %v9512_v20 = vadd.f32 %v2829_v10, %v9067_v8  ;;  %v2654_v48 = vpop.f32.mrf.mxu0  ;;  %v7057_v8 = vrot.slane %v407_v9, 9  ;;  %v2983_v10 = vrot.slane %v2981_v0, 4 }
 0x3ff   : > { %v2743_v63 = vpop.f32.mrf.mxu1  ;;  %v2918_v12 = vadd.f32 %v2654_v48, %v9076_v19  ;;  %v2580_v19 = vrot.slane %v2579_v22, 4  ;;  %v2590_v48 = vrot.slane %v2589_v15, 4 }
 0x400   : > { %v9517_v27 = vadd.f32 %v2743_v63, %v9089_v54  ;;  %v2594_v54 = vrot.slane %v2592_v51, 5  ;;  %v2982_v50 = vsel %vm8175_vm7, %v7057_v8, %v2981_v0  ;;  %v2985_v40 = vsel %vm8175_vm7, %v2983_v10, %v2984_v17 }
 0x401   : > { %7073 = vmatmul.msk.bf16.gmra.mxu3 %vm856_vm4, %v8702_v39  ;;  %7023 = vmatmul.msk.bf16.gmra.mxu0 %vm856_vm4, %v15562_v35  ;;  %v2585_v22 = vsel %vm7683_vm3, %v2580_v19, %v2584_v2  ;;  %v2988_v0 = vunpack.c.l.b16 %v2982_v50  ;;  %v2989_v8 = vunpack.c.l.b16 %v2985_v40  ;;  %v15570_v2 = vld [vmem:[#allocation33_spill] sm:$0xff] }
 0x402   : > { %7039 = vmatmul.msk.bf16.gmra.mxu1 %vm856_vm4, %v15562_v35  ;;  %7055 = vmatmul.msk.bf16.gmra.mxu2 %vm856_vm4, %v15562_v35  ;;  %v2595_v15 = vsel %vm7683_vm3, %v2590_v48, %v2594_v54  ;;  %v2598_v11 = vunpack.c.l.b16 %v2585_v22  ;;  %v15571_v54 = vld [vmem:[#allocation38_spill] sm:$0xff] }
 0x403   : > { %v2599_v10 = vunpack.c.l.b16 %v2595_v15 }
 0x404   : > { %v3044_v38 = vpop.f32.mrf.mxu3 }
 0x405   : > { %v9527_v59 = vadd.f32 %v3044_v38, %v2918_v12  ;;  %v2832_v28 = vpop.f32.mrf.mxu2  ;;  %v15567_v12 = vld [vmem:[#allocation50_spill] sm:$0xff] }
 0x406   : > { %v9534_v9 = vadd.f32 %v2832_v28, %v15565_v56  ;;  %v2656_v57 = vpop.f32.mrf.mxu0  ;;  %v9546_v56 = vpack.c.b16 %v2989_v8, %v2988_v0 }
 0x407   : > { %15563 = vst [vmem:[#allocation118_spill] sm:$0xff] %v9527_v59  ;;  %v2745_v63 = vpop.f32.mrf.mxu1  ;;  %v2921_v51 = vadd.f32 %v2656_v57, %v9092_v44  ;;  %v9548_v59 = vpack.c.b16 %v2599_v10, %v2598_v11 }
 0x408   : > { %v9542_v38 = vadd.f32 %v2745_v63, %v15567_v12  ;;  %15568 = vst [vmem:[#allocation97_spill] sm:$0xff] %v9546_v56  ;;  %v15572_v63 = vld [vmem:[#allocation36_spill] sm:$0xff] }
 0x409   : > { %15569 = vst [vmem:[#allocation104_spill] sm:$0xff] %v9548_v59  ;;  %v15573_v12 = vld [vmem:[#allocation56_spill] sm:$0xff] }
 0x40c   : > { %v3046_v17 = vpop.f32.mrf.mxu3 }
 0x40d   : > { %v9544_v28 = vadd.f32 %v3046_v17, %v2921_v51  ;;  %v2834_v35 = vpop.f32.mrf.mxu2 }
 0x40e   : > { %v9551_v19 = vadd.f32 %v2834_v35, %v15570_v2  ;;  %v2659_v48 = vpop.f32.mrf.mxu0  ;;  %v15575_v2 = vld [vmem:[#allocation37_spill] sm:$0xff] }
 0x40f   : > { %v2748_v44 = vpop.f32.mrf.mxu1  ;;  %v2924_v57 = vadd.f32 %v2659_v48, %v15571_v54 }
 0x410   : > { %v9555_v50 = vadd.f32 %v2748_v44, %v9115_v5 }
 0x411   : > { %7074 = vmatmul.msk.bf16.gmra.mxu3 %vm856_vm4, %v9546_v56  ;;  %7024 = vmatmul.msk.bf16.gmra.mxu0 %vm856_vm4, %v9548_v59 }
 0x412   : > { %7040 = vmatmul.msk.bf16.gmra.mxu1 %vm856_vm4, %v9548_v59  ;;  %7056 = vmatmul.msk.bf16.gmra.mxu2 %vm856_vm4, %v9548_v59 }
 0x414   : > { %v3049_v35 = vpop.f32.mrf.mxu3 }
 0x415   : > { %v9565_v11 = vadd.f32 %v3049_v35, %v2924_v57  ;;  %v2837_v40 = vpop.f32.mrf.mxu2  ;;  %v15576_v57 = vld [vmem:[#allocation42_spill] sm:$0xff] }
 0x416   : > { %v9568_v5 = vadd.f32 %v2837_v40, %v15572_v63  ;;  %v2661_v22 = vpop.f32.mrf.mxu0  ;;  %v15577_v40 = vld [vmem:[#allocation61_spill] sm:$0xff] }
 0x417   : > { %v2750_v15 = vpop.f32.mrf.mxu1  ;;  %v2927_v51 = vadd.f32 %v2661_v22, %v9118_v18  ;;  %v15580_v18 = vld [vmem:[#allocation75_spill] sm:$0xff] }
 0x418   : > { %v9572_v0 = vadd.f32 %v2750_v15, %v15573_v12  ;;  %v15582_v12 = vld [vmem:[#allocation39_spill] sm:$0xff] }
 0x41c   : > { %v3051_v8 = vpop.f32.mrf.mxu3 }
 0x41d   : > { %v9574_v10 = vadd.f32 %v3051_v8, %v2927_v51  ;;  %v2839_v17 = vpop.f32.mrf.mxu2 }
 0x41e   : > { %v9577_v48 = vadd.f32 %v2839_v17, %v15575_v2  ;;  %v2664_v44 = vpop.f32.mrf.mxu0 }
 0x41f   : > { %15574 = vst [vmem:[#allocation119_spill] sm:$0xff] %v9574_v10  ;;  %v2753_v54 = vpop.f32.mrf.mxu1  ;;  %v2930_v35 = vadd.f32 %v2664_v44, %v15576_v57 }
 0x420   : > { %v9581_v63 = vadd.f32 %v2753_v54, %v15577_v40  ;;  %v15584_v54 = vld [vmem:[#allocation63_spill] sm:$0xff] }
 0x421   : > { %7128 = vmatmul.msk.bf16.vlgmr.msra.gmra.mxu3 %vm856_vm4, %v9584_v24  ;;  %7075 = vmatmul.msk.bf16.vlgmr.msra.gmra.mxu0 %vm856_vm4, %v15580_v18 }
 0x422   : > { %15578 = vst [vmem:[#allocation106_spill] sm:$0xff] %v9581_v63  ;;  %7091 = vmatmul.msk.bf16.vlgmr.msra.gmra.mxu1 %vm856_vm4, %v15580_v18  ;;  %7112 = vmatmul.msk.bf16.vlgmr.msra.gmra.mxu2 %vm856_vm4, %v9584_v24  ;;  %v15585_v24 = vld [vmem:[#allocation45_spill] sm:$0xff] }
 0x424   : > { %v3054_v22 = vpop.f32.mrf.mxu3 }
 0x425   : > { %v9594_v15 = vadd.f32 %v3054_v22, %v2930_v35  ;;  %v2842_v51 = vpop.f32.mrf.mxu2 }
 0x426   : > { %v9597_v8 = vadd.f32 %v2842_v51, %v15582_v12  ;;  %v2666_v17 = vpop.f32.mrf.mxu0  ;;  %v15587_v51 = vld [vmem:[#allocation67_spill] sm:$0xff] }
 0x427   : > { %15581 = vst [vmem:[#allocation101_spill] sm:$0xff] %v9594_v15  ;;  %v2755_v2 = vpop.f32.mrf.mxu1  ;;  %v2933_v44 = vadd.f32 %v2666_v17, %v9146_v41  ;;  %v15586_v15 = vld [vmem:[#allocation64_spill] sm:$0xff] }
 0x428   : > { %15583 = vst [vmem:[#allocation108_spill] sm:$0xff] %v9597_v8  ;;  %v9601_v57 = vadd.f32 %v2755_v2, %v15584_v54  ;;  %v9613_v8 = vld [vmem:[%s7662_s18 + $0x24] sm:$0xff]  ;;  %v15589_v41 = vld [vmem:[#allocation80_spill] sm:$0xff] }
 0x429   : > { %15588 = vst [vmem:[#allocation121_spill] sm:$0xff] %v9613_v8  ;;  %v15591_v17 = vld [vmem:[#allocation44_spill] sm:$0xff] }
 0x42c   : > { %v3056_v40 = vpop.f32.mrf.mxu3 }
 0x42d   : > { %v9603_v18 = vadd.f32 %v3056_v40, %v2933_v44  ;;  %v2844_v59 = vpop.f32.mrf.mxu2 }
 0x42e   : > { %v9606_v63 = vadd.f32 %v2844_v59, %v15585_v24  ;;  %v2669_v35 = vpop.f32.mrf.mxu0 }
 0x42f   : > { %v2758_v22 = vpop.f32.mrf.mxu1  ;;  %v2936_v10 = vadd.f32 %v2669_v35, %v15586_v15 }
 0x430   : > { %v9610_v12 = vadd.f32 %v2758_v22, %v15587_v51  ;;  %v3379_v22 = vld.sshfl [vmem:[#allocation1 + $0x10] sm:$0xff pattern:$0x73625140] }
 0x431   : > { %7129 = vmatmul.msk.bf16.gmra.mxu3 %vm856_vm4, %v9613_v8  ;;  %7076 = vmatmul.msk.bf16.gmra.mxu0 %vm856_vm4, %v15589_v41  ;;  %v3387_v51 = vsel %vm905_vm0, %v3379_v22, 0 }
 0x432   : > { %7092 = vmatmul.msk.bf16.gmra.mxu1 %vm856_vm4, %v15589_v41  ;;  %7113 = vmatmul.msk.bf16.gmra.mxu2 %vm856_vm4, %v9613_v8 }
 0x433   : > { %3574 = vmatpush.bf16.msrb.mxu0 %v3387_v51 }
 0x434   : > { %v3059_v59 = vpop.f32.mrf.mxu3 }
 0x435   : > { %v9623_v24 = vadd.f32 %v3059_v59, %v2936_v10  ;;  %v2847_v15 = vpop.f32.mrf.mxu2 }
 0x436   : > { %v9626_v2 = vadd.f32 %v2847_v15, %v15591_v17  ;;  %v2671_v44 = vpop.f32.mrf.mxu0 }
 0x437   : > { %15590 = vst [vmem:[#allocation105_spill] sm:$0xff] %v9623_v24  ;;  %v2760_v54 = vpop.f32.mrf.mxu1  ;;  %v2939_v40 = vadd.f32 %v2671_v44, %v9174_v49  ;;  %v9646_v44 = vld [vmem:[%s7662_s18 + $0x30] sm:$0xff] }
 0x438   : > { %v9630_v35 = vadd.f32 %v2760_v54, %v9182_v47  ;;  %v7160_v47 = vld [vmem:[%s14685_s1 + $0x2a] sm:$0x3f]  ;;  %15594 = vst [vmem:[#allocation18_spill] sm:$0xff] %v9646_v44 }
 0x439   : > { %3782 = vst [vmem:[#allocation1] ss:$4 sm:$0xff] %v7160_v47  ;;  %v15597_v54 = vld [vmem:[#allocation70_spill] sm:$0xff] }
 0x43c   : > { %v3061_v41 = vpop.f32.mrf.mxu3 }
 0x43d   : > { %v9633_v8 = vadd.f32 %v3061_v41, %v2939_v40  ;;  %v2849_v10 = vpop.f32.mrf.mxu2  ;;  %v15595_v41 = vld [vmem:[#allocation86_spill] sm:$0xff] }
 0x43e   : > { %v9636_v59 = vadd.f32 %v2849_v10, %v9177_v61  ;;  %v2674_v15 = vpop.f32.mrf.mxu0 }
 0x43f   : > { %15592 = vst [vmem:[#allocation11_spill] sm:$0xff] %v9633_v8  ;;  %v2763_v17 = vpop.f32.mrf.mxu1  ;;  %v2942_v24 = vadd.f32 %v2674_v15, %v9185_v32  ;;  %v15601_v8 = vld [vmem:[#allocation73_spill] sm:$0xff] }
 0x440   : > { %v9640_v49 = vadd.f32 %v2763_v17, %v9201_v31  ;;  %v3783_v17 = vld.sshfl [vmem:[#allocation1] sm:$0xff pattern:$0x73625140] }
 0x441   : > { %7130 = vmatmul.msk.bf16.gmra.mxu3 %vm856_vm4, %v9646_v44  ;;  %7077 = vmatmul.msk.bf16.gmra.mxu0 %vm856_vm4, %v15595_v41  ;;  %v3789_v47 = vsel %vm905_vm0, %v3783_v17, 0  ;;  %v15606_v17 = vld [vmem:[#allocation55_spill] sm:$0xff] }
 0x442   : > { %15593 = vst [vmem:[#allocation12_spill] sm:$0xff] %v9640_v49  ;;  %7093 = vmatmul.msk.bf16.gmra.mxu1 %vm856_vm4, %v15595_v41  ;;  %7114 = vmatmul.msk.bf16.gmra.mxu2 %vm856_vm4, %v9646_v44 }
 0x443   : > { %3802 = vmatpush.bf16.msrb.mxu1 %v3789_v47 }
 0x444   : > { %v3064_v61 = vpop.f32.mrf.mxu3 }
 0x445   : > { %v9656_v32 = vadd.f32 %v3064_v61, %v2942_v24  ;;  %v2852_v31 = vpop.f32.mrf.mxu2  ;;  %v15599_v61 = vld [vmem:[#allocation48_spill] sm:$0xff] }
 0x446   : > { %v9659_v40 = vadd.f32 %v2852_v31, %v15597_v54  ;;  %v2676_v22 = vpop.f32.mrf.mxu0 }
 0x447   : > { %15596 = vst [vmem:[#allocation15_spill] sm:$0xff] %v9656_v32  ;;  %v2765_v51 = vpop.f32.mrf.mxu1  ;;  %v2945_v10 = vadd.f32 %v2676_v22, %v9204_v30  ;;  %v9676_v22 = vld [vmem:[%s7662_s18 + $0x3c] sm:$0xff] }
 0x448   : > { %15598 = vst [vmem:[#allocation112_spill] sm:$0xff] %v9659_v40  ;;  %v9663_v15 = vadd.f32 %v2765_v51, %v9211_v3  ;;  %v15600_v40 = vld [vmem:[#allocation43_spill] sm:$0xff]  ;;  %v3784_v3 = vld.sshfl [vmem:[#allocation1 + $0x8] sm:$0xff pattern:$0x73625140] }
 0x449   : > { %15603 = vst [vmem:[#allocation122_spill] sm:$0xff] %v9676_v22  ;;  %v15604_v51 = vld [vmem:[#allocation90_spill] sm:$0xff] }
 0x44c   : > { %v3066_v41 = vpop.f32.mrf.mxu3 }
 0x44d   : > { %v9666_v44 = vadd.f32 %v3066_v41, %v2945_v10  ;;  %v2854_v24 = vpop.f32.mrf.mxu2  ;;  %v3791_v41 = vsel %vm905_vm0, %v3784_v3, 0 }
 0x44e   : > { %v9669_v32 = vadd.f32 %v2854_v24, %v15599_v61  ;;  %v2679_v31 = vpop.f32.mrf.mxu0  ;;  %3891 = vmatpush.bf16.msrb.mxu2 %v3791_v41 }
 0x44f   : > { %v2768_v54 = vpop.f32.mrf.mxu1  ;;  %v2948_v49 = vadd.f32 %v2679_v31, %v15600_v40 }
 0x450   : > { %v9673_v30 = vadd.f32 %v2768_v54, %v15601_v8 }
 0x451   : > { %7131 = vmatmul.msk.bf16.gmra.mxu3 %vm856_vm4, %v9676_v22  ;;  %7078 = vmatmul.msk.bf16.gmra.mxu0 %vm856_vm4, %v15604_v51 }
 0x452   : > { %15602 = vst [vmem:[#allocation24_spill] sm:$0xff] %v9673_v30  ;;  %7094 = vmatmul.msk.bf16.gmra.mxu1 %vm856_vm4, %v15604_v51  ;;  %7115 = vmatmul.msk.bf16.gmra.mxu2 %vm856_vm4, %v9676_v22 }
 0x454   : > { %v3069_v40 = vpop.f32.mrf.mxu3 }
 0x455   : > { %v9687_v8 = vadd.f32 %v3069_v40, %v2948_v49  ;;  %v2857_v10 = vpop.f32.mrf.mxu2 }
 0x456   : > { %v9690_v47 = vadd.f32 %v2857_v10, %v15606_v17  ;;  %v2681_v24 = vpop.f32.mrf.mxu0  ;;  %v9706_v17 = vld [vmem:[%s7662_s18 + $0x48] sm:$0xff] }
 0x457   : > { %15605 = vst [vmem:[#allocation113_spill] sm:$0xff] %v9687_v8  ;;  %v2770_v61 = vpop.f32.mrf.mxu1  ;;  %v2951_v31 = vadd.f32 %v2681_v24, %v9235_v46  ;;  %v15607_v8 = vld [vmem:[#allocation57_spill] sm:$0xff]  ;;  %v15610_v46 = vld [vmem:[#allocation95_spill] sm:$0xff] }
 0x458   : > { %v9694_v54 = vadd.f32 %v2770_v61, %v9243_v55  ;;  %15609 = vst [vmem:[#allocation14_spill] sm:$0xff] %v9706_v17 }
 0x45c   : > { %v3071_v3 = vpop.f32.mrf.mxu3 }
 0x45d   : > { %v9696_v51 = vadd.f32 %v3071_v3, %v2951_v31  ;;  %v2859_v22 = vpop.f32.mrf.mxu2 }
 0x45e   : > { %v9699_v41 = vadd.f32 %v2859_v22, %v9238_v14  ;;  %v2684_v49 = vpop.f32.mrf.mxu0  ;;  %v15612_v22 = vld [vmem:[#allocation52_spill] sm:$0xff] }
 0x45f   : > { %v2773_v40 = vpop.f32.mrf.mxu1  ;;  %v2954_v30 = vadd.f32 %v2684_v49, %v15607_v8 }
 0x460   : > { %v9703_v10 = vadd.f32 %v2773_v40, %v9261_v43 }
 0x461   : > { %7132 = vmatmul.msk.bf16.gmra.mxu3 %vm856_vm4, %v9706_v17  ;;  %7079 = vmatmul.msk.bf16.gmra.mxu0 %vm856_vm4, %v15610_v46 }
 0x462   : > { %15608 = vst [vmem:[#allocation110_spill] sm:$0xff] %v9703_v10  ;;  %7095 = vmatmul.msk.bf16.gmra.mxu1 %vm856_vm4, %v15610_v46  ;;  %7116 = vmatmul.msk.bf16.gmra.mxu2 %vm856_vm4, %v9706_v17 }
 0x464   : > { %v3074_v14 = vpop.f32.mrf.mxu3 }
 0x465   : > { %v9716_v55 = vadd.f32 %v3074_v14, %v2954_v30  ;;  %v2862_v43 = vpop.f32.mrf.mxu2 }
 0x466   : > { %v9719_v8 = vadd.f32 %v2862_v43, %v15612_v22  ;;  %v2686_v24 = vpop.f32.mrf.mxu0  ;;  %v9735_v22 = vld [vmem:[%s7662_s18 + $0x54] sm:$0xff] }
 0x467   : > { %15611 = vst [vmem:[#allocation16_spill] sm:$0xff] %v9716_v55  ;;  %v2775_v61 = vpop.f32.mrf.mxu1  ;;  %v2957_v31 = vadd.f32 %v2686_v24, %v9264_v4  ;;  %v15613_v55 = vld [vmem:[#allocation3_spill] sm:$0xff] }
 0x468   : > { %v9723_v3 = vadd.f32 %v2775_v61, %v9271_v53  ;;  %15615 = vst [vmem:[#allocation17_spill] sm:$0xff] %v9735_v22  ;;  %v15616_v53 = vld [vmem:[#allocation99_spill] sm:$0xff] }
 0x46c   : > { %v3076_v49 = vpop.f32.mrf.mxu3 }
 0x46d   : > { %v9725_v40 = vadd.f32 %v3076_v49, %v2957_v31  ;;  %v2864_v46 = vpop.f32.mrf.mxu2 }
 0x46e   : > { %v9728_v17 = vadd.f32 %v2864_v46, %v9266_v42  ;;  %v2689_v30 = vpop.f32.mrf.mxu0  ;;  %v15618_v46 = vld [vmem:[#allocation76_spill] sm:$0xff] }
 0x46f   : > { %v2778_v14 = vpop.f32.mrf.mxu1  ;;  %v2960_v10 = vadd.f32 %v2689_v30, %v15613_v55 }
 0x470   : > { %v9732_v43 = vadd.f32 %v2778_v14, %v9289_v25 }
 0x471   : > { %7133 = vmatmul.msk.bf16.gmra.mxu3 %vm856_vm4, %v9735_v22  ;;  %7080 = vmatmul.msk.bf16.gmra.mxu0 %vm856_vm4, %v15616_v53 }
 0x472   : > { %15614 = vst [vmem:[#allocation29_spill] sm:$0xff] %v9732_v43  ;;  %7096 = vmatmul.msk.bf16.gmra.mxu1 %vm856_vm4, %v15616_v53  ;;  %7117 = vmatmul.msk.bf16.gmra.mxu2 %vm856_vm4, %v9735_v22 }
 0x474   : > { %v3079_v4 = vpop.f32.mrf.mxu3 }
 0x475   : > { %v9745_v42 = vadd.f32 %v3079_v4, %v2960_v10  ;;  %v2867_v25 = vpop.f32.mrf.mxu2 }
 0x476   : > { %v9748_v55 = vadd.f32 %v2867_v25, %v15618_v46  ;;  %v2691_v24 = vpop.f32.mrf.mxu0  ;;  %v9764_v46 = vld [vmem:[%s7662_s18 + $0x60] sm:$0xff] }
 0x477   : > { %15617 = vst [vmem:[#allocation35_spill] sm:$0xff] %v9745_v42  ;;  %v2780_v61 = vpop.f32.mrf.mxu1  ;;  %v2963_v31 = vadd.f32 %v2691_v24, %v9292_v13  ;;  %v15619_v42 = vld [vmem:[#allocation58_spill] sm:$0xff] }
 0x478   : > { %v9752_v49 = vadd.f32 %v2780_v61, %v9299_v7  ;;  %15620 = vst [vmem:[#allocation25_spill] sm:$0xff] %v9764_v46  ;;  %v15621_v7 = vld [vmem:[#allocation103_spill] sm:$0xff] }
 0x47c   : > { %v3081_v30 = vpop.f32.mrf.mxu3 }
 0x47d   : > { %v9754_v14 = vadd.f32 %v3081_v30, %v2963_v31  ;;  %v2869_v53 = vpop.f32.mrf.mxu2 }
 0x47e   : > { %v9757_v22 = vadd.f32 %v2869_v53, %v9294_v58  ;;  %v2694_v10 = vpop.f32.mrf.mxu0  ;;  %v15623_v53 = vld [vmem:[#allocation54_spill] sm:$0xff] }
 0x47f   : > { %v2783_v4 = vpop.f32.mrf.mxu1  ;;  %v2966_v43 = vadd.f32 %v2694_v10, %v15619_v42 }
 0x480   : > { %v9761_v25 = vadd.f32 %v2783_v4, %v9317_v26 }
 0x481   : > { %7134 = vmatmul.msk.bf16.gmra.mxu3 %vm856_vm4, %v9764_v46  ;;  %7081 = vmatmul.msk.bf16.gmra.mxu0 %vm856_vm4, %v15621_v7 }
 0x482   : > { %7097 = vmatmul.msk.bf16.gmra.mxu1 %vm856_vm4, %v15621_v7  ;;  %7118 = vmatmul.msk.bf16.gmra.mxu2 %vm856_vm4, %v9764_v46 }
 0x484   : > { %v3084_v13 = vpop.f32.mrf.mxu3 }
 0x485   : > { %v9774_v58 = vadd.f32 %v3084_v13, %v2966_v43  ;;  %v2872_v26 = vpop.f32.mrf.mxu2 }
 0x486   : > { %v9777_v42 = vadd.f32 %v2872_v26, %v15623_v53  ;;  %v2696_v24 = vpop.f32.mrf.mxu0  ;;  %v9793_v53 = vld [vmem:[%s7662_s18 + $0x6c] sm:$0xff] }
 0x487   : > { %15622 = vst [vmem:[#allocation22_spill] sm:$0xff] %v9774_v58  ;;  %v2785_v61 = vpop.f32.mrf.mxu1  ;;  %v2969_v31 = vadd.f32 %v2696_v24, %v9320_v21 }
 0x488   : > { %v9781_v30 = vadd.f32 %v2785_v61, %v9327_v52  ;;  %15624 = vst [vmem:[#allocation40_spill] sm:$0xff] %v9793_v53 }
 0x48c   : > { %v3086_v10 = vpop.f32.mrf.mxu3 }
 0x48d   : > { %v9783_v4 = vadd.f32 %v3086_v10, %v2969_v31  ;;  %v2874_v7 = vpop.f32.mrf.mxu2 }
 0x48e   : > { %v9786_v46 = vadd.f32 %v2874_v7, %v9322_v36  ;;  %v2699_v43 = vpop.f32.mrf.mxu0 }
 0x48f   : > { %v2788_v13 = vpop.f32.mrf.mxu1  ;;  %v2972_v58 = vadd.f32 %v2699_v43, %v9330_v16  ;;  %v15626_v16 = vld [vmem:[#allocation66_spill] sm:$0xff] }
 0x490   : > { %v9790_v26 = vadd.f32 %v2788_v13, %v9345_v29 }
 0x491   : > { %7135 = vmatmul.msk.bf16.gmra.mxu3 %vm856_vm4, %v9793_v53  ;;  %7082 = vmatmul.msk.bf16.gmra.mxu0 %vm856_vm4, %v8471_v6 }
 0x492   : > { %7098 = vmatmul.msk.bf16.gmra.mxu1 %vm856_vm4, %v8471_v6  ;;  %7119 = vmatmul.msk.bf16.gmra.mxu2 %vm856_vm4, %v9793_v53  ;;  %v9822_v53 = vld [vmem:[%s7662_s18 + $0x78] sm:$0xff] }
 0x493   : > { %15632 = vst [vmem:[#allocation46_spill] sm:$0xff] %v9822_v53 }
 0x494   : > { %v3089_v52 = vpop.f32.mrf.mxu3 }
 0x495   : > { %v9803_v21 = vadd.f32 %v3089_v52, %v2972_v58  ;;  %v2877_v36 = vpop.f32.mrf.mxu2 }
 0x496   : > { %v9806_v29 = vadd.f32 %v2877_v36, %v15626_v16  ;;  %v2701_v7 = vpop.f32.mrf.mxu0  ;;  %v15630_v36 = vld [vmem:[#allocation68_spill] sm:$0xff] }
 0x497   : > { %15625 = vst [vmem:[#allocation20_spill] sm:$0xff] %v9803_v21  ;;  %v2790_v24 = vpop.f32.mrf.mxu1  ;;  %v2975_v61 = vadd.f32 %v2701_v7, %v9348_v37  ;;  %v15633_v37 = vld [vmem:[#allocation109_spill] sm:$0xff]  ;;  %v15635_v7 = vld [vmem:[#allocation79_spill] sm:$0xff] }
 0x498   : > { %v9810_v31 = vadd.f32 %v2790_v24, %v9353_v1 }
 0x49a   : > { %15627 = vst [vmem:[#allocation28_spill] sm:$0xff] %v9810_v31 }
 0x49c   : > { %v3091_v10 = vpop.f32.mrf.mxu3 }
 0x49d   : > { %v9812_v43 = vadd.f32 %v3091_v10, %v2975_v61  ;;  %v2879_v13 = vpop.f32.mrf.mxu2 }
 0x49e   : > { %v9815_v6 = vadd.f32 %v2879_v13, %v9350_v34  ;;  %v3103_v58 = vpop.f32.mrf.mxu0  ;;  %v15636_v13 = vld [vmem:[#allocation53_spill] sm:$0xff] }
 0x49f   : > { %15628 = vst [vmem:[#allocation27_spill] sm:$0xff] %v9812_v43  ;;  %v3192_v52 = vpop.f32.mrf.mxu1  ;;  %v3273_v21 = vadd.f32 %v3103_v58, %v9357_v60 }
 0x4a0   : > { %15629 = vst [vmem:[#allocation31_spill] sm:$0xff] %v9815_v6  ;;  %v9819_v16 = vadd.f32 %v3192_v52, %v15630_v36  ;;  %v15637_v52 = vld [vmem:[#allocation81_spill] sm:$0xff] }
 0x4a1   : > { %7136 = vmatmul.msk.bf16.gmra.mxu3 %vm856_vm4, %v9822_v53  ;;  %7083 = vmatmul.msk.bf16.gmra.mxu0 %vm856_vm4, %v15633_v37 }
 0x4a2   : > { %15631 = vst [vmem:[#allocation34_spill] sm:$0xff] %v9819_v16  ;;  %7099 = vmatmul.msk.bf16.gmra.mxu1 %vm856_vm4, %v15633_v37  ;;  %7120 = vmatmul.msk.bf16.gmra.mxu2 %vm856_vm4, %v9822_v53  ;;  %v15640_v53 = vld [vmem:[#allocation62_spill] sm:$0xff] }
 0x4a4   : > { %v3487_v34 = vpop.f32.mrf.mxu3 }
 0x4a5   : > { %v9832_v1 = vadd.f32 %v3487_v34, %v3273_v21  ;;  %v3398_v60 = vpop.f32.mrf.mxu2 }
 0x4a6   : > { %v9835_v24 = vadd.f32 %v3398_v60, %v15635_v7  ;;  %v3105_v61 = vpop.f32.mrf.mxu0  ;;  %v9851_v7 = vld [vmem:[%s7662_s18 + $0x84] sm:$0xff] }
 0x4a7   : > { %15634 = vst [vmem:[#allocation21_spill] sm:$0xff] %v9832_v1  ;;  %v3194_v10 = vpop.f32.mrf.mxu1  ;;  %v3276_v58 = vadd.f32 %v3105_v61, %v15636_v13  ;;  %v15642_v1 = vld [vmem:[#allocation71_spill] sm:$0xff] }
 0x4a8   : > { %v9839_v36 = vadd.f32 %v3194_v10, %v15637_v52  ;;  %15644 = vst [vmem:[#allocation56_spill] sm:$0xff] %v9851_v7  ;;  %v15645_v61 = vld [vmem:[#allocation111_spill] sm:$0xff] }
 0x4aa   : > { %15638 = vst [vmem:[#allocation50_spill] sm:$0xff] %v9839_v36 }
 0x4ac   : > { %v3489_v16 = vpop.f32.mrf.mxu3 }
 0x4ad   : > { %v9841_v37 = vadd.f32 %v3489_v16, %v3276_v58  ;;  %v3400_v43 = vpop.f32.mrf.mxu2  ;;  %v15647_v16 = vld [vmem:[#allocation69_spill] sm:$0xff]  ;;  %v15649_v58 = vld [vmem:[#allocation74_spill] sm:$0xff] }
 0x4ae   : > { %v9844_v6 = vadd.f32 %v3400_v43, %v15640_v53  ;;  %v3108_v21 = vpop.f32.mrf.mxu0 }
 0x4af   : > { %15639 = vst [vmem:[#allocation33_spill] sm:$0xff] %v9841_v37  ;;  %v3197_v34 = vpop.f32.mrf.mxu1  ;;  %v3279_v31 = vadd.f32 %v3108_v21, %v15642_v1  ;;  %v15650_v21 = vld [vmem:[#allocation77_spill] sm:$0xff] }
 0x4b0   : > { %15641 = vst [vmem:[#allocation38_spill] sm:$0xff] %v9844_v6  ;;  %v9848_v60 = vadd.f32 %v3197_v34, %v9396_v45 }
 0x4b1   : > { %7137 = vmatmul.msk.bf16.gmra.mxu3 %vm856_vm4, %v9851_v7  ;;  %7084 = vmatmul.msk.bf16.gmra.mxu0 %vm856_vm4, %v15645_v61 }
 0x4b2   : > { %15643 = vst [vmem:[#allocation36_spill] sm:$0xff] %v9848_v60  ;;  %7100 = vmatmul.msk.bf16.gmra.mxu1 %vm856_vm4, %v15645_v61  ;;  %7121 = vmatmul.msk.bf16.gmra.mxu2 %vm856_vm4, %v9851_v7  ;;  %v15653_v7 = vld [vmem:[#allocation84_spill] sm:$0xff] }
 0x4b4   : > { %v3492_v53 = vpop.f32.mrf.mxu3 }
 0x4b5   : > { %v9861_v43 = vadd.f32 %v3492_v53, %v3279_v31  ;;  %v3403_v45 = vpop.f32.mrf.mxu2 }
 0x4b6   : > { %v9864_v1 = vadd.f32 %v3403_v45, %v15647_v16  ;;  %v3110_v10 = vpop.f32.mrf.mxu0  ;;  %v15656_v45 = vld [vmem:[#allocation89_spill] sm:$0xff] }
 0x4b7   : > { %15646 = vst [vmem:[#allocation37_spill] sm:$0xff] %v9861_v43  ;;  %v3199_v13 = vpop.f32.mrf.mxu1  ;;  %v3282_v52 = vadd.f32 %v3110_v10, %v15649_v58  ;;  %v15655_v43 = vld [vmem:[#allocation72_spill] sm:$0xff]  ;;  %v15659_v10 = vld [vmem:[#allocation23_spill] sm:$0xff] }
 0x4b8   : > { %15648 = vst [vmem:[#allocation42_spill] sm:$0xff] %v9864_v1  ;;  %v9868_v34 = vadd.f32 %v3199_v13, %v15650_v21  ;;  %v9880_v1 = vld [vmem:[%s7662_s18 + $0x90] sm:$0xff]  ;;  %v15662_v21 = vld [vmem:[#allocation82_spill] sm:$0xff] }
 0x4b9   : > { %15658 = vst [vmem:[#allocation45_spill] sm:$0xff] %v9880_v1 }
 0x4ba   : > { %15651 = vst [vmem:[#allocation61_spill] sm:$0xff] %v9868_v34 }
 0x4bc   : > { %v3494_v60 = vpop.f32.mrf.mxu3 }
 0x4bd   : > { %v9870_v61 = vadd.f32 %v3494_v60, %v3282_v52  ;;  %v3405_v37 = vpop.f32.mrf.mxu2 }
 0x4be   : > { %v9873_v6 = vadd.f32 %v3405_v37, %v15653_v7  ;;  %v3113_v31 = vpop.f32.mrf.mxu0 }
 0x4bf   : > { %15652 = vst [vmem:[#allocation75_spill] sm:$0xff] %v9870_v61  ;;  %v3202_v53 = vpop.f32.mrf.mxu1  ;;  %v3285_v36 = vadd.f32 %v3113_v31, %v15655_v43  ;;  %v15661_v43 = vld [vmem:[#allocation87_spill] sm:$0xff] }
 0x4c0   : > { %15654 = vst [vmem:[#allocation39_spill] sm:$0xff] %v9873_v6  ;;  %v9877_v16 = vadd.f32 %v3202_v53, %v15656_v45  ;;  %v15663_v53 = vld [vmem:[#allocation91_spill] sm:$0xff] }
 0x4c1   : > { %7138 = vmatmul.msk.bf16.gmra.mxu3 %vm856_vm4, %v9880_v1  ;;  %7085 = vmatmul.msk.bf16.gmra.mxu0 %vm856_vm4, %v15659_v10 }
 0x4c2   : > { %15657 = vst [vmem:[#allocation63_spill] sm:$0xff] %v9877_v16  ;;  %7101 = vmatmul.msk.bf16.gmra.mxu1 %vm856_vm4, %v15659_v10  ;;  %7122 = vmatmul.msk.bf16.gmra.mxu2 %vm856_vm4, %v9880_v1  ;;  %v15666_v1 = vld [vmem:[#allocation78_spill] sm:$0xff] }
 0x4c4   : > { %v3497_v37 = vpop.f32.mrf.mxu3 }
 0x4c5   : > { %v9890_v60 = vadd.f32 %v3497_v37, %v3285_v36  ;;  %v3408_v7 = vpop.f32.mrf.mxu2 }
 0x4c6   : > { %v9893_v13 = vadd.f32 %v3408_v7, %v15661_v43  ;;  %v3115_v58 = vpop.f32.mrf.mxu0  ;;  %v9909_v43 = vld [vmem:[%s7662_s18 + $0x9c] sm:$0xff] }
 0x4c7   : > { %15660 = vst [vmem:[#allocation64_spill] sm:$0xff] %v9890_v60  ;;  %v3204_v52 = vpop.f32.mrf.mxu1  ;;  %v3288_v31 = vadd.f32 %v3115_v58, %v15662_v21  ;;  %v15668_v60 = vld [vmem:[#allocation85_spill] sm:$0xff]  ;;  %v15671_v58 = vld [vmem:[#allocation26_spill] sm:$0xff] }
 0x4c8   : > { %v9897_v45 = vadd.f32 %v3204_v52, %v15663_v53  ;;  %15670 = vst [vmem:[#allocation43_spill] sm:$0xff] %v9909_v43 }
 0x4ca   : > { %15664 = vst [vmem:[#allocation67_spill] sm:$0xff] %v9897_v45 }
 0x4cc   : > { %v3499_v16 = vpop.f32.mrf.mxu3 }
 0x4cd   : > { %v9899_v10 = vadd.f32 %v3499_v16, %v3288_v31  ;;  %v3410_v61 = vpop.f32.mrf.mxu2  ;;  %v15673_v16 = vld [vmem:[#allocation83_spill] sm:$0xff]  ;;  %v15675_v31 = vld [vmem:[#allocation114_spill] sm:$0xff] }
 0x4ce   : > { %v9902_v6 = vadd.f32 %v3410_v61, %v15666_v1  ;;  %v3118_v36 = vpop.f32.mrf.mxu0 }
 0x4cf   : > { %15665 = vst [vmem:[#allocation44_spill] sm:$0xff] %v9899_v10  ;;  %v3207_v37 = vpop.f32.mrf.mxu1  ;;  %v3291_v34 = vadd.f32 %v3118_v36, %v15668_v60  ;;  %v15676_v36 = vld [vmem:[#allocation115_spill] sm:$0xff] }
 0x4d0   : > { %15667 = vst [vmem:[#allocation70_spill] sm:$0xff] %v9902_v6  ;;  %v9906_v7 = vadd.f32 %v3207_v37, %v9448_v33 }
 0x4d1   : > { %7139 = vmatmul.msk.bf16.gmra.mxu3 %vm856_vm4, %v9909_v43  ;;  %7086 = vmatmul.msk.bf16.gmra.mxu0 %vm856_vm4, %v15671_v58 }
 0x4d2   : > { %15669 = vst [vmem:[#allocation48_spill] sm:$0xff] %v9906_v7  ;;  %7102 = vmatmul.msk.bf16.gmra.mxu1 %vm856_vm4, %v15671_v58  ;;  %7123 = vmatmul.msk.bf16.gmra.mxu2 %vm856_vm4, %v9909_v43  ;;  %v15679_v43 = vld [vmem:[#allocation94_spill] sm:$0xff] }
 0x4d4   : > { %v3502_v61 = vpop.f32.mrf.mxu3 }
 0x4d5   : > { %v9919_v1 = vadd.f32 %v3502_v61, %v3291_v34  ;;  %v3413_v33 = vpop.f32.mrf.mxu2 }
 0x4d6   : > { %v9922_v60 = vadd.f32 %v3413_v33, %v15673_v16  ;;  %v3120_v52 = vpop.f32.mrf.mxu0  ;;  %v15682_v33 = vld [vmem:[#allocation93_spill] sm:$0xff] }
 0x4d7   : > { %15672 = vst [vmem:[#allocation73_spill] sm:$0xff] %v9919_v1  ;;  %v3209_v21 = vpop.f32.mrf.mxu1  ;;  %v3294_v53 = vadd.f32 %v3120_v52, %v15675_v31  ;;  %v15681_v1 = vld [vmem:[#allocation88_spill] sm:$0xff] }
 0x4d8   : > { %15674 = vst [vmem:[#allocation55_spill] sm:$0xff] %v9922_v60  ;;  %v9926_v37 = vadd.f32 %v3209_v21, %v15676_v36  ;;  %v9938_v60 = vld [vmem:[%s7662_s18 + $0xa8] sm:$0xff]  ;;  %v15685_v52 = vld [vmem:[#allocation32_spill] sm:$0xff] }
 0x4d9   : > { %15684 = vst [vmem:[#allocation58_spill] sm:$0xff] %v9938_v60  ;;  %v15689_v36 = vld [vmem:[#allocation98_spill] sm:$0xff] }
 0x4da   : > { %15677 = vst [vmem:[#allocation57_spill] sm:$0xff] %v9926_v37 }
 0x4dc   : > { %v3504_v7 = vpop.f32.mrf.mxu3 }
 0x4dd   : > { %v9928_v58 = vadd.f32 %v3504_v7, %v3294_v53  ;;  %v3415_v10 = vpop.f32.mrf.mxu2 }
 0x4de   : > { %v9931_v6 = vadd.f32 %v3415_v10, %v15679_v43  ;;  %v3123_v34 = vpop.f32.mrf.mxu0 }
 0x4df   : > { %15678 = vst [vmem:[#allocation52_spill] sm:$0xff] %v9928_v58  ;;  %v3212_v61 = vpop.f32.mrf.mxu1  ;;  %v3297_v45 = vadd.f32 %v3123_v34, %v15681_v1  ;;  %v15687_v1 = vld [vmem:[#allocation96_spill] sm:$0xff] }
 0x4e0   : > { %15680 = vst [vmem:[#allocation3_spill] sm:$0xff] %v9931_v6  ;;  %v9935_v16 = vadd.f32 %v3212_v61, %v15682_v33  ;;  %v15690_v61 = vld [vmem:[#allocation92_spill] sm:$0xff] }
 0x4e1   : > { %7140 = vmatmul.msk.bf16.gmra.mxu3 %vm856_vm4, %v9938_v60  ;;  %7087 = vmatmul.msk.bf16.gmra.mxu0 %vm856_vm4, %v15685_v52 }
 0x4e2   : > { %15683 = vst [vmem:[#allocation76_spill] sm:$0xff] %v9935_v16  ;;  %7103 = vmatmul.msk.bf16.gmra.mxu1 %vm856_vm4, %v15685_v52  ;;  %7124 = vmatmul.msk.bf16.gmra.mxu2 %vm856_vm4, %v9938_v60  ;;  %v15691_v60 = vld [vmem:[#allocation116_spill] sm:$0xff] }
 0x4e4   : > { %v3507_v10 = vpop.f32.mrf.mxu3 }
 0x4e5   : > { %v9948_v7 = vadd.f32 %v3507_v10, %v3297_v45  ;;  %v3418_v43 = vpop.f32.mrf.mxu2 }
 0x4e6   : > { %v9951_v21 = vadd.f32 %v3418_v43, %v15687_v1  ;;  %v3125_v31 = vpop.f32.mrf.mxu0  ;;  %v15693_v43 = vld [vmem:[#allocation102_spill] sm:$0xff] }
 0x4e7   : > { %15686 = vst [vmem:[#allocation54_spill] sm:$0xff] %v9948_v7  ;;  %v3214_v53 = vpop.f32.mrf.mxu1  ;;  %v3300_v34 = vadd.f32 %v3125_v31, %v15689_v36  ;;  %v15692_v7 = vld [vmem:[#allocation100_spill] sm:$0xff]  ;;  %v15695_v31 = vld [vmem:[#allocation47_spill] sm:$0xff] }
 0x4e8   : > { %15688 = vst [vmem:[#allocation66_spill] sm:$0xff] %v9951_v21  ;;  %v9955_v33 = vadd.f32 %v3214_v53, %v15690_v61  ;;  %v9967_v21 = vld [vmem:[%s7662_s18 + $0xb4] sm:$0xff] }
 0x4e9   : > { %15694 = vst [vmem:[#allocation68_spill] sm:$0xff] %v9967_v21 }
 0x4ec   : > { %v3509_v16 = vpop.f32.mrf.mxu3 }
 0x4ed   : > { %v9957_v52 = vadd.f32 %v3509_v16, %v3300_v34  ;;  %v3420_v58 = vpop.f32.mrf.mxu2 }
 0x4ee   : > { %v9960_v6 = vadd.f32 %v3420_v58, %v15691_v60  ;;  %v3128_v45 = vpop.f32.mrf.mxu0 }
 0x4ef   : > { %v3217_v10 = vpop.f32.mrf.mxu1  ;;  %v3303_v37 = vadd.f32 %v3128_v45, %v15692_v7  ;;  %v15697_v7 = vld [vmem:[#allocation117_spill] sm:$0xff] }
 0x4f0   : > { %v9964_v1 = vadd.f32 %v3217_v10, %v15693_v43 }
 0x4f1   : > { %7141 = vmatmul.msk.bf16.gmra.mxu3 %vm856_vm4, %v9967_v21  ;;  %7088 = vmatmul.msk.bf16.gmra.mxu0 %vm856_vm4, %v15695_v31 }
 0x4f2   : > { %7104 = vmatmul.msk.bf16.gmra.mxu1 %vm856_vm4, %v15695_v31  ;;  %7125 = vmatmul.msk.bf16.gmra.mxu2 %vm856_vm4, %v9967_v21  ;;  %v3785_v21 = vld.sshfl [vmem:[#allocation1 + $0x10] sm:$0xff pattern:$0x73625140] }
 0x4f4   : > { %v3512_v58 = vpop.f32.mrf.mxu3 }
 0x4f5   : > { %v9977_v60 = vadd.f32 %v3512_v58, %v3303_v37  ;;  %v3423_v16 = vpop.f32.mrf.mxu2 }
 0x4f6   : > { %v9980_v53 = vadd.f32 %v3423_v16, %v15697_v7  ;;  %v3130_v36 = vpop.f32.mrf.mxu0  ;;  %v3793_v16 = vsel %vm905_vm0, %v3785_v21, 0 }
 0x4f7   : > { %15696 = vst [vmem:[#allocation79_spill] sm:$0xff] %v9977_v60  ;;  %v3219_v34 = vpop.f32.mrf.mxu1  ;;  %v3306_v61 = vadd.f32 %v3130_v36, %v9506_v62  ;;  %3980 = vmatpush.bf16.msrb.mxu3 %v3793_v16 }
 0x4f8   : > { %15698 = vst [vmem:[#allocation53_spill] sm:$0xff] %v9980_v53  ;;  %v9984_v45 = vadd.f32 %v3219_v34, %v9512_v20  ;;  %v9997_v20 = vld [vmem:[%s7662_s18 + $0xc0] sm:$0xff] }
 0x4fc   : > { %v3514_v10 = vpop.f32.mrf.mxu3 }
 0x4fd   : > { %v9986_v43 = vadd.f32 %v3514_v10, %v3306_v61  ;;  %v3425_v31 = vpop.f32.mrf.mxu2 }
 0x4fe   : > { %v9989_v37 = vadd.f32 %v3425_v31, %v9509_v23  ;;  %v3133_v58 = vpop.f32.mrf.mxu0 }
 0x4ff   : > { %v3222_v60 = vpop.f32.mrf.mxu1  ;;  %v3309_v7 = vadd.f32 %v3133_v58, %v9517_v27  ;;  %v10019_v58 = vld [vmem:[%s7662_s18 + $0xcc] sm:$0xff] }
 0x500   : > { %v9994_v53 = vadd.f32 %v3222_v60, %v9534_v9  ;;  %v15699_v9 = vld [vmem:[#allocation118_spill] sm:$0xff]  ;;  %15700 = vst [vmem:[#allocation81_spill] sm:$0xff] %v10019_v58 }
 0x501   : > { %7142 = vmatmul.msk.bf16.gmra.mxu3 %vm856_vm4, %v9997_v20  ;;  %7089 = vmatmul.msk.bf16.gmra.mxu0 %vm856_vm4, %v8702_v39 }
 0x502   : > { %7105 = vmatmul.msk.bf16.gmra.mxu1 %vm856_vm4, %v8702_v39  ;;  %7126 = vmatmul.msk.bf16.gmra.mxu2 %vm856_vm4, %v9997_v20 }
 0x504   : > { %v3517_v23 = vpop.f32.mrf.mxu3 }
 0x505   : > { %v10007_v62 = vadd.f32 %v3517_v23, %v3309_v7  ;;  %v3428_v27 = vpop.f32.mrf.mxu2 }
 0x506   : > { %v10010_v21 = vadd.f32 %v3428_v27, %v15699_v9  ;;  %v3135_v31 = vpop.f32.mrf.mxu0 }
 0x507   : > { %v3224_v60 = vpop.f32.mrf.mxu1  ;;  %v3312_v36 = vadd.f32 %v3135_v31, %v9542_v38 }
 0x508   : > { %v10014_v34 = vadd.f32 %v3224_v60, %v9551_v19 }
 0x50c   : > { %v3519_v61 = vpop.f32.mrf.mxu3 }
 0x50d   : > { %v10016_v10 = vadd.f32 %v3519_v61, %v3312_v36  ;;  %v3430_v16 = vpop.f32.mrf.mxu2 }
 0x50e   : > { %v10022_v7 = vadd.f32 %v3430_v16, %v9544_v28  ;;  %v3138_v23 = vpop.f32.mrf.mxu0 }
 0x50f   : > { %v3227_v39 = vpop.f32.mrf.mxu1  ;;  %v3315_v27 = vadd.f32 %v3138_v23, %v9555_v50  ;;  %v15703_v23 = vld [vmem:[#allocation119_spill] sm:$0xff] }
 0x510   : > { %v10026_v9 = vadd.f32 %v3227_v39, %v9568_v5 }
 0x511   : > { %7143 = vmatmul.msk.bf16.gmra.mxu3 %vm856_vm4, %v10019_v58  ;;  %7090 = vmatmul.msk.bf16.gmra.mxu0 %vm856_vm4, %v9546_v56 }
 0x512   : > { %7106 = vmatmul.msk.bf16.gmra.mxu1 %vm856_vm4, %v9546_v56  ;;  %7127 = vmatmul.msk.bf16.gmra.mxu2 %vm856_vm4, %v10019_v58 }
 0x514   : > { %v3522_v38 = vpop.f32.mrf.mxu3 }
 0x515   : > { %v10036_v28 = vadd.f32 %v3522_v38, %v3315_v27  ;;  %v3433_v19 = vpop.f32.mrf.mxu2 }
 0x516   : > { %v10039_v50 = vadd.f32 %v3433_v19, %v9565_v11  ;;  %v3140_v39 = vpop.f32.mrf.mxu0  ;;  %v15705_v11 = vld [vmem:[#allocation108_spill] sm:$0xff] }
 0x517   : > { %15701 = vst [vmem:[#allocation62_spill] sm:$0xff] %v10036_v28  ;;  %v3229_v5 = vpop.f32.mrf.mxu1  ;;  %v3318_v31 = vadd.f32 %v3140_v39, %v9572_v0  ;;  %v15704_v28 = vld [vmem:[#allocation106_spill] sm:$0xff]  ;;  %v15707_v0 = vld [vmem:[#allocation120_spill] sm:$0xff] }
 0x518   : > { %15702 = vst [vmem:[#allocation71_spill] sm:$0xff] %v10039_v50  ;;  %v10043_v60 = vadd.f32 %v3229_v5, %v9577_v48  ;;  %v15706_v50 = vld [vmem:[#allocation4_spill] sm:$0xff] }
 0x51c   : > { %v3524_v36 = vpop.f32.mrf.mxu3 }
 0x51d   : > { %v10045_v61 = vadd.f32 %v3524_v36, %v3318_v31  ;;  %v3435_v16 = vpop.f32.mrf.mxu2 }
 0x51e   : > { %v10048_v56 = vadd.f32 %v3435_v16, %v15703_v23  ;;  %v3143_v27 = vpop.f32.mrf.mxu0 }
 0x51f   : > { %v3232_v38 = vpop.f32.mrf.mxu1  ;;  %v3321_v58 = vadd.f32 %v3143_v27, %v15704_v28  ;;  %v15709_v28 = vld [vmem:[#allocation101_spill] sm:$0xff] }
 0x520   : > { %v10052_v19 = vadd.f32 %v3232_v38, %v15705_v11 }
 0x521   : > { %7193 = vmatmul.msk.bf16.vlgmr.msrb.gmra.mxu3 %vm856_vm4, %v15706_v50  ;;  %7144 = vmatmul.msk.bf16.vlgmr.msrb.gmra.mxu0 %vm856_vm4, %v15707_v0 }
 0x522   : > { %7161 = vmatmul.msk.bf16.vlgmr.msrb.gmra.mxu1 %vm856_vm4, %v15706_v50  ;;  %7177 = vmatmul.msk.bf16.vlgmr.msrb.gmra.mxu2 %vm856_vm4, %v15706_v50 }
 0x524   : > { %v3527_v48 = vpop.f32.mrf.mxu3 }
 0x525   : > { %v10062_v39 = vadd.f32 %v3527_v48, %v3321_v58  ;;  %v3438_v5 = vpop.f32.mrf.mxu2 }
 0x526   : > { %v10065_v31 = vadd.f32 %v3438_v5, %v15709_v28  ;;  %v3145_v36 = vpop.f32.mrf.mxu0  ;;  %v15710_v28 = vld [vmem:[#allocation5_spill] sm:$0xff] }
 0x527   : > { %15708 = vst [vmem:[#allocation69_spill] sm:$0xff] %v10062_v39  ;;  %v3234_v16 = vpop.f32.mrf.mxu1  ;;  %v3324_v23 = vadd.f32 %v3145_v36, %v9601_v57  ;;  %v15711_v57 = vld [vmem:[#allocation121_spill] sm:$0xff] }
 0x528   : > { %v10069_v27 = vadd.f32 %v3234_v16, %v9606_v63 }
 0x52c   : > { %v3529_v38 = vpop.f32.mrf.mxu3 }
 0x52d   : > { %v10071_v11 = vadd.f32 %v3529_v38, %v3324_v23  ;;  %v3440_v0 = vpop.f32.mrf.mxu2 }
 0x52e   : > { %v10074_v50 = vadd.f32 %v3440_v0, %v9603_v18  ;;  %v3148_v58 = vpop.f32.mrf.mxu0 }
 0x52f   : > { %v3237_v48 = vpop.f32.mrf.mxu1  ;;  %v3327_v39 = vadd.f32 %v3148_v58, %v9610_v12  ;;  %v15713_v12 = vld [vmem:[#allocation105_spill] sm:$0xff]  ;;  %v7210_v58 = vld [vmem:[%s14685_s1 + $0x30] sm:$0x3f] }
 0x530   : > { %v10078_v5 = vadd.f32 %v3237_v48, %v9626_v2  ;;  %4172 = vst [vmem:[#allocation1] ss:$4 sm:$0xff] %v7210_v58 }
 0x531   : > { %7194 = vmatmul.msk.bf16.gmra.mxu3 %vm856_vm4, %v15710_v28  ;;  %7145 = vmatmul.msk.bf16.gmra.mxu0 %vm856_vm4, %v15711_v57  ;;  %v15717_v57 = vld [vmem:[#allocation11_spill] sm:$0xff] }
 0x532   : > { %7162 = vmatmul.msk.bf16.gmra.mxu1 %vm856_vm4, %v15710_v28  ;;  %7178 = vmatmul.msk.bf16.gmra.mxu2 %vm856_vm4, %v15710_v28 }
 0x534   : > { %v3532_v63 = vpop.f32.mrf.mxu3 }
 0x535   : > { %v10088_v18 = vadd.f32 %v3532_v63, %v3327_v39  ;;  %v3443_v36 = vpop.f32.mrf.mxu2 }
 0x536   : > { %v10091_v16 = vadd.f32 %v3443_v36, %v15713_v12  ;;  %v3150_v2 = vpop.f32.mrf.mxu0 }
 0x537   : > { %15712 = vst [vmem:[#allocation74_spill] sm:$0xff] %v10088_v18  ;;  %v3239_v23 = vpop.f32.mrf.mxu1  ;;  %v3330_v38 = vadd.f32 %v3150_v2, %v9630_v35  ;;  %v15718_v18 = vld [vmem:[#allocation12_spill] sm:$0xff] }
 0x538   : > { %15714 = vst [vmem:[#allocation77_spill] sm:$0xff] %v10091_v16  ;;  %v10095_v0 = vadd.f32 %v3239_v23, %v9636_v59  ;;  %v15719_v35 = vld [vmem:[#allocation112_spill] sm:$0xff]  ;;  %v4173_v59 = vld.sshfl [vmem:[#allocation1] sm:$0xff pattern:$0x73625140] }
 0x539   : > { %v4174_v23 = vld.sshfl [vmem:[#allocation1 + $0x8] sm:$0xff pattern:$0x73625140]  ;;  %v4179_v58 = vsel %vm905_vm0, %v4173_v59, 0 }
 0x53a   : > { %15715 = vst [vmem:[#allocation84_spill] sm:$0xff] %v10095_v0  ;;  %v15721_v0 = vld [vmem:[#allocation6_spill] sm:$0xff]  ;;  %4192 = vmatpush.bf16.msra.mxu0 %v4179_v58 }
 0x53c   : > { %v3534_v48 = vpop.f32.mrf.mxu3 }
 0x53d   : > { %v10100_v28 = vadd.f32 %v3534_v48, %v3330_v38  ;;  %v3445_v39 = vpop.f32.mrf.mxu2  ;;  %v4181_v38 = vsel %vm905_vm0, %v4174_v23, 0  ;;  %v15722_v48 = vld [vmem:[#allocation18_spill] sm:$0xff] }
 0x53e   : > { %v10103_v63 = vadd.f32 %v3445_v39, %v15717_v57  ;;  %v3153_v36 = vpop.f32.mrf.mxu0  ;;  %4281 = vmatpush.bf16.msra.mxu1 %v4181_v38 }
 0x53f   : > { %15716 = vst [vmem:[#allocation72_spill] sm:$0xff] %v10100_v28  ;;  %v3242_v12 = vpop.f32.mrf.mxu1  ;;  %v3333_v16 = vadd.f32 %v3153_v36, %v15718_v18  ;;  %v15724_v36 = vld [vmem:[#allocation15_spill] sm:$0xff] }
 0x540   : > { %v10107_v2 = vadd.f32 %v3242_v12, %v15719_v35 }
 0x541   : > { %7195 = vmatmul.msk.bf16.gmra.mxu3 %vm856_vm4, %v15721_v0  ;;  %7146 = vmatmul.msk.bf16.gmra.mxu0 %vm856_vm4, %v15722_v48 }
 0x542   : > { %15720 = vst [vmem:[#allocation89_spill] sm:$0xff] %v10107_v2  ;;  %7163 = vmatmul.msk.bf16.gmra.mxu1 %vm856_vm4, %v15721_v0  ;;  %7179 = vmatmul.msk.bf16.gmra.mxu2 %vm856_vm4, %v15721_v0 }
 0x544   : > { %v3537_v18 = vpop.f32.mrf.mxu3 }
 0x545   : > { %v10119_v39 = vadd.f32 %v3537_v18, %v3333_v16  ;;  %v3448_v57 = vpop.f32.mrf.mxu2  ;;  %v15726_v18 = vld [vmem:[#allocation24_spill] sm:$0xff] }
 0x546   : > { %v10122_v12 = vadd.f32 %v3448_v57, %v15724_v36  ;;  %v3155_v35 = vpop.f32.mrf.mxu0  ;;  %v4175_v36 = vld.sshfl [vmem:[#allocation1 + $0x10] sm:$0xff pattern:$0x73625140] }
 0x547   : > { %15723 = vst [vmem:[#allocation87_spill] sm:$0xff] %v10119_v39  ;;  %v3244_v59 = vpop.f32.mrf.mxu1  ;;  %v3336_v23 = vadd.f32 %v3155_v35, %v9663_v15  ;;  %v15728_v15 = vld [vmem:[#allocation122_spill] sm:$0xff]  ;;  %v15730_v35 = vld [vmem:[#allocation113_spill] sm:$0xff] }
 0x548   : > { %15725 = vst [vmem:[#allocation82_spill] sm:$0xff] %v10122_v12  ;;  %v10126_v48 = vadd.f32 %v3244_v59, %v9669_v32  ;;  %v15727_v12 = vld [vmem:[#allocation7_spill] sm:$0xff]  ;;  %v4183_v32 = vsel %vm905_vm0, %v4175_v36, 0 }
 0x549   : > { %4370 = vmatpush.bf16.msra.mxu2 %v4183_v32 }
 0x54c   : > { %v3539_v2 = vpop.f32.mrf.mxu3 }
 0x54d   : > { %v10128_v28 = vadd.f32 %v3539_v2, %v3336_v23  ;;  %v3450_v0 = vpop.f32.mrf.mxu2 }
 0x54e   : > { %v10131_v58 = vadd.f32 %v3450_v0, %v9666_v44  ;;  %v3158_v16 = vpop.f32.mrf.mxu0 }
 0x54f   : > { %v3247_v38 = vpop.f32.mrf.mxu1  ;;  %v3339_v39 = vadd.f32 %v3158_v16, %v15726_v18 }
 0x550   : > { %v10135_v57 = vadd.f32 %v3247_v38, %v9690_v47 }
 0x551   : > { %7196 = vmatmul.msk.bf16.gmra.mxu3 %vm856_vm4, %v15727_v12  ;;  %7147 = vmatmul.msk.bf16.gmra.mxu0 %vm856_vm4, %v15728_v15 }
 0x552   : > { %7164 = vmatmul.msk.bf16.gmra.mxu1 %vm856_vm4, %v15727_v12  ;;  %7180 = vmatmul.msk.bf16.gmra.mxu2 %vm856_vm4, %v15727_v12 }
 0x554   : > { %v3542_v44 = vpop.f32.mrf.mxu3 }
 0x555   : > { %v10146_v2 = vadd.f32 %v3542_v44, %v3339_v39  ;;  %v3453_v47 = vpop.f32.mrf.mxu2  ;;  %v15731_v44 = vld [vmem:[#allocation110_spill] sm:$0xff] }
 0x556   : > { %v10149_v59 = vadd.f32 %v3453_v47, %v15730_v35  ;;  %v3160_v23 = vpop.f32.mrf.mxu0  ;;  %v15733_v35 = vld [vmem:[#allocation8_spill] sm:$0xff] }
 0x557   : > { %15729 = vst [vmem:[#allocation91_spill] sm:$0xff] %v10146_v2  ;;  %v3249_v0 = vpop.f32.mrf.mxu1  ;;  %v3342_v16 = vadd.f32 %v3160_v23, %v9694_v54  ;;  %v15734_v54 = vld [vmem:[#allocation14_spill] sm:$0xff] }
 0x558   : > { %v10153_v38 = vadd.f32 %v3249_v0, %v9699_v41  ;;  %v15736_v0 = vld [vmem:[#allocation16_spill] sm:$0xff] }
 0x55c   : > { %v3544_v18 = vpop.f32.mrf.mxu3 }
 0x55d   : > { %v10155_v36 = vadd.f32 %v3544_v18, %v3342_v16  ;;  %v3455_v15 = vpop.f32.mrf.mxu2 }
 0x55e   : > { %v10158_v12 = vadd.f32 %v3455_v15, %v9696_v51  ;;  %v3163_v39 = vpop.f32.mrf.mxu0 }
 0x55f   : > { %v3252_v32 = vpop.f32.mrf.mxu1  ;;  %v3345_v2 = vadd.f32 %v3163_v39, %v15731_v44 }
 0x560   : > { %v10162_v47 = vadd.f32 %v3252_v32, %v9719_v8 }
 0x561   : > { %7197 = vmatmul.msk.bf16.gmra.mxu3 %vm856_vm4, %v15733_v35  ;;  %7148 = vmatmul.msk.bf16.gmra.mxu0 %vm856_vm4, %v15734_v54 }
 0x562   : > { %15732 = vst [vmem:[#allocation78_spill] sm:$0xff] %v10162_v47  ;;  %7165 = vmatmul.msk.bf16.gmra.mxu1 %vm856_vm4, %v15733_v35  ;;  %7181 = vmatmul.msk.bf16.gmra.mxu2 %vm856_vm4, %v15733_v35 }
 0x564   : > { %v3547_v51 = vpop.f32.mrf.mxu3 }
 0x565   : > { %v10172_v41 = vadd.f32 %v3547_v51, %v3345_v2  ;;  %v3458_v23 = vpop.f32.mrf.mxu2 }
 0x566   : > { %v10175_v16 = vadd.f32 %v3458_v23, %v15736_v0  ;;  %v3165_v8 = vpop.f32.mrf.mxu0  ;;  %v15738_v0 = vld [vmem:[#allocation9_spill] sm:$0xff] }
 0x567   : > { %15735 = vst [vmem:[#allocation85_spill] sm:$0xff] %v10172_v41  ;;  %v3254_v18 = vpop.f32.mrf.mxu1  ;;  %v3348_v15 = vadd.f32 %v3165_v8, %v9723_v3  ;;  %v15737_v41 = vld [vmem:[#allocation29_spill] sm:$0xff] }
 0x568   : > { %v10179_v39 = vadd.f32 %v3254_v18, %v9728_v17  ;;  %v15739_v3 = vld [vmem:[#allocation17_spill] sm:$0xff] }
 0x56c   : > { %v3549_v32 = vpop.f32.mrf.mxu3 }
 0x56d   : > { %v10181_v44 = vadd.f32 %v3549_v32, %v3348_v15  ;;  %v3460_v54 = vpop.f32.mrf.mxu2 }
 0x56e   : > { %v10184_v35 = vadd.f32 %v3460_v54, %v9725_v40  ;;  %v3168_v2 = vpop.f32.mrf.mxu0 }
 0x56f   : > { %v3257_v51 = vpop.f32.mrf.mxu1  ;;  %v3351_v47 = vadd.f32 %v3168_v2, %v15737_v41  ;;  %v15741_v41 = vld [vmem:[#allocation35_spill] sm:$0xff] }
 0x570   : > { %v10188_v23 = vadd.f32 %v3257_v51, %v9748_v55 }
 0x571   : > { %7198 = vmatmul.msk.bf16.gmra.mxu3 %vm856_vm4, %v15738_v0  ;;  %7149 = vmatmul.msk.bf16.gmra.mxu0 %vm856_vm4, %v15739_v3 }
 0x572   : > { %7166 = vmatmul.msk.bf16.gmra.mxu1 %vm856_vm4, %v15738_v0  ;;  %7182 = vmatmul.msk.bf16.gmra.mxu2 %vm856_vm4, %v15738_v0 }
 0x574   : > { %v3552_v17 = vpop.f32.mrf.mxu3 }
 0x575   : > { %v10198_v40 = vadd.f32 %v3552_v17, %v3351_v47  ;;  %v3463_v8 = vpop.f32.mrf.mxu2 }
 0x576   : > { %v10201_v18 = vadd.f32 %v3463_v8, %v15741_v41  ;;  %v3170_v55 = vpop.f32.mrf.mxu0  ;;  %v15742_v41 = vld [vmem:[#allocation10_spill] sm:$0xff] }
 0x577   : > { %15740 = vst [vmem:[#allocation83_spill] sm:$0xff] %v10198_v40  ;;  %v3259_v15 = vpop.f32.mrf.mxu1  ;;  %v3354_v32 = vadd.f32 %v3170_v55, %v9752_v49  ;;  %v15743_v49 = vld [vmem:[#allocation25_spill] sm:$0xff] }
 0x578   : > { %v10205_v54 = vadd.f32 %v3259_v15, %v9757_v22 }
 0x57c   : > { %v3554_v2 = vpop.f32.mrf.mxu3 }
 0x57d   : > { %v10207_v51 = vadd.f32 %v3554_v2, %v3354_v32  ;;  %v3465_v3 = vpop.f32.mrf.mxu2 }
 0x57e   : > { %v10210_v0 = vadd.f32 %v3465_v3, %v9754_v14  ;;  %v3173_v47 = vpop.f32.mrf.mxu0 }
 0x57f   : > { %v3262_v17 = vpop.f32.mrf.mxu1  ;;  %v3357_v40 = vadd.f32 %v3173_v47, %v9761_v25  ;;  %v15745_v25 = vld [vmem:[#allocation22_spill] sm:$0xff] }
 0x580   : > { %v10214_v8 = vadd.f32 %v3262_v17, %v9777_v42 }
 0x581   : > { %7199 = vmatmul.msk.bf16.gmra.mxu3 %vm856_vm4, %v15742_v41  ;;  %7150 = vmatmul.msk.bf16.gmra.mxu0 %vm856_vm4, %v15743_v49 }
 0x582   : > { %7167 = vmatmul.msk.bf16.gmra.mxu1 %vm856_vm4, %v15742_v41  ;;  %7183 = vmatmul.msk.bf16.gmra.mxu2 %vm856_vm4, %v15742_v41 }
 0x584   : > { %v3557_v22 = vpop.f32.mrf.mxu3 }
 0x585   : > { %v10224_v14 = vadd.f32 %v3557_v22, %v3357_v40  ;;  %v3468_v55 = vpop.f32.mrf.mxu2 }
 0x586   : > { %v10227_v15 = vadd.f32 %v3468_v55, %v15745_v25  ;;  %v3175_v42 = vpop.f32.mrf.mxu0  ;;  %v15750_v25 = vld [vmem:[#allocation13_spill] sm:$0xff] }
 0x587   : > { %15744 = vst [vmem:[#allocation114_spill] sm:$0xff] %v10224_v14  ;;  %v3264_v32 = vpop.f32.mrf.mxu1  ;;  %v3360_v2 = vadd.f32 %v3175_v42, %v9781_v30  ;;  %v15751_v30 = vld [vmem:[#allocation40_spill] sm:$0xff] }
 0x588   : > { %v10231_v3 = vadd.f32 %v3264_v32, %v9786_v46 }
 0x58a   : > { %15746 = vst [vmem:[#allocation115_spill] sm:$0xff] %v10231_v3 }
 0x58c   : > { %v3559_v47 = vpop.f32.mrf.mxu3 }
 0x58d   : > { %v10233_v17 = vadd.f32 %v3559_v47, %v3360_v2  ;;  %v3470_v49 = vpop.f32.mrf.mxu2  ;;  %v15754_v47 = vld [vmem:[#allocation28_spill] sm:$0xff] }
 0x58e   : > { %v10236_v41 = vadd.f32 %v3470_v49, %v9783_v4  ;;  %v3178_v40 = vpop.f32.mrf.mxu0 }
 0x58f   : > { %15747 = vst [vmem:[#allocation94_spill] sm:$0xff] %v10233_v17  ;;  %v3267_v22 = vpop.f32.mrf.mxu1  ;;  %v3363_v14 = vadd.f32 %v3178_v40, %v9790_v26  ;;  %v15753_v26 = vld [vmem:[#allocation20_spill] sm:$0xff]  ;;  %v15755_v40 = vld [vmem:[#allocation31_spill] sm:$0xff] }
 0x590   : > { %15748 = vst [vmem:[#allocation88_spill] sm:$0xff] %v10236_v41  ;;  %v10240_v55 = vadd.f32 %v3267_v22, %v9806_v29  ;;  %v15758_v41 = vld [vmem:[#allocation27_spill] sm:$0xff] }
 0x591   : > { %7200 = vmatmul.msk.bf16.gmra.mxu3 %vm856_vm4, %v15750_v25  ;;  %7151 = vmatmul.msk.bf16.gmra.mxu0 %vm856_vm4, %v15751_v30 }
 0x592   : > { %15749 = vst [vmem:[#allocation93_spill] sm:$0xff] %v10240_v55  ;;  %7168 = vmatmul.msk.bf16.gmra.mxu1 %vm856_vm4, %v15750_v25  ;;  %7184 = vmatmul.msk.bf16.gmra.mxu2 %vm856_vm4, %v15750_v25 }
 0x594   : > { %v3562_v46 = vpop.f32.mrf.mxu3 }
 0x595   : > { %v10250_v4 = vadd.f32 %v3562_v46, %v3363_v14  ;;  %v3473_v42 = vpop.f32.mrf.mxu2 }
 0x596   : > { %v10253_v32 = vadd.f32 %v3473_v42, %v15753_v26  ;;  %v3180_v29 = vpop.f32.mrf.mxu0  ;;  %v15762_v26 = vld [vmem:[#allocation19_spill] sm:$0xff] }
 0x597   : > { %15752 = vst [vmem:[#allocation96_spill] sm:$0xff] %v10250_v4  ;;  %v3269_v2 = vpop.f32.mrf.mxu1  ;;  %v3366_v49 = vadd.f32 %v3180_v29, %v15754_v47  ;;  %v15760_v4 = vld [vmem:[#allocation34_spill] sm:$0xff] }
 0x598   : > { %v10257_v22 = vadd.f32 %v3269_v2, %v15755_v40  ;;  %v15763_v29 = vld [vmem:[#allocation46_spill] sm:$0xff] }
 0x599   : > { %v15767_v40 = vld [vmem:[#allocation50_spill] sm:$0xff] }
 0x59a   : > { %15756 = vst [vmem:[#allocation98_spill] sm:$0xff] %v10257_v22 }
 0x59c   : > { %v3564_v30 = vpop.f32.mrf.mxu3 }
 0x59d   : > { %v10259_v55 = vadd.f32 %v3564_v30, %v3366_v49  ;;  %v3475_v17 = vpop.f32.mrf.mxu2 }
 0x59e   : > { %v10262_v25 = vadd.f32 %v3475_v17, %v15758_v41  ;;  %v3576_v14 = vpop.f32.mrf.mxu0 }
 0x59f   : > { %15757 = vst [vmem:[#allocation92_spill] sm:$0xff] %v10259_v55  ;;  %v3804_v46 = vpop.f32.mrf.mxu1  ;;  %v3658_v3 = vadd.f32 %v3576_v14, %v15760_v4  ;;  %v15765_v4 = vld [vmem:[#allocation21_spill] sm:$0xff]  ;;  %v15768_v14 = vld [vmem:[#allocation38_spill] sm:$0xff] }
 0x5a0   : > { %15759 = vst [vmem:[#allocation116_spill] sm:$0xff] %v10262_v25  ;;  %v10266_v42 = vadd.f32 %v3804_v46, %v9835_v24  ;;  %v15771_v25 = vld [vmem:[#allocation33_spill] sm:$0xff] }
 0x5a1   : > { %7201 = vmatmul.msk.bf16.gmra.mxu3 %vm856_vm4, %v15762_v26  ;;  %7152 = vmatmul.msk.bf16.gmra.mxu0 %vm856_vm4, %v15763_v29 }
 0x5a2   : > { %15761 = vst [vmem:[#allocation100_spill] sm:$0xff] %v10266_v42  ;;  %7169 = vmatmul.msk.bf16.gmra.mxu1 %vm856_vm4, %v15762_v26  ;;  %7185 = vmatmul.msk.bf16.gmra.mxu2 %vm856_vm4, %v15762_v26 }
 0x5a4   : > { %v3982_v17 = vpop.f32.mrf.mxu3 }
 0x5a5   : > { %v10276_v41 = vadd.f32 %v3982_v17, %v3658_v3  ;;  %v3893_v2 = vpop.f32.mrf.mxu2 }
 0x5a6   : > { %v10279_v47 = vadd.f32 %v3893_v2, %v15765_v4  ;;  %v3578_v24 = vpop.f32.mrf.mxu0  ;;  %v15774_v2 = vld [vmem:[#allocation42_spill] sm:$0xff] }
 0x5a7   : > { %15764 = vst [vmem:[#allocation102_spill] sm:$0xff] %v10276_v41  ;;  %v3806_v49 = vpop.f32.mrf.mxu1  ;;  %v3661_v30 = vadd.f32 %v3578_v24, %v15767_v40  ;;  %v15773_v41 = vld [vmem:[#allocation36_spill] sm:$0xff] }
 0x5a8   : > { %15766 = vst [vmem:[#allocation117_spill] sm:$0xff] %v10279_v47  ;;  %v10283_v46 = vadd.f32 %v3806_v49, %v15768_v14  ;;  %v15776_v47 = vld [vmem:[#allocation30_spill] sm:$0xff]  ;;  %v15777_v24 = vld [vmem:[#allocation56_spill] sm:$0xff] }
 0x5aa   : > { %15769 = vst [vmem:[#allocation118_spill] sm:$0xff] %v10283_v46 }
 0x5ac   : > { %v3984_v29 = vpop.f32.mrf.mxu3 }
 0x5ad   : > { %v10285_v42 = vadd.f32 %v3984_v29, %v3661_v30  ;;  %v3895_v55 = vpop.f32.mrf.mxu2  ;;  %v15780_v29 = vld [vmem:[#allocation61_spill] sm:$0xff] }
 0x5ae   : > { %v10288_v26 = vadd.f32 %v3895_v55, %v15771_v25  ;;  %v3581_v3 = vpop.f32.mrf.mxu0 }
 0x5af   : > { %15770 = vst [vmem:[#allocation119_spill] sm:$0xff] %v10285_v42  ;;  %v3809_v17 = vpop.f32.mrf.mxu1  ;;  %v3664_v22 = vadd.f32 %v3581_v3, %v15773_v41  ;;  %v15779_v41 = vld [vmem:[#allocation37_spill] sm:$0xff] }
 0x5b0   : > { %15772 = vst [vmem:[#allocation106_spill] sm:$0xff] %v10288_v26  ;;  %v10292_v4 = vadd.f32 %v3809_v17, %v15774_v2  ;;  %v15781_v17 = vld [vmem:[#allocation39_spill] sm:$0xff] }
 0x5b1   : > { %7202 = vmatmul.msk.bf16.gmra.mxu3 %vm856_vm4, %v15776_v47  ;;  %7153 = vmatmul.msk.bf16.gmra.mxu0 %vm856_vm4, %v15777_v24  ;;  %v15784_v26 = vld [vmem:[#allocation75_spill] sm:$0xff] }
 0x5b2   : > { %15775 = vst [vmem:[#allocation108_spill] sm:$0xff] %v10292_v4  ;;  %7170 = vmatmul.msk.bf16.gmra.mxu1 %vm856_vm4, %v15776_v47  ;;  %7186 = vmatmul.msk.bf16.gmra.mxu2 %vm856_vm4, %v15776_v47 }
 0x5b4   : > { %v3987_v55 = vpop.f32.mrf.mxu3 }
 0x5b5   : > { %v10302_v25 = vadd.f32 %v3987_v55, %v3664_v22  ;;  %v3898_v49 = vpop.f32.mrf.mxu2 }
 0x5b6   : > { %v10305_v40 = vadd.f32 %v3898_v49, %v15779_v41  ;;  %v3583_v30 = vpop.f32.mrf.mxu0  ;;  %v15788_v41 = vld [vmem:[#allocation41_spill] sm:$0xff] }
 0x5b7   : > { %15778 = vst [vmem:[#allocation4_spill] sm:$0xff] %v10302_v25  ;;  %v3811_v14 = vpop.f32.mrf.mxu1  ;;  %v3667_v3 = vadd.f32 %v3583_v30, %v15780_v29  ;;  %v15786_v25 = vld [vmem:[#allocation63_spill] sm:$0xff]  ;;  %v15789_v30 = vld [vmem:[#allocation45_spill] sm:$0xff] }
 0x5b8   : > { %v10309_v2 = vadd.f32 %v3811_v14, %v15781_v17  ;;  %v15793_v17 = vld [vmem:[#allocation67_spill] sm:$0xff] }
 0x5ba   : > { %15782 = vst [vmem:[#allocation120_spill] sm:$0xff] %v10309_v2 }
 0x5bc   : > { %v3989_v24 = vpop.f32.mrf.mxu3 }
 0x5bd   : > { %v10311_v4 = vadd.f32 %v3989_v24, %v3667_v3  ;;  %v3900_v42 = vpop.f32.mrf.mxu2 }
 0x5be   : > { %v10314_v47 = vadd.f32 %v3900_v42, %v15784_v26  ;;  %v3586_v22 = vpop.f32.mrf.mxu0 }
 0x5bf   : > { %15783 = vst [vmem:[#allocation101_spill] sm:$0xff] %v10311_v4  ;;  %v3814_v55 = vpop.f32.mrf.mxu1  ;;  %v3670_v46 = vadd.f32 %v3586_v22, %v15786_v25  ;;  %v15791_v25 = vld [vmem:[#allocation64_spill] sm:$0xff]  ;;  %v15794_v22 = vld [vmem:[#allocation70_spill] sm:$0xff] }
 0x5c0   : > { %15785 = vst [vmem:[#allocation5_spill] sm:$0xff] %v10314_v47  ;;  %v10318_v49 = vadd.f32 %v3814_v55, %v9893_v13  ;;  %v15797_v47 = vld [vmem:[#allocation44_spill] sm:$0xff] }
 0x5c1   : > { %7203 = vmatmul.msk.bf16.gmra.mxu3 %vm856_vm4, %v15788_v41  ;;  %7154 = vmatmul.msk.bf16.gmra.mxu0 %vm856_vm4, %v15789_v30 }
 0x5c2   : > { %15787 = vst [vmem:[#allocation121_spill] sm:$0xff] %v10318_v49  ;;  %7171 = vmatmul.msk.bf16.gmra.mxu1 %vm856_vm4, %v15788_v41  ;;  %7187 = vmatmul.msk.bf16.gmra.mxu2 %vm856_vm4, %v15788_v41 }
 0x5c4   : > { %v3992_v42 = vpop.f32.mrf.mxu3 }
 0x5c5   : > { %v10328_v26 = vadd.f32 %v3992_v42, %v3670_v46  ;;  %v3903_v14 = vpop.f32.mrf.mxu2 }
 0x5c6   : > { %v10331_v29 = vadd.f32 %v3903_v14, %v15791_v25  ;;  %v3588_v13 = vpop.f32.mrf.mxu0  ;;  %v15800_v14 = vld [vmem:[#allocation55_spill] sm:$0xff] }
 0x5c7   : > { %15790 = vst [vmem:[#allocation105_spill] sm:$0xff] %v10328_v26  ;;  %v3816_v3 = vpop.f32.mrf.mxu1  ;;  %v3673_v24 = vadd.f32 %v3588_v13, %v15793_v17  ;;  %v15799_v26 = vld [vmem:[#allocation48_spill] sm:$0xff]  ;;  %v15803_v13 = vld [vmem:[#allocation43_spill] sm:$0xff] }
 0x5c8   : > { %15792 = vst [vmem:[#allocation11_spill] sm:$0xff] %v10331_v29  ;;  %v10335_v55 = vadd.f32 %v3816_v3, %v15794_v22  ;;  %v15802_v29 = vld [vmem:[#allocation51_spill] sm:$0xff] }
 0x5ca   : > { %15795 = vst [vmem:[#allocation12_spill] sm:$0xff] %v10335_v55 }
 0x5cc   : > { %v3994_v30 = vpop.f32.mrf.mxu3 }
 0x5cd   : > { %v10337_v49 = vadd.f32 %v3994_v30, %v3673_v24  ;;  %v3905_v4 = vpop.f32.mrf.mxu2  ;;  %v15807_v30 = vld [vmem:[#allocation57_spill] sm:$0xff] }
 0x5ce   : > { %v10340_v41 = vadd.f32 %v3905_v4, %v15797_v47  ;;  %v3591_v46 = vpop.f32.mrf.mxu0 }
 0x5cf   : > { %15796 = vst [vmem:[#allocation112_spill] sm:$0xff] %v10337_v49  ;;  %v3819_v42 = vpop.f32.mrf.mxu1  ;;  %v3676_v2 = vadd.f32 %v3591_v46, %v15799_v26  ;;  %v15805_v26 = vld [vmem:[#allocation73_spill] sm:$0xff] }
 0x5d0   : > { %15798 = vst [vmem:[#allocation6_spill] sm:$0xff] %v10340_v41  ;;  %v10344_v25 = vadd.f32 %v3819_v42, %v15800_v14  ;;  %v15808_v42 = vld [vmem:[#allocation3_spill] sm:$0xff]  ;;  %v15809_v41 = vld [vmem:[#allocation52_spill] sm:$0xff] }
 0x5d1   : > { %7204 = vmatmul.msk.bf16.gmra.mxu3 %vm856_vm4, %v15802_v29  ;;  %7155 = vmatmul.msk.bf16.gmra.mxu0 %vm856_vm4, %v15803_v13 }
 0x5d2   : > { %15801 = vst [vmem:[#allocation18_spill] sm:$0xff] %v10344_v25  ;;  %7172 = vmatmul.msk.bf16.gmra.mxu1 %vm856_vm4, %v15802_v29  ;;  %7188 = vmatmul.msk.bf16.gmra.mxu2 %vm856_vm4, %v15802_v29 }
 0x5d4   : > { %v3997_v4 = vpop.f32.mrf.mxu3 }
 0x5d5   : > { %v10354_v47 = vadd.f32 %v3997_v4, %v3676_v2  ;;  %v3908_v3 = vpop.f32.mrf.mxu2 }
 0x5d6   : > { %v10357_v17 = vadd.f32 %v3908_v3, %v15805_v26  ;;  %v3593_v24 = vpop.f32.mrf.mxu0  ;;  %v15812_v3 = vld [vmem:[#allocation66_spill] sm:$0xff] }
 0x5d7   : > { %15804 = vst [vmem:[#allocation15_spill] sm:$0xff] %v10354_v47  ;;  %v3821_v22 = vpop.f32.mrf.mxu1  ;;  %v3679_v46 = vadd.f32 %v3593_v24, %v15807_v30  ;;  %v15810_v47 = vld [vmem:[#allocation76_spill] sm:$0xff]  ;;  %v15815_v24 = vld [vmem:[#allocation58_spill] sm:$0xff] }
 0x5d8   : > { %15806 = vst [vmem:[#allocation24_spill] sm:$0xff] %v10357_v17  ;;  %v10361_v14 = vadd.f32 %v3821_v22, %v15808_v42  ;;  %v15814_v17 = vld [vmem:[#allocation59_spill] sm:$0xff] }
 0x5dc   : > { %v3999_v13 = vpop.f32.mrf.mxu3 }
 0x5dd   : > { %v10363_v25 = vadd.f32 %v3999_v13, %v3679_v46  ;;  %v3910_v49 = vpop.f32.mrf.mxu2 }
 0x5de   : > { %v10366_v29 = vadd.f32 %v3910_v49, %v15809_v41  ;;  %v3596_v2 = vpop.f32.mrf.mxu0 }
 0x5df   : > { %v3824_v4 = vpop.f32.mrf.mxu1  ;;  %v10369_v55 = vadd.f32 %v3596_v2, %v15810_v47  ;;  %v15817_v47 = vld [vmem:[#allocation54_spill] sm:$0xff] }
 0x5e0   : > { %v10372_v26 = vadd.f32 %v3824_v4, %v15812_v3 }
 0x5e1   : > { %15811 = vst [vmem:[#allocation7_spill] sm:$0xff] %v10369_v55  ;;  %7205 = vmatmul.msk.bf16.gmra.mxu3 %vm856_vm4, %v15814_v17  ;;  %7156 = vmatmul.msk.bf16.gmra.mxu0 %vm856_vm4, %v15815_v24  ;;  %v15826_v55 = vld [vmem:[#allocation65_spill] sm:$0xff] }
 0x5e2   : > { %15813 = vst [vmem:[#allocation122_spill] sm:$0xff] %v10372_v26  ;;  %7173 = vmatmul.msk.bf16.gmra.mxu1 %vm856_vm4, %v15814_v17  ;;  %7189 = vmatmul.msk.bf16.gmra.mxu2 %vm856_vm4, %v15814_v17 }
 0x5e4   : > { %v10382_v49 = vpop.f32.mrf.mxu3 }
 0x5e5   : > { %15816 = vst [vmem:[#allocation113_spill] sm:$0xff] %v10382_v49  ;;  %v3913_v41 = vpop.f32.mrf.mxu2 }
 0x5e6   : > { %v10385_v22 = vadd.f32 %v3913_v41, %v15817_v47  ;;  %v3598_v30 = vpop.f32.mrf.mxu0  ;;  %v15824_v47 = vld [vmem:[#allocation53_spill] sm:$0xff] }
 0x5e7   : > { %v3826_v46 = vpop.f32.mrf.mxu1  ;;  %v10388_v42 = vadd.f32 %v3598_v30, %v9955_v33  ;;  %v15827_v33 = vld [vmem:[#allocation68_spill] sm:$0xff] }
 0x5e8   : > { %15818 = vst [vmem:[#allocation110_spill] sm:$0xff] %v10385_v22  ;;  %v10391_v13 = vadd.f32 %v3826_v46, %v9960_v6  ;;  %v10413_v6 = vld [vmem:[%s7662_s18 + $0xcc] sm:$0xf] }
 0x5e9   : > { %15819 = vst [vmem:[#allocation8_spill] sm:$0xff] %v10388_v42  ;;  %v3753_v46 = vshrl.u32 %v10413_v6, 16 }
 0x5ea   : > { %15820 = vst [vmem:[#allocation14_spill] sm:$0xff] %v10391_v13 }
 0x5eb   : > { %15828 = vst [vmem:[#allocation35_spill] sm:$0xff] %v10413_v6 }
 0x5ec   : > { %v10393_v2 = vpop.f32.mrf.mxu3 }
 0x5ed   : > { %15821 = vst [vmem:[#allocation16_spill] sm:$0xff] %v10393_v2  ;;  %v3915_v4 = vpop.f32.mrf.mxu2 }
 0x5ee   : > { %v10396_v17 = vadd.f32 %v3915_v4, %v9957_v52  ;;  %v3601_v3 = vpop.f32.mrf.mxu0  ;;  %v10416_v52 = vld [vmem:[%s7662_s18 + $0xd0] sm:$0xf]  ;;  %v3756_v4 = vshll.u32 %v10413_v6, 16  ;;  %v10434_v6 = vld [vmem:[%s7662_s18 + $0xd4] sm:$0x1] }
 0x5ef   : > { %v3829_v24 = vpop.f32.mrf.mxu1  ;;  %v10399_v41 = vadd.f32 %v3601_v3, %v9964_v1  ;;  %15829 = vst [vmem:[#allocation10_spill] sm:$0xff] %v10416_v52  ;;  %v3762_v3 = vshll.u32 %v10416_v52, 16 }
 0x5f0   : > { %15822 = vst [vmem:[#allocation29_spill] sm:$0xff] %v10396_v17  ;;  %v10402_v49 = vadd.f32 %v3829_v24, %v15824_v47  ;;  %v3766_v24 = vshrl.u32 %v10416_v52, 16  ;;  %v15831_v47 = vld [vmem:[#allocation79_spill] sm:$0xff] }
 0x5f1   : > { %15823 = vst [vmem:[#allocation9_spill] sm:$0xff] %v10399_v41  ;;  %7206 = vmatmul.msk.bf16.gmra.mxu3 %vm856_vm4, %v15826_v55  ;;  %7157 = vmatmul.msk.bf16.gmra.mxu0 %vm856_vm4, %v15827_v33  ;;  %v3764_v2 = vrot.slane %v3762_v3, 5 }
 0x5f2   : > { %15825 = vst [vmem:[#allocation17_spill] sm:$0xff] %v10402_v49  ;;  %7174 = vmatmul.msk.bf16.gmra.mxu1 %vm856_vm4, %v15826_v55  ;;  %7190 = vmatmul.msk.bf16.gmra.mxu2 %vm856_vm4, %v15826_v55  ;;  %v3758_v49 = vrot.slane %v3756_v4, 5  ;;  %v3768_v42 = vrot.slane %v3766_v24, 4 }
 0x5f4   : > { %v10418_v1 = vpop.f32.mrf.mxu3 }
 0x5f5   : > { %15830 = vst [vmem:[#allocation25_spill] sm:$0xff] %v10418_v1  ;;  %v3918_v30 = vpop.f32.mrf.mxu2  ;;  %v3755_v1 = vrot.slane %v3753_v46, 4  ;;  %v15833_v46 = vld [vmem:[#allocation104_spill] sm:$0xff] }
 0x5f6   : > { %v10425_v33 = vadd.f32 %v3918_v30, %v15831_v47  ;;  %v3603_v55 = vpop.f32.mrf.mxu0  ;;  %v3769_v30 = vor.u32 %v3768_v42, %v3764_v2  ;;  %v3772_v47 = vshll.u32 %v10434_v6, 16 }
 0x5f7   : > { %v3831_v22 = vpop.f32.mrf.mxu1  ;;  %v10428_v26 = vadd.f32 %v3603_v55, %v9984_v45  ;;  %v3759_v13 = vor.u32 %v3758_v49, %v3755_v1 }
 0x5f8   : > { %15832 = vst [vmem:[#allocation22_spill] sm:$0xff] %v10425_v33  ;;  %v10431_v41 = vadd.f32 %v3831_v22, %v9989_v37  ;;  %v3774_v42 = vrot.slane %v3772_v47, 5 }
 0x5f9   : > { %v3760_v49 = vrot.slane %v3759_v13, 4 }
 0x5fb   : > { %v3765_v1 = vsel %vm7683_vm3, %v3760_v49, %v3764_v2 }
 0x5fc   : > { %v10436_v17 = vpop.f32.mrf.mxu3  ;;  %v3778_v47 = vunpack.c.l.b16 %v3765_v1  ;;  %v15837_v1 = vld [vmem:[#allocation62_spill] sm:$0xff] }
 0x5fd   : > { %v3920_v52 = vpop.f32.mrf.mxu2 }
 0x5fe   : > { %v10440_v33 = vadd.f32 %v3920_v52, %v9986_v43  ;;  %v3606_v45 = vpop.f32.mrf.mxu0  ;;  %v3770_v43 = vrot.slane %v3769_v30, 4 }
 0x5ff   : > { %v3834_v55 = vpop.f32.mrf.mxu1  ;;  %v10443_v37 = vadd.f32 %v3606_v45, %v9994_v53 }
 0x600   : > { %v10446_v22 = vadd.f32 %v3834_v55, %v10010_v21  ;;  %v3775_v4 = vsel %vm7683_vm3, %v3770_v43, %v3774_v42 }
 0x601   : > { %7207 = vmatmul.msk.bf16.gmra.mxu3 %vm856_vm4, %v15833_v46  ;;  %7158 = vmatmul.msk.bf16.gmra.mxu0 %vm856_vm4, %v9997_v20  ;;  %v3779_v45 = vunpack.c.l.b16 %v3775_v4 }
 0x602   : > { %7175 = vmatmul.msk.bf16.gmra.mxu1 %vm856_vm4, %v15833_v46  ;;  %7191 = vmatmul.msk.bf16.gmra.mxu2 %vm856_vm4, %v15833_v46 }
 0x603   : > { %v3780_v46 = vpack.c.b16 %v3779_v45, %v3778_v47 }
 0x604   : > { %v10456_v53 = vpop.f32.mrf.mxu3 }
 0x605   : > { %v3923_v52 = vpop.f32.mrf.mxu2 }
 0x606   : > { %v10463_v20 = vadd.f32 %v3923_v52, %v10007_v62  ;;  %v3608_v3 = vpop.f32.mrf.mxu0  ;;  %v15835_v52 = vld [vmem:[#allocation71_spill] sm:$0xff] }
 0x607   : > { %v3836_v24 = vpop.f32.mrf.mxu1  ;;  %v10466_v13 = vadd.f32 %v3608_v3, %v10014_v34 }
 0x608   : > { %v10469_v30 = vadd.f32 %v3836_v24, %v10022_v7  ;;  %v15836_v7 = vld [vmem:[#allocation81_spill] sm:$0xff] }
 0x60c   : > { %v10471_v55 = vpop.f32.mrf.mxu3 }
 0x60d   : > { %v3925_v2 = vpop.f32.mrf.mxu2 }
 0x60e   : > { %v10474_v49 = vadd.f32 %v3925_v2, %v10016_v10  ;;  %v3611_v43 = vpop.f32.mrf.mxu0 }
 0x60f   : > { %v3839_v62 = vpop.f32.mrf.mxu1  ;;  %v10477_v42 = vadd.f32 %v3611_v43, %v10026_v9 }
 0x610   : > { %v10480_v34 = vadd.f32 %v3839_v62, %v15835_v52 }
 0x611   : > { %7208 = vmatmul.msk.bf16.gmra.mxu3 %vm856_vm4, %v3780_v46  ;;  %7159 = vmatmul.msk.bf16.gmra.mxu0 %vm856_vm4, %v15836_v7 }
 0x612   : > { %7176 = vmatmul.msk.bf16.gmra.mxu1 %vm856_vm4, %v3780_v46  ;;  %7192 = vmatmul.msk.bf16.gmra.mxu2 %vm856_vm4, %v3780_v46 }
 0x614   : > { %v10487_v21 = vpop.f32.mrf.mxu3 }
 0x615   : > { %v3928_v10 = vpop.f32.mrf.mxu2 }
 0x616   : > { %v10490_v4 = vadd.f32 %v3928_v10, %v15837_v1  ;;  %v3613_v9 = vpop.f32.mrf.mxu0  ;;  %v15840_v10 = vld [vmem:[#allocation80_spill] sm:$0xff] }
 0x617   : > { %v3841_v3 = vpop.f32.mrf.mxu1  ;;  %v10493_v24 = vadd.f32 %v3613_v9, %v10043_v60 }
 0x618   : > { %v10496_v47 = vadd.f32 %v3841_v3, %v10048_v56 }
 0x61c   : > { %v10498_v45 = vpop.f32.mrf.mxu3 }
 0x61d   : > { %v3930_v2 = vpop.f32.mrf.mxu2 }
 0x61e   : > { %v10501_v43 = vadd.f32 %v3930_v2, %v10045_v61  ;;  %v3616_v46 = vpop.f32.mrf.mxu0  ;;  %v15842_v61 = vld [vmem:[#allocation69_spill] sm:$0xff] }
 0x61f   : > { %v3844_v62 = vpop.f32.mrf.mxu1  ;;  %v10504_v52 = vadd.f32 %v3616_v46, %v10052_v19 }
 0x620   : > { %v10507_v7 = vadd.f32 %v3844_v62, %v10065_v31 }
 0x621   : > { %15838 = vst [vmem:[#allocation13_spill] sm:$0xff] %v10504_v52  ;;  %7211 = vmatmul.msk.bf16.vlgmr.msra.gmra.mxu0 %vm856_vm4, %v15840_v10 }
 0x622   : > { %15839 = vst [vmem:[#allocation40_spill] sm:$0xff] %v10507_v7  ;;  %7227 = vmatmul.msk.bf16.vlgmr.msra.gmra.mxu1 %vm856_vm4, %v15840_v10  ;;  %7243 = vmatmul.msk.bf16.vlgmr.msra.gmra.mxu2 %vm856_vm4, %v15840_v10 }
 0x624   : > { %v10515_v56 = vpop.f32.mrf.mxu3 }
 0x625   : > { %15841 = vst [vmem:[#allocation20_spill] sm:$0xff] %v10515_v56  ;;  %v3933_v60 = vpop.f32.mrf.mxu2 }
 0x626   : > { %v10518_v1 = vadd.f32 %v3933_v60, %v15842_v61  ;;  %v3618_v19 = vpop.f32.mrf.mxu0  ;;  %v15846_v60 = vld [vmem:[#allocation77_spill] sm:$0xff] }
 0x627   : > { %v3846_v9 = vpop.f32.mrf.mxu1  ;;  %v3709_v31 = vadd.f32 %v3618_v19, %v10069_v27  ;;  %v15850_v19 = vld [vmem:[#allocation74_spill] sm:$0xff] }
 0x628   : > { %15843 = vst [vmem:[#allocation28_spill] sm:$0xff] %v10518_v1  ;;  %v10522_v3 = vadd.f32 %v3846_v9, %v10074_v50  ;;  %v15848_v1 = vld [vmem:[#allocation86_spill] sm:$0xff] }
 0x62c   : > { %v4024_v2 = vpop.f32.mrf.mxu3 }
 0x62d   : > { %v10524_v46 = vadd.f32 %v4024_v2, %v3709_v31  ;;  %v3935_v62 = vpop.f32.mrf.mxu2 }
 0x62e   : > { %v10527_v52 = vadd.f32 %v3935_v62, %v10071_v11  ;;  %v3621_v10 = vpop.f32.mrf.mxu0 }
 0x62f   : > { %15844 = vst [vmem:[#allocation31_spill] sm:$0xff] %v10524_v46  ;;  %v3849_v56 = vpop.f32.mrf.mxu1  ;;  %v3712_v7 = vadd.f32 %v3621_v10, %v10078_v5  ;;  %v15853_v46 = vld [vmem:[#allocation72_spill] sm:$0xff] }
 0x630   : > { %15845 = vst [vmem:[#allocation27_spill] sm:$0xff] %v10527_v52  ;;  %v10531_v61 = vadd.f32 %v3849_v56, %v15846_v60  ;;  %v15852_v56 = vld [vmem:[#allocation84_spill] sm:$0xff] }
 0x631   : > { %7212 = vmatmul.msk.bf16.gmra.mxu0 %vm856_vm4, %v15848_v1 }
 0x632   : > { %15847 = vst [vmem:[#allocation34_spill] sm:$0xff] %v10531_v61  ;;  %7228 = vmatmul.msk.bf16.gmra.mxu1 %vm856_vm4, %v15848_v1  ;;  %7244 = vmatmul.msk.bf16.gmra.mxu2 %vm856_vm4, %v15848_v1 }
 0x634   : > { %v4027_v27 = vpop.f32.mrf.mxu3 }
 0x635   : > { %v10539_v50 = vadd.f32 %v4027_v27, %v3712_v7  ;;  %v3938_v11 = vpop.f32.mrf.mxu2 }
 0x636   : > { %v10542_v9 = vadd.f32 %v3938_v11, %v15850_v19  ;;  %v3623_v5 = vpop.f32.mrf.mxu0  ;;  %v15855_v11 = vld [vmem:[#allocation82_spill] sm:$0xff] }
 0x637   : > { %15849 = vst [vmem:[#allocation19_spill] sm:$0xff] %v10539_v50  ;;  %v3851_v31 = vpop.f32.mrf.mxu1  ;;  %v3715_v2 = vadd.f32 %v3623_v5, %v15852_v56  ;;  %v15854_v50 = vld [vmem:[#allocation89_spill] sm:$0xff] }
 0x638   : > { %15851 = vst [vmem:[#allocation46_spill] sm:$0xff] %v10542_v9  ;;  %v10546_v62 = vadd.f32 %v3851_v31, %v10103_v63  ;;  %v15856_v9 = vld [vmem:[#allocation90_spill] sm:$0xff] }
 0x63c   : > { %v4029_v10 = vpop.f32.mrf.mxu3 }
 0x63d   : > { %v10548_v60 = vadd.f32 %v4029_v10, %v3715_v2  ;;  %v3940_v61 = vpop.f32.mrf.mxu2 }
 0x63e   : > { %v10551_v1 = vadd.f32 %v3940_v61, %v15853_v46  ;;  %v3626_v7 = vpop.f32.mrf.mxu0  ;;  %v15857_v61 = vld [vmem:[#allocation87_spill] sm:$0xff] }
 0x63f   : > { %v3854_v27 = vpop.f32.mrf.mxu1  ;;  %v3718_v52 = vadd.f32 %v3626_v7, %v15854_v50 }
 0x640   : > { %v10555_v19 = vadd.f32 %v3854_v27, %v15855_v11 }
 0x641   : > { %7213 = vmatmul.msk.bf16.gmra.mxu0 %vm856_vm4, %v15856_v9 }
 0x642   : > { %7229 = vmatmul.msk.bf16.gmra.mxu1 %vm856_vm4, %v15856_v9  ;;  %7245 = vmatmul.msk.bf16.gmra.mxu2 %vm856_vm4, %v15856_v9 }
 0x644   : > { %v4032_v63 = vpop.f32.mrf.mxu3 }
 0x645   : > { %v10563_v5 = vadd.f32 %v4032_v63, %v3718_v52  ;;  %v3943_v46 = vpop.f32.mrf.mxu2 }
 0x646   : > { %v10566_v31 = vadd.f32 %v3943_v46, %v15857_v61  ;;  %v3628_v50 = vpop.f32.mrf.mxu0  ;;  %v15863_v46 = vld [vmem:[#allocation95_spill] sm:$0xff] }
 0x647   : > { %v3856_v56 = vpop.f32.mrf.mxu1  ;;  %v10569_v2 = vadd.f32 %v3628_v50, %v10126_v48 }
 0x648   : > { %v10572_v10 = vadd.f32 %v3856_v56, %v10131_v58 }
 0x649   : > { %15858 = vst [vmem:[#allocation21_spill] sm:$0xff] %v10569_v2  ;;  %v15941_v2 = vld [vmem:[#allocation47_spill] sm:$0xff] }
 0x64a   : > { %15859 = vst [vmem:[#allocation50_spill] sm:$0xff] %v10572_v10 }
 0x64d   : > { %v3945_v7 = vpop.f32.mrf.mxu2 }
 0x64e   : > { %v10575_v27 = vadd.f32 %v3945_v7, %v10128_v28  ;;  %v3631_v9 = vpop.f32.mrf.mxu0  ;;  %v15864_v28 = vld [vmem:[#allocation91_spill] sm:$0xff] }
 0x64f   : > { %v3859_v11 = vpop.f32.mrf.mxu1  ;;  %v10578_v52 = vadd.f32 %v3631_v9, %v10135_v57 }
 0x650   : > { %15860 = vst [vmem:[#allocation38_spill] sm:$0xff] %v10575_v27  ;;  %v10581_v63 = vadd.f32 %v3859_v11, %v10149_v59 }
 0x651   : > { %15861 = vst [vmem:[#allocation33_spill] sm:$0xff] %v10578_v52  ;;  %7214 = vmatmul.msk.bf16.gmra.mxu0 %vm856_vm4, %v15863_v46  ;;  %v15937_v52 = vld [vmem:[#allocation32_spill] sm:$0xff] }
 0x652   : > { %15862 = vst [vmem:[#allocation36_spill] sm:$0xff] %v10581_v63  ;;  %7230 = vmatmul.msk.bf16.gmra.mxu1 %vm856_vm4, %v15863_v46  ;;  %7246 = vmatmul.msk.bf16.gmra.mxu2 %vm856_vm4, %v15863_v46  ;;  %v15869_v63 = vld [vmem:[#allocation78_spill] sm:$0xff] }
 0x655   : > { %v3948_v48 = vpop.f32.mrf.mxu2 }
 0x656   : > { %v10590_v58 = vadd.f32 %v3948_v48, %v15864_v28  ;;  %v3633_v61 = vpop.f32.mrf.mxu0  ;;  %v15872_v28 = vld [vmem:[#allocation99_spill] sm:$0xff] }
 0x657   : > { %v3861_v50 = vpop.f32.mrf.mxu1  ;;  %v10593_v57 = vadd.f32 %v3633_v61, %v10153_v38 }
 0x658   : > { %15865 = vst [vmem:[#allocation42_spill] sm:$0xff] %v10590_v58  ;;  %v10596_v59 = vadd.f32 %v3861_v50, %v10158_v12  ;;  %v15933_v58 = vld [vmem:[#allocation112_spill] sm:$0xff] }
 0x659   : > { %15866 = vst [vmem:[#allocation30_spill] sm:$0xff] %v10593_v57 }
 0x65a   : > { %15867 = vst [vmem:[#allocation56_spill] sm:$0xff] %v10596_v59 }
 0x65d   : > { %v3950_v56 = vpop.f32.mrf.mxu2 }
 0x65e   : > { %v10599_v7 = vadd.f32 %v3950_v56, %v10155_v36  ;;  %v3636_v9 = vpop.f32.mrf.mxu0  ;;  %v15873_v36 = vld [vmem:[#allocation85_spill] sm:$0xff] }
 0x65f   : > { %v3864_v11 = vpop.f32.mrf.mxu1  ;;  %v10602_v46 = vadd.f32 %v3636_v9, %v15869_v63 }
 0x660   : > { %15868 = vst [vmem:[#allocation37_spill] sm:$0xff] %v10599_v7  ;;  %v10605_v48 = vadd.f32 %v3864_v11, %v10175_v16  ;;  %v15927_v7 = vld [vmem:[#allocation11_spill] sm:$0xff] }
 0x661   : > { %15870 = vst [vmem:[#allocation61_spill] sm:$0xff] %v10602_v46  ;;  %7215 = vmatmul.msk.bf16.gmra.mxu0 %vm856_vm4, %v15872_v28  ;;  %v15935_v46 = vld [vmem:[#allocation18_spill] sm:$0xff] }
 0x662   : > { %15871 = vst [vmem:[#allocation39_spill] sm:$0xff] %v10605_v48  ;;  %7231 = vmatmul.msk.bf16.gmra.mxu1 %vm856_vm4, %v15872_v28  ;;  %7247 = vmatmul.msk.bf16.gmra.mxu2 %vm856_vm4, %v15872_v28 }
 0x665   : > { %v3953_v38 = vpop.f32.mrf.mxu2 }
 0x666   : > { %v10614_v12 = vadd.f32 %v3953_v38, %v15873_v36  ;;  %v3638_v61 = vpop.f32.mrf.mxu0  ;;  %v15880_v36 = vld [vmem:[#allocation103_spill] sm:$0xff] }
 0x667   : > { %v3866_v50 = vpop.f32.mrf.mxu1  ;;  %v10617_v63 = vadd.f32 %v3638_v61, %v10179_v39 }
 0x668   : > { %15874 = vst [vmem:[#allocation75_spill] sm:$0xff] %v10614_v12  ;;  %v10620_v16 = vadd.f32 %v3866_v50, %v10184_v35  ;;  %v15926_v12 = vld [vmem:[#allocation121_spill] sm:$0xff] }
 0x669   : > { %15875 = vst [vmem:[#allocation63_spill] sm:$0xff] %v10617_v63  ;;  %v15918_v63 = vld [vmem:[#allocation108_spill] sm:$0xff] }
 0x66a   : > { %15876 = vst [vmem:[#allocation41_spill] sm:$0xff] %v10620_v16 }
 0x66d   : > { %v3955_v56 = vpop.f32.mrf.mxu2 }
 0x66e   : > { %v10623_v9 = vadd.f32 %v3955_v56, %v10181_v44  ;;  %v3641_v11 = vpop.f32.mrf.mxu0  ;;  %v15881_v44 = vld [vmem:[#allocation83_spill] sm:$0xff] }
 0x66f   : > { %v3869_v48 = vpop.f32.mrf.mxu1  ;;  %v10626_v28 = vadd.f32 %v3641_v11, %v10188_v23 }
 0x670   : > { %15877 = vst [vmem:[#allocation45_spill] sm:$0xff] %v10623_v9  ;;  %v10629_v38 = vadd.f32 %v3869_v48, %v10201_v18 }
 0x671   : > { %15878 = vst [vmem:[#allocation64_spill] sm:$0xff] %v10626_v28  ;;  %7216 = vmatmul.msk.bf16.gmra.mxu0 %vm856_vm4, %v15880_v36 }
 0x672   : > { %15879 = vst [vmem:[#allocation67_spill] sm:$0xff] %v10629_v38  ;;  %7232 = vmatmul.msk.bf16.gmra.mxu1 %vm856_vm4, %v15880_v36  ;;  %7248 = vmatmul.msk.bf16.gmra.mxu2 %vm856_vm4, %v15880_v36 }
 0x675   : > { %v3958_v39 = vpop.f32.mrf.mxu2 }
 0x676   : > { %v10638_v35 = vadd.f32 %v3958_v39, %v15881_v44  ;;  %v3643_v61 = vpop.f32.mrf.mxu0  ;;  %v15888_v44 = vld [vmem:[#allocation107_spill] sm:$0xff] }
 0x677   : > { %v3871_v50 = vpop.f32.mrf.mxu1  ;;  %v10641_v23 = vadd.f32 %v3643_v61, %v10205_v54 }
 0x678   : > { %15882 = vst [vmem:[#allocation70_spill] sm:$0xff] %v10638_v35  ;;  %v10644_v18 = vadd.f32 %v3871_v50, %v10210_v0  ;;  %v15924_v35 = vld [vmem:[#allocation101_spill] sm:$0xff] }
 0x679   : > { %15883 = vst [vmem:[#allocation44_spill] sm:$0xff] %v10641_v23 }
 0x67a   : > { %15884 = vst [vmem:[#allocation48_spill] sm:$0xff] %v10644_v18  ;;  %v15897_v18 = vld [vmem:[#allocation93_spill] sm:$0xff] }
 0x67d   : > { %v3960_v48 = vpop.f32.mrf.mxu2 }
 0x67e   : > { %v10647_v56 = vadd.f32 %v3960_v48, %v10207_v51  ;;  %v3646_v11 = vpop.f32.mrf.mxu0  ;;  %v15889_v51 = vld [vmem:[#allocation114_spill] sm:$0xff] }
 0x67f   : > { %v3874_v28 = vpop.f32.mrf.mxu1  ;;  %v10650_v36 = vadd.f32 %v3646_v11, %v10214_v8  ;;  %v15891_v8 = vld [vmem:[#allocation115_spill] sm:$0xff] }
 0x680   : > { %15885 = vst [vmem:[#allocation55_spill] sm:$0xff] %v10647_v56  ;;  %v10653_v39 = vadd.f32 %v3874_v28, %v10227_v15  ;;  %v15893_v15 = vld [vmem:[#allocation88_spill] sm:$0xff] }
 0x681   : > { %15886 = vst [vmem:[#allocation51_spill] sm:$0xff] %v10650_v36  ;;  %7217 = vmatmul.msk.bf16.gmra.mxu0 %vm856_vm4, %v15888_v44  ;;  %v15895_v36 = vld [vmem:[#allocation94_spill] sm:$0xff] }
 0x682   : > { %15887 = vst [vmem:[#allocation43_spill] sm:$0xff] %v10653_v39  ;;  %7233 = vmatmul.msk.bf16.gmra.mxu1 %vm856_vm4, %v15888_v44  ;;  %7249 = vmatmul.msk.bf16.gmra.mxu2 %vm856_vm4, %v15888_v44 }
 0x685   : > { %v3963_v54 = vpop.f32.mrf.mxu2 }
 0x686   : > { %v10662_v0 = vadd.f32 %v3963_v54, %v15889_v51  ;;  %v3648_v61 = vpop.f32.mrf.mxu0  ;;  %v15900_v51 = vld [vmem:[#allocation109_spill] sm:$0xff] }
 0x687   : > { %v3876_v50 = vpop.f32.mrf.mxu1  ;;  %v10665_v48 = vadd.f32 %v3648_v61, %v15891_v8 }
 0x688   : > { %15890 = vst [vmem:[#allocation73_spill] sm:$0xff] %v10662_v0  ;;  %v10668_v28 = vadd.f32 %v3876_v50, %v15893_v15  ;;  %v15910_v0 = vld [vmem:[#allocation117_spill] sm:$0xff] }
 0x689   : > { %15892 = vst [vmem:[#allocation57_spill] sm:$0xff] %v10665_v48 }
 0x68a   : > { %15894 = vst [vmem:[#allocation3_spill] sm:$0xff] %v10668_v28  ;;  %v15909_v28 = vld [vmem:[#allocation100_spill] sm:$0xff] }
 0x68d   : > { %v3965_v11 = vpop.f32.mrf.mxu2 }
 0x68e   : > { %v10671_v23 = vadd.f32 %v3965_v11, %v15895_v36  ;;  %v3651_v39 = vpop.f32.mrf.mxu0  ;;  %v15901_v36 = vld [vmem:[#allocation96_spill] sm:$0xff] }
 0x68f   : > { %v3879_v56 = vpop.f32.mrf.mxu1  ;;  %v10674_v44 = vadd.f32 %v3651_v39, %v15897_v18  ;;  %v15903_v18 = vld [vmem:[#allocation98_spill] sm:$0xff] }
 0x690   : > { %15896 = vst [vmem:[#allocation52_spill] sm:$0xff] %v10671_v23  ;;  %v10677_v54 = vadd.f32 %v3879_v56, %v10253_v32  ;;  %v15905_v32 = vld [vmem:[#allocation116_spill] sm:$0xff] }
 0x691   : > { %15898 = vst [vmem:[#allocation76_spill] sm:$0xff] %v10674_v44  ;;  %7218 = vmatmul.msk.bf16.gmra.mxu0 %vm856_vm4, %v15900_v51  ;;  %v15907_v44 = vld [vmem:[#allocation92_spill] sm:$0xff] }
 0x692   : > { %15899 = vst [vmem:[#allocation66_spill] sm:$0xff] %v10677_v54  ;;  %7234 = vmatmul.msk.bf16.gmra.mxu1 %vm856_vm4, %v15900_v51  ;;  %7250 = vmatmul.msk.bf16.gmra.mxu2 %vm856_vm4, %v15900_v51 }
 0x695   : > { %v3968_v61 = vpop.f32.mrf.mxu2 }
 0x696   : > { %v10686_v50 = vadd.f32 %v3968_v61, %v15901_v36  ;;  %v3653_v8 = vpop.f32.mrf.mxu0  ;;  %v15911_v36 = vld [vmem:[#allocation111_spill] sm:$0xff] }
 0x697   : > { %v3881_v15 = vpop.f32.mrf.mxu1  ;;  %v10689_v39 = vadd.f32 %v3653_v8, %v15903_v18 }
 0x698   : > { %15902 = vst [vmem:[#allocation59_spill] sm:$0xff] %v10686_v50  ;;  %v10692_v56 = vadd.f32 %v3881_v15, %v15905_v32 }
 0x699   : > { %15904 = vst [vmem:[#allocation58_spill] sm:$0xff] %v10689_v39  ;;  %v15916_v39 = vld [vmem:[#allocation119_spill] sm:$0xff] }
 0x69a   : > { %15906 = vst [vmem:[#allocation54_spill] sm:$0xff] %v10692_v56 }
 0x69d   : > { %v3970_v11 = vpop.f32.mrf.mxu2 }
 0x69e   : > { %v10695_v48 = vadd.f32 %v3970_v11, %v15907_v44  ;;  %v4194_v54 = vpop.f32.mrf.mxu0  ;;  %v15912_v44 = vld [vmem:[#allocation102_spill] sm:$0xff] }
 0x69f   : > { %v4283_v23 = vpop.f32.mrf.mxu1  ;;  %v10698_v51 = vadd.f32 %v4194_v54, %v15909_v28  ;;  %v15914_v28 = vld [vmem:[#allocation118_spill] sm:$0xff] }
 0x6a0   : > { %15908 = vst [vmem:[#allocation53_spill] sm:$0xff] %v10695_v48  ;;  %v10701_v61 = vadd.f32 %v4283_v23, %v15910_v0  ;;  %v15915_v23 = vld [vmem:[#allocation106_spill] sm:$0xff] }
 0x6a1   : > { %7219 = vmatmul.msk.bf16.gmra.mxu0 %vm856_vm4, %v15911_v36 }
 0x6a2   : > { %7235 = vmatmul.msk.bf16.gmra.mxu1 %vm856_vm4, %v15911_v36  ;;  %7251 = vmatmul.msk.bf16.gmra.mxu2 %vm856_vm4, %v15911_v36 }
 0x6a5   : > { %v4372_v8 = vpop.f32.mrf.mxu2 }
 0x6a6   : > { %v10710_v15 = vadd.f32 %v4372_v8, %v15912_v44  ;;  %v4196_v18 = vpop.f32.mrf.mxu0  ;;  %v15919_v44 = vld [vmem:[#allocation23_spill] sm:$0xff] }
 0x6a7   : > { %v4285_v32 = vpop.f32.mrf.mxu1  ;;  %v10713_v54 = vadd.f32 %v4196_v18, %v15914_v28 }
 0x6a8   : > { %15913 = vst [vmem:[#allocation65_spill] sm:$0xff] %v10710_v15  ;;  %v10716_v0 = vadd.f32 %v4285_v32, %v15915_v23  ;;  %v15949_v15 = vld [vmem:[#allocation22_spill] sm:$0xff] }
 0x6ad   : > { %v4374_v11 = vpop.f32.mrf.mxu2 }
 0x6ae   : > { %v10719_v48 = vadd.f32 %v4374_v11, %v15916_v39  ;;  %v4199_v56 = vpop.f32.mrf.mxu0  ;;  %v15920_v39 = vld [vmem:[#allocation4_spill] sm:$0xff] }
 0x6af   : > { %v4288_v50 = vpop.f32.mrf.mxu1  ;;  %v10722_v36 = vadd.f32 %v4199_v56, %v15918_v63  ;;  %v15922_v63 = vld [vmem:[#allocation120_spill] sm:$0xff] }
 0x6b0   : > { %15917 = vst [vmem:[#allocation68_spill] sm:$0xff] %v10719_v48  ;;  %v10725_v8 = vadd.f32 %v4288_v50, %v10305_v40  ;;  %v15923_v40 = vld [vmem:[#allocation5_spill] sm:$0xff] }
 0x6b1   : > { %7220 = vmatmul.msk.bf16.gmra.mxu0 %vm856_vm4, %v15919_v44 }
 0x6b2   : > { %7236 = vmatmul.msk.bf16.gmra.mxu1 %vm856_vm4, %v15919_v44  ;;  %7252 = vmatmul.msk.bf16.gmra.mxu2 %vm856_vm4, %v15919_v44 }
 0x6b5   : > { %v4377_v18 = vpop.f32.mrf.mxu2 }
 0x6b6   : > { %v10734_v32 = vadd.f32 %v4377_v18, %v15920_v39  ;;  %v4201_v28 = vpop.f32.mrf.mxu0  ;;  %v15928_v39 = vld [vmem:[#allocation26_spill] sm:$0xff] }
 0x6b7   : > { %v4290_v23 = vpop.f32.mrf.mxu1  ;;  %v10737_v56 = vadd.f32 %v4201_v28, %v15922_v63 }
 0x6b8   : > { %15921 = vst [vmem:[#allocation79_spill] sm:$0xff] %v10734_v32  ;;  %v10740_v50 = vadd.f32 %v4290_v23, %v15923_v40  ;;  %v15929_v23 = vld [vmem:[#allocation105_spill] sm:$0xff]  ;;  %v15932_v40 = vld [vmem:[#allocation6_spill] sm:$0xff] }
 0x6bd   : > { %v4379_v11 = vpop.f32.mrf.mxu2 }
 0x6be   : > { %v10743_v38 = vadd.f32 %v4379_v11, %v15924_v35  ;;  %v4204_v9 = vpop.f32.mrf.mxu0  ;;  %v4667_v35 = vld [vmem:[%s14687_s3 + $0x78] sm:$0xff] }
 0x6bf   : > { %v4293_v16 = vpop.f32.mrf.mxu1  ;;  %v10746_v44 = vadd.f32 %v4204_v9, %v15926_v12  ;;  %5056 = vmatpush.msra.mxu3 %v4667_v35 }
 0x6c0   : > { %15925 = vst [vmem:[#allocation104_spill] sm:$0xff] %v10743_v38  ;;  %v10749_v18 = vadd.f32 %v4293_v16, %v15927_v7  ;;  %v15931_v16 = vld [vmem:[#allocation12_spill] sm:$0xff]  ;;  %v15948_v38 = vld [vmem:[#allocation17_spill] sm:$0xff] }
 0x6c1   : > { %7221 = vmatmul.msk.bf16.gmra.mxu0 %vm856_vm4, %v15928_v39 }
 0x6c2   : > { %7237 = vmatmul.msk.bf16.gmra.mxu1 %vm856_vm4, %v15928_v39  ;;  %7253 = vmatmul.msk.bf16.gmra.mxu2 %vm856_vm4, %v15928_v39 }
 0x6c5   : > { %v4382_v28 = vpop.f32.mrf.mxu2 }
 0x6c6   : > { %v10761_v12 = vadd.f32 %v4382_v28, %v15929_v23  ;;  %v4206_v9 = vpop.f32.mrf.mxu0  ;;  %v15936_v28 = vld [vmem:[#allocation24_spill] sm:$0xff] }
 0x6c7   : > { %v4295_v7 = vpop.f32.mrf.mxu1  ;;  %v10764_v63 = vadd.f32 %v4206_v9, %v15931_v16 }
 0x6c8   : > { %15930 = vst [vmem:[#allocation2_spill] sm:$0xff] %v10761_v12  ;;  %v10767_v11 = vadd.f32 %v4295_v7, %v15932_v40 }
 0x6cd   : > { %v4384_v59 = vpop.f32.mrf.mxu2 }
 0x6ce   : > { %v10770_v39 = vadd.f32 %v4384_v59, %v15933_v58  ;;  %v4209_v27 = vpop.f32.mrf.mxu0  ;;  %v4666_v58 = vld [vmem:[%s14687_s3 + $0x70] sm:$0xff] }
 0x6cf   : > { %v4298_v10 = vpop.f32.mrf.mxu1  ;;  %v10773_v57 = vadd.f32 %v4209_v27, %v15935_v46  ;;  %v15938_v59 = vld [vmem:[#allocation15_spill] sm:$0xff]  ;;  %5057 = vmatpush.msra.mxu3 %v4666_v58  ;;  %v15943_v58 = vld [vmem:[#allocation14_spill] sm:$0xff] }
 0x6d0   : > { %15934 = vst [vmem:[#allocation71_spill] sm:$0xff] %v10770_v39  ;;  %v10776_v23 = vadd.f32 %v4298_v10, %v15936_v28 }
 0x6d1   : > { %7222 = vmatmul.msk.bf16.gmra.mxu0 %vm856_vm4, %v15937_v52 }
 0x6d2   : > { %7238 = vmatmul.msk.bf16.gmra.mxu1 %vm856_vm4, %v15937_v52  ;;  %7254 = vmatmul.msk.bf16.gmra.mxu2 %vm856_vm4, %v15937_v52 }
 0x6d5   : > { %v4387_v35 = vpop.f32.mrf.mxu2 }
 0x6d6   : > { %v10788_v27 = vadd.f32 %v4387_v35, %v15938_v59  ;;  %v4211_v46 = vpop.f32.mrf.mxu0 }
 0x6d7   : > { %v4300_v10 = vpop.f32.mrf.mxu1  ;;  %v10791_v9 = vadd.f32 %v4211_v46, %v10361_v14  ;;  %v15944_v46 = vld [vmem:[#allocation29_spill] sm:$0xff] }
 0x6d8   : > { %15939 = vst [vmem:[#allocation81_spill] sm:$0xff] %v10788_v27  ;;  %v10794_v7 = vadd.f32 %v4300_v10, %v10366_v29 }
 0x6dd   : > { %v4389_v16 = vpop.f32.mrf.mxu2 }
 0x6de   : > { %v10797_v52 = vadd.f32 %v4389_v16, %v10363_v25  ;;  %v10799_v40 = vpop.f32.mrf.mxu0  ;;  %v4665_v25 = vld [vmem:[%s14687_s3 + $0x68] sm:$0xff]  ;;  %v15945_v16 = vld [vmem:[#allocation8_spill] sm:$0xff] }
 0x6df   : > { %v10801_v28 = vpop.f32.mrf.mxu1  ;;  %5058 = vmatpush.msra.mxu3 %v4665_v25  ;;  %v15950_v25 = vld [vmem:[#allocation49_spill] sm:$0xff] }
 0x6e0   : > { %15940 = vst [vmem:[#allocation62_spill] sm:$0xff] %v10797_v52  ;;  %v15946_v52 = vld [vmem:[#allocation16_spill] sm:$0xff] }
 0x6e1   : > { %7223 = vmatmul.msk.bf16.gmra.mxu0 %vm856_vm4, %v15941_v2  ;;  %v4091_v27 = vadd.f32 %v15946_v52, %v15945_v16  ;;  %v15951_v52 = vld [vmem:[#allocation9_spill] sm:$0xff] }
 0x6e2   : > { %7239 = vmatmul.msk.bf16.gmra.mxu1 %vm856_vm4, %v15941_v2  ;;  %7255 = vmatmul.msk.bf16.gmra.mxu2 %vm856_vm4, %v15941_v2 }
 0x6e5   : > { %v10809_v14 = vpop.f32.mrf.mxu2 }
 0x6e6   : > { %15942 = vst [vmem:[#allocation80_spill] sm:$0xff] %v10809_v14  ;;  %v4216_v29 = vpop.f32.mrf.mxu0 }
 0x6e7   : > { %v4305_v35 = vpop.f32.mrf.mxu1  ;;  %v10815_v59 = vadd.f32 %v4216_v29, %v15943_v58 }
 0x6e8   : > { %v10818_v10 = vadd.f32 %v4305_v35, %v15944_v46  ;;  %v4097_v46 = vadd.f32 %v10436_v17, %v10428_v26  ;;  %v15956_v26 = vld [vmem:[#allocation35_spill] sm:$0xff] }
 0x6e9   : > { %v7209_v17 = vrot.slane %v15956_v26, 9 }
 0x6ed   : > { %v4394_v39 = vpop.f32.mrf.mxu2 }
 0x6ee   : > { %v10822_v2 = vadd.f32 %v4394_v39, %v4091_v27  ;;  %v4219_v14 = vpop.f32.mrf.mxu0  ;;  %v15952_v39 = vld [vmem:[#allocation25_spill] sm:$0xff] }
 0x6ef   : > { %v4308_v12 = vpop.f32.mrf.mxu1  ;;  %v10825_v32 = vadd.f32 %v4219_v14, %v15948_v38  ;;  %v4094_v27 = vadd.f32 %v15952_v39, %v15951_v52  ;;  %v4664_v38 = vld [vmem:[%s14687_s3 + $0x60] sm:$0xff] }
 0x6f0   : > { %15947 = vst [vmem:[#allocation69_spill] sm:$0xff] %v10822_v2  ;;  %v10828_v48 = vadd.f32 %v4308_v12, %v15949_v15  ;;  %5059 = vmatpush.msra.mxu3 %v4664_v38  ;;  %v15954_v2 = vld [vmem:[#allocation10_spill] sm:$0xff] }
 0x6f1   : > { %7224 = vmatmul.msk.bf16.gmra.mxu0 %vm856_vm4, %v15950_v25 }
 0x6f2   : > { %7240 = vmatmul.msk.bf16.gmra.mxu1 %vm856_vm4, %v15950_v25  ;;  %7256 = vmatmul.msk.bf16.gmra.mxu2 %vm856_vm4, %v15950_v25 }
 0x6f5   : > { %v4397_v29 = vpop.f32.mrf.mxu2 }
 0x6f6   : > { %v10841_v14 = vadd.f32 %v4397_v29, %v4094_v27  ;;  %v4221_v15 = vpop.f32.mrf.mxu0  ;;  %v4161_v27 = vrot.slane %v15954_v2, 5  ;;  %v4164_v2 = vrot.slane %v10434_v6, 5 }
 0x6f7   : > { %v4310_v12 = vpop.f32.mrf.mxu1  ;;  %v10844_v35 = vadd.f32 %v4221_v15, %v10431_v41  ;;  %v15955_v41 = vld [vmem:[#allocation97_spill] sm:$0xff] }
 0x6f8   : > { %v10847_v58 = vadd.f32 %v4310_v12, %v10440_v33  ;;  %v4163_v33 = vrot.slane %v4161_v27, 4 }
 0x6fd   : > { %v4399_v16 = vpop.f32.mrf.mxu2 }
 0x6fe   : > { %v10851_v25 = vadd.f32 %v4399_v16, %v4097_v46  ;;  %v4224_v52 = vpop.f32.mrf.mxu0 }
 0x6ff   : > { %v4313_v39 = vpop.f32.mrf.mxu1  ;;  %v10855_v29 = vadd.f32 %v4224_v52, %v10446_v22  ;;  %v4100_v22 = vadd.f32 %v10456_v53, %v10443_v37 }
 0x700   : > { %15953 = vst [vmem:[#allocation77_spill] sm:$0xff] %v10851_v25  ;;  %v10858_v38 = vadd.f32 %v4313_v39, %v10463_v20  ;;  %v4663_v20 = vld [vmem:[%s14687_s3 + $0x58] sm:$0xff]  ;;  %v4162_v39 = vsel %vm8175_vm7, %v7209_v17, %v4161_v27 }
 0x701   : > { %7225 = vmatmul.msk.bf16.gmra.mxu0 %vm856_vm4, %v15955_v41  ;;  %5060 = vmatpush.msra.mxu3 %v4663_v20  ;;  %v4168_v53 = vunpack.c.l.b16 %v4162_v39  ;;  %v15962_v39 = vld [vmem:[#allocation40_spill] sm:$0xff] }
 0x702   : > { %7241 = vmatmul.msk.bf16.gmra.mxu1 %vm856_vm4, %v15955_v41  ;;  %7257 = vmatmul.msk.bf16.gmra.mxu2 %vm856_vm4, %v15955_v41  ;;  %v4165_v41 = vsel %vm8175_vm7, %v4163_v33, %v4164_v2 }
 0x703   : > { %v4169_v26 = vunpack.c.l.b16 %v4165_v41 }
 0x705   : > { %v4402_v15 = vpop.f32.mrf.mxu2 }
 0x706   : > { %v10873_v12 = vadd.f32 %v4402_v15, %v4100_v22  ;;  %v4226_v46 = vpop.f32.mrf.mxu0  ;;  %v4103_v22 = vadd.f32 %v10471_v55, %v10466_v13  ;;  %v4106_v13 = vadd.f32 %v10487_v21, %v10477_v42 }
 0x707   : > { %v4315_v16 = vpop.f32.mrf.mxu1  ;;  %v10880_v6 = vadd.f32 %v4226_v46, %v10469_v30 }
 0x708   : > { %15957 = vst [vmem:[#allocation86_spill] sm:$0xff] %v10873_v12  ;;  %v10883_v37 = vadd.f32 %v4315_v16, %v10474_v49  ;;  %v4170_v12 = vpack.c.b16 %v4169_v26, %v4168_v53  ;;  %v4662_v49 = vld [vmem:[%s14687_s3 + $0x50] sm:$0xff]  ;;  %v15963_v53 = vld [vmem:[#allocation28_spill] sm:$0xff] }
 0x709   : > { %5061 = vmatpush.msra.mxu3 %v4662_v49 }
 0x70d   : > { %v4404_v15 = vpop.f32.mrf.mxu2 }
 0x70e   : > { %v10887_v25 = vadd.f32 %v4404_v15, %v4103_v22  ;;  %v4229_v27 = vpop.f32.mrf.mxu0  ;;  %v15964_v22 = vld [vmem:[#allocation13_spill] sm:$0xff] }
 0x70f   : > { %v4318_v17 = vpop.f32.mrf.mxu1  ;;  %v10890_v33 = vadd.f32 %v4229_v27, %v10480_v34 }
 0x710   : > { %15959 = vst [vmem:[#allocation74_spill] sm:$0xff] %v10887_v25  ;;  %v10893_v30 = vadd.f32 %v4318_v17, %v10490_v4 }
 0x711   : > { %7226 = vmatmul.msk.bf16.gmra.mxu0 %vm856_vm4, %v4170_v12 }
 0x712   : > { %7242 = vmatmul.msk.bf16.gmra.mxu1 %vm856_vm4, %v4170_v12  ;;  %7258 = vmatmul.msk.bf16.gmra.mxu2 %vm856_vm4, %v4170_v12  ;;  %v4109_v12 = vadd.f32 %v10498_v45, %v10493_v24 }
 0x715   : > { %v4407_v55 = vpop.f32.mrf.mxu2 }
 0x716   : > { %v10903_v2 = vadd.f32 %v4407_v55, %v4106_v13  ;;  %v4231_v34 = vpop.f32.mrf.mxu0  ;;  %v15967_v55 = vld [vmem:[#allocation27_spill] sm:$0xff] }
 0x717   : > { %v4320_v20 = vpop.f32.mrf.mxu1  ;;  %v10906_v4 = vadd.f32 %v4231_v34, %v10496_v47  ;;  %v15965_v47 = vld [vmem:[#allocation20_spill] sm:$0xff] }
 0x718   : > { %15960 = vst [vmem:[#allocation84_spill] sm:$0xff] %v10903_v2  ;;  %v10909_v46 = vadd.f32 %v4320_v20, %v10501_v43  ;;  %v4112_v15 = vadd.f32 %v15965_v47, %v15964_v22  ;;  %v4661_v43 = vld [vmem:[%s14687_s3 + $0x48] sm:$0xff]  ;;  %v15968_v20 = vld [vmem:[#allocation31_spill] sm:$0xff] }
 0x719   : > { %5062 = vmatpush.msra.mxu3 %v4661_v43 }
 0x71d   : > { %v4409_v42 = vpop.f32.mrf.mxu2 }
 0x71e   : > { %v10913_v21 = vadd.f32 %v4409_v42, %v4109_v12  ;;  %v4234_v16 = vpop.f32.mrf.mxu0 }
 0x71f   : > { %v4323_v52 = vpop.f32.mrf.mxu1  ;;  %v10916_v41 = vadd.f32 %v4234_v16, %v15962_v39 }
 0x720   : > { %15961 = vst [vmem:[#allocation72_spill] sm:$0xff] %v10913_v21  ;;  %v10919_v26 = vadd.f32 %v4323_v52, %v15963_v53  ;;  %v15970_v52 = vld [vmem:[#allocation34_spill] sm:$0xff] }
 0x721   : > { %v15971_v53 = vld [vmem:[#allocation46_spill] sm:$0xff] }
 0x725   : > { %v4412_v27 = vpop.f32.mrf.mxu2 }
 0x726   : > { %v10926_v24 = vadd.f32 %v4412_v27, %v4112_v15  ;;  %v4236_v45 = vpop.f32.mrf.mxu0  ;;  %v15972_v15 = vld [vmem:[#allocation19_spill] sm:$0xff] }
 0x727   : > { %v4325_v17 = vpop.f32.mrf.mxu1  ;;  %v10929_v13 = vadd.f32 %v4236_v45, %v10522_v3  ;;  %v4660_v3 = vld [vmem:[%s14687_s3 + $0x40] sm:$0xff] }
 0x728   : > { %15966 = vst [vmem:[#allocation89_spill] sm:$0xff] %v10926_v24  ;;  %v10932_v49 = vadd.f32 %v4325_v17, %v15967_v55  ;;  %5063 = vmatpush.msra.mxu3 %v4660_v3 }
 0x72d   : > { %v4414_v34 = vpop.f32.mrf.mxu2 }
 0x72e   : > { %v10935_v12 = vadd.f32 %v4414_v34, %v15968_v20  ;;  %v4239_v42 = vpop.f32.mrf.mxu0  ;;  %v10955_v34 = vpop.f32.mrf.mxu3 }
 0x72f   : > { %v4328_v16 = vpop.f32.mrf.mxu1  ;;  %v10938_v39 = vadd.f32 %v4239_v42, %v15970_v52 }
 0x730   : > { %15969 = vst [vmem:[#allocation82_spill] sm:$0xff] %v10935_v12  ;;  %v10941_v22 = vadd.f32 %v4328_v16, %v15971_v53 }
 0x735   : > { %v4417_v47 = vpop.f32.mrf.mxu2 }
 0x736   : > { %v10947_v27 = vadd.f32 %v4417_v47, %v15972_v15  ;;  %v4241_v43 = vpop.f32.mrf.mxu0 }
 0x737   : > { %v4330_v45 = vpop.f32.mrf.mxu1  ;;  %v10950_v17 = vadd.f32 %v4241_v43, %v10546_v62  ;;  %v4659_v62 = vld [vmem:[%s14687_s3 + $0x38] sm:$0xff]  ;;  %v10976_v43 = vpop.f32.mrf.mxu3 }
 0x738   : > { %15973 = vst [vmem:[#allocation90_spill] sm:$0xff] %v10947_v27  ;;  %v10953_v55 = vadd.f32 %v4330_v45, %v10551_v1  ;;  %5064 = vmatpush.msra.mxu3 %v4659_v62  ;;  %v4658_v62 = vld [vmem:[%s14687_s3 + $0x30] sm:$0xff] }
 0x73a   : > { %5065 = vmatpush.msra.mxu3 %v4658_v62 }
 0x73d   : > { %v4419_v20 = vpop.f32.mrf.mxu2 }
 0x73e   : > { %v10958_v42 = vadd.f32 %v4419_v20, %v10548_v60  ;;  %v4244_v16 = vpop.f32.mrf.mxu0 }
 0x73f   : > { %v4333_v52 = vpop.f32.mrf.mxu1  ;;  %v10961_v53 = vadd.f32 %v4244_v16, %v10555_v19  ;;  %v10984_v20 = vpop.f32.mrf.mxu3 }
 0x740   : > { %15974 = vst [vmem:[#allocation87_spill] sm:$0xff] %v10958_v42  ;;  %v10964_v47 = vadd.f32 %v4333_v52, %v10566_v31 }
 0x745   : > { %v4422_v3 = vpop.f32.mrf.mxu2 }
 0x746   : > { %v10970_v1 = vadd.f32 %v4422_v3, %v10563_v5  ;;  %v10972_v15 = vpop.f32.mrf.mxu0  ;;  %v4548_v5 = vld [vmem:[%s14686_s2] sm:$0x7] }
 0x747   : > { %v10974_v60 = vpop.f32.mrf.mxu1  ;;  %v10989_v16 = vperm.slane %v4548_v5, 0  ;;  %v10991_v52 = vperm.slane %v4548_v5, 1  ;;  %v11026_v62 = vpop.f32.mrf.mxu3 }
 0x748   : > { %15975 = vst [vmem:[#allocation95_spill] sm:$0xff] %v10970_v1 }
 0x749   : > { %v11004_v42 = vadd.f32 %v10989_v16, %v10713_v54  ;;  %v11008_v27 = vadd.f32 %v10991_v52, %v10716_v0  ;;  %v11016_v12 = vadd.f32 %v10991_v52, %v10701_v61  ;;  %v11020_v24 = vadd.f32 %v10989_v16, %v10722_v36 }
 0x74a   : > { %v11024_v54 = vadd.f32 %v10991_v52, %v10725_v8  ;;  %v11034_v61 = vadd.f32 %v10989_v16, %v10737_v56  ;;  %v11038_v36 = vadd.f32 %v10991_v52, %v10740_v50  ;;  %v11044_v2 = vadd.f32 %v10989_v16, %v10746_v44 }
 0x74b   : > { %15978 = vst [vmem:[#allocation99_spill] sm:$0xff] %v11004_v42  ;;  %v11048_v25 = vadd.f32 %v10991_v52, %v10749_v18  ;;  %v11063_v44 = vadd.f32 %v10989_v16, %v10764_v63  ;;  %v11067_v18 = vadd.f32 %v10991_v52, %v10767_v11  ;;  %v11080_v63 = vadd.f32 %v10991_v52, %v10776_v23 }
 0x74c   : > { %15979 = vst [vmem:[#allocation85_spill] sm:$0xff] %v11008_v27  ;;  %v11095_v23 = vadd.f32 %v10989_v16, %v10791_v9 }
 0x74d   : > { %v10978_v19 = vpop.f32.mrf.mxu2  ;;  %15981 = vst [vmem:[#allocation83_spill] sm:$0xff] %v11016_v12 }
 0x74e   : > { %15976 = vst [vmem:[#allocation91_spill] sm:$0xff] %v10978_v19  ;;  %v10980_v45 = vpop.f32.mrf.mxu0 }
 0x74f   : > { %v10982_v31 = vpop.f32.mrf.mxu1  ;;  %15982 = vst [vmem:[#allocation107_spill] sm:$0xff] %v11020_v24 }
 0x750   : > { %15983 = vst [vmem:[#allocation114_spill] sm:$0xff] %v11024_v54 }
 0x751   : > { %15984 = vst [vmem:[#allocation115_spill] sm:$0xff] %v11034_v61 }
 0x752   : > { %15985 = vst [vmem:[#allocation88_spill] sm:$0xff] %v11038_v36 }
 0x753   : > { %15986 = vst [vmem:[#allocation94_spill] sm:$0xff] %v11044_v2 }
 0x754   : > { %15987 = vst [vmem:[#allocation93_spill] sm:$0xff] %v11048_v25 }
 0x755   : > { %v10993_v3 = vpop.f32.mrf.mxu2  ;;  %15989 = vst [vmem:[#allocation96_spill] sm:$0xff] %v11063_v44 }
 0x756   : > { %15977 = vst [vmem:[#allocation78_spill] sm:$0xff] %v10993_v3  ;;  %v10998_v1 = vpop.f32.mrf.mxu0  ;;  %v11012_v3 = vadd.f32 %v10989_v16, %v10698_v51  ;;  %v4775_v51 = vadd.f32 %v11008_v27, %v11016_v12 }
 0x757   : > { %v11000_v19 = vpop.f32.mrf.mxu1  ;;  %15990 = vst [vmem:[#allocation98_spill] sm:$0xff] %v11067_v18 }
 0x758   : > { %15980 = vst [vmem:[#allocation103_spill] sm:$0xff] %v11012_v3  ;;  %v4738_v0 = vadd.f32 %v11004_v42, %v11012_v3  ;;  %v4776_v8 = vadd.f32 %v4775_v51, %v11024_v54  ;;  %v4657_v51 = vld [vmem:[%s14687_s3 + $0x28] sm:$0xff] }
 0x759   : > { %5066 = vmatpush.msra.mxu3 %v4657_v51  ;;  %15992 = vst [vmem:[#allocation92_spill] sm:$0xff] %v11080_v63  ;;  %v15994_v51 = vld [vmem:[#allocation110_spill] sm:$0xff] }
 0x75a   : > { %v4739_v21 = vadd.f32 %v4738_v0, %v11020_v24  ;;  %v4777_v0 = vadd.f32 %v4776_v8, %v11038_v36  ;;  %v11076_v8 = vadd.f32 %v10989_v16, %v10773_v57  ;;  %v15993_v36 = vld [vmem:[#allocation122_spill] sm:$0xff]  ;;  %15996 = vst [vmem:[#allocation117_spill] sm:$0xff] %v11095_v23 }
 0x75b   : > { %v4476_v11 = vadd.f32 %v10799_v40, %v15993_v36  ;;  %v11099_v40 = vadd.f32 %v10991_v52, %v10794_v7 }
 0x75c   : > { %v4740_v50 = vadd.f32 %v4739_v21, %v11034_v61  ;;  %v4656_v21 = vld [vmem:[%s14687_s3 + $0x20] sm:$0xff]  ;;  %15991 = vst [vmem:[#allocation116_spill] sm:$0xff] %v11076_v8 }
 0x75d   : > { %v11050_v12 = vpop.f32.mrf.mxu2  ;;  %5067 = vmatpush.msra.mxu3 %v4656_v21  ;;  %15997 = vst [vmem:[#allocation111_spill] sm:$0xff] %v11099_v40  ;;  %v11114_v21 = vadd.f32 %v10989_v16, %v4476_v11  ;;  %v11133_v11 = vadd.f32 %v10989_v16, %v10815_v59  ;;  %v11151_v59 = vadd.f32 %v10989_v16, %v10825_v32 }
 0x75e   : > { %15988 = vst [vmem:[#allocation109_spill] sm:$0xff] %v11050_v12  ;;  %v11052_v56 = vpop.f32.mrf.mxu0  ;;  %v4741_v54 = vadd.f32 %v4740_v50, %v11044_v2  ;;  %v4778_v12 = vadd.f32 %v4777_v0, %v11048_v25  ;;  %v4477_v50 = vadd.f32 %v10801_v28, %v15994_v51  ;;  %v11089_v0 = vld [vmem:[%s14687_s3 + $0x18] sm:$0xff]  ;;  %v11102_v28 = vpop.f32.mrf.mxu3 }
 0x75f   : > { %v11054_v27 = vpop.f32.mrf.mxu1  ;;  %15995 = vst [vmem:[#allocation100_spill] sm:$0xff] %v11089_v0  ;;  %5068 = vmatpush.msra.mxu3 %v11089_v0 }
 0x760   : > { %v4742_v25 = vadd.f32 %v4741_v54, %v11063_v44  ;;  %v4779_v57 = vadd.f32 %v4778_v12, %v11067_v18  ;;  %v11109_v54 = vld [vmem:[%s14687_s3 + $0x10] sm:$0xff]  ;;  %15999 = vst [vmem:[#allocation118_spill] sm:$0xff] %v11114_v21  ;;  %v11117_v7 = vadd.f32 %v10991_v52, %v4477_v50  ;;  %v11127_v18 = vld [vmem:[%s14687_s3 + $0x8] sm:$0xff]  ;;  %v11137_v50 = vadd.f32 %v10991_v52, %v10818_v10 }
 0x761   : > { %15998 = vst [vmem:[#allocation102_spill] sm:$0xff] %v11109_v54  ;;  %5069 = vmatpush.msra.mxu3 %v11109_v54  ;;  %v11140_v54 = vperm.slane %v4548_v5, 2  ;;  %v11155_v10 = vadd.f32 %v10991_v52, %v10828_v48  ;;  %v11161_v5 = vld [vmem:[%s14687_s3 + $0xf8] sm:$0xff]  ;;  %v11172_v48 = vadd.f32 %v10989_v16, %v10844_v35 }
 0x762   : > { %v4743_v12 = vadd.f32 %v4742_v25, %v11076_v8  ;;  %v4780_v9 = vadd.f32 %v4779_v57, %v11080_v63  ;;  %16000 = vst [vmem:[#allocation106_spill] sm:$0xff] %v11117_v7  ;;  %v11145_v63 = vld [vmem:[%s14687_s3] sm:$0xff] }
 0x763   : > { %16001 = vst [vmem:[#allocation119_spill] sm:$0xff] %v11127_v18  ;;  %5070 = vmatpush.msra.mxu3 %v11127_v18  ;;  %v16008_v18 = vld [vmem:[#allocation68_spill] sm:$0xff] }
 0x764   : > { %v4744_v25 = vadd.f32 %v4743_v12, %v11095_v23  ;;  %v4781_v57 = vadd.f32 %v4780_v9, %v11099_v40  ;;  %16002 = vst [vmem:[#allocation108_spill] sm:$0xff] %v11133_v11  ;;  %v11198_v40 = vadd.f32 %v10989_v16, %v10855_v29  ;;  %v16021_v29 = vld [vmem:[#allocation104_spill] sm:$0xff] }
 0x765   : > { %v11104_v36 = vpop.f32.mrf.mxu2  ;;  %16003 = vst [vmem:[#allocation23_spill] sm:$0xff] %v11137_v50  ;;  %5071 = vmatpush.msra.mxu3 %v11145_v63 }
 0x766   : > { %v11119_v51 = vpop.f32.mrf.mxu0  ;;  %16004 = vst [vmem:[#allocation4_spill] sm:$0xff] %v11145_v63  ;;  %v4745_v12 = vadd.f32 %v4744_v25, %v11114_v21  ;;  %v4782_v9 = vadd.f32 %v4781_v57, %v11117_v7  ;;  %v11165_v25 = vadd.f32 %v11140_v54, %v16008_v18  ;;  %v11176_v63 = vadd.f32 %v10991_v52, %v10847_v58  ;;  %v11181_v7 = vld [vmem:[%s14687_s3 + $0xf0] sm:$0xff]  ;;  %v16013_v18 = vld [vmem:[#allocation65_spill] sm:$0xff] }
 0x767   : > { %v11121_v0 = vpop.f32.mrf.mxu1  ;;  %16005 = vst [vmem:[#allocation120_spill] sm:$0xff] %v11151_v59  ;;  %5076 = vmatpush.msrb.mxu3 %v11161_v5  ;;  %v11226_v21 = vadd.f32 %v10989_v16, %v10880_v6 }
 0x768   : > { %16006 = vst [vmem:[#allocation5_spill] sm:$0xff] %v11155_v10  ;;  %v4746_v32 = vadd.f32 %v4745_v12, %v11133_v11  ;;  %v4783_v57 = vadd.f32 %v4782_v9, %v11137_v50  ;;  %v16015_v12 = vld [vmem:[#allocation79_spill] sm:$0xff] }
 0x769   : > { %16007 = vst [vmem:[#allocation101_spill] sm:$0xff] %v11161_v5  ;;  %v11185_v5 = vadd.f32 %v11140_v54, %v16013_v18  ;;  %v11189_v9 = vadd.f32 %v11140_v54, %v16015_v12  ;;  %5077 = vmatpush.msrb.mxu3 %v11181_v7  ;;  %v11202_v18 = vadd.f32 %v10991_v52, %v10858_v38 }
 0x76a   : > { %16009 = vst [vmem:[#allocation121_spill] sm:$0xff] %v11165_v25  ;;  %v4747_v35 = vadd.f32 %v4746_v32, %v11151_v59  ;;  %v4784_v58 = vadd.f32 %v4783_v57, %v11155_v10  ;;  %v11213_v32 = vpop.f32.mrf.mxu3  ;;  %v11219_v10 = vadd.f32 %v11140_v54, %v16021_v29 }
 0x76b   : > { %16010 = vst [vmem:[#allocation11_spill] sm:$0xff] %v11172_v48  ;;  %v4812_v57 = vadd.f32 %v11165_v25, %v11185_v5  ;;  %v11251_v25 = vadd.f32 %v10991_v52, %v10893_v30 }
 0x76c   : > { %16011 = vst [vmem:[#allocation26_spill] sm:$0xff] %v11176_v63  ;;  %v4748_v38 = vadd.f32 %v4747_v35, %v11172_v48  ;;  %v4785_v59 = vadd.f32 %v4784_v58, %v11176_v63  ;;  %v16033_v63 = vld [vmem:[#allocation71_spill] sm:$0xff] }
 0x76d   : > { %16012 = vst [vmem:[#allocation105_spill] sm:$0xff] %v11181_v7  ;;  %v11191_v50 = vpop.f32.mrf.mxu2  ;;  %v11211_v7 = vld [vmem:[%s14687_s3 + $0xe8] sm:$0xff]  ;;  %v4813_v29 = vadd.f32 %v4812_v57, %v11189_v9  ;;  %v11256_v57 = vld [vmem:[%s14687_s3 + $0xd8] sm:$0xff] }
 0x76e   : > { %16014 = vst [vmem:[#allocation12_spill] sm:$0xff] %v11185_v5  ;;  %v11204_v11 = vpop.f32.mrf.mxu0  ;;  %5078 = vmatpush.msrb.mxu3 %v11211_v7  ;;  %v11235_v5 = vld [vmem:[%s14687_s3 + $0xe0] sm:$0xff]  ;;  %v4749_v6 = vadd.f32 %v4748_v38, %v11198_v40  ;;  %v4786_v58 = vadd.f32 %v4785_v59, %v11202_v18  ;;  %v11263_v59 = vadd.f32 %v11140_v54, %v16033_v63 }
 0x76f   : > { %16016 = vst [vmem:[#allocation6_spill] sm:$0xff] %v11189_v9  ;;  %v11206_v12 = vpop.f32.mrf.mxu1  ;;  %v16032_v9 = vld [vmem:[#allocation113_spill] sm:$0xff]  ;;  %v4814_v38 = vadd.f32 %v4813_v29, %v11219_v10 }
 0x770   : > { %16017 = vst [vmem:[#allocation112_spill] sm:$0xff] %v11191_v50  ;;  %v11230_v50 = vadd.f32 %v10991_v52, %v10883_v37  ;;  %5079 = vmatpush.msrb.mxu3 %v11235_v5  ;;  %v11247_v37 = vadd.f32 %v10989_v16, %v10890_v33  ;;  %v4750_v33 = vadd.f32 %v4749_v6, %v11226_v21  ;;  %v16038_v29 = vld [vmem:[#allocation81_spill] sm:$0xff] }
 0x771   : > { %16018 = vst [vmem:[#allocation18_spill] sm:$0xff] %v11198_v40  ;;  %v11274_v40 = vadd.f32 %v10991_v52, %v10909_v46  ;;  %v11284_v6 = vadd.f32 %v11140_v54, %v16038_v29 }
 0x772   : > { %16019 = vst [vmem:[#allocation24_spill] sm:$0xff] %v11202_v18  ;;  %5080 = vmatpush.msrb.mxu3 %v11256_v57  ;;  %v4787_v30 = vadd.f32 %v4786_v58, %v11230_v50  ;;  %v11270_v18 = vadd.f32 %v10989_v16, %v10906_v4  ;;  %v16040_v58 = vld [vmem:[#allocation80_spill] sm:$0xff]  ;;  %v4751_v4 = vadd.f32 %v4750_v33, %v11247_v37 }
 0x773   : > { %16020 = vst [vmem:[#allocation32_spill] sm:$0xff] %v11211_v7  ;;  %v16026_v7 = vld [vmem:[#allocation2_spill] sm:$0xff] }
 0x774   : > { %16022 = vst [vmem:[#allocation15_spill] sm:$0xff] %v11219_v10  ;;  %v11240_v35 = vadd.f32 %v11140_v54, %v16026_v7  ;;  %v16031_v7 = vld [vmem:[#allocation7_spill] sm:$0xff]  ;;  %v4788_v46 = vadd.f32 %v4787_v30, %v11251_v25  ;;  %v11294_v10 = vadd.f32 %v10989_v16, %v10916_v41  ;;  %v16044_v30 = vld [vmem:[#allocation62_spill] sm:$0xff]  ;;  %v4752_v41 = vadd.f32 %v4751_v4, %v11270_v18  ;;  %v16050_v4 = vld [vmem:[#allocation33_spill] sm:$0xff] }
 0x775   : > { %16023 = vst [vmem:[#allocation47_spill] sm:$0xff] %v11226_v21 }
 0x776   : > { %16024 = vst [vmem:[#allocation14_spill] sm:$0xff] %v11230_v50  ;;  %v4815_v63 = vadd.f32 %v4814_v38, %v11240_v35  ;;  %v11298_v38 = vadd.f32 %v10991_v52, %v10919_v26  ;;  %v11300_v29 = vpop.f32.mrf.mxu0  ;;  %v4789_v26 = vadd.f32 %v4788_v46, %v11274_v40  ;;  %v11336_v46 = vadd.f32 %v10976_v43, %v16050_v4 }
 0x777   : > { %16025 = vst [vmem:[#allocation29_spill] sm:$0xff] %v11235_v5  ;;  %v4088_v5 = vadd.f32 %v16032_v9, %v16031_v7  ;;  %v11279_v9 = vld [vmem:[%s14687_s3 + $0xd0] sm:$0xff]  ;;  %v11353_v43 = vadd.f32 %v10991_v52, %v10941_v22  ;;  %v4852_v22 = vmul.f32 %v11004_v42, %v11004_v42  ;;  %v16062_v42 = vld [vmem:[#allocation50_spill] sm:$0xff] }
 0x778   : > { %16027 = vst [vmem:[#allocation8_spill] sm:$0xff] %v11240_v35  ;;  %5081 = vmatpush.msrb.mxu3 %v11279_v9  ;;  %v11302_v35 = vpop.f32.mrf.mxu1  ;;  %v4816_v33 = vadd.f32 %v4815_v63, %v11263_v59  ;;  %v11328_v63 = vld [vmem:[%s14687_s3 + $0xc0] sm:$0xff]  ;;  %v4790_v50 = vadd.f32 %v4789_v26, %v11298_v38 }
 0x779   : > { %16028 = vst [vmem:[#allocation16_spill] sm:$0xff] %v11247_v37  ;;  %v4478_v7 = vadd.f32 %v16040_v58, %v4088_v5  ;;  %v11307_v5 = vld [vmem:[%s14687_s3 + $0xc8] sm:$0xff]  ;;  %v11312_v58 = vadd.f32 %v11140_v54, %v16044_v30  ;;  %v16049_v30 = vld [vmem:[#allocation21_spill] sm:$0xff] }
 0x77a   : > { %16029 = vst [vmem:[#allocation17_spill] sm:$0xff] %v11251_v25  ;;  %5082 = vmatpush.msrb.mxu3 %v11307_v5  ;;  %v11323_v25 = vadd.f32 %v10991_v52, %v10932_v49 }
 0x77b   : > { %16030 = vst [vmem:[#allocation22_spill] sm:$0xff] %v11256_v57  ;;  %v11287_v57 = vpop.f32.mrf.mxu2  ;;  %v11342_v49 = vadd.f32 %v11140_v54, %v4478_v7  ;;  %v16055_v7 = vld [vmem:[#allocation30_spill] sm:$0xff] }
 0x77c   : > { %16034 = vst [vmem:[#allocation49_spill] sm:$0xff] %v11263_v59  ;;  %v11338_v59 = vpop.f32.mrf.mxu3  ;;  %5083 = vmatpush.msrb.mxu3 %v11328_v63 }
 0x77d   : > { %16035 = vst [vmem:[#allocation9_spill] sm:$0xff] %v11270_v18 }
 0x77e   : > { %16036 = vst [vmem:[#allocation25_spill] sm:$0xff] %v11274_v40  ;;  %v4753_v40 = vadd.f32 %v4752_v41, %v11294_v10  ;;  %v16056_v41 = vld [vmem:[#allocation61_spill] sm:$0xff] }
 0x77f   : > { %16037 = vst [vmem:[#allocation10_spill] sm:$0xff] %v11279_v9  ;;  %v11319_v9 = vadd.f32 %v10989_v16, %v10929_v13  ;;  %v4817_v13 = vadd.f32 %v4816_v33, %v11284_v6  ;;  %v11358_v33 = vld [vmem:[%s14687_s3 + $0xb8] sm:$0xff]  ;;  %v11366_v26 = vadd.f32 %v11026_v62, %v16056_v41  ;;  %v11383_v62 = vld [vmem:[%s14687_s3 + $0xb0] sm:$0xff]  ;;  %v11387_v41 = vadd.f32 %v10989_v16, %v10950_v17 }
 0x780   : > { %16039 = vst [vmem:[#allocation97_spill] sm:$0xff] %v11284_v6  ;;  %5084 = vmatpush.msrb.mxu3 %v11358_v33  ;;  %v11403_v17 = vadd.f32 %v11140_v54, %v10841_v14  ;;  %v11422_v14 = vadd.f32 %v10991_v52, %v10964_v47  ;;  %v11439_v47 = vld [vmem:[%s14687_s3 + $0xa0] sm:$0xff] }
 0x781   : > { %16041 = vst [vmem:[#allocation35_spill] sm:$0xff] %v11294_v10  ;;  %v4818_v4 = vadd.f32 %v4817_v13, %v11312_v58  ;;  %v11391_v13 = vadd.f32 %v10991_v52, %v10953_v55 }
 0x782   : > { %16042 = vst [vmem:[#allocation60_spill] sm:$0xff] %v11298_v38  ;;  %5085 = vmatpush.msrb.mxu3 %v11383_v62 }
 0x783   : > { %16043 = vst [vmem:[#allocation40_spill] sm:$0xff] %v11307_v5  ;;  %v11332_v5 = vadd.f32 %v10955_v34, %v16049_v30  ;;  %v11349_v34 = vadd.f32 %v10989_v16, %v10938_v39  ;;  %v11362_v30 = vadd.f32 %v10984_v20, %v16055_v7  ;;  %v4849_v39 = vmul.f32 %v11012_v3, %v11012_v3  ;;  %v16063_v3 = vld [vmem:[#allocation38_spill] sm:$0xff] }
 0x784   : > { %16045 = vst [vmem:[#allocation28_spill] sm:$0xff] %v11312_v58  ;;  %v4754_v20 = vadd.f32 %v4753_v40, %v11319_v9  ;;  %v4791_v7 = vadd.f32 %v4790_v50, %v11323_v25  ;;  %v4516_v40 = vadd.f32 %v10974_v60, %v16063_v3  ;;  %v11397_v50 = vpop.f32.mrf.mxu2  ;;  %v11418_v60 = vadd.f32 %v10989_v16, %v10961_v53  ;;  %v16068_v3 = vld [vmem:[#allocation36_spill] sm:$0xff]  ;;  %v16070_v53 = vld [vmem:[#allocation77_spill] sm:$0xff] }
 0x785   : > { %16046 = vst [vmem:[#allocation13_spill] sm:$0xff] %v11319_v9  ;;  %v11434_v38 = vadd.f32 %v11140_v54, %v16070_v53  ;;  %v16077_v53 = vld [vmem:[#allocation56_spill] sm:$0xff] }
 0x786   : > { %16047 = vst [vmem:[#allocation20_spill] sm:$0xff] %v11323_v25  ;;  %v4755_v58 = vadd.f32 %v4754_v20, %v11349_v34  ;;  %v4792_v55 = vadd.f32 %v4791_v7, %v11353_v43  ;;  %v11407_v25 = vpop.f32.mrf.mxu0  ;;  %v16069_v20 = vld [vmem:[#allocation42_spill] sm:$0xff] }
 0x787   : > { %16048 = vst [vmem:[#allocation27_spill] sm:$0xff] %v11328_v63  ;;  %v16057_v63 = vld [vmem:[#allocation69_spill] sm:$0xff]  ;;  %v4519_v7 = vadd.f32 %v10982_v31, %v16069_v20 }
 0x788   : > { %16051 = vst [vmem:[#allocation31_spill] sm:$0xff] %v11342_v49  ;;  %v11376_v6 = vadd.f32 %v11140_v54, %v16057_v63  ;;  %v4515_v63 = vadd.f32 %v10972_v15, %v16062_v42  ;;  %v11409_v42 = vpop.f32.mrf.mxu1  ;;  %v11414_v15 = vld [vmem:[%s14687_s3 + $0xa8] sm:$0xff]  ;;  %v4793_v31 = vadd.f32 %v4792_v55, %v11391_v13 }
 0x789   : > { %16052 = vst [vmem:[#allocation34_spill] sm:$0xff] %v11349_v34  ;;  %5086 = vmatpush.msrb.mxu3 %v11414_v15 }
 0x78a   : > { %16053 = vst [vmem:[#allocation46_spill] sm:$0xff] %v11353_v43 }
 0x78b   : > { %16054 = vst [vmem:[#allocation19_spill] sm:$0xff] %v11358_v33  ;;  %v4819_v33 = vadd.f32 %v4818_v4, %v11342_v49  ;;  %v4518_v4 = vadd.f32 %v10980_v45, %v16068_v3  ;;  %v4855_v49 = vmul.f32 %v11020_v24, %v11020_v24  ;;  %v4756_v45 = vadd.f32 %v4755_v58, %v11387_v41  ;;  %v16075_v3 = vld [vmem:[#allocation86_spill] sm:$0xff]  ;;  %v16078_v58 = vld [vmem:[#allocation37_spill] sm:$0xff] }
 0x78c   : > { %16058 = vst [vmem:[#allocation122_spill] sm:$0xff] %v11376_v6  ;;  %5087 = vmatpush.msrb.mxu3 %v11439_v47  ;;  %v11453_v20 = vadd.f32 %v11140_v54, %v16075_v3  ;;  %v4521_v24 = vadd.f32 %v10998_v1, %v16077_v53  ;;  %v4522_v55 = vadd.f32 %v11000_v19, %v16078_v58  ;;  %v16082_v53 = vld [vmem:[#allocation39_spill] sm:$0xff] }
 0x78d   : > { %16059 = vst [vmem:[#allocation110_spill] sm:$0xff] %v11383_v62  ;;  %v4945_v62 = vadd.f32 %v4852_v22, %v4849_v39  ;;  %v4820_v43 = vadd.f32 %v4819_v33, %v11376_v6  ;;  %v11444_v39 = vadd.f32 %v10989_v16, %v4515_v63  ;;  %v11447_v22 = vadd.f32 %v10991_v52, %v4516_v40  ;;  %v11462_v63 = vld [vmem:[%s14687_s3 + $0x98] sm:$0xff]  ;;  %v11464_v40 = vpop.f32.mrf.mxu3 }
 0x78e   : > { %16060 = vst [vmem:[#allocation68_spill] sm:$0xff] %v11387_v41  ;;  %v11469_v3 = vadd.f32 %v10989_v16, %v4518_v4  ;;  %5088 = vmatpush.msrb.mxu3 %v11462_v63  ;;  %v4858_v19 = vmul.f32 %v11034_v61, %v11034_v61  ;;  %v4524_v58 = vadd.f32 %v11052_v56, %v16082_v53  ;;  %v11484_v4 = vld [vmem:[%s14687_s3 + $0x90] sm:$0xff]  ;;  %v11493_v61 = vpop.f32.mrf.mxu2  ;;  %v16090_v53 = vld [vmem:[#allocation45_spill] sm:$0xff] }
 0x78f   : > { %16061 = vst [vmem:[#allocation65_spill] sm:$0xff] %v11391_v13  ;;  %v4821_v33 = vadd.f32 %v4820_v43, %v11403_v17  ;;  %v4794_v43 = vadd.f32 %v4793_v31, %v11422_v14  ;;  %v4946_v1 = vadd.f32 %v4945_v62, %v4855_v49  ;;  %v16085_v31 = vld [vmem:[#allocation74_spill] sm:$0xff]  ;;  %v11500_v56 = vadd.f32 %v10991_v52, %v4522_v55 }
 0x790   : > { %16064 = vst [vmem:[#allocation79_spill] sm:$0xff] %v11403_v17  ;;  %v16083_v17 = vld [vmem:[#allocation75_spill] sm:$0xff]  ;;  %5089 = vmatpush.msrb.mxu3 %v11484_v4 }
 0x791   : > { %16065 = vst [vmem:[#allocation104_spill] sm:$0xff] %v11414_v15  ;;  %v11472_v15 = vadd.f32 %v10991_v52, %v4519_v7  ;;  %v4822_v7 = vadd.f32 %v4821_v33, %v11434_v38  ;;  %v4795_v62 = vadd.f32 %v4794_v43, %v11447_v22  ;;  %v11509_v43 = vld [vmem:[%s14687_s3 + $0x88] sm:$0xff] }
 0x792   : > { %16066 = vst [vmem:[#allocation2_spill] sm:$0xff] %v11418_v60  ;;  %5090 = vmatpush.msrb.mxu3 %v11509_v43 }
 0x793   : > { %16067 = vst [vmem:[#allocation7_spill] sm:$0xff] %v11422_v14 }
 0x794   : > { %16071 = vst [vmem:[#allocation113_spill] sm:$0xff] %v11434_v38  ;;  %v4266_v38 = vpop.f32.mrf.mxu0 }
 0x795   : > { %16072 = vst [vmem:[#allocation71_spill] sm:$0xff] %v11439_v47  ;;  %v4757_v47 = vadd.f32 %v4756_v45, %v11418_v60  ;;  %v4525_v45 = vadd.f32 %v11054_v27, %v16083_v17  ;;  %v11497_v27 = vadd.f32 %v10989_v16, %v4521_v24  ;;  %v16089_v17 = vld [vmem:[#allocation41_spill] sm:$0xff]  ;;  %v16092_v24 = vld [vmem:[#allocation84_spill] sm:$0xff] }
 0x796   : > { %16073 = vst [vmem:[#allocation81_spill] sm:$0xff] %v11444_v39  ;;  %v4527_v33 = vadd.f32 %v11119_v51, %v16089_v17  ;;  %v11514_v6 = vadd.f32 %v11140_v54, %v16092_v24  ;;  %v4796_v51 = vadd.f32 %v4795_v62, %v11472_v15  ;;  %v16099_v62 = vld [vmem:[#allocation63_spill] sm:$0xff] }
 0x797   : > { %16074 = vst [vmem:[#allocation80_spill] sm:$0xff] %v11447_v22  ;;  %v4758_v49 = vadd.f32 %v4757_v47, %v11444_v39  ;;  %v4355_v47 = vpop.f32.mrf.mxu1  ;;  %v11523_v17 = vadd.f32 %v10991_v52, %v4525_v45  ;;  %v11536_v24 = vadd.f32 %v11102_v28, %v16099_v62  ;;  %v16100_v45 = vld [vmem:[#allocation72_spill] sm:$0xff] }
 0x798   : > { %16076 = vst [vmem:[#allocation62_spill] sm:$0xff] %v11453_v20 }
 0x799   : > { %16079 = vst [vmem:[#allocation21_spill] sm:$0xff] %v11462_v63  ;;  %v11489_v63 = vadd.f32 %v11140_v54, %v16085_v31  ;;  %v4528_v31 = vadd.f32 %v11121_v0, %v16090_v53  ;;  %v4759_v55 = vadd.f32 %v4758_v49, %v11469_v3  ;;  %v11520_v0 = vadd.f32 %v10989_v16, %v4524_v58  ;;  %v16096_v53 = vld [vmem:[#allocation67_spill] sm:$0xff]  ;;  %v11532_v49 = vld [vmem:[%s14687_s3 + $0x80] sm:$0xff] }
 0x79a   : > { %16080 = vst [vmem:[#allocation33_spill] sm:$0xff] %v11469_v3  ;;  %v4530_v22 = vadd.f32 %v11204_v11, %v16096_v53  ;;  %v4947_v58 = vadd.f32 %v4946_v1, %v4858_v19  ;;  %5091 = vmatpush.msrb.mxu3 %v11532_v49  ;;  %v11547_v53 = vadd.f32 %v10989_v16, %v4527_v33  ;;  %v16104_v1 = vld [vmem:[#allocation89_spill] sm:$0xff] }
 0x79b   : > { %16081 = vst [vmem:[#allocation30_spill] sm:$0xff] %v11472_v15  ;;  %v11541_v15 = vadd.f32 %v11140_v54, %v16100_v45  ;;  %v4760_v11 = vadd.f32 %v4759_v55, %v11497_v27  ;;  %v11555_v19 = vadd.f32 %v11140_v54, %v16104_v1  ;;  %v16107_v45 = vld [vmem:[#allocation55_spill] sm:$0xff]  ;;  %v4861_v1 = vmul.f32 %v11044_v2, %v11044_v2 }
 0x79c   : > { %16084 = vst [vmem:[#allocation61_spill] sm:$0xff] %v11484_v4  ;;  %v4823_v4 = vadd.f32 %v4822_v7, %v11453_v20  ;;  %v16097_v7 = vld [vmem:[#allocation70_spill] sm:$0xff]  ;;  %v4534_v55 = vadd.f32 %v11302_v35, %v16107_v45  ;;  %v4269_v2 = vpop.f32.mrf.mxu0 }
 0x79d   : > { %16086 = vst [vmem:[#allocation69_spill] sm:$0xff] %v11489_v63  ;;  %v4531_v20 = vadd.f32 %v11206_v12, %v16097_v7  ;;  %v4797_v12 = vadd.f32 %v4796_v51, %v11500_v56  ;;  %v11550_v7 = vadd.f32 %v10991_v52, %v4528_v31  ;;  %v4761_v51 = vadd.f32 %v4760_v11, %v11520_v0  ;;  %v16111_v11 = vld [vmem:[#allocation73_spill] sm:$0xff]  ;;  %v16112_v45 = vld [vmem:[#allocation82_spill] sm:$0xff] }
 0x79e   : > { %16087 = vst [vmem:[#allocation50_spill] sm:$0xff] %v11497_v27 }
 0x79f   : > { %16088 = vst [vmem:[#allocation38_spill] sm:$0xff] %v11500_v56  ;;  %v4798_v33 = vadd.f32 %v4797_v12, %v11523_v17  ;;  %v11567_v31 = vadd.f32 %v10991_v52, %v4531_v20  ;;  %v4537_v12 = vadd.f32 %v11409_v42, %v16111_v11  ;;  %v11582_v20 = vadd.f32 %v11140_v54, %v16112_v45  ;;  %v16117_v11 = vld [vmem:[#allocation52_spill] sm:$0xff]  ;;  %v16118_v45 = vld [vmem:[#allocation90_spill] sm:$0xff] }
 0x7a0   : > { %16091 = vst [vmem:[#allocation36_spill] sm:$0xff] %v11509_v43  ;;  %v4824_v43 = vadd.f32 %v4823_v4, %v11489_v63  ;;  %v16106_v4 = vld [vmem:[#allocation48_spill] sm:$0xff]  ;;  %v11597_v56 = vadd.f32 %v11140_v54, %v16118_v45 }
 0x7a1   : > { %16093 = vst [vmem:[#allocation42_spill] sm:$0xff] %v11514_v6  ;;  %v4533_v62 = vadd.f32 %v11300_v29, %v16106_v4  ;;  %v4864_v29 = vmul.f32 %v11063_v44, %v11063_v44  ;;  %v16110_v4 = vld [vmem:[#allocation43_spill] sm:$0xff]  ;;  %v4799_v63 = vadd.f32 %v4798_v33, %v11550_v7 }
 0x7a2   : > { %16094 = vst [vmem:[#allocation77_spill] sm:$0xff] %v11520_v0  ;;  %v4825_v28 = vadd.f32 %v4824_v43, %v11514_v6  ;;  %v11569_v43 = vpop.f32.mrf.mxu3  ;;  %v4536_v35 = vadd.f32 %v11407_v25, %v16110_v4  ;;  %v4762_v6 = vadd.f32 %v4761_v51, %v11547_v53  ;;  %v11590_v25 = vadd.f32 %v10991_v52, %v4534_v55  ;;  %v16116_v4 = vld [vmem:[#allocation3_spill] sm:$0xff] }
 0x7a3   : > { %16095 = vst [vmem:[#allocation86_spill] sm:$0xff] %v11523_v17  ;;  %v4358_v17 = vpop.f32.mrf.mxu1  ;;  %v11587_v44 = vadd.f32 %v10989_v16, %v4533_v62  ;;  %v4539_v42 = vadd.f32 %v4266_v38, %v16116_v4  ;;  %v4800_v33 = vadd.f32 %v4799_v63, %v11567_v31  ;;  %v11607_v55 = vadd.f32 %v10991_v52, %v4537_v12  ;;  %v16121_v38 = vld [vmem:[#allocation66_spill] sm:$0xff]  ;;  %v16122_v4 = vld [vmem:[#allocation59_spill] sm:$0xff] }
 0x7a4   : > { %16098 = vst [vmem:[#allocation56_spill] sm:$0xff] %v11532_v49  ;;  %v11564_v49 = vadd.f32 %v10989_v16, %v4530_v22  ;;  %v4826_v22 = vadd.f32 %v4825_v28, %v11541_v15  ;;  %v4540_v28 = vadd.f32 %v4355_v47, %v16117_v11  ;;  %v11604_v62 = vadd.f32 %v10989_v16, %v4536_v35  ;;  %v16125_v63 = vld [vmem:[#allocation91_spill] sm:$0xff]  ;;  %v11621_v35 = vld [vmem:[%s14688_s4 + $0x118] sm:$0xff] }
 0x7a5   : > { %16101 = vst [vmem:[#allocation37_spill] sm:$0xff] %v11541_v15  ;;  %v4542_v47 = vadd.f32 %v4269_v2, %v16121_v38  ;;  %v4948_v11 = vadd.f32 %v4947_v58, %v4861_v1  ;;  %v4801_v2 = vadd.f32 %v4800_v33, %v11590_v25  ;;  %5299 = vmatpush.msrb.mxu2 %v11621_v35  ;;  %v16130_v38 = vld [vmem:[#allocation78_spill] sm:$0xff] }
 0x7a6   : > { %16102 = vst [vmem:[#allocation39_spill] sm:$0xff] %v11547_v53  ;;  %v4827_v15 = vadd.f32 %v4826_v22, %v11555_v19  ;;  %v4763_v51 = vadd.f32 %v4762_v6, %v11564_v49  ;;  %v4543_v22 = vadd.f32 %v4358_v17, %v16122_v4  ;;  %v11626_v17 = vadd.f32 %v10989_v16, %v4539_v42 }
 0x7a7   : > { %16103 = vst [vmem:[#allocation75_spill] sm:$0xff] %v11550_v7  ;;  %v11601_v7 = vpop.f32.mrf.mxu2  ;;  %v4949_v58 = vadd.f32 %v4948_v11, %v4864_v29  ;;  %v4802_v42 = vadd.f32 %v4801_v2, %v11607_v55  ;;  %v11642_v4 = vadd.f32 %v10989_v16, %v4542_v47  ;;  %v4867_v29 = vmul.f32 %v11076_v8, %v11076_v8  ;;  %v11658_v47 = vld [vmem:[%s14688_s4 + $0x110] sm:$0xff] }
 0x7a8   : > { %16105 = vst [vmem:[#allocation74_spill] sm:$0xff] %v11555_v19  ;;  %v4828_v45 = vadd.f32 %v4827_v15, %v11582_v20  ;;  %v16123_v19 = vld [vmem:[#allocation87_spill] sm:$0xff]  ;;  %v4764_v12 = vadd.f32 %v4763_v51, %v11587_v44  ;;  %v11629_v15 = vadd.f32 %v10991_v52, %v4540_v28  ;;  %v4520_v51 = vadd.f32 %v16130_v38, %v11336_v46  ;;  %v16133_v46 = vld [vmem:[#allocation109_spill] sm:$0xff]  ;;  %v16135_v38 = vld [vmem:[#allocation54_spill] sm:$0xff] }
 0x7a9   : > { %16108 = vst [vmem:[#allocation41_spill] sm:$0xff] %v11564_v49  ;;  %v11614_v6 = vadd.f32 %v11140_v54, %v16123_v19  ;;  %v16128_v19 = vld [vmem:[#allocation95_spill] sm:$0xff]  ;;  %v11645_v28 = vadd.f32 %v10991_v52, %v4543_v22  ;;  %5279 = vmatpush.msrb.mxu1 %v11658_v47 }
 0x7aa   : > { %16109 = vst [vmem:[#allocation45_spill] sm:$0xff] %v11567_v31  ;;  %v4517_v31 = vadd.f32 %v16125_v63, %v11332_v5  ;;  %v4829_v5 = vadd.f32 %v4828_v45, %v11597_v56  ;;  %v11635_v1 = vadd.f32 %v11140_v54, %v16128_v19  ;;  %v4765_v33 = vadd.f32 %v4764_v12, %v11604_v62  ;;  %v4271_v12 = vpop.f32.mrf.mxu0 }
 0x7ab   : > { %16113 = vst [vmem:[#allocation84_spill] sm:$0xff] %v11582_v20  ;;  %v4523_v63 = vadd.f32 %v16133_v46, %v11362_v30  ;;  %v4360_v19 = vpop.f32.mrf.mxu1  ;;  %v4803_v2 = vadd.f32 %v4802_v42, %v11629_v15  ;;  %v4545_v8 = vadd.f32 %v4271_v12, %v16135_v38  ;;  %v4870_v30 = vmul.f32 %v11095_v23, %v11095_v23  ;;  %v11676_v42 = vld [vmem:[%s14688_s4 + $0x108] sm:$0xff] }
 0x7ac   : > { %16114 = vst [vmem:[#allocation67_spill] sm:$0xff] %v11587_v44  ;;  %v4830_v11 = vadd.f32 %v4829_v5, %v11614_v6  ;;  %v11651_v45 = vadd.f32 %v11140_v54, %v4517_v31  ;;  %v4766_v22 = vadd.f32 %v4765_v33, %v11626_v17  ;;  %v16136_v5 = vld [vmem:[#allocation53_spill] sm:$0xff]  ;;  %v4057_v31 = vpop.f32.mrf.mxu3  ;;  %v4526_v33 = vadd.f32 %v11104_v36, %v11366_v26 }
 0x7ad   : > { %16115 = vst [vmem:[#allocation70_spill] sm:$0xff] %v11590_v25  ;;  %v11681_v38 = vadd.f32 %v10989_v16, %v4545_v8  ;;  %5259 = vmatpush.msrb.mxu0 %v11676_v42  ;;  %v4950_v8 = vadd.f32 %v4949_v58, %v4867_v29 }
 0x7ae   : > { %16119 = vst [vmem:[#allocation63_spill] sm:$0xff] %v11597_v56  ;;  %v4831_v46 = vadd.f32 %v4830_v11, %v11635_v1  ;;  %v4767_v12 = vadd.f32 %v4766_v22, %v11642_v4  ;;  %v16141_v22 = vld [vmem:[#allocation112_spill] sm:$0xff] }
 0x7af   : > { %16120 = vst [vmem:[#allocation72_spill] sm:$0xff] %v11604_v62  ;;  %v4529_v23 = vadd.f32 %v16141_v22, %v11536_v24  ;;  %v4951_v24 = vadd.f32 %v4950_v8, %v4870_v30 }
 0x7b0   : > { %16124 = vst [vmem:[#allocation89_spill] sm:$0xff] %v11614_v6  ;;  %v11669_v6 = vadd.f32 %v11140_v54, %v4520_v51  ;;  %v16139_v51 = vld [vmem:[#allocation64_spill] sm:$0xff]  ;;  %v4832_v26 = vadd.f32 %v4831_v46, %v11651_v45 }
 0x7b1   : > { %16126 = vst [vmem:[#allocation48_spill] sm:$0xff] %v11621_v35  ;;  %v4546_v35 = vadd.f32 %v4360_v19, %v16136_v5  ;;  %v4804_v19 = vadd.f32 %v4803_v2, %v11645_v28  ;;  %v4142_v36 = vadd.f32 %v11213_v32, %v16139_v51  ;;  %v11691_v5 = vadd.f32 %v11140_v54, %v4523_v63  ;;  %v4447_v2 = vpop.f32.mrf.mxu2 }
 0x7b2   : > { %16127 = vst [vmem:[#allocation55_spill] sm:$0xff] %v11626_v17  ;;  %v4833_v46 = vadd.f32 %v4832_v26, %v11669_v6  ;;  %v11703_v63 = vadd.f32 %v11140_v54, %v4526_v33  ;;  %v11710_v29 = vadd.f32 %v11140_v54, %v4529_v23 }
 0x7b3   : > { %16129 = vst [vmem:[#allocation43_spill] sm:$0xff] %v11635_v1  ;;  %v11684_v11 = vadd.f32 %v10991_v52, %v4546_v35  ;;  %v4768_v52 = vadd.f32 %v4767_v12, %v11681_v38  ;;  %v4532_v51 = vadd.f32 %v11287_v57, %v4142_v36  ;;  %v16144_v1 = vld [vmem:[#allocation108_spill] sm:$0xff]  ;;  %v16145_v12 = vld [vmem:[#allocation51_spill] sm:$0xff] }
 0x7b4   : > { %16131 = vst [vmem:[#allocation73_spill] sm:$0xff] %v11642_v4  ;;  %v4834_v58 = vadd.f32 %v4833_v46, %v11691_v5  ;;  %v16146_v57 = vld [vmem:[#allocation120_spill] sm:$0xff]  ;;  %v16147_v46 = vld [vmem:[#allocation57_spill] sm:$0xff] }
 0x7b5   : > { %16132 = vst [vmem:[#allocation82_spill] sm:$0xff] %v11651_v45  ;;  %v4805_v35 = vadd.f32 %v4804_v19, %v11684_v11  ;;  %v4769_v22 = vrot.slane %v4768_v52, 4  ;;  %v4148_v19 = vadd.f32 %v11464_v40, %v16145_v12  ;;  %v4879_v30 = vmul.f32 %v16146_v57, %v16146_v57  ;;  %v16150_v12 = vld [vmem:[#allocation58_spill] sm:$0xff] }
 0x7b6   : > { %16134 = vst [vmem:[#allocation3_spill] sm:$0xff] %v11658_v47  ;;  %v16142_v47 = vld [vmem:[#allocation44_spill] sm:$0xff]  ;;  %v4835_v36 = vadd.f32 %v4834_v58, %v11703_v63  ;;  %v11719_v8 = vadd.f32 %v11140_v54, %v4532_v51  ;;  %v4151_v23 = vadd.f32 %v11569_v43, %v16147_v46  ;;  %v4882_v40 = vmul.f32 %v11172_v48, %v11172_v48  ;;  %v16149_v58 = vld [vmem:[#allocation18_spill] sm:$0xff] }
 0x7b7   : > { %16137 = vst [vmem:[#allocation52_spill] sm:$0xff] %v11676_v42  ;;  %v4145_v16 = vadd.f32 %v11338_v59, %v16142_v47  ;;  %v16143_v42 = vld [vmem:[#allocation118_spill] sm:$0xff]  ;;  %v4806_v45 = vrot.slane %v4805_v35, 4  ;;  %v4876_v59 = vmul.f32 %v16144_v1, %v16144_v1  ;;  %v4770_v33 = vadd.f32 %v4769_v22, %v4768_v52 }
 0x7b8   : > { %16138 = vst [vmem:[#allocation90_spill] sm:$0xff] %v11681_v38  ;;  %v4873_v32 = vmul.f32 %v16143_v42, %v16143_v42  ;;  %v4538_v1 = vadd.f32 %v11493_v61, %v4148_v19  ;;  %v4541_v51 = vadd.f32 %v11601_v7, %v4151_v23  ;;  %v4885_v61 = vmul.f32 %v16149_v58, %v16149_v58 }
 0x7b9   : > { %16140 = vst [vmem:[#allocation66_spill] sm:$0xff] %v11691_v5  ;;  %v4535_v47 = vadd.f32 %v11397_v50, %v4145_v16  ;;  %v4807_v26 = vadd.f32 %v4806_v45, %v4805_v35  ;;  %v4771_v50 = vrot.slane %v4770_v33, 2  ;;  %v4059_v16 = vpop.f32.mrf.mxu3  ;;  %v4836_v45 = vadd.f32 %v4835_v36, %v11710_v29  ;;  %v16148_v35 = vld [vmem:[#allocation76_spill] sm:$0xff] }
 0x7ba   : > { %v4952_v42 = vadd.f32 %v4951_v24, %v4873_v32  ;;  %v4154_v32 = vadd.f32 %v4057_v31, %v16148_v35  ;;  %v4157_v19 = vadd.f32 %v4059_v16, %v16150_v12  ;;  %v11737_v36 = vadd.f32 %v11140_v54, %v4538_v1 }
 0x7bb   : > { %v11728_v52 = vadd.f32 %v11140_v54, %v4535_v47  ;;  %v4772_v24 = vadd.f32 %v4771_v50, %v4770_v33  ;;  %v4808_v22 = vrot.slane %v4807_v26, 2  ;;  %v4888_v7 = vmul.f32 %v11226_v21, %v11226_v21  ;;  %v11748_v50 = vld [vmem:[%s14687_s3 + $0x178] sm:$0xff] }
 0x7bc   : > { %v4953_v5 = vadd.f32 %v4952_v42, %v4876_v59  ;;  %v4837_v42 = vadd.f32 %v4836_v45, %v11719_v8  ;;  %v4449_v59 = vpop.f32.mrf.mxu2  ;;  %16151 = vst [vmem:[#allocation59_spill] sm:$0xff] %v11737_v36  ;;  %v4544_v47 = vadd.f32 %v4447_v2, %v4154_v32  ;;  %v11753_v2 = vld [vmem:[%s14688_s4 + $0x100] sm:$0xff]  ;;  %v4891_v16 = vmul.f32 %v11247_v37, %v11247_v37  ;;  %v11764_v45 = vld [vmem:[%s14687_s3 + $0x170] sm:$0xff] }
 0x7bd   : > { %v4773_v46 = vrot.slane %v4772_v24, 1  ;;  %v4809_v33 = vadd.f32 %v4808_v22, %v4807_v26  ;;  %5300 = vmatpush.msrb.mxu2 %v11753_v2  ;;  %v4894_v35 = vmul.f32 %v11270_v18, %v11270_v18  ;;  %v11777_v22 = vld [vmem:[%s14687_s3 + $0x168] sm:$0xff] }
 0x7be   : > { %v4954_v43 = vadd.f32 %v4953_v5, %v4879_v30  ;;  %v4838_v31 = vadd.f32 %v4837_v42, %v11728_v52  ;;  %v11743_v5 = vadd.f32 %v11140_v54, %v4541_v51  ;;  %v4547_v30 = vadd.f32 %v4449_v59, %v4157_v19  ;;  %v11786_v59 = vld [vmem:[%s14687_s3 + $0x160] sm:$0xff]  ;;  %v11794_v19 = vld [vmem:[%s14688_s4 + $0xf8] sm:$0xff] }
 0x7bf   : > { %v4774_v23 = vadd.f32 %v4773_v46, %v4772_v24  ;;  %v11759_v26 = vadd.f32 %v11140_v54, %v4544_v47  ;;  %v4810_v51 = vrot.slane %v4809_v33, 1  ;;  %v4900_v46 = vmul.f32 %v11319_v9, %v11319_v9  ;;  %5280 = vmatpush.msrb.mxu1 %v11794_v19 }
 0x7c0   : > { %v4955_v48 = vadd.f32 %v4954_v43, %v4882_v40  ;;  %16152 = vst [vmem:[#allocation87_spill] sm:$0xff] %v11743_v5  ;;  %v4839_v40 = vadd.f32 %v4838_v31, %v11737_v36  ;;  %v11772_v24 = vadd.f32 %v11140_v54, %v4547_v30  ;;  %v16155_v54 = vld [vmem:[#allocation85_spill] sm:$0xff]  ;;  %v11802_v30 = vld [vmem:[%s14687_s3 + $0x158] sm:$0xff] }
 0x7c1   : > { %16153 = vst [vmem:[#allocation91_spill] sm:$0xff] %v11759_v26  ;;  %5072 = vmatmul.f32.vlgmr.msra.gmra.mxu3 %v4774_v23  ;;  %v4853_v12 = vmul.f32 %v16155_v54, %v16155_v54  ;;  %v4811_v31 = vadd.f32 %v4810_v51, %v4809_v33  ;;  %v16156_v23 = vld [vmem:[#allocation83_spill] sm:$0xff] }
 0x7c2   : > { %v4956_v1 = vadd.f32 %v4955_v48, %v4885_v61  ;;  %5096 = vmatpush.msra.mxu3 %v11748_v50  ;;  %v4840_v32 = vadd.f32 %v4839_v40, %v11743_v5  ;;  %16154 = vst [vmem:[#allocation95_spill] sm:$0xff] %v11772_v24  ;;  %v4897_v61 = vmul.f32 %v11294_v10, %v11294_v10 }
 0x7c4   : > { %v4957_v48 = vadd.f32 %v4956_v1, %v4888_v7  ;;  %5097 = vmatpush.msra.mxu3 %v11764_v45  ;;  %v4841_v42 = vadd.f32 %v4840_v32, %v11759_v26  ;;  %v4850_v1 = vmul.f32 %v16156_v23, %v16156_v23  ;;  %v11820_v32 = vld [vmem:[%s14687_s3 + $0x150] sm:$0xff]  ;;  %v16159_v23 = vld [vmem:[#allocation93_spill] sm:$0xff] }
 0x7c6   : > { %v4958_v43 = vadd.f32 %v4957_v48, %v4891_v16  ;;  %5098 = vmatpush.msra.mxu3 %v11777_v22  ;;  %v4842_v7 = vadd.f32 %v4841_v42, %v11772_v24  ;;  %v16157_v16 = vld [vmem:[#allocation114_spill] sm:$0xff]  ;;  %v11813_v48 = vld [vmem:[%s14688_s4 + $0xf0] sm:$0xff]  ;;  %v4982_v51 = vadd.f32 %v4853_v12, %v4850_v1  ;;  %v4909_v1 = vmul.f32 %v11418_v60, %v11418_v60  ;;  %v16161_v60 = vld [vmem:[#allocation92_spill] sm:$0xff] }
 0x7c7   : > { %v4856_v40 = vmul.f32 %v16157_v16, %v16157_v16  ;;  %5260 = vmatpush.msrb.mxu0 %v11813_v48  ;;  %v4868_v9 = vmul.f32 %v16161_v60, %v16161_v60 }
 0x7c8   : > { %v4959_v47 = vadd.f32 %v4958_v43, %v4894_v35  ;;  %5099 = vmatpush.msra.mxu3 %v11786_v59  ;;  %v4903_v35 = vmul.f32 %v11349_v34, %v11349_v34  ;;  %v16158_v43 = vld [vmem:[#allocation88_spill] sm:$0xff]  ;;  %v4862_v34 = vmul.f32 %v16159_v23, %v16159_v23 }
 0x7c9   : > { %5092 = vmatmul.f32.vlgmr.msrb.gmra.mxu3 %v4811_v31  ;;  %v4859_v42 = vmul.f32 %v16158_v43, %v16158_v43  ;;  %v11831_v31 = vld [vmem:[%s14687_s3 + $0x148] sm:$0xff]  ;;  %v4983_v54 = vadd.f32 %v4982_v51, %v4856_v40  ;;  %v4912_v51 = vmul.f32 %v11444_v39, %v11444_v39 }
 0x7ca   : > { %v4960_v33 = vadd.f32 %v4959_v47, %v4897_v61  ;;  %5100 = vmatpush.msra.mxu3 %v11802_v30  ;;  %v4906_v61 = vmul.f32 %v11387_v41, %v11387_v41  ;;  %v4843_v47 = vrot.slane %v4842_v7, 4  ;;  %v16160_v43 = vld [vmem:[#allocation98_spill] sm:$0xff] }
 0x7cb   : > { %v4865_v41 = vmul.f32 %v16160_v43, %v16160_v43  ;;  %v16163_v43 = vld [vmem:[#allocation106_spill] sm:$0xff] }
 0x7cc   : > { %v4961_v16 = vadd.f32 %v4960_v33, %v4900_v46  ;;  %5101 = vmatpush.msra.mxu3 %v11820_v32  ;;  %v11841_v46 = vld [vmem:[%s14687_s3 + $0x140] sm:$0xff]  ;;  %v4984_v33 = vadd.f32 %v4983_v54, %v4859_v42  ;;  %v4844_v23 = vadd.f32 %v4843_v47, %v4842_v7  ;;  %v4915_v42 = vmul.f32 %v11469_v3, %v11469_v3  ;;  %v16162_v47 = vld [vmem:[#allocation111_spill] sm:$0xff] }
 0x7cd   : > { %v4874_v3 = vmul.f32 %v16163_v43, %v16163_v43  ;;  %v11896_v43 = vld [vmem:[%s14687_s3 + $0x118] sm:$0xff] }
 0x7ce   : > { %v4962_v12 = vadd.f32 %v4961_v16, %v4903_v35  ;;  %5102 = vmatpush.msra.mxu3 %v11831_v31  ;;  %v11851_v16 = vld [vmem:[%s14687_s3 + $0x138] sm:$0xff]  ;;  %v4985_v35 = vadd.f32 %v4984_v33, %v4862_v34  ;;  %v4918_v33 = vmul.f32 %v11497_v27, %v11497_v27  ;;  %v4845_v60 = vrot.slane %v4844_v23, 2 }
 0x7d0   : > { %v4963_v40 = vadd.f32 %v4962_v12, %v4906_v61  ;;  %5103 = vmatpush.msra.mxu3 %v11841_v46  ;;  %v11861_v61 = vld [vmem:[%s14687_s3 + $0x130] sm:$0xff]  ;;  %v4986_v7 = vadd.f32 %v4985_v35, %v4865_v41  ;;  %v4871_v12 = vmul.f32 %v16162_v47, %v16162_v47  ;;  %v4921_v35 = vmul.f32 %v11520_v0, %v11520_v0 }
 0x7d1   : > { %v16164_v47 = vld [vmem:[#allocation23_spill] sm:$0xff] }
 0x7d2   : > { %v4964_v54 = vadd.f32 %v4963_v40, %v4909_v1  ;;  %5104 = vmatpush.msra.mxu3 %v11851_v16  ;;  %v11871_v1 = vld [vmem:[%s14687_s3 + $0x128] sm:$0xff]  ;;  %v4987_v40 = vadd.f32 %v4986_v7, %v4868_v9  ;;  %v4877_v27 = vmul.f32 %v16164_v47, %v16164_v47  ;;  %v4924_v7 = vmul.f32 %v11547_v53, %v11547_v53 }
 0x7d3   : > { %v11889_v9 = vld [vmem:[%s14688_s4 + $0xe8] sm:$0xff] }
 0x7d4   : > { %v4965_v34 = vadd.f32 %v4964_v54, %v4912_v51  ;;  %5105 = vmatpush.msra.mxu3 %v11861_v61  ;;  %v11881_v51 = vld [vmem:[%s14687_s3 + $0x120] sm:$0xff]  ;;  %v4988_v54 = vadd.f32 %v4987_v40, %v4871_v12  ;;  %5301 = vmatpush.msrb.mxu2 %v11889_v9 }
 0x7d5   : > { %v16165_v40 = vld [vmem:[#allocation5_spill] sm:$0xff] }
 0x7d6   : > { %v4966_v41 = vadd.f32 %v4965_v34, %v4915_v42  ;;  %5106 = vmatpush.msra.mxu3 %v11871_v1  ;;  %v4846_v34 = vadd.f32 %v4845_v60, %v4844_v23  ;;  %v4989_v12 = vadd.f32 %v4988_v54, %v4874_v3  ;;  %v4880_v47 = vmul.f32 %v16165_v40, %v16165_v40  ;;  %v11907_v60 = vld [vmem:[%s14687_s3 + $0x110] sm:$0xff]  ;;  %v11915_v3 = vld [vmem:[%s14688_s4 + $0xe0] sm:$0xff]  ;;  %v11922_v40 = vld [vmem:[%s14687_s3 + $0x108] sm:$0xff] }
 0x7d7   : > { %v4930_v54 = vmul.f32 %v11587_v44, %v11587_v44  ;;  %5281 = vmatpush.msrb.mxu1 %v11915_v3  ;;  %v4933_v44 = vmul.f32 %v11604_v62, %v11604_v62 }
 0x7d8   : > { %v4967_v42 = vadd.f32 %v4966_v41, %v4918_v33  ;;  %5107 = vmatpush.msra.mxu3 %v11881_v51  ;;  %v4927_v33 = vmul.f32 %v11564_v49, %v11564_v49  ;;  %v4990_v23 = vadd.f32 %v4989_v12, %v4877_v27  ;;  %v16166_v41 = vld [vmem:[#allocation26_spill] sm:$0xff]  ;;  %v11929_v12 = vld [vmem:[%s14688_s4 + $0xd8] sm:$0xff]  ;;  %v11938_v49 = vld [vmem:[%s14687_s3 + $0x100] sm:$0xff] }
 0x7d9   : > { %v4883_v53 = vmul.f32 %v16166_v41, %v16166_v41  ;;  %5261 = vmatpush.msrb.mxu0 %v11929_v12 }
 0x7da   : > { %v4968_v0 = vadd.f32 %v4967_v42, %v4921_v35  ;;  %5108 = vmatpush.msra.mxu3 %v11896_v43  ;;  %v4847_v42 = vrot.slane %v4846_v34, 1  ;;  %v4991_v27 = vadd.f32 %v4990_v23, %v4880_v47  ;;  %v16168_v23 = vld [vmem:[#allocation14_spill] sm:$0xff] }
 0x7db   : > { %v4889_v39 = vmul.f32 %v16168_v23, %v16168_v23 }
 0x7dc   : > { %v4969_v35 = vadd.f32 %v4968_v0, %v4924_v7  ;;  %5109 = vmatpush.msra.mxu3 %v11907_v60  ;;  %v16167_v0 = vld [vmem:[#allocation24_spill] sm:$0xff]  ;;  %v4992_v47 = vadd.f32 %v4991_v27, %v4883_v53  ;;  %v4939_v53 = vmul.f32 %v11642_v4, %v11642_v4 }
 0x7dd   : > { %v4886_v7 = vmul.f32 %v16167_v0, %v16167_v0  ;;  %v16169_v0 = vld [vmem:[#allocation17_spill] sm:$0xff]  ;;  %v7571_v27 = vld [vmem:[%s14687_s3 + $0x78] sm:$0xff] }
 0x7de   : > { %v4970_v41 = vadd.f32 %v4969_v35, %v4927_v33  ;;  %5110 = vmatpush.msra.mxu3 %v11922_v40  ;;  %v4936_v33 = vmul.f32 %v11626_v17, %v11626_v17  ;;  %v4848_v35 = vadd.f32 %v4847_v42, %v4846_v34  ;;  %v4892_v18 = vmul.f32 %v16169_v0, %v16169_v0  ;;  %v16172_v17 = vld [vmem:[#allocation121_spill] sm:$0xff] }
 0x7df   : > { %v4993_v62 = vadd.f32 %v4992_v47, %v4886_v7  ;;  %v4942_v7 = vmul.f32 %v11681_v38, %v11681_v38  ;;  %v16171_v47 = vld [vmem:[#allocation60_spill] sm:$0xff] }
 0x7e0   : > { %v4971_v10 = vadd.f32 %v4970_v41, %v4930_v54  ;;  %5111 = vmatpush.msra.mxu3 %v11938_v49  ;;  %v16170_v54 = vld [vmem:[#allocation25_spill] sm:$0xff] }
 0x7e1   : > { %5112 = vmatmul.f32.vlgmr.msra.gmra.mxu3 %v4848_v35  ;;  %v4994_v41 = vadd.f32 %v4993_v62, %v4889_v39  ;;  %v4895_v34 = vmul.f32 %v16170_v54, %v16170_v54  ;;  %v4898_v35 = vmul.f32 %v16171_v47, %v16171_v47  ;;  %v4854_v39 = vmul.f32 %v16172_v17, %v16172_v17  ;;  %v16174_v54 = vld [vmem:[#allocation12_spill] sm:$0xff]  ;;  %v16176_v17 = vld [vmem:[#allocation46_spill] sm:$0xff] }
 0x7e2   : > { %v4972_v37 = vadd.f32 %v4971_v10, %v4933_v44  ;;  %5124 = vmatpush.msrb.mxu3 %v7571_v27  ;;  %v7572_v44 = vld [vmem:[%s14687_s3 + $0x70] sm:$0xff] }
 0x7e3   : > { %v4995_v10 = vadd.f32 %v4994_v41, %v4892_v18  ;;  %v4851_v18 = vmul.f32 %v16174_v54, %v16174_v54  ;;  %v16175_v41 = vld [vmem:[#allocation6_spill] sm:$0xff] }
 0x7e4   : > { %v4973_v42 = vadd.f32 %v4972_v37, %v4936_v33  ;;  %5125 = vmatpush.msrb.mxu3 %v7572_v44  ;;  %v7573_v37 = vld [vmem:[%s14687_s3 + $0x68] sm:$0xff]  ;;  %v16173_v33 = vld [vmem:[#allocation20_spill] sm:$0xff]  ;;  %v4857_v44 = vmul.f32 %v16175_v41, %v16175_v41  ;;  %v4907_v41 = vmul.f32 %v11391_v13, %v11391_v13 }
 0x7e5   : > { %v4996_v62 = vadd.f32 %v4995_v10, %v4895_v34  ;;  %v4901_v27 = vmul.f32 %v16173_v33, %v16173_v33  ;;  %v5019_v34 = vadd.f32 %v4854_v39, %v4851_v18  ;;  %v16177_v10 = vld [vmem:[#allocation15_spill] sm:$0xff] }
 0x7e6   : > { %v4974_v4 = vadd.f32 %v4973_v42, %v4939_v53  ;;  %5126 = vmatpush.msrb.mxu3 %v7573_v37  ;;  %v7574_v53 = vld [vmem:[%s14687_s3 + $0x60] sm:$0xff]  ;;  %v4904_v37 = vmul.f32 %v16176_v17, %v16176_v17  ;;  %v4860_v33 = vmul.f32 %v16177_v10, %v16177_v10  ;;  %v7576_v39 = vld [vmem:[%s14687_s3 + $0x50] sm:$0xff] }
 0x7e7   : > { %v4997_v42 = vadd.f32 %v4996_v62, %v4898_v35  ;;  %v5020_v47 = vadd.f32 %v5019_v34, %v4857_v44  ;;  %v11994_v62 = vld [vmem:[%s14688_s4 + $0xd0] sm:$0xff] }
 0x7e8   : > { %v4975_v38 = vadd.f32 %v4974_v4, %v4942_v7  ;;  %5127 = vmatpush.msrb.mxu3 %v7574_v53  ;;  %v7575_v4 = vld [vmem:[%s14687_s3 + $0x58] sm:$0xff]  ;;  %5302 = vmatpush.msrb.mxu2 %v11994_v62 }
 0x7e9   : > { %v4998_v7 = vadd.f32 %v4997_v42, %v4901_v27  ;;  %v16178_v53 = vld [vmem:[#allocation8_spill] sm:$0xff]  ;;  %v4910_v27 = vmul.f32 %v11422_v14, %v11422_v14  ;;  %v5021_v44 = vadd.f32 %v5020_v47, %v4860_v33  ;;  %v16179_v42 = vld [vmem:[#allocation49_spill] sm:$0xff]  ;;  %v12014_v33 = vld [vmem:[%s14688_s4 + $0xc8] sm:$0xff] }
 0x7ea   : > { %5128 = vmatpush.msrb.mxu3 %v7575_v4  ;;  %v4976_v54 = vrot.slane %v4975_v38, 4  ;;  %v4863_v35 = vmul.f32 %v16178_v53, %v16178_v53  ;;  %v4866_v34 = vmul.f32 %v16179_v42, %v16179_v42  ;;  %v7577_v4 = vld [vmem:[%s14687_s3 + $0x48] sm:$0xff]  ;;  %v16180_v53 = vld [vmem:[#allocation80_spill] sm:$0xff]  ;;  %v7578_v47 = vld [vmem:[%s14687_s3 + $0x40] sm:$0xff]  ;;  %5282 = vmatpush.msrb.mxu1 %v12014_v33 }
 0x7eb   : > { %v4999_v18 = vadd.f32 %v4998_v7, %v4904_v37  ;;  %v4913_v10 = vmul.f32 %v16180_v53, %v16180_v53  ;;  %v16181_v7 = vld [vmem:[#allocation97_spill] sm:$0xff]  ;;  %v16186_v53 = vld [vmem:[#allocation86_spill] sm:$0xff] }
 0x7ec   : > { %5129 = vmatpush.msrb.mxu3 %v7576_v39  ;;  %v4977_v13 = vadd.f32 %v4976_v54, %v4975_v38  ;;  %v5022_v37 = vadd.f32 %v5021_v44, %v4863_v35  ;;  %v4869_v14 = vmul.f32 %v16181_v7, %v16181_v7  ;;  %v16183_v54 = vld [vmem:[#allocation28_spill] sm:$0xff]  ;;  %v4922_v17 = vmul.f32 %v16186_v53, %v16186_v53 }
 0x7ed   : > { %v5000_v39 = vadd.f32 %v4999_v18, %v4907_v41  ;;  %v16182_v41 = vld [vmem:[#allocation30_spill] sm:$0xff]  ;;  %v4872_v35 = vmul.f32 %v16183_v54, %v16183_v54  ;;  %v7579_v44 = vld [vmem:[%s14687_s3 + $0x38] sm:$0xff] }
 0x7ee   : > { %5130 = vmatpush.msrb.mxu3 %v7577_v4  ;;  %v4916_v18 = vmul.f32 %v16182_v41, %v16182_v41  ;;  %v5023_v38 = vadd.f32 %v5022_v37, %v4866_v34  ;;  %v4978_v42 = vrot.slane %v4977_v13, 2  ;;  %v16185_v37 = vld [vmem:[#allocation31_spill] sm:$0xff] }
 0x7ef   : > { %v5001_v4 = vadd.f32 %v5000_v39, %v4910_v27  ;;  %v16184_v39 = vld [vmem:[#allocation38_spill] sm:$0xff]  ;;  %v4875_v54 = vmul.f32 %v16185_v37, %v16185_v37  ;;  %v16188_v37 = vld [vmem:[#allocation75_spill] sm:$0xff] }
 0x7f0   : > { %5131 = vmatpush.msrb.mxu3 %v7578_v47  ;;  %v12027_v47 = vld [vmem:[%s14688_s4 + $0xc0] sm:$0xff]  ;;  %v4919_v7 = vmul.f32 %v16184_v39, %v16184_v39  ;;  %v5024_v34 = vadd.f32 %v5023_v38, %v4869_v14  ;;  %v7581_v14 = vld [vmem:[%s14687_s3 + $0x28] sm:$0xff]  ;;  %v4925_v0 = vmul.f32 %v16188_v37, %v16188_v37  ;;  %v4979_v23 = vadd.f32 %v4978_v42, %v4977_v13 }
 0x7f1   : > { %v5002_v27 = vadd.f32 %v5001_v4, %v4913_v10  ;;  %5262 = vmatpush.msrb.mxu0 %v12027_v47  ;;  %v16187_v4 = vld [vmem:[#allocation122_spill] sm:$0xff]  ;;  %v4931_v42 = vmul.f32 %v11590_v25, %v11590_v25 }
 0x7f2   : > { %5132 = vmatpush.msrb.mxu3 %v7579_v44  ;;  %v7580_v44 = vld [vmem:[%s14687_s3 + $0x30] sm:$0xff]  ;;  %v5025_v10 = vadd.f32 %v5024_v34, %v4872_v35  ;;  %v4878_v39 = vmul.f32 %v16187_v4, %v16187_v4  ;;  %v7582_v35 = vld [vmem:[%s14687_s3 + $0x20] sm:$0xff]  ;;  %v16194_v37 = vld [vmem:[#allocation62_spill] sm:$0xff] }
 0x7f3   : > { %v5003_v41 = vadd.f32 %v5002_v27, %v4916_v18  ;;  %v16190_v34 = vld [vmem:[#allocation45_spill] sm:$0xff]  ;;  %v16198_v25 = vld [vmem:[#allocation42_spill] sm:$0xff] }
 0x7f4   : > { %5133 = vmatpush.msrb.mxu3 %v7580_v44  ;;  %v5026_v21 = vadd.f32 %v5025_v10, %v4875_v54  ;;  %v16189_v44 = vld [vmem:[#allocation79_spill] sm:$0xff]  ;;  %v4928_v4 = vmul.f32 %v16190_v34, %v16190_v34  ;;  %v4980_v54 = vrot.slane %v4979_v23, 1 }
 0x7f5   : > { %v5004_v38 = vadd.f32 %v5003_v41, %v4919_v7  ;;  %v4881_v18 = vmul.f32 %v16189_v44, %v16189_v44  ;;  %v16192_v41 = vld [vmem:[#allocation100_spill] sm:$0xff]  ;;  %v16193_v44 = vld [vmem:[#allocation102_spill] sm:$0xff] }
 0x7f6   : > { %5134 = vmatpush.msrb.mxu3 %v7581_v14  ;;  %v5027_v53 = vadd.f32 %v5026_v21, %v4878_v39  ;;  %v16191_v14 = vld [vmem:[#allocation113_spill] sm:$0xff]  ;;  %v4934_v21 = vmul.f32 %v11607_v55, %v11607_v55 }
 0x7f7   : > { %v5005_v27 = vadd.f32 %v5004_v38, %v4922_v17  ;;  %v4884_v7 = vmul.f32 %v16191_v14, %v16191_v14  ;;  %v4887_v17 = vmul.f32 %v16194_v37, %v16194_v37  ;;  %v16196_v14 = vld [vmem:[#allocation69_spill] sm:$0xff] }
 0x7f8   : > { %5135 = vmatpush.msrb.mxu3 %v7582_v35  ;;  %v5028_v10 = vadd.f32 %v5027_v53, %v4881_v18  ;;  %v16195_v35 = vld [vmem:[#allocation119_spill] sm:$0xff]  ;;  %v4981_v53 = vadd.f32 %v4980_v54, %v4979_v23  ;;  %v16197_v18 = vld [vmem:[#allocation4_spill] sm:$0xff]  ;;  %v16200_v23 = vld [vmem:[#allocation37_spill] sm:$0xff] }
 0x7f9   : > { %v5006_v13 = vadd.f32 %v5005_v27, %v4925_v0  ;;  %v4890_v0 = vmul.f32 %v16196_v14, %v16196_v14  ;;  %v4896_v54 = vmul.f32 %v16200_v23, %v16200_v23  ;;  %v16212_v23 = vld [vmem:[#allocation19_spill] sm:$0xff]  ;;  %v16214_v14 = vld [vmem:[#allocation110_spill] sm:$0xff] }
 0x7fa   : > { %5136 = vmatpush.msrb.mxu3 %v16192_v41  ;;  %v5029_v39 = vadd.f32 %v5028_v10, %v4884_v7  ;;  %v4937_v41 = vmul.f32 %v11629_v15, %v11629_v15  ;;  %v4940_v7 = vmul.f32 %v11645_v28, %v11645_v28  ;;  %v16199_v10 = vld [vmem:[#allocation101_spill] sm:$0xff] }
 0x7fb   : > { %v5007_v38 = vadd.f32 %v5006_v13, %v4928_v4  ;;  %v4893_v4 = vmul.f32 %v16198_v25, %v16198_v25 }
 0x7fc   : > { %5137 = vmatpush.msrb.mxu3 %v16193_v44  ;;  %v5030_v44 = vadd.f32 %v5029_v39, %v4887_v17  ;;  %v4943_v39 = vmul.f32 %v11684_v11, %v11684_v11 }
 0x7fd   : > { %v5008_v27 = vadd.f32 %v5007_v38, %v4931_v42  ;;  %v12077_v42 = vld [vmem:[%s14688_s4 + $0xb8] sm:$0xff] }
 0x7fe   : > { %5138 = vmatpush.msrb.mxu3 %v16195_v35  ;;  %v5031_v38 = vadd.f32 %v5030_v44, %v4890_v0  ;;  %5303 = vmatpush.msrb.mxu2 %v12077_v42  ;;  %v4902_v0 = vmul.f32 %v11582_v20, %v11582_v20 }
 0x7ff   : > { %v5009_v13 = vadd.f32 %v5008_v27, %v4934_v21  ;;  %v16201_v21 = vld [vmem:[#allocation105_spill] sm:$0xff]  ;;  %v16202_v27 = vld [vmem:[#allocation74_spill] sm:$0xff] }
 0x800   : > { %5139 = vmatpush.msrb.mxu3 %v16197_v18  ;;  %v5032_v35 = vadd.f32 %v5031_v38, %v4893_v4  ;;  %v4905_v4 = vmul.f32 %v11597_v56, %v11597_v56  ;;  %v12103_v38 = vld [vmem:[%s14688_s4 + $0xa8] sm:$0xff] }
 0x801   : > { %5140 = vmatmul.f32.vlgmr.msrb.gmra.mxu3 %v4981_v53  ;;  %v5010_v17 = vadd.f32 %v5009_v13, %v4937_v41  ;;  %v4899_v53 = vmul.f32 %v16202_v27, %v16202_v27  ;;  %v16204_v41 = vld [vmem:[#allocation29_spill] sm:$0xff]  ;;  %v12094_v13 = vld [vmem:[%s14688_s4 + $0xb0] sm:$0xff]  ;;  %5263 = vmatpush.msrb.mxu0 %v12103_v38  ;;  %v16210_v56 = vld [vmem:[#allocation82_spill] sm:$0xff] }
 0x802   : > { %5144 = vmatpush.msra.mxu3 %v16199_v10  ;;  %v16203_v10 = vld [vmem:[#allocation32_spill] sm:$0xff]  ;;  %v5033_v25 = vadd.f32 %v5032_v35, %v4896_v54  ;;  %5283 = vmatpush.msrb.mxu1 %v12094_v13  ;;  %v4914_v20 = vmul.f32 %v16210_v56, %v16210_v56 }
 0x803   : > { %v5011_v18 = vadd.f32 %v5010_v17, %v4940_v7  ;;  %v16205_v7 = vld [vmem:[#allocation22_spill] sm:$0xff]  ;;  %v16206_v17 = vld [vmem:[#allocation89_spill] sm:$0xff] }
 0x804   : > { %5145 = vmatpush.msra.mxu3 %v16201_v21  ;;  %v5034_v21 = vadd.f32 %v5033_v25, %v4899_v53  ;;  %v16207_v25 = vld [vmem:[#allocation10_spill] sm:$0xff] }
 0x805   : > { %v5012_v44 = vadd.f32 %v5011_v18, %v4943_v39  ;;  %v4908_v39 = vmul.f32 %v16206_v17, %v16206_v17  ;;  %v16208_v18 = vld [vmem:[#allocation43_spill] sm:$0xff]  ;;  %v4917_v17 = vmul.f32 %v11669_v6, %v11669_v6 }
 0x806   : > { %5146 = vmatpush.msra.mxu3 %v16203_v10  ;;  %v5035_v54 = vadd.f32 %v5034_v21, %v4902_v0  ;;  %v4911_v10 = vmul.f32 %v16208_v18, %v16208_v18  ;;  %v16211_v0 = vld [vmem:[#allocation27_spill] sm:$0xff] }
 0x807   : > { %v5013_v35 = vrot.slane %v5012_v44, 4 }
 0x808   : > { %5147 = vmatpush.msra.mxu3 %v16204_v41  ;;  %v5036_v53 = vadd.f32 %v5035_v54, %v4905_v4  ;;  %v16209_v41 = vld [vmem:[#allocation40_spill] sm:$0xff]  ;;  %v16213_v4 = vld [vmem:[#allocation66_spill] sm:$0xff] }
 0x809   : > { %v5014_v27 = vadd.f32 %v5013_v35, %v5012_v44  ;;  %v4920_v54 = vmul.f32 %v16213_v4, %v16213_v4  ;;  %v16215_v44 = vld [vmem:[#allocation104_spill] sm:$0xff] }
 0x80a   : > { %5148 = vmatpush.msra.mxu3 %v16205_v7  ;;  %v5037_v7 = vadd.f32 %v5036_v53, %v4908_v39  ;;  %v4923_v53 = vmul.f32 %v11703_v63, %v11703_v63 }
 0x80b   : > { %v5015_v18 = vrot.slane %v5014_v27, 2 }
 0x80c   : > { %5149 = vmatpush.msra.mxu3 %v16207_v25  ;;  %v5038_v21 = vadd.f32 %v5037_v7, %v4911_v10  ;;  %v4926_v10 = vmul.f32 %v11710_v29, %v11710_v29  ;;  %v16216_v7 = vld [vmem:[#allocation71_spill] sm:$0xff] }
 0x80e   : > { %5150 = vmatpush.msra.mxu3 %v16209_v41  ;;  %v5039_v25 = vadd.f32 %v5038_v21, %v4914_v20  ;;  %v5016_v41 = vadd.f32 %v5015_v18, %v5014_v27  ;;  %v12130_v20 = vld [vmem:[%s14688_s4 + $0xa0] sm:$0xff]  ;;  %v4932_v21 = vmul.f32 %v11728_v52, %v11728_v52 }
 0x80f   : > { %5304 = vmatpush.msrb.mxu2 %v12130_v20  ;;  %v16218_v18 = vld [vmem:[#allocation61_spill] sm:$0xff] }
 0x810   : > { %5151 = vmatpush.msra.mxu3 %v16211_v0  ;;  %v5040_v39 = vadd.f32 %v5039_v25, %v4917_v17  ;;  %v16217_v17 = vld [vmem:[#allocation21_spill] sm:$0xff]  ;;  %v5017_v27 = vrot.slane %v5016_v41, 1  ;;  %v12142_v25 = vld [vmem:[%s14688_s4 + $0x98] sm:$0xff] }
 0x811   : > { %5284 = vmatpush.msrb.mxu1 %v12142_v25 }
 0x812   : > { %5152 = vmatpush.msra.mxu3 %v16212_v23  ;;  %v5041_v35 = vadd.f32 %v5040_v39, %v4920_v54  ;;  %v4935_v39 = vmul.f32 %v11737_v36, %v11737_v36  ;;  %v16327_v36 = vld [vmem:[#allocation89_spill] sm:$0xff] }
 0x814   : > { %5153 = vmatpush.msra.mxu3 %v16214_v14  ;;  %v5042_v23 = vadd.f32 %v5041_v35, %v4923_v53  ;;  %v4929_v14 = vmul.f32 %v11719_v8, %v11719_v8  ;;  %v16219_v53 = vld [vmem:[#allocation36_spill] sm:$0xff] }
 0x816   : > { %5154 = vmatpush.msra.mxu3 %v16215_v44  ;;  %v5043_v0 = vadd.f32 %v5042_v23, %v4926_v10  ;;  %v12151_v44 = vld [vmem:[%s14688_s4 + $0x90] sm:$0xff]  ;;  %v4938_v10 = vmul.f32 %v11743_v5, %v11743_v5  ;;  %v16220_v23 = vld [vmem:[#allocation56_spill] sm:$0xff] }
 0x817   : > { %5264 = vmatpush.msrb.mxu0 %v12151_v44 }
 0x818   : > { %5155 = vmatpush.msra.mxu3 %v16216_v7  ;;  %v5044_v54 = vadd.f32 %v5043_v0, %v4929_v14  ;;  %v5018_v7 = vadd.f32 %v5017_v27, %v5016_v41 }
 0x81a   : > { %5156 = vmatpush.msra.mxu3 %v16217_v17  ;;  %v5045_v35 = vadd.f32 %v5044_v54, %v4932_v21  ;;  %v4941_v17 = vmul.f32 %v11759_v26, %v11759_v26  ;;  %v16282_v26 = vld [vmem:[#allocation60_spill] sm:$0xff] }
 0x81c   : > { %5157 = vmatpush.msra.mxu3 %v16218_v18  ;;  %v5046_v14 = vadd.f32 %v5045_v35, %v4935_v39  ;;  %v4944_v18 = vmul.f32 %v11772_v24, %v11772_v24  ;;  %v12211_v35 = vld [vmem:[%s14688_s4 + $0x70] sm:$0xff] }
 0x81e   : > { %5158 = vmatpush.msra.mxu3 %v16219_v53  ;;  %v5047_v0 = vadd.f32 %v5046_v14, %v4938_v10 }
 0x820   : > { %5159 = vmatpush.msra.mxu3 %v16220_v23  ;;  %v5048_v21 = vadd.f32 %v5047_v0, %v4941_v17  ;;  %v4708_v0 = vld [vmem:[%s14688_s4 + $0x40] sm:$0xff] }
 0x821   : > { %5160 = vmatmul.f32.vlgmr.msra.gmra.mxu3 %v5018_v7  ;;  %v16222_v7 = vld [vmem:[#allocation3_spill] sm:$0xff] }
 0x822   : > { %5164 = vmatpush.msrb.mxu3 %v11748_v50  ;;  %v5049_v41 = vadd.f32 %v5048_v21, %v4944_v18  ;;  %v4715_v50 = vld [vmem:[%s14688_s4 + $0x78] sm:$0xff]  ;;  %v4705_v18 = vld [vmem:[%s14688_s4 + $0x28] sm:$0xff] }
 0x823   : > { %5265 = vmatpush.msrb.mxu0 %v4715_v50 }
 0x824   : > { %5165 = vmatpush.msrb.mxu3 %v11764_v45  ;;  %v5050_v27 = vrot.slane %v5049_v41, 4  ;;  %v12174_v45 = vld [vmem:[%s14688_s4 + $0x88] sm:$0xff] }
 0x825   : > { %5305 = vmatpush.msrb.mxu2 %v12174_v45 }
 0x826   : > { %5166 = vmatpush.msrb.mxu3 %v11777_v22  ;;  %v4712_v22 = vld [vmem:[%s14688_s4 + $0x60] sm:$0xff] }
 0x827   : > { %5266 = vmatpush.msrb.mxu0 %v4712_v22  ;;  %5306 = vmatpush.msrb.mxu2 %v12211_v35 }
 0x828   : > { %5167 = vmatpush.msrb.mxu3 %v11786_v59  ;;  %v5051_v59 = vadd.f32 %v5050_v27, %v5049_v41 }
 0x82a   : > { %5168 = vmatpush.msrb.mxu3 %v11802_v30  ;;  %v4709_v30 = vld [vmem:[%s14688_s4 + $0x48] sm:$0xff]  ;;  %v5052_v54 = vrot.slane %v5051_v59, 2 }
 0x82b   : > { %5267 = vmatpush.msrb.mxu0 %v4709_v30 }
 0x82c   : > { %5169 = vmatpush.msrb.mxu3 %v11820_v32  ;;  %v12188_v32 = vld [vmem:[%s14688_s4 + $0x80] sm:$0xff]  ;;  %v5053_v39 = vadd.f32 %v5052_v54, %v5051_v59 }
 0x82d   : > { %5285 = vmatpush.msrb.mxu1 %v12188_v32 }
 0x82e   : > { %5170 = vmatpush.msrb.mxu3 %v11831_v31  ;;  %v4706_v31 = vld [vmem:[%s14688_s4 + $0x30] sm:$0xff]  ;;  %v5054_v53 = vrot.slane %v5053_v39, 1 }
 0x82f   : > { %5268 = vmatpush.msrb.mxu0 %v4706_v31 }
 0x830   : > { %5171 = vmatpush.msrb.mxu3 %v11841_v46  ;;  %v4703_v46 = vld [vmem:[%s14688_s4 + $0x18] sm:$0xff] }
 0x831   : > { %5269 = vmatpush.msrb.mxu0 %v4703_v46 }
 0x832   : > { %5172 = vmatpush.msrb.mxu3 %v11851_v16  ;;  %v4700_v16 = vld [vmem:[%s14688_s4] sm:$0xff] }
 0x833   : > { %5270 = vmatpush.msrb.mxu0 %v4700_v16 }
 0x834   : > { %5173 = vmatpush.msrb.mxu3 %v11861_v61  ;;  %v5055_v61 = vadd.f32 %v5054_v53, %v5053_v39 }
 0x836   : > { %5174 = vmatpush.msrb.mxu3 %v11871_v1  ;;  %v16221_v1 = vld [vmem:[#allocation52_spill] sm:$0xff] }
 0x838   : > { %5175 = vmatpush.msrb.mxu3 %v11881_v51  ;;  %v7591_v51 = vmov 1024.0  }
 0x839   : > { %7330 = vrcp.f32 %v7591_v51 }
 0x83a   : > { %5176 = vmatpush.msrb.mxu3 %v11896_v43  ;;  %v4713_v43 = vld [vmem:[%s14688_s4 + $0x68] sm:$0xff] }
 0x83b   : > { %5286 = vmatpush.msrb.mxu1 %v4713_v43 }
 0x83c   : > { %5177 = vmatpush.msrb.mxu3 %v11907_v60  ;;  %v4701_v60 = vld [vmem:[%s14688_s4 + $0x8] sm:$0xff] }
 0x83e   : > { %5178 = vmatpush.msrb.mxu3 %v11922_v40  ;;  %v4704_v40 = vld [vmem:[%s14688_s4 + $0x20] sm:$0xff] }
 0x840   : > { %5179 = vmatpush.msrb.mxu3 %v11938_v49  ;;  %v4710_v49 = vld [vmem:[%s14688_s4 + $0x50] sm:$0xff] }
 0x841   : > { %5180 = vmatmul.f32.vlgmr.msrb.gmra.mxu3 %v5055_v61  ;;  %5287 = vmatpush.msrb.mxu1 %v4710_v49 }
 0x842   : > { %5196 = vmatpush.msra.mxu3 %v16221_v1 }
 0x844   : > { %5197 = vmatpush.msra.mxu3 %v11813_v48  ;;  %v4707_v48 = vld [vmem:[%s14688_s4 + $0x38] sm:$0xff] }
 0x845   : > { %5288 = vmatpush.msrb.mxu1 %v4707_v48 }
 0x846   : > { %5198 = vmatpush.msra.mxu3 %v11929_v12  ;;  %v7331_v12 = vpop.eup %7330 }
 0x847   : > { %5289 = vmatpush.msrb.mxu1 %v4704_v40  ;;  %vm5121_vm8 = vweird.f32 %v7331_v12 }
 0x848   : > { %5199 = vmatpush.msra.mxu3 %v12027_v47  ;;  %v5073_v47 = vpop.f32.mrf.mxu3 }
 0x849   : > { %5290 = vmatpush.msrb.mxu1 %v4701_v60 }
 0x84a   : > { %5200 = vmatpush.msra.mxu3 %v12103_v38  ;;  %v5117_v38 = vmul.f32 1024.0, %v7331_v12 }
 0x84c   : > { %5201 = vmatpush.msra.mxu3 %v12151_v44  ;;  %v5118_v10 = vsub.f32 1.0, %v5117_v38  ;;  %v4711_v44 = vld [vmem:[%s14688_s4 + $0x58] sm:$0xff] }
 0x84d   : > { %5307 = vmatpush.msrb.mxu2 %v4711_v44 }
 0x84e   : > { %5202 = vmatpush.msra.mxu3 %v4715_v50  ;;  %v5119_v14 = vmul.f32 %v7331_v12, %v5118_v10 }
 0x84f   : > { %5308 = vmatpush.msrb.mxu2 %v4708_v0 }
 0x850   : > { %5203 = vmatpush.msra.mxu3 %v4712_v22  ;;  %v5093_v23 = vpop.f32.mrf.mxu3  ;;  %v5120_v17 = vadd.f32 %v7331_v12, %v5119_v14 }
 0x851   : > { %5309 = vmatpush.msrb.mxu2 %v4705_v18 }
 0x852   : > { %5204 = vmatpush.msra.mxu3 %v4709_v30  ;;  %v5122_v21 = vsel %vm5121_vm8, %v7331_v12, %v5120_v17 }
 0x854   : > { %5205 = vmatpush.msra.mxu3 %v4706_v31 }
 0x856   : > { %5206 = vmatpush.msra.mxu3 %v4703_v46 }
 0x858   : > { %5207 = vmatpush.msra.mxu3 %v4700_v16 }
 0x85a   : > { %5216 = vmatpush.msrb.mxu3 %v16222_v7 }
 0x85c   : > { %5217 = vmatpush.msrb.mxu3 %v11794_v19  ;;  %v5094_v19 = vadd.f32 %v5093_v23, %v5073_v47 }
 0x85e   : > { %5218 = vmatpush.msrb.mxu3 %v11915_v3 }
 0x860   : > { %5219 = vmatpush.msrb.mxu3 %v12014_v33  ;;  %v4702_v33 = vld [vmem:[%s14688_s4 + $0x10] sm:$0xff] }
 0x861   : > { %5310 = vmatpush.msrb.mxu2 %v4702_v33 }
 0x862   : > { %5220 = vmatpush.msrb.mxu3 %v12094_v13 }
 0x864   : > { %5221 = vmatpush.msrb.mxu3 %v12142_v25  ;;  %v5113_v3 = vpop.f32.mrf.mxu3  ;;  %v16223_v25 = vld [vmem:[#allocation48_spill] sm:$0xff] }
 0x865   : > { %v5114_v41 = vadd.f32 %v5113_v3, %v5094_v19 }
 0x866   : > { %5222 = vmatpush.msrb.mxu3 %v12188_v32 }
 0x867   : > { %v5123_v13 = vmul.f32 %v5122_v21, %v5114_v41 }
 0x868   : > { %5223 = vmatpush.msrb.mxu3 %v4713_v43 }
 0x869   : > { %7259 = vmatmul.msk.f32.vlgmr.msra.gmra.mxu3 %vm5188_vm9, %v5123_v13  ;;  %v5185_v59 = vmul.f32 %v5123_v13, %v5123_v13 }
 0x86a   : > { %5224 = vmatpush.msrb.mxu3 %v4710_v49 }
 0x86c   : > { %5225 = vmatpush.msrb.mxu3 %v4707_v48 }
 0x86e   : > { %5226 = vmatpush.msrb.mxu3 %v4704_v40 }
 0x870   : > { %5227 = vmatpush.msrb.mxu3 %v4701_v60  ;;  %v12275_v60 = vld [vmem:[%s14689_s5] sm:$0x7] }
 0x871   : > { %7260 = vmatmul.msk.f32.vlgmr.msrb.gmra.mxu3 %vm5188_vm9, %v5123_v13  ;;  %v5346_v10 = vperm.slane %v12275_v60, 0  ;;  %v5347_v23 = vperm.slane %v12275_v60, 1 }
 0x872   : > { %5236 = vmatpush.msra.mxu3 %v16223_v25 }
 0x874   : > { %5237 = vmatpush.msra.mxu3 %v11753_v2 }
 0x876   : > { %5238 = vmatpush.msra.mxu3 %v11889_v9 }
 0x878   : > { %5239 = vmatpush.msra.mxu3 %v11994_v62 }
 0x87a   : > { %5240 = vmatpush.msra.mxu3 %v12077_v42 }
 0x87c   : > { %5241 = vmatpush.msra.mxu3 %v12130_v20 }
 0x87e   : > { %5242 = vmatpush.msra.mxu3 %v12174_v45 }
 0x880   : > { %5243 = vmatpush.msra.mxu3 %v12211_v35 }
 0x882   : > { %5244 = vmatpush.msra.mxu3 %v4711_v44 }
 0x884   : > { %5245 = vmatpush.msra.mxu3 %v4708_v0  ;;  %v5141_v2 = vpop.f32.mrf.mxu3 }
 0x886   : > { %5246 = vmatpush.msra.mxu3 %v4705_v18 }
 0x888   : > { %5247 = vmatpush.msra.mxu3 %v4702_v33  ;;  %v5348_v33 = vperm.slane %v12275_v60, 2 }
 0x889   : > { %7261 = vmatmul.msk.f32.vlgmr.msra.gmra.mxu3 %vm5188_vm9, %v5123_v13 }
 0x8a4   : > { %v5161_v27 = vpop.f32.mrf.mxu3 }
 0x8a5   : > { %v5162_v50 = vadd.f32 %v5161_v27, %v5141_v2  ;;  %v16225_v27 = vld [vmem:[#allocation103_spill] sm:$0xff] }
 0x8c4   : > { %v5181_v9 = vpop.f32.mrf.mxu3 }
 0x8c5   : > { %v5182_v22 = vadd.f32 %v5181_v9, %v5162_v50  ;;  %v16226_v9 = vld [vmem:[#allocation99_spill] sm:$0xff] }
 0x8c7   : > { %v5184_v62 = vmul.f32 %v5182_v22, %v5122_v21 }
 0x8c9   : > { %v5186_v42 = vsub.f32 %v5184_v62, %v5185_v59  ;;  %v16227_v62 = vld [vmem:[#allocation107_spill] sm:$0xff] }
 0x8cb   : > { %v5187_v30 = vmax.f32 %v5186_v42, 0.0  ;;  %v16228_v42 = vld [vmem:[#allocation115_spill] sm:$0xff] }
 0x8cd   : > { %7262 = vmatmul.msk.f32.vlgmr.msrb.gmra.mxu0 %vm5188_vm9, %v5187_v30  ;;  %7263 = vmatmul.msk.f32.vlgmr.msrb.gmra.mxu1 %vm5188_vm9, %v5187_v30 }
 0x8ce   : > { %7264 = vmatmul.msk.f32.vlgmr.msrb.gmra.mxu2 %vm5188_vm9, %v5187_v30 }
 0x8ec   : > { %v5209_v38 = vpop.f32.mrf.mxu3 }
 0x8f4   : > { %v5229_v21 = vpop.f32.mrf.mxu3 }
 0x94a   : > { %v5272_v20 = vpop.f32.mrf.mxu0  ;;  %v5292_v45 = vpop.f32.mrf.mxu1 }
 0x94b   : > { %v5273_v32 = vadd.f32 1e-05, %v5272_v20  ;;  %v5293_v31 = vadd.f32 1e-05, %v5292_v45  ;;  %v16229_v20 = vld [vmem:[#allocation94_spill] sm:$0xff] }
 0x94d   : > { %7332 = vrsqrt.f32 %v5273_v32  ;;  %vm5321_vm11 = vweird.f32 %v5273_v32  ;;  %vm5331_vm14 = vweird.f32 %v5293_v31 }
 0x94e   : > { %7334 = vrsqrt.f32 %v5293_v31 }
 0x951   : > { %v5312_v54 = vpop.f32.mrf.mxu2 }
 0x952   : > { %v12267_v46 = vadd.f32 1e-05, %v5312_v54  ;;  %v16231_v54 = vld [vmem:[#allocation116_spill] sm:$0xff] }
 0x953   : > { %v7333_v16 = vpop.eup %7332 }
 0x954   : > { %v7335_v39 = vpop.eup %7334  ;;  %v5316_v53 = vmul.f32 %v7333_v16, %v5273_v32  ;;  %7336 = vrsqrt.f32 %v12267_v46  ;;  %vm5322_vm10 = vweird.f32 %v7333_v16  ;;  %vm5341_vm3 = vweird.f32 %v12267_v46  ;;  %v16230_v32 = vld [vmem:[#allocation96_spill] sm:$0xff] }
 0x955   : > { %v5326_v61 = vmul.f32 %v7335_v39, %v5293_v31  ;;  %vm5323_vm12 = vmor %vm5321_vm11, %vm5322_vm10  ;;  %vm5332_vm13 = vweird.f32 %v7335_v39 }
 0x956   : > { %v5317_v1 = vmul.f32 %v7333_v16, %v5316_v53  ;;  %vm5333_vm15 = vmor %vm5331_vm14, %vm5332_vm13 }
 0x957   : > { %v5327_v35 = vmul.f32 %v7335_v39, %v5326_v61  ;;  %v16233_v61 = vld [vmem:[#allocation118_spill] sm:$0xff] }
 0x958   : > { %v5318_v43 = vmul.f32 0.5, %v5317_v1 }
 0x959   : > { %v5328_v49 = vmul.f32 0.5, %v5327_v35  ;;  %v16234_v35 = vld [vmem:[#allocation108_spill] sm:$0xff] }
 0x95a   : > { %v5319_v48 = vsub.f32 1.5, %v5318_v43  ;;  %v12270_v51 = vpop.eup %7336 }
 0x95b   : > { %v5329_v40 = vsub.f32 1.5, %v5328_v49  ;;  %v5336_v47 = vmul.f32 %v12270_v51, %v12267_v46  ;;  %vm5342_vm2 = vweird.f32 %v12270_v51  ;;  %v16278_v46 = vld [vmem:[#allocation14_spill] sm:$0xff] }
 0x95c   : > { %v5320_v12 = vmul.f32 %v7333_v16, %v5319_v48  ;;  %v16235_v48 = vld [vmem:[#allocation11_spill] sm:$0xff]  ;;  %vm5343_vm4 = vmor %vm5341_vm3, %vm5342_vm2 }
 0x95d   : > { %v5330_v44 = vmul.f32 %v7335_v39, %v5329_v40  ;;  %v5337_v14 = vmul.f32 %v12270_v51, %v5336_v47 }
 0x95e   : > { %v5324_v7 = vsel %vm5323_vm12, %v7333_v16, %v5320_v12  ;;  %v16236_v12 = vld [vmem:[#allocation47_spill] sm:$0xff] }
 0x95f   : > { %v5352_v17 = vmul.f32 %v5346_v10, %v5324_v7  ;;  %v5334_v0 = vsel %vm5333_vm15, %v7335_v39, %v5330_v44  ;;  %v5338_v19 = vmul.f32 0.5, %v5337_v14  ;;  %v16232_v39 = vld [vmem:[#allocation117_spill] sm:$0xff]  ;;  %v16241_v7 = vld [vmem:[#allocation35_spill] sm:$0xff] }
 0x960   : > { %v5353_v18 = vmul.f32 %v5347_v23, %v5334_v0  ;;  %v16239_v44 = vld [vmem:[#allocation9_spill] sm:$0xff] }
 0x961   : > { %v12282_v3 = vperm.slane %v5352_v17, 0  ;;  %v5355_v41 = vmul.f32 %v5352_v17, %v5209_v38  ;;  %v5339_v2 = vsub.f32 1.5, %v5338_v19  ;;  %v16237_v38 = vld [vmem:[#allocation16_spill] sm:$0xff]  ;;  %v16243_v14 = vld [vmem:[#allocation13_spill] sm:$0xff]  ;;  %v16245_v17 = vld [vmem:[#allocation34_spill] sm:$0xff] }
 0x962   : > { %v5356_v13 = vmul.f32 %v5353_v18, %v5229_v21  ;;  %v12286_v25 = vperm.slane %v5353_v18, 0  ;;  %v16247_v18 = vld [vmem:[#allocation68_spill] sm:$0xff]  ;;  %v16249_v21 = vld [vmem:[#allocation2_spill] sm:$0xff] }
 0x963   : > { %16224 = vst [vmem:[#allocation78_spill] sm:$0xff] %v12282_v3  ;;  %v12290_v50 = vmul.f32 %v12282_v3, %v16225_v27  ;;  %v12294_v22 = vmul.f32 %v12282_v3, %v16226_v9  ;;  %v12298_v59 = vmul.f32 %v12282_v3, %v16227_v62  ;;  %v12302_v30 = vmul.f32 %v12282_v3, %v16228_v42  ;;  %v16251_v9 = vld [vmem:[#allocation81_spill] sm:$0xff] }
 0x964   : > { %v12307_v45 = vmul.f32 %v12282_v3, %v16229_v20  ;;  %v12311_v31 = vmul.f32 %v12282_v3, %v16230_v32  ;;  %v12315_v16 = vmul.f32 %v12282_v3, %v16231_v54  ;;  %v12319_v53 = vmul.f32 %v12282_v3, %v16232_v39  ;;  %v16253_v42 = vld [vmem:[#allocation33_spill] sm:$0xff]  ;;  %v16255_v54 = vld [vmem:[#allocation50_spill] sm:$0xff] }
 0x965   : > { %v12323_v1 = vmul.f32 %v12282_v3, %v16233_v61  ;;  %v12327_v43 = vmul.f32 %v12282_v3, %v16234_v35  ;;  %v12331_v49 = vmul.f32 %v12282_v3, %v16146_v57  ;;  %v12335_v40 = vmul.f32 %v12282_v3, %v16235_v48  ;;  %v16257_v61 = vld [vmem:[#allocation77_spill] sm:$0xff]  ;;  %v16259_v48 = vld [vmem:[#allocation39_spill] sm:$0xff] }
 0x966   : > { %v12339_v60 = vmul.f32 %v12282_v3, %v16149_v58  ;;  %v12343_v47 = vmul.f32 %v12282_v3, %v16236_v12  ;;  %v12347_v10 = vmul.f32 %v12282_v3, %v16237_v38  ;;  %v12351_v57 = vmul.f32 %v12282_v3, %v16239_v44  ;;  %v16261_v38 = vld [vmem:[#allocation41_spill] sm:$0xff] }
 0x967   : > { %v12355_v23 = vmul.f32 %v12282_v3, %v16241_v7  ;;  %v12359_v58 = vmul.f32 %v12282_v3, %v16243_v14  ;;  %v12363_v0 = vmul.f32 %v12282_v3, %v16245_v17  ;;  %v12367_v19 = vmul.f32 %v12282_v3, %v16247_v18  ;;  %v16263_v7 = vld [vmem:[#allocation67_spill] sm:$0xff]  ;;  %v16266_v18 = vld [vmem:[#allocation85_spill] sm:$0xff] }
 0x968   : > { %16238 = vst [vmem:[#allocation109_spill] sm:$0xff] %v12347_v10  ;;  %v12371_v27 = vmul.f32 %v12282_v3, %v16249_v21  ;;  %v12375_v62 = vmul.f32 %v12282_v3, %v16251_v9  ;;  %v12379_v20 = vmul.f32 %v12282_v3, %v16253_v42  ;;  %v5361_v32 = vrot.slane %v5356_v13, 7  ;;  %v16265_v13 = vld [vmem:[#allocation83_spill] sm:$0xff]  ;;  %v16267_v9 = vld [vmem:[#allocation114_spill] sm:$0xff] }
 0x969   : > { %16240 = vst [vmem:[#allocation54_spill] sm:$0xff] %v12351_v57  ;;  %v12383_v39 = vmul.f32 %v12282_v3, %v16255_v54  ;;  %v12387_v35 = vmul.f32 %v12282_v3, %v16257_v61  ;;  %v12391_v12 = vmul.f32 %v12282_v3, %v16259_v48  ;;  %v12395_v44 = vmul.f32 %v12282_v3, %v16261_v38  ;;  %v16268_v54 = vld [vmem:[#allocation88_spill] sm:$0xff]  ;;  %v16269_v48 = vld [vmem:[#allocation93_spill] sm:$0xff]  ;;  %v16326_v10 = vld [vmem:[#allocation63_spill] sm:$0xff] }
 0x96a   : > { %16242 = vst [vmem:[#allocation53_spill] sm:$0xff] %v12355_v23  ;;  %v12399_v14 = vmul.f32 %v12282_v3, %v16263_v7  ;;  %v12403_v17 = vmul.f32 %v12286_v25, %v16265_v13  ;;  %v12407_v21 = vmul.f32 %v12286_v25, %v16266_v18  ;;  %v12411_v42 = vmul.f32 %v12286_v25, %v16267_v9  ;;  %v16270_v7 = vld [vmem:[#allocation98_spill] sm:$0xff]  ;;  %v16272_v3 = vld [vmem:[#allocation111_spill] sm:$0xff] }
 0x96b   : > { %16244 = vst [vmem:[#allocation64_spill] sm:$0xff] %v12359_v58  ;;  %v12415_v61 = vmul.f32 %v12286_v25, %v16268_v54  ;;  %v12419_v38 = vmul.f32 %v12286_v25, %v16269_v48  ;;  %v12423_v13 = vmul.f32 %v12286_v25, %v16270_v7  ;;  %v5364_v18 = vsel %vm5363_vm1, %v5355_v41, %v5361_v32  ;;  %v16275_v32 = vld [vmem:[#allocation5_spill] sm:$0xff]  ;;  %v16276_v7 = vld [vmem:[#allocation26_spill] sm:$0xff] }
 0x96c   : > { %16246 = vst [vmem:[#allocation112_spill] sm:$0xff] %v12363_v0  ;;  %v12433_v54 = vmul.f32 %v12286_v25, %v16272_v3  ;;  %v12453_v3 = vmul.f32 %v12286_v25, %v16276_v7  ;;  %v12462_v24 = vmul.f32 %v12286_v25, %v16278_v46  ;;  %v16286_v46 = vld [vmem:[#allocation46_spill] sm:$0xff] }
 0x96d   : > { %16248 = vst [vmem:[#allocation44_spill] sm:$0xff] %v12367_v19  ;;  %v12482_v19 = vmul.f32 %v12286_v25, %v16286_v46  ;;  %v16296_v46 = vld [vmem:[#allocation38_spill] sm:$0xff] }
 0x96e   : > { %16250 = vst [vmem:[#allocation51_spill] sm:$0xff] %v12371_v27  ;;  %v16280_v27 = vld [vmem:[#allocation25_spill] sm:$0xff] }
 0x96f   : > { %16252 = vst [vmem:[#allocation120_spill] sm:$0xff] %v12375_v62  ;;  %v5249_v62 = vpop.f32.mrf.mxu3  ;;  %v12470_v7 = vmul.f32 %v12286_v25, %v16280_v27 }
 0x970   : > { %16254 = vst [vmem:[#allocation57_spill] sm:$0xff] %v12379_v20 }
 0x971   : > { %16256 = vst [vmem:[#allocation76_spill] sm:$0xff] %v12383_v39 }
 0x972   : > { %16258 = vst [vmem:[#allocation18_spill] sm:$0xff] %v12387_v35  ;;  %v16277_v35 = vld [vmem:[#allocation24_spill] sm:$0xff] }
 0x973   : > { %16260 = vst [vmem:[#allocation58_spill] sm:$0xff] %v12391_v12  ;;  %v16273_v12 = vld [vmem:[#allocation106_spill] sm:$0xff]  ;;  %v12458_v39 = vmul.f32 %v12286_v25, %v16277_v35  ;;  %v16284_v35 = vld [vmem:[#allocation20_spill] sm:$0xff] }
 0x974   : > { %16262 = vst [vmem:[#allocation45_spill] sm:$0xff] %v12395_v44  ;;  %v16271_v44 = vld [vmem:[#allocation92_spill] sm:$0xff]  ;;  %v12437_v48 = vmul.f32 %v12286_v25, %v16273_v12 }
 0x975   : > { %16264 = vst [vmem:[#allocation100_spill] sm:$0xff] %v12399_v14  ;;  %v5340_v14 = vmul.f32 %v12270_v51, %v5339_v2  ;;  %v12429_v9 = vmul.f32 %v12286_v25, %v16271_v44  ;;  %v16274_v2 = vld [vmem:[#allocation23_spill] sm:$0xff]  ;;  %v12449_v44 = vmul.f32 %v12286_v25, %v16275_v32 }
 0x976   : > { %v12445_v41 = vmul.f32 %v12286_v25, %v16274_v2  ;;  %v16279_v2 = vld [vmem:[#allocation17_spill] sm:$0xff]  ;;  %16281 = vst [vmem:[#allocation102_spill] sm:$0xff] %v12470_v7  ;;  %v16329_v7 = vld [vmem:[#allocation43_spill] sm:$0xff] }
 0x977   : > { %v5344_v12 = vsel %vm5343_vm4, %v12270_v51, %v5340_v14  ;;  %v12466_v20 = vmul.f32 %v12286_v25, %v16279_v2  ;;  %v12474_v51 = vmul.f32 %v12286_v25, %v16282_v26  ;;  %v12478_v14 = vmul.f32 %v12286_v25, %v16284_v35  ;;  %16287 = vst [vmem:[#allocation4_spill] sm:$0xff] %v12482_v19  ;;  %v16288_v2 = vld [vmem:[#allocation65_spill] sm:$0xff]  ;;  %v16292_v26 = vld [vmem:[#allocation80_spill] sm:$0xff]  ;;  %v16294_v35 = vld [vmem:[#allocation30_spill] sm:$0xff] }
 0x978   : > { %v5354_v32 = vmul.f32 %v5348_v33, %v5344_v12  ;;  %v12486_v33 = vmul.f32 %v12286_v25, %v16288_v2  ;;  %v16290_v12 = vld [vmem:[#allocation7_spill] sm:$0xff]  ;;  %v12496_v5 = vmul.f32 %v12286_v25, %v16292_v26  ;;  %v12500_v23 = vmul.f32 %v12286_v25, %v16294_v35  ;;  %v16298_v2 = vld [vmem:[#allocation86_spill] sm:$0xff] }
 0x979   : > { %16283 = vst [vmem:[#allocation62_spill] sm:$0xff] %v12474_v51  ;;  %v12490_v27 = vmul.f32 %v12286_v25, %v16290_v12  ;;  %v12504_v19 = vmul.f32 %v12286_v25, %v16296_v46  ;;  %v16300_v12 = vld [vmem:[#allocation75_spill] sm:$0xff]  ;;  %v16303_v26 = vld [vmem:[#allocation70_spill] sm:$0xff]  ;;  %v12524_v46 = vmul.f32 %v12286_v25, %v11607_v55  ;;  %v16309_v55 = vld [vmem:[#allocation12_spill] sm:$0xff] }
 0x97a   : > { %16285 = vst [vmem:[#allocation119_spill] sm:$0xff] %v12478_v14  ;;  %v5357_v0 = vmul.f32 %v5354_v32, %v5249_v62  ;;  %v12492_v58 = vperm.slane %v5354_v32, 0  ;;  %v12512_v62 = vmul.f32 %v12286_v25, %v16300_v12  ;;  %v12516_v32 = vmul.f32 %v12286_v25, %v16190_v34  ;;  %v16325_v51 = vld [vmem:[#allocation84_spill] sm:$0xff] }
 0x97b   : > { %16289 = vst [vmem:[#allocation101_spill] sm:$0xff] %v12486_v33  ;;  %v12508_v33 = vmul.f32 %v12286_v25, %v16298_v2  ;;  %v12520_v35 = vmul.f32 %v12286_v25, %v16303_v26  ;;  %v12528_v2 = vmul.f32 %v12286_v25, %v11629_v15  ;;  %v12532_v12 = vmul.f32 %v12286_v25, %v11645_v28  ;;  %v16310_v15 = vld [vmem:[#allocation121_spill] sm:$0xff] }
 0x97c   : > { %16291 = vst [vmem:[#allocation105_spill] sm:$0xff] %v12490_v27  ;;  %v12536_v34 = vmul.f32 %v12286_v25, %v11684_v11  ;;  %v16313_v25 = vld [vmem:[#allocation8_spill] sm:$0xff] }
 0x97d   : > { %16293 = vst [vmem:[#allocation32_spill] sm:$0xff] %v12496_v5 }
 0x97e   : > { %16295 = vst [vmem:[#allocation29_spill] sm:$0xff] %v12500_v23  ;;  %v5362_v23 = vrot.slane %v5357_v0, 6  ;;  %v4737_v0 = vld [vmem:[%s14690_s6] sm:$0x7] }
 0x97f   : > { %16297 = vst [vmem:[#allocation22_spill] sm:$0xff] %v12504_v19 }
 0x980   : > { %16299 = vst [vmem:[#allocation10_spill] sm:$0xff] %v12508_v33  ;;  %v5365_v26 = vsel %vm905_vm0, %v5364_v18, %v5362_v23  ;;  %v16315_v23 = vld [vmem:[#allocation97_spill] sm:$0xff]  ;;  %vm15113_vm0 = vcmask 64512  }
 0x981   : > { %16301 = vst [vmem:[#allocation40_spill] sm:$0xff] %v12512_v62  ;;  %v5391_v18 = vmul.f32 %v12492_v58, %v16315_v23  ;;  %v5367_v33 = vsub.f32 %v4737_v0, %v5365_v26  ;;  %v16321_v0 = vld [vmem:[#allocation69_spill] sm:$0xff]  ;;  %v16322_v23 = vld [vmem:[#allocation42_spill] sm:$0xff] }
 0x982   : > { %16302 = vst [vmem:[#allocation82_spill] sm:$0xff] %v12516_v32  ;;  %v16314_v32 = vld [vmem:[#allocation49_spill] sm:$0xff]  ;;  %v12572_v26 = vmul.f32 %v12492_v58, %v16321_v0  ;;  %v12593_v0 = vmul.f32 %v12492_v58, %v16326_v10  ;;  %v12613_v10 = vmul.f32 %v12492_v58, %v16213_v4 }
 0x983   : > { %16304 = vst [vmem:[#allocation27_spill] sm:$0xff] %v12520_v35  ;;  %v16311_v35 = vld [vmem:[#allocation6_spill] sm:$0xff]  ;;  %v5388_v62 = vmul.f32 %v12492_v58, %v16314_v32  ;;  %v12568_v32 = vmul.f32 %v12492_v58, %v16194_v37  ;;  %v12589_v37 = vmul.f32 %v12492_v58, %v16325_v51  ;;  %v12609_v51 = vmul.f32 %v12492_v58, %v11669_v6 }
 0x984   : > { %16305 = vst [vmem:[#allocation19_spill] sm:$0xff] %v12524_v46  ;;  %v5373_v46 = vmul.f32 %v12492_v58, %v16309_v55  ;;  %v5379_v28 = vmul.f32 %v12492_v58, %v16311_v35  ;;  %v16316_v55 = vld [vmem:[#allocation28_spill] sm:$0xff]  ;;  %v16318_v35 = vld [vmem:[#allocation122_spill] sm:$0xff]  ;;  %v12632_v6 = vperm.slane %v5367_v33, 1  ;;  %v12634_v4 = vperm.slane %v5367_v33, 2 }
 0x985   : > { %16306 = vst [vmem:[#allocation66_spill] sm:$0xff] %v12528_v2  ;;  %v5376_v2 = vmul.f32 %v12492_v58, %v16310_v15  ;;  %v5394_v19 = vmul.f32 %v12492_v58, %v16316_v55  ;;  %v16317_v15 = vld [vmem:[#allocation31_spill] sm:$0xff]  ;;  %v5400_v27 = vmul.f32 %v12492_v58, %v16318_v35  ;;  %v12577_v55 = vmul.f32 %v12492_v58, %v16322_v23 }
 0x986   : > { %16307 = vst [vmem:[#allocation110_spill] sm:$0xff] %v12532_v12  ;;  %v16312_v12 = vld [vmem:[#allocation15_spill] sm:$0xff]  ;;  %v5397_v5 = vmul.f32 %v12492_v58, %v16317_v15  ;;  %v16323_v15 = vld [vmem:[#allocation37_spill] sm:$0xff]  ;;  %v12597_v23 = vmul.f32 %v12492_v58, %v16327_v36  ;;  %v12617_v36 = vmul.f32 %v12492_v58, %v11703_v63 }
 0x987   : > { %16308 = vst [vmem:[#allocation104_spill] sm:$0xff] %v12536_v34  ;;  %v5382_v11 = vmul.f32 %v12492_v58, %v16312_v12  ;;  %v5385_v34 = vmul.f32 %v12492_v58, %v16313_v25  ;;  %v16319_v12 = vld [vmem:[#allocation79_spill] sm:$0xff]  ;;  %v16320_v25 = vld [vmem:[#allocation113_spill] sm:$0xff]  ;;  %v12581_v35 = vmul.f32 %v12492_v58, %v16323_v15  ;;  %v12601_v15 = vmul.f32 %v12492_v58, %v16329_v7 }
 0x988   : > { %v5403_v14 = vmul.f32 %v12492_v58, %v16319_v12  ;;  %v5406_v57 = vmul.f32 %v12492_v58, %v16320_v25  ;;  %v16324_v12 = vld [vmem:[#allocation74_spill] sm:$0xff]  ;;  %16328 = vst [vmem:[#allocation71_spill] sm:$0xff] %v12597_v23  ;;  %v12619_v23 = vperm.slane %v5367_v33, 0  ;;  %v12649_v33 = vadd.f32 %v12634_v4, %v5373_v46 }
 0x989   : > { %v12585_v25 = vmul.f32 %v12492_v58, %v16324_v12  ;;  %v12605_v12 = vmul.f32 %v12492_v58, %v16210_v56  ;;  %16330 = vst [vmem:[#allocation21_spill] sm:$0xff] %v12617_v36  ;;  %v12630_v56 = vmul.f32 %v12492_v58, %v11710_v29  ;;  %v12670_v46 = vadd.f32 %v12634_v4, %v5382_v11 }
 0x98a   : > { %v5474_v63 = vadd.f32 %v12619_v23, %v12290_v50  ;;  %v5477_v7 = vadd.f32 %v12619_v23, %v12294_v22  ;;  %v5480_v36 = vadd.f32 %v12619_v23, %v12298_v59  ;;  %v5483_v29 = vadd.f32 %v12619_v23, %v12302_v30  ;;  %16332 = vst [vmem:[#allocation36_spill] sm:$0xff] %v12649_v33 }
 0x98b   : > { %16331 = vst [vmem:[#allocation61_spill] sm:$0xff] %v12630_v56  ;;  %v12646_v56 = vadd.f32 %v12632_v6, %v12403_v17  ;;  %v12653_v50 = vadd.f32 %v12632_v6, %v12407_v21  ;;  %v12656_v22 = vadd.f32 %v12634_v4, %v5376_v2  ;;  %v12660_v59 = vadd.f32 %v12632_v6, %v12411_v42 }
 0x98c   : > { %v12663_v30 = vadd.f32 %v12634_v4, %v5379_v28  ;;  %v12667_v17 = vadd.f32 %v12632_v6, %v12415_v61  ;;  %16338 = vst [vmem:[#allocation99_spill] sm:$0xff] %v12670_v46  ;;  %v5486_v21 = vadd.f32 %v12619_v23, %v12307_v45  ;;  %v12678_v42 = vadd.f32 %v12632_v6, %v12419_v38 }
 0x98d   : > { %16333 = vst [vmem:[#allocation56_spill] sm:$0xff] %v12653_v50  ;;  %v12681_v2 = vadd.f32 %v12634_v4, %v5385_v34  ;;  %v5489_v61 = vadd.f32 %v12619_v23, %v12311_v31  ;;  %v12689_v28 = vadd.f32 %v12632_v6, %v12423_v13  ;;  %v12692_v11 = vadd.f32 %v12634_v4, %v5388_v62 }
 0x98e   : > { %16334 = vst [vmem:[#allocation52_spill] sm:$0xff] %v12656_v22  ;;  %v5492_v45 = vadd.f32 %v12619_v23, %v12315_v16  ;;  %v12698_v38 = vadd.f32 %v12632_v6, %v12429_v9  ;;  %v12703_v31 = vadd.f32 %v12634_v4, %v5391_v18  ;;  %v5495_v13 = vadd.f32 %v12619_v23, %v12319_v53 }
 0x98f   : > { %16335 = vst [vmem:[#allocation3_spill] sm:$0xff] %v12660_v59  ;;  %v12709_v62 = vadd.f32 %v12632_v6, %v12433_v54  ;;  %v12712_v34 = vadd.f32 %v12634_v4, %v5394_v19  ;;  %v12718_v16 = vmul.f32 %v12492_v58, %v11719_v8  ;;  %v5498_v9 = vadd.f32 %v12619_v23, %v12323_v1 }
 0x990   : > { %16336 = vst [vmem:[#allocation48_spill] sm:$0xff] %v12663_v30  ;;  %v12724_v53 = vadd.f32 %v12632_v6, %v12437_v48  ;;  %v12727_v54 = vadd.f32 %v12634_v4, %v5397_v5  ;;  %v5501_v19 = vadd.f32 %v12619_v23, %v12327_v43  ;;  %v12735_v8 = vadd.f32 %v12632_v6, %v12445_v41 }
 0x991   : > { %16337 = vst [vmem:[#allocation103_spill] sm:$0xff] %v12667_v17  ;;  %v12738_v18 = vadd.f32 %v12634_v4, %v5400_v27  ;;  %v12742_v1 = vadd.f32 %v12632_v6, %v12449_v44  ;;  %v5504_v5 = vadd.f32 %v12619_v23, %v12331_v49  ;;  %v12749_v48 = vadd.f32 %v12634_v4, %v5403_v14 }
 0x992   : > { %5571 = vst.msk [vmem:[%s12626_s25] sm:$0xff] %vm15113_vm0, %v5474_v63  ;;  %v12753_v43 = vadd.f32 %v12632_v6, %v12453_v3  ;;  %v12756_v41 = vadd.f32 %v12634_v4, %v5406_v57  ;;  %v5454_v44 = vmul.f32 %v12492_v58, %v11728_v52  ;;  %v5507_v27 = vadd.f32 %v12619_v23, %v12335_v40  ;;  %v16365_v63 = vld [vmem:[#allocation109_spill] sm:$0xff] }
 0x993   : > { %16339 = vst [vmem:[#allocation107_spill] sm:$0xff] %v12678_v42  ;;  %v12766_v49 = vadd.f32 %v12632_v6, %v12458_v39  ;;  %v12770_v3 = vadd.f32 %v12634_v4, %v12568_v32  ;;  %v5510_v57 = vadd.f32 %v12619_v23, %v12339_v60  ;;  %v12778_v52 = vadd.f32 %v12632_v6, %v12462_v24  ;;  %v16361_v24 = vld [vmem:[#allocation102_spill] sm:$0xff] }
 0x994   : > { %16340 = vst [vmem:[#allocation115_spill] sm:$0xff] %v12681_v2  ;;  %v12782_v40 = vadd.f32 %v12634_v4, %v12572_v26  ;;  %v12786_v39 = vadd.f32 %v12632_v6, %v12466_v20  ;;  %v5513_v14 = vadd.f32 %v12619_v23, %v12343_v47  ;;  %v12794_v60 = vadd.f32 %v12634_v4, %v12577_v55  ;;  %v16364_v20 = vld [vmem:[#allocation59_spill] sm:$0xff] }
 0x995   : > { %5572 = vst.msk [vmem:[%s12626_s25 + $0x8] sm:$0xff] %vm15113_vm0, %v5477_v7  ;;  %v12798_v32 = vadd.f32 %v12632_v6, %v16361_v24  ;;  %v12802_v26 = vadd.f32 %v12634_v4, %v12581_v35  ;;  %v5516_v47 = vadd.f32 %v12619_v23, %v16365_v63  ;;  %v16366_v7 = vld [vmem:[#allocation62_spill] sm:$0xff]  ;;  %v12840_v24 = vadd.f32 %v12634_v4, %v12593_v0 }
 0x996   : > { %16341 = vst [vmem:[#allocation94_spill] sm:$0xff] %v12689_v28  ;;  %v12812_v55 = vadd.f32 %v12632_v6, %v16366_v7  ;;  %v16369_v35 = vld [vmem:[#allocation54_spill] sm:$0xff] }
 0x997   : > { %16342 = vst [vmem:[#allocation96_spill] sm:$0xff] %v12692_v11 }
 0x998   : > { %16343 = vst [vmem:[#allocation116_spill] sm:$0xff] %v12698_v38 }
 0x999   : > { %5573 = vst.msk [vmem:[%s12626_s25 + $0x10] sm:$0xff] %vm15113_vm0, %v5480_v36  ;;  %v5457_v36 = vmul.f32 %v12492_v58, %v16364_v20  ;;  %v16377_v20 = vld [vmem:[#allocation101_spill] sm:$0xff] }
 0x99a   : > { %16344 = vst [vmem:[#allocation117_spill] sm:$0xff] %v12703_v31  ;;  %v12844_v63 = vadd.f32 %v12632_v6, %v16377_v20  ;;  %v12862_v20 = vadd.f32 %v12634_v4, %v12601_v15  ;;  %v16392_v15 = vld [vmem:[#allocation44_spill] sm:$0xff] }
 0x99b   : > { %16345 = vst [vmem:[#allocation118_spill] sm:$0xff] %v12709_v62 }
 0x99c   : > { %16346 = vst [vmem:[#allocation108_spill] sm:$0xff] %v12712_v34 }
 0x99d   : > { %5574 = vst.msk [vmem:[%s12626_s25 + $0x18] sm:$0xff] %vm15113_vm0, %v5483_v29  ;;  %v12816_v29 = vadd.f32 %v12634_v4, %v12585_v25  ;;  %v16375_v25 = vld [vmem:[#allocation53_spill] sm:$0xff] }
 0x99e   : > { %16347 = vst [vmem:[#allocation11_spill] sm:$0xff] %v12724_v53 }
 0x99f   : > { %16348 = vst [vmem:[#allocation47_spill] sm:$0xff] %v12727_v54 }
 0x9a0   : > { %5575 = vst.msk [vmem:[%s12626_s25 + $0x20] sm:$0xff] %vm15113_vm0, %v5486_v21  ;;  %v5519_v21 = vadd.f32 %v12619_v23, %v16369_v35  ;;  %v16381_v35 = vld [vmem:[#allocation87_spill] sm:$0xff] }
 0x9a1   : > { %16349 = vst [vmem:[#allocation16_spill] sm:$0xff] %v12735_v8 }
 0x9a2   : > { %16350 = vst [vmem:[#allocation9_spill] sm:$0xff] %v12738_v18 }
 0x9a3   : > { %16351 = vst [vmem:[#allocation35_spill] sm:$0xff] %v12742_v1 }
 0x9a4   : > { %5576 = vst.msk [vmem:[%s12626_s25 + $0x28] sm:$0xff] %vm15113_vm0, %v5489_v61  ;;  %v16370_v61 = vld [vmem:[#allocation119_spill] sm:$0xff] }
 0x9a5   : > { %16352 = vst [vmem:[#allocation13_spill] sm:$0xff] %v12749_v48 }
 0x9a6   : > { %16353 = vst [vmem:[#allocation34_spill] sm:$0xff] %v12753_v43 }
 0x9a7   : > { %16354 = vst [vmem:[#allocation68_spill] sm:$0xff] %v12756_v41 }
 0x9a8   : > { %5577 = vst.msk [vmem:[%s12626_s25 + $0x30] sm:$0xff] %vm15113_vm0, %v5492_v45  ;;  %v12824_v45 = vadd.f32 %v12632_v6, %v16370_v61  ;;  %v16382_v61 = vld [vmem:[#allocation64_spill] sm:$0xff] }
 0x9a9   : > { %16355 = vst [vmem:[#allocation2_spill] sm:$0xff] %v12766_v49 }
 0x9aa   : > { %16356 = vst [vmem:[#allocation81_spill] sm:$0xff] %v12770_v3 }
 0x9ab   : > { %5578 = vst.msk [vmem:[%s12626_s25 + $0x38] sm:$0xff] %vm15113_vm0, %v5495_v13  ;;  %v12828_v13 = vadd.f32 %v12634_v4, %v12589_v37  ;;  %v16379_v37 = vld [vmem:[#allocation71_spill] sm:$0xff] }
 0x9ac   : > { %16357 = vst [vmem:[#allocation33_spill] sm:$0xff] %v12778_v52  ;;  %v12848_v7 = vadd.f32 %v12634_v4, %v16379_v37  ;;  %v16386_v37 = vld [vmem:[#allocation112_spill] sm:$0xff] }
 0x9ad   : > { %16358 = vst [vmem:[#allocation50_spill] sm:$0xff] %v12782_v40  ;;  %v5613_v40 = vand.u32 2147483647, %v12742_v1 }
 0x9ae   : > { %16359 = vst [vmem:[#allocation77_spill] sm:$0xff] %v12786_v39 }
 0x9af   : > { %5579 = vst.msk [vmem:[%s12626_s25 + $0x40] sm:$0xff] %vm15113_vm0, %v5498_v9  ;;  %v16373_v9 = vld [vmem:[#allocation4_spill] sm:$0xff] }
 0x9b0   : > { %16360 = vst [vmem:[#allocation39_spill] sm:$0xff] %v12794_v60  ;;  %v16417_v60 = vld [vmem:[#allocation19_spill] sm:$0xff] }
 0x9b1   : > { %16362 = vst [vmem:[#allocation41_spill] sm:$0xff] %v12798_v32 }
 0x9b2   : > { %16363 = vst [vmem:[#allocation67_spill] sm:$0xff] %v12802_v26 }
 0x9b3   : > { %5580 = vst.msk [vmem:[%s12626_s25 + $0x48] sm:$0xff] %vm15113_vm0, %v5501_v19  ;;  %v12832_v19 = vadd.f32 %v12632_v6, %v16373_v9  ;;  %v5525_v9 = vadd.f32 %v12619_v23, %v16382_v61  ;;  %v12874_v61 = vadd.f32 %v12634_v4, %v12605_v12  ;;  %v12894_v12 = vadd.f32 %v12634_v4, %v12613_v10  ;;  %v16403_v10 = vld [vmem:[#allocation120_spill] sm:$0xff] }
 0x9b4   : > { %16367 = vst [vmem:[#allocation83_spill] sm:$0xff] %v12812_v55 }
 0x9b5   : > { %16368 = vst [vmem:[#allocation85_spill] sm:$0xff] %v12816_v29  ;;  %v16406_v29 = vld [vmem:[#allocation61_spill] sm:$0xff] }
 0x9b6   : > { %5581 = vst.msk [vmem:[%s12626_s25 + $0x50] sm:$0xff] %vm15113_vm0, %v5504_v5  ;;  %v5522_v5 = vadd.f32 %v12619_v23, %v16375_v25  ;;  %v16383_v25 = vld [vmem:[#allocation105_spill] sm:$0xff] }
 0x9b7   : > { %16371 = vst [vmem:[#allocation114_spill] sm:$0xff] %v12824_v45  ;;  %v12858_v0 = vadd.f32 %v12632_v6, %v16383_v25  ;;  %v16390_v25 = vld [vmem:[#allocation29_spill] sm:$0xff] }
 0x9b8   : > { %16372 = vst [vmem:[#allocation88_spill] sm:$0xff] %v12828_v13  ;;  %v16399_v13 = vld [vmem:[#allocation10_spill] sm:$0xff] }
 0x9b9   : > { %16374 = vst [vmem:[#allocation93_spill] sm:$0xff] %v12832_v19 }
 0x9ba   : > { %5582 = vst.msk [vmem:[%s12626_s25 + $0x58] sm:$0xff] %vm15113_vm0, %v5507_v27  ;;  %v5460_v27 = vmul.f32 %v12492_v58, %v16381_v35 }
 0x9bb   : > { %16376 = vst [vmem:[#allocation98_spill] sm:$0xff] %v12840_v24  ;;  %v12878_v24 = vadd.f32 %v12632_v6, %v16390_v25  ;;  %v16397_v25 = vld [vmem:[#allocation91_spill] sm:$0xff] }
 0x9bc   : > { %16378 = vst [vmem:[#allocation92_spill] sm:$0xff] %v12844_v63 }
 0x9bd   : > { %16380 = vst [vmem:[#allocation111_spill] sm:$0xff] %v12848_v7  ;;  %v16387_v7 = vld [vmem:[#allocation32_spill] sm:$0xff] }
 0x9be   : > { %5583 = vst.msk [vmem:[%s12626_s25 + $0x60] sm:$0xff] %vm15113_vm0, %v5510_v57  ;;  %v5528_v57 = vadd.f32 %v12619_v23, %v16386_v37  ;;  %v12870_v35 = vadd.f32 %v12632_v6, %v16387_v7  ;;  %v12886_v37 = vadd.f32 %v12634_v4, %v12609_v51  ;;  %v16394_v7 = vld [vmem:[#allocation22_spill] sm:$0xff]  ;;  %v12904_v51 = vadd.f32 %v12632_v6, %v16399_v13 }
 0x9bf   : > { %16384 = vst [vmem:[#allocation106_spill] sm:$0xff] %v12858_v0  ;;  %v16408_v13 = vld [vmem:[#allocation82_spill] sm:$0xff] }
 0x9c0   : > { %16385 = vst [vmem:[#allocation23_spill] sm:$0xff] %v12862_v20  ;;  %v12890_v20 = vadd.f32 %v12632_v6, %v16394_v7  ;;  %v12924_v26 = vadd.f32 %v12632_v6, %v16408_v13  ;;  %v16415_v13 = vld [vmem:[#allocation95_spill] sm:$0xff] }
 0x9c1   : > { %5584 = vst.msk [vmem:[%s12626_s25 + $0x68] sm:$0xff] %vm15113_vm0, %v5513_v14  ;;  %v5531_v14 = vadd.f32 %v12619_v23, %v16392_v15 }
 0x9c2   : > { %16388 = vst [vmem:[#allocation5_spill] sm:$0xff] %v12870_v35 }
 0x9c3   : > { %16389 = vst [vmem:[#allocation26_spill] sm:$0xff] %v12874_v61  ;;  %v16398_v61 = vld [vmem:[#allocation51_spill] sm:$0xff] }
 0x9c4   : > { %16391 = vst [vmem:[#allocation24_spill] sm:$0xff] %v12878_v24  ;;  %v5534_v15 = vadd.f32 %v12619_v23, %v16398_v61  ;;  %v12920_v61 = vadd.f32 %v12634_v4, %v16406_v29  ;;  %v12939_v29 = vadd.f32 %v12634_v4, %v5454_v44  ;;  %v16420_v44 = vld [vmem:[#allocation18_spill] sm:$0xff] }
 0x9c5   : > { %5585 = vst.msk [vmem:[%s12626_s25 + $0x70] sm:$0xff] %vm15113_vm0, %v5516_v47  ;;  %v5463_v47 = vmul.f32 %v12492_v58, %v16397_v25 }
 0x9c6   : > { %16393 = vst [vmem:[#allocation14_spill] sm:$0xff] %v12886_v37  ;;  %v16401_v37 = vld [vmem:[#allocation21_spill] sm:$0xff] }
 0x9c7   : > { %16395 = vst [vmem:[#allocation17_spill] sm:$0xff] %v12890_v20  ;;  %v12908_v7 = vadd.f32 %v12634_v4, %v16401_v37  ;;  %v16410_v37 = vld [vmem:[#allocation57_spill] sm:$0xff] }
 0x9c8   : > { %16396 = vst [vmem:[#allocation25_spill] sm:$0xff] %v12894_v12  ;;  %v16404_v12 = vld [vmem:[#allocation40_spill] sm:$0xff] }
 0x9c9   : > { %5586 = vst.msk [vmem:[%s12626_s25 + $0x78] sm:$0xff] %vm15113_vm0, %v5519_v21  ;;  %v5537_v21 = vadd.f32 %v12619_v23, %v16403_v10  ;;  %v12916_v25 = vadd.f32 %v12632_v6, %v16404_v12  ;;  %v12932_v10 = vadd.f32 %v12634_v4, %v12718_v16  ;;  %v16412_v12 = vld [vmem:[#allocation27_spill] sm:$0xff]  ;;  %v12949_v16 = vadd.f32 %v12632_v6, %v16417_v60 }
 0x9ca   : > { %16400 = vst [vmem:[#allocation60_spill] sm:$0xff] %v12904_v51 }
 0x9cb   : > { %16402 = vst [vmem:[#allocation20_spill] sm:$0xff] %v12908_v7  ;;  %v12936_v7 = vadd.f32 %v12632_v6, %v16412_v12  ;;  %v12952_v12 = vadd.f32 %v12634_v4, %v5457_v36  ;;  %v16426_v36 = vld [vmem:[#allocation58_spill] sm:$0xff] }
 0x9cc   : > { %5587 = vst.msk [vmem:[%s12626_s25 + $0x80] sm:$0xff] %vm15113_vm0, %v5522_v5  ;;  %v5540_v5 = vadd.f32 %v12619_v23, %v16410_v37 }
 0x9cd   : > { %16405 = vst [vmem:[#allocation46_spill] sm:$0xff] %v12916_v25 }
 0x9ce   : > { %16407 = vst [vmem:[#allocation65_spill] sm:$0xff] %v12920_v61  ;;  %v16416_v61 = vld [vmem:[#allocation76_spill] sm:$0xff] }
 0x9cf   : > { %16409 = vst [vmem:[#allocation7_spill] sm:$0xff] %v12924_v26  ;;  %v5543_v37 = vadd.f32 %v12619_v23, %v16416_v61  ;;  %v12963_v61 = vadd.f32 %v12634_v4, %v5460_v27 }
 0x9d0   : > { %5588 = vst.msk [vmem:[%s12626_s25 + $0x88] sm:$0xff] %vm15113_vm0, %v5525_v9  ;;  %v5466_v9 = vmul.f32 %v12492_v58, %v16415_v13  ;;  %v16424_v13 = vld [vmem:[#allocation110_spill] sm:$0xff] }
 0x9d1   : > { %16411 = vst [vmem:[#allocation80_spill] sm:$0xff] %v12932_v10  ;;  %v12967_v60 = vadd.f32 %v12632_v6, %v16424_v13  ;;  %v16431_v13 = vld [vmem:[#allocation72_spill] sm:$0xff]  ;;  %v16433_v10 = vld [vmem:[#allocation45_spill] sm:$0xff] }
 0x9d2   : > { %16413 = vst [vmem:[#allocation30_spill] sm:$0xff] %v12936_v7  ;;  %v12981_v27 = vadd.f32 %v12634_v4, %v5466_v9 }
 0x9d3   : > { %16414 = vst [vmem:[#allocation38_spill] sm:$0xff] %v12939_v29  ;;  %v16421_v29 = vld [vmem:[#allocation66_spill] sm:$0xff] }
 0x9d4   : > { %5589 = vst.msk [vmem:[%s12626_s25 + $0x90] sm:$0xff] %vm15113_vm0, %v5528_v57  ;;  %v5546_v57 = vadd.f32 %v12619_v23, %v16420_v44  ;;  %v12960_v58 = vadd.f32 %v12632_v6, %v16421_v29  ;;  %v12974_v44 = vadd.f32 %v12634_v4, %v5463_v47  ;;  %v16434_v47 = vld [vmem:[#allocation55_spill] sm:$0xff] }
 0x9d5   : > { %16418 = vst [vmem:[#allocation86_spill] sm:$0xff] %v12949_v16 }
 0x9d6   : > { %16419 = vst [vmem:[#allocation75_spill] sm:$0xff] %v12952_v12  ;;  %v16428_v12 = vld [vmem:[#allocation104_spill] sm:$0xff] }
 0x9d7   : > { %5590 = vst.msk [vmem:[%s12626_s25 + $0x98] sm:$0xff] %vm15113_vm0, %v5531_v14  ;;  %v5549_v14 = vadd.f32 %v12619_v23, %v16426_v36  ;;  %v12978_v29 = vadd.f32 %v12632_v6, %v16428_v12  ;;  %v5552_v36 = vadd.f32 %v12619_v23, %v16433_v10  ;;  %v16435_v12 = vld [vmem:[#allocation100_spill] sm:$0xff]  ;;  %v16437_v10 = vld [vmem:[#allocation90_spill] sm:$0xff] }
 0x9d8   : > { %16422 = vst [vmem:[#allocation70_spill] sm:$0xff] %v12960_v58  ;;  %v5555_v4 = vadd.f32 %v12619_v23, %v16435_v12 }
 0x9d9   : > { %16423 = vst [vmem:[#allocation12_spill] sm:$0xff] %v12963_v61  ;;  %v16432_v61 = vld [vmem:[#allocation78_spill] sm:$0xff] }
 0x9da   : > { %16425 = vst [vmem:[#allocation121_spill] sm:$0xff] %v12967_v60  ;;  %v5458_v6 = vmul.f32 %v16432_v61, %v16434_v47 }
 0x9db   : > { %5591 = vst.msk [vmem:[%s12626_s25 + $0xa0] sm:$0xff] %vm15113_vm0, %v5534_v15  ;;  %v5455_v15 = vmul.f32 %v16432_v61, %v16431_v13 }
 0x9dc   : > { %16427 = vst [vmem:[#allocation6_spill] sm:$0xff] %v12974_v44 }
 0x9dd   : > { %16429 = vst [vmem:[#allocation15_spill] sm:$0xff] %v12978_v29  ;;  %v5558_v13 = vadd.f32 %v12619_v23, %v5455_v15  ;;  %v5606_v15 = vand.u32 2147483647, %v12667_v17 }
 0x9de   : > { %16430 = vst [vmem:[#allocation8_spill] sm:$0xff] %v12981_v27  ;;  %v5561_v27 = vadd.f32 %v12619_v23, %v5458_v6  ;;  %v5608_v6 = vand.u32 2147483647, %v12689_v28 }
 0x9df   : > { %5592 = vst.msk [vmem:[%s12626_s25 + $0xa8] sm:$0xff] %vm15113_vm0, %v5537_v21  ;;  %v16436_v21 = vld [vmem:[#allocation73_spill] sm:$0xff] }
 0x9e0   : > { %5593 = vst.msk [vmem:[%s12626_s25 + $0xb0] sm:$0xff] %vm15113_vm0, %v5540_v5  ;;  %v5461_v9 = vmul.f32 %v16432_v61, %v16436_v21  ;;  %v5464_v5 = vmul.f32 %v16432_v61, %v16437_v10  ;;  %v5604_v61 = vand.u32 2147483647, %v12653_v50  ;;  %v5610_v21 = vand.u32 2147483647, %v12709_v62 }
 0x9e1   : > { %5594 = vst.msk [vmem:[%s12626_s25 + $0xb8] sm:$0xff] %vm15113_vm0, %v5543_v37 }
 0x9e2   : > { %5595 = vst.msk [vmem:[%s12626_s25 + $0xc0] sm:$0xff] %vm15113_vm0, %v5546_v57  ;;  %v5564_v47 = vadd.f32 %v12619_v23, %v5461_v9  ;;  %v5567_v37 = vadd.f32 %v12619_v23, %v5464_v5  ;;  %v5603_v57 = vand.u32 2147483647, %v12646_v56  ;;  %v5607_v23 = vand.u32 2147483647, %v12678_v42 }
 0x9e3   : > { %5596 = vst.msk [vmem:[%s12626_s25 + $0xc8] sm:$0xff] %vm15113_vm0, %v5549_v14  ;;  %v5605_v14 = vand.u32 2147483647, %v12660_v59  ;;  %v5636_v12 = vsub.f32 0.0, %v5604_v61  ;;  %v5638_v9 = vsub.f32 0.0, %v5606_v15  ;;  %v5642_v41 = vsub.f32 0.0, %v5610_v21 }
 0x9e4   : > { %5597 = vst.msk [vmem:[%s12626_s25 + $0xd0] sm:$0xff] %vm15113_vm0, %v5552_v36  ;;  %v5635_v36 = vsub.f32 0.0, %v5603_v57  ;;  %v5639_v10 = vsub.f32 0.0, %v5607_v23  ;;  %v5614_v61 = vand.u32 2147483647, %v12753_v43 }
 0x9e5   : > { %5598 = vst.msk [vmem:[%s12626_s25 + $0xd8] sm:$0xff] %vm15113_vm0, %v5555_v4  ;;  %v5637_v4 = vsub.f32 0.0, %v5605_v14  ;;  %v5669_v44 = vmul.f32 1.442695, %v5636_v12  ;;  %v5673_v48 = vmul.f32 1.442695, %v5638_v9 }
 0x9e6   : > { %5599 = vst.msk [vmem:[%s12626_s25 + $0xe0] sm:$0xff] %vm15113_vm0, %v5558_v13  ;;  %v5611_v13 = vand.u32 2147483647, %v12724_v53  ;;  %v5667_v5 = vmul.f32 1.442695, %v5635_v36  ;;  %v5645_v12 = vsub.f32 0.0, %v5613_v40 }
 0x9e7   : > { %5600 = vst.msk [vmem:[%s12626_s25 + $0xe8] sm:$0xff] %vm15113_vm0, %v5561_v27  ;;  %v5609_v27 = vand.u32 2147483647, %v12698_v38  ;;  %v5671_v3 = vmul.f32 1.442695, %v5637_v4  ;;  %v5646_v34 = vsub.f32 0.0, %v5614_v61 }
 0x9e8   : > { %5601 = vst.msk [vmem:[%s12626_s25 + $0xf0] sm:$0xff] %vm15113_vm0, %v5564_v47  ;;  %v5612_v47 = vand.u32 2147483647, %v12735_v8  ;;  %v5615_v14 = vand.u32 2147483647, %v12766_v49  ;;  %v5643_v18 = vsub.f32 0.0, %v5611_v13  ;;  %7338 = vpow2.f32 %v5667_v5 }
 0x9e9   : > { %5602 = vst.msk [vmem:[%s12626_s25 + $0xf8] sm:$0xff] %vm15113_vm0, %v5567_v37  ;;  %v5640_v37 = vsub.f32 0.0, %v5608_v6  ;;  %v5641_v57 = vsub.f32 0.0, %v5609_v27  ;;  %v5675_v15 = vmul.f32 1.442695, %v5639_v10  ;;  %7340 = vpow2.f32 %v5669_v44 }
 0x9ea   : > { %v5616_v23 = vand.u32 2147483647, %v12778_v52  ;;  %v5644_v36 = vsub.f32 0.0, %v5612_v47  ;;  %v5617_v6 = vand.u32 2147483647, %v12786_v39  ;;  %7342 = vpow2.f32 %v5671_v3 }
 0x9eb   : > { %v5677_v54 = vmul.f32 1.442695, %v5640_v37  ;;  %v5679_v27 = vmul.f32 1.442695, %v5641_v57  ;;  %v5618_v4 = vand.u32 2147483647, %v12798_v32  ;;  %7344 = vpow2.f32 %v5673_v48 }
 0x9ec   : > { %v5681_v21 = vmul.f32 1.442695, %v5642_v41  ;;  %v5619_v9 = vand.u32 2147483647, %v12812_v55  ;;  %v5647_v13 = vsub.f32 0.0, %v5615_v14  ;;  %7346 = vpow2.f32 %v5675_v15 }
 0x9ed   : > { %v5683_v10 = vmul.f32 1.442695, %v5643_v18  ;;  %v5620_v5 = vand.u32 2147483647, %v12824_v45  ;;  %v5648_v47 = vsub.f32 0.0, %v5616_v23  ;;  %7348 = vpow2.f32 %v5677_v54 }
 0x9ee   : > { %v5685_v44 = vmul.f32 1.442695, %v5644_v36  ;;  %v13039_v37 = vpop.eup %7338  ;;  %v5621_v3 = vand.u32 2147483647, %v12832_v19  ;;  %v5649_v40 = vsub.f32 0.0, %v5617_v6  ;;  %7350 = vpow2.f32 %v5679_v27 }
 0x9ef   : > { %16438 = vst [vmem:[#allocation49_spill] sm:$0xff] %v13039_v37  ;;  %v5687_v57 = vmul.f32 1.442695, %v5645_v12  ;;  %v13042_v61 = vpop.eup %7340  ;;  %v5622_v48 = vand.u32 2147483647, %v12844_v63  ;;  %v5650_v41 = vsub.f32 0.0, %v5618_v4  ;;  %7352 = vpow2.f32 %v5681_v21 }
 0x9f0   : > { %16439 = vst [vmem:[#allocation97_spill] sm:$0xff] %v13042_v61  ;;  %v5689_v14 = vmul.f32 1.442695, %v5646_v34  ;;  %v13045_v18 = vpop.eup %7342  ;;  %v5623_v15 = vand.u32 2147483647, %v12858_v0  ;;  %v5651_v54 = vsub.f32 0.0, %v5619_v9  ;;  %7354 = vpow2.f32 %v5683_v10 }
 0x9f1   : > { %16440 = vst [vmem:[#allocation28_spill] sm:$0xff] %v13045_v18  ;;  %v5691_v23 = vmul.f32 1.442695, %v5647_v13  ;;  %v13048_v36 = vpop.eup %7344  ;;  %v5624_v6 = vand.u32 2147483647, %v12870_v35  ;;  %v5652_v27 = vsub.f32 0.0, %v5620_v5  ;;  %7356 = vpow2.f32 %v5685_v44 }
 0x9f2   : > { %16441 = vst [vmem:[#allocation31_spill] sm:$0xff] %v13048_v36  ;;  %v5693_v12 = vmul.f32 1.442695, %v5648_v47  ;;  %v13051_v31 = vpop.eup %7346  ;;  %v5625_v4 = vand.u32 2147483647, %v12878_v24  ;;  %v5653_v21 = vsub.f32 0.0, %v5621_v3  ;;  %7358 = vpow2.f32 %v5687_v57 }
 0x9f3   : > { %16442 = vst [vmem:[#allocation122_spill] sm:$0xff] %v13051_v31  ;;  %v5695_v34 = vmul.f32 1.442695, %v5649_v40  ;;  %v13054_v11 = vpop.eup %7348  ;;  %v5626_v9 = vand.u32 2147483647, %v12890_v20  ;;  %v5654_v10 = vsub.f32 0.0, %v5622_v48  ;;  %7360 = vpow2.f32 %v5689_v14 }
 0x9f4   : > { %16443 = vst [vmem:[#allocation79_spill] sm:$0xff] %v13054_v11  ;;  %v5697_v13 = vmul.f32 1.442695, %v5650_v41  ;;  %v13057_v2 = vpop.eup %7350  ;;  %v5627_v5 = vand.u32 2147483647, %v12904_v51  ;;  %v5655_v44 = vsub.f32 0.0, %v5623_v15  ;;  %7362 = vpow2.f32 %v5691_v23 }
 0x9f5   : > { %16444 = vst [vmem:[#allocation113_spill] sm:$0xff] %v13057_v2  ;;  %v5699_v47 = vmul.f32 1.442695, %v5651_v54  ;;  %v13060_v46 = vpop.eup %7352  ;;  %v5628_v3 = vand.u32 2147483647, %v12916_v25  ;;  %v5656_v57 = vsub.f32 0.0, %v5624_v6  ;;  %7364 = vpow2.f32 %v5693_v12 }
 0x9f6   : > { %16445 = vst [vmem:[#allocation69_spill] sm:$0xff] %v13060_v46  ;;  %v5701_v40 = vmul.f32 1.442695, %v5652_v27  ;;  %v13063_v30 = vpop.eup %7354  ;;  %v5629_v48 = vand.u32 2147483647, %v12924_v26  ;;  %v5657_v14 = vsub.f32 0.0, %v5625_v4  ;;  %7366 = vpow2.f32 %v5695_v34 }
 0x9f7   : > { %16446 = vst [vmem:[#allocation42_spill] sm:$0xff] %v13063_v30  ;;  %v5703_v41 = vmul.f32 1.442695, %v5653_v21  ;;  %v13066_v22 = vpop.eup %7356  ;;  %v5630_v15 = vand.u32 2147483647, %v12936_v7  ;;  %v5658_v23 = vsub.f32 0.0, %v5626_v9  ;;  %7368 = vpow2.f32 %v5697_v13 }
 0x9f8   : > { %16447 = vst [vmem:[#allocation37_spill] sm:$0xff] %v13066_v22  ;;  %v5705_v54 = vmul.f32 1.442695, %v5654_v10  ;;  %v13069_v33 = vpop.eup %7358  ;;  %v5659_v25 = vsub.f32 0.0, %v5627_v5  ;;  %7370 = vpow2.f32 %v5699_v47  ;;  %v5707_v6 = vmul.f32 1.442695, %v5655_v44 }
 0x9f9   : > { %16448 = vst [vmem:[#allocation74_spill] sm:$0xff] %v13069_v33  ;;  %v13071_v27 = vpop.eup %7360  ;;  %v5660_v12 = vsub.f32 0.0, %v5628_v3  ;;  %7372 = vpow2.f32 %v5701_v40  ;;  %v5709_v26 = vmul.f32 1.442695, %v5656_v57  ;;  %v5661_v21 = vsub.f32 0.0, %v5629_v48 }
 0x9fa   : > { %16449 = vst [vmem:[#allocation84_spill] sm:$0xff] %v13071_v27  ;;  %v13073_v4 = vpop.eup %7362  ;;  %7374 = vpow2.f32 %v5703_v41  ;;  %v5711_v34 = vmul.f32 1.442695, %v5657_v14  ;;  %v5662_v9 = vsub.f32 0.0, %v5630_v15  ;;  %v5713_v10 = vmul.f32 1.442695, %v5658_v23 }
 0x9fb   : > { %16450 = vst [vmem:[#allocation63_spill] sm:$0xff] %v13073_v4  ;;  %v13075_v51 = vpop.eup %7364  ;;  %7376 = vpow2.f32 %v5705_v54  ;;  %v5715_v5 = vmul.f32 1.442695, %v5659_v25  ;;  %v5717_v47 = vmul.f32 1.442695, %v5660_v12  ;;  %v13127_v7 = vadd.f32 1.0, %v13057_v2 }
 0x9fc   : > { %16451 = vst [vmem:[#allocation89_spill] sm:$0xff] %v13075_v51  ;;  %v13077_v13 = vpop.eup %7366  ;;  %7378 = vpow2.f32 %v5707_v6  ;;  %v5631_v57 = vand.u32 2147483647, %v12949_v16  ;;  %v5719_v40 = vmul.f32 1.442695, %v5661_v21  ;;  %v13097_v6 = vadd.f32 1.0, %v13042_v61 }
 0x9fd   : > { %16452 = vst [vmem:[#allocation43_spill] sm:$0xff] %v13077_v13  ;;  %v13079_v44 = vpop.eup %7368  ;;  %7380 = vpow2.f32 %v5709_v26  ;;  %v5632_v14 = vand.u32 2147483647, %v12960_v58  ;;  %v5633_v41 = vand.u32 2147483647, %v12967_v60  ;;  %v13092_v26 = vadd.f32 1.0, %v13039_v37 }
 0x9fe   : > { %16453 = vst [vmem:[#allocation102_spill] sm:$0xff] %v13079_v44  ;;  %v13081_v3 = vpop.eup %7370  ;;  %7382 = vpow2.f32 %v5711_v34  ;;  %v5721_v15 = vmul.f32 1.442695, %v5662_v9  ;;  %v5634_v25 = vand.u32 2147483647, %v12978_v29  ;;  %v5663_v21 = vsub.f32 0.0, %v5631_v57 }
 0x9ff   : > { %16454 = vst [vmem:[#allocation59_spill] sm:$0xff] %v13081_v3  ;;  %v13084_v48 = vpop.eup %7372  ;;  %7384 = vpow2.f32 %v5713_v10  ;;  %v13102_v34 = vadd.f32 1.0, %v13045_v18  ;;  %v5664_v10 = vsub.f32 0.0, %v5632_v14  ;;  %v13107_v29 = vadd.f32 1.0, %v13048_v36 }
 0xa00   : > { %16455 = vst [vmem:[#allocation109_spill] sm:$0xff] %v13084_v48  ;;  %v13088_v23 = vpop.eup %7374  ;;  %7386 = vpow2.f32 %v5715_v5  ;;  %v5665_v5 = vsub.f32 0.0, %v5633_v41  ;;  %v13112_v58 = vadd.f32 1.0, %v13051_v31  ;;  %v5723_v41 = vmul.f32 1.442695, %v5663_v21 }
 0xa01   : > { %16456 = vst [vmem:[#allocation62_spill] sm:$0xff] %v13088_v23  ;;  %v13094_v54 = vpop.eup %7376  ;;  %7388 = vpow2.f32 %v5717_v47  ;;  %v5666_v47 = vsub.f32 0.0, %v5634_v25  ;;  %v5725_v25 = vmul.f32 1.442695, %v5664_v10  ;;  %v13133_v35 = vadd.f32 1.0, %v13060_v46 }
 0xa02   : > { %16457 = vst [vmem:[#allocation54_spill] sm:$0xff] %v13094_v54  ;;  %v13099_v12 = vpop.eup %7378  ;;  %7390 = vpow2.f32 %v5719_v40  ;;  %v13118_v40 = vadd.f32 1.0, %v13054_v11  ;;  %v5727_v16 = vmul.f32 1.442695, %v5665_v5  ;;  %v13136_v0 = vadd.f32 1.0, %v13063_v30 }
 0xa03   : > { %16458 = vst [vmem:[#allocation119_spill] sm:$0xff] %v13099_v12  ;;  %v13104_v9 = vpop.eup %7380  ;;  %7392 = vpow2.f32 %v5721_v15  ;;  %v5729_v24 = vmul.f32 1.442695, %v5666_v47  ;;  %v13142_v10 = vadd.f32 1.0, %v13066_v22  ;;  %v13145_v5 = vadd.f32 1.0, %v13069_v33 }
 0xa04   : > { %16459 = vst [vmem:[#allocation4_spill] sm:$0xff] %v13104_v9  ;;  %v13109_v60 = vpop.eup %7382  ;;  %7394 = vrcp.f32 %v13092_v26  ;;  %v13148_v63 = vadd.f32 1.0, %v13071_v27  ;;  %v13154_v19 = vadd.f32 1.0, %v13073_v4  ;;  %v13157_v45 = vadd.f32 1.0, %v13075_v51 }
 0xa05   : > { %16460 = vst [vmem:[#allocation53_spill] sm:$0xff] %v13109_v60  ;;  %v13115_v57 = vpop.eup %7384  ;;  %7396 = vrcp.f32 %v13097_v6  ;;  %v13160_v55 = vadd.f32 1.0, %v13077_v13  ;;  %v13165_v33 = vadd.f32 1.0, %v13079_v44  ;;  %v13168_v27 = vadd.f32 1.0, %v13081_v3 }
 0xa06   : > { %16461 = vst [vmem:[#allocation101_spill] sm:$0xff] %v13115_v57  ;;  %v13121_v14 = vpop.eup %7386  ;;  %7398 = vrcp.f32 %v13102_v34  ;;  %v5806_v22 = vand.u32 2147483648, %v13092_v26  ;;  %v13175_v51 = vadd.f32 1.0, %v13084_v48  ;;  %v13178_v13 = vadd.f32 1.0, %v13088_v23 }
 0xa07   : > { %16462 = vst [vmem:[#allocation71_spill] sm:$0xff] %v13121_v14  ;;  %v13124_v15 = vpop.eup %7388  ;;  %7400 = vrcp.f32 %v13107_v29  ;;  %v13181_v4 = vadd.f32 1.0, %v13094_v54  ;;  %v13186_v3 = vadd.f32 1.0, %v13099_v12  ;;  %v5804_v39 = vand.u32 2147483647, %v13092_v26 }
 0xa08   : > { %16463 = vst [vmem:[#allocation87_spill] sm:$0xff] %v13124_v15  ;;  %v13130_v20 = vpop.eup %7390  ;;  %7402 = vrcp.f32 %v13112_v58  ;;  %v5821_v30 = vand.u32 2147483648, %v13097_v6  ;;  %v13193_v48 = vadd.f32 1.0, %v13104_v9  ;;  %v5819_v23 = vand.u32 2147483647, %v13097_v6 }
 0xa09   : > { %16464 = vst [vmem:[#allocation64_spill] sm:$0xff] %v13130_v20  ;;  %v13139_v21 = vpop.eup %7392  ;;  %7404 = vrcp.f32 %v13118_v40  ;;  %v13204_v12 = vadd.f32 1.0, %v13115_v57  ;;  %v13206_v46 = vor.u32 1.1754944e-38, %v5806_v22  ;;  %v13212_v9 = vadd.f32 1.0, %v13121_v14 }
 0xa0a   : > { %16465 = vst [vmem:[#allocation105_spill] sm:$0xff] %v13139_v21  ;;  %v13151_v47 = vpop.eup %7394  ;;  %7406 = vpow2.f32 %v5723_v41  ;;  %v13222_v22 = vadd.f32 1.0, %v13124_v15  ;;  %v13224_v57 = vor.u32 1.1754944e-38, %v5821_v30  ;;  %v13233_v8 = vadd.f32 1.0, %v13130_v20 }
 0xa0b   : > { %v13162_v32 = vpop.eup %7396  ;;  %7408 = vrcp.f32 %v13127_v7  ;;  %v5796_v54 = vmul.f32 %v13151_v47, %v13092_v26  ;;  %v5851_v18 = vand.u32 2147483648, %v13107_v29  ;;  %v13241_v30 = vadd.f32 1.0, %v13139_v21 }
 0xa0c   : > { %v13172_v41 = vpop.eup %7398  ;;  %7410 = vpow2.f32 %v5725_v25  ;;  %v5811_v2 = vmul.f32 %v13162_v32, %v13097_v6  ;;  %vm5800_vm5 = vweird.f32 %v13092_v26  ;;  %v5849_v37 = vand.u32 2147483647, %v13107_v29 }
 0xa0d   : > { %v13183_v44 = vpop.eup %7400  ;;  %7412 = vpow2.f32 %v5727_v16  ;;  %v13201_v16 = vadd.f32 1.0, %v13109_v60  ;;  %v5826_v43 = vmul.f32 %v13172_v41, %v13102_v34  ;;  %v5834_v60 = vand.u32 2147483647, %v13102_v34 }
 0xa0e   : > { %v13190_v25 = vpop.eup %7402  ;;  %7414 = vpow2.f32 %v5729_v24  ;;  %v5836_v24 = vand.u32 2147483648, %v13102_v34  ;;  %v5841_v1 = vmul.f32 %v13183_v44, %v13107_v29  ;;  %v5797_v36 = vsub.f32 1.0, %v5796_v54 }
 0xa0f   : > { %v13198_v52 = vpop.eup %7404  ;;  %v5856_v14 = vmul.f32 %v13190_v25, %v13112_v58  ;;  %v5866_v20 = vand.u32 2147483648, %v13112_v58  ;;  %v5812_v38 = vsub.f32 1.0, %v5811_v2  ;;  %vm5815_vm6 = vweird.f32 %v13097_v6 }
 0xa10   : > { %v13209_v49 = vpop.eup %7406  ;;  %v5871_v15 = vmul.f32 %v13198_v52, %v13118_v40  ;;  %v13244_v61 = vor.u32 1.1754944e-38, %v5836_v24  ;;  %v5827_v28 = vsub.f32 1.0, %v5826_v43  ;;  %vm5830_vm7 = vweird.f32 %v13102_v34 }
 0xa11   : > { %16466 = vst [vmem:[#allocation112_spill] sm:$0xff] %v13209_v49  ;;  %v13219_v11 = vpop.eup %7408  ;;  %v13251_v54 = vadd.f32 1.0, %v13209_v49  ;;  %v5842_v24 = vsub.f32 1.0, %v5841_v1  ;;  %v5857_v17 = vsub.f32 1.0, %v5856_v14  ;;  %v5864_v59 = vand.u32 2147483647, %v13112_v58 }
 0xa12   : > { %v13230_v31 = vpop.eup %7410  ;;  %v5886_v21 = vmul.f32 %v13219_v11, %v13127_v7  ;;  %v5798_v2 = vmul.f32 %v13151_v47, %v5797_v36  ;;  %vm5845_vm8 = vweird.f32 %v13107_v29  ;;  %v13266_v43 = vor.u32 1.1754944e-38, %v5851_v18 }
 0xa13   : > { %16467 = vst [vmem:[#allocation32_spill] sm:$0xff] %v13230_v31  ;;  %v13238_v53 = vpop.eup %7412  ;;  %v13257_v42 = vadd.f32 1.0, %v13230_v31  ;;  %v5872_v49 = vsub.f32 1.0, %v5871_v15  ;;  %vm5860_vm9 = vweird.f32 %v13112_v58  ;;  %v13272_v31 = vor.u32 1.1754944e-38, %v5866_v20 }
 0xa14   : > { %16468 = vst [vmem:[#allocation29_spill] sm:$0xff] %v13238_v53  ;;  %v13248_v62 = vpop.eup %7414  ;;  %v13262_v50 = vadd.f32 1.0, %v13238_v53  ;;  %v5879_v1 = vand.u32 2147483647, %v13118_v40  ;;  %7416 = vrcp.f32 %v13133_v35  ;;  %vm13276_vm10 = vcmp.eq.f32.partialorder %v5804_v39, 8.507059e+37 }
 0xa15   : > { %16469 = vst [vmem:[#allocation44_spill] sm:$0xff] %v13248_v62  ;;  %v5813_v36 = vmul.f32 %v13162_v32, %v5812_v38  ;;  %v5828_v18 = vmul.f32 %v13172_v41, %v5827_v28  ;;  %v5887_v15 = vsub.f32 1.0, %v5886_v21  ;;  %7418 = vrcp.f32 %v13136_v0 }
 0xa16   : > { %16470 = vst [vmem:[#allocation22_spill] sm:$0xff] %v13251_v54  ;;  %v13269_v54 = vadd.f32 1.0, %v13248_v62  ;;  %vm5801_vm12 = vweird.f32 %v13151_v47  ;;  %v5843_v20 = vmul.f32 %v13183_v44, %v5842_v24  ;;  %v5858_v62 = vmul.f32 %v13190_v25, %v5857_v17 }
 0xa17   : > { %16471 = vst [vmem:[#allocation91_spill] sm:$0xff] %v13257_v42  ;;  %7420 = vrcp.f32 %v13142_v10  ;;  %v5799_v39 = vadd.f32 %v13151_v47, %v5798_v2  ;;  %vm5816_vm13 = vweird.f32 %v13162_v32  ;;  %vm13290_vm14 = vcmp.eq.f32.partialorder %v5819_v23, 8.507059e+37  ;;  %vm13312_vm4 = vmor %vm5800_vm5, %vm5801_vm12 }
 0xa18   : > { %16472 = vst [vmem:[#allocation51_spill] sm:$0xff] %v13262_v50  ;;  %vm13294_vm15 = vcmp.eq.f32.partialorder %v5834_v60, 8.507059e+37  ;;  %v5873_v21 = vmul.f32 %v13198_v52, %v5872_v49  ;;  %v5881_v24 = vand.u32 2147483648, %v13118_v40  ;;  %vm5831_vm1 = vweird.f32 %v13172_v41  ;;  %vm13330_vm5 = vmor %vm5815_vm6, %vm5816_vm13 }
 0xa19   : > { %16473 = vst [vmem:[#allocation10_spill] sm:$0xff] %v13269_v54  ;;  %vm13301_vm2 = vcmp.eq.f32.partialorder %v5849_v37, 8.507059e+37  ;;  %vm5890_vm3 = vweird.f32 %v13127_v7  ;;  %v5894_v23 = vand.u32 2147483647, %v13127_v7  ;;  %7422 = vrcp.f32 %v13145_v5  ;;  %vm13347_vm6 = vmor %vm5830_vm7, %vm5831_vm1 }
 0xa1a   : > { %v5814_v60 = vadd.f32 %v13162_v32, %v5813_v36  ;;  %v5829_v37 = vadd.f32 %v13172_v41, %v5828_v18  ;;  %vm5846_vm0 = vweird.f32 %v13183_v44  ;;  %vm13319_vm11 = vcmp.eq.f32.partialorder %v5864_v59, 8.507059e+37  ;;  %v13324_v54 = vpop.eup %7416 }
 0xa1b   : > { %v5888_v53 = vmul.f32 %v13219_v11, %v5887_v15  ;;  %v5844_v36 = vadd.f32 %v13183_v44, %v5843_v20  ;;  %v5859_v18 = vadd.f32 %v13190_v25, %v5858_v62  ;;  %vm5861_vm12 = vweird.f32 %v13190_v25  ;;  %v13338_v59 = vpop.eup %7418 }
 0xa1c   : > { %7424 = vrcp.f32 %v13148_v63  ;;  %v5803_v15 = vsel %vm13312_vm4, %v13151_v47, %v5799_v39  ;;  %v5874_v62 = vadd.f32 %v13198_v52, %v5873_v21  ;;  %vm5876_vm13 = vweird.f32 %v13198_v52  ;;  %vm13360_vm4 = vmor %vm5845_vm8, %vm5846_vm0 }
 0xa1d   : > { %7426 = vrcp.f32 %v13154_v19  ;;  %v13354_v20 = vpop.eup %7420  ;;  %vm13364_vm7 = vcmp.eq.f32.partialorder %v5879_v1, 8.507059e+37  ;;  %v5882_v39 = vor.u32 1.1754944e-38, %v5881_v24  ;;  %vm5891_vm1 = vweird.f32 %v13219_v11  ;;  %vm13380_vm0 = vmor %vm5860_vm9, %vm5861_vm12 }
 0xa1e   : > { %v5896_v21 = vand.u32 2147483648, %v13127_v7  ;;  %v5818_v49 = vsel %vm13330_vm5, %v13162_v32, %v5814_v60  ;;  %v5833_v29 = vsel %vm13347_vm6, %v13172_v41, %v5829_v37  ;;  %v5889_v24 = vadd.f32 %v13219_v11, %v5888_v53 }
 0xa1f   : > { %v5901_v50 = vmul.f32 %v13324_v54, %v13133_v35  ;;  %v13387_v42 = vpop.eup %7422  ;;  %v13392_v32 = vsel %vm13276_vm10, %v13206_v46, %v5803_v15  ;;  %v5848_v58 = vsel %vm13360_vm4, %v13183_v44, %v5844_v36  ;;  %v5863_v41 = vsel %vm13380_vm0, %v13190_v25, %v5859_v18  ;;  %vm13436_vm10 = vmor %vm5890_vm3, %vm5891_vm1 }
 0xa20   : > { %vm16496_vm8 = vweird.f32 %v13118_v40  ;;  %vm13408_vm5 = vcmp.eq.f32.partialorder %v5894_v23, 8.507059e+37  ;;  %v5916_v44 = vmul.f32 %v13338_v59, %v13136_v0  ;;  %v5931_v25 = vmul.f32 %v13354_v20, %v13142_v10 }
 0xa21   : > { %vm13404_vm9 = vmor %vm16496_vm8, %vm5876_vm13  ;;  %7428 = vrcp.f32 %v13157_v45  ;;  %v13425_v23 = vsel %vm13290_vm14, %v13224_v57, %v5818_v49  ;;  %v13430_v60 = vsel %vm13294_vm15, %v13244_v61, %v5833_v29  ;;  %v5897_v37 = vor.u32 1.1754944e-38, %v5896_v21 }
 0xa22   : > { %v5878_v46 = vsel %vm13404_vm9, %v13198_v52, %v5874_v62  ;;  %v13420_v40 = vpop.eup %7424  ;;  %v5911_v26 = vand.u32 2147483648, %v13133_v35  ;;  %v13446_v57 = vsel %vm13301_vm2, %v13266_v43, %v5848_v58  ;;  %v5893_v61 = vsel %vm13436_vm10, %v13219_v11, %v5889_v24 }
 0xa23   : > { %v13441_v36 = vpop.eup %7426  ;;  %v5902_v38 = vsub.f32 1.0, %v5901_v50  ;;  %v5946_v7 = vmul.f32 %v13387_v42, %v13145_v5  ;;  %v13456_v28 = vsel %vm13319_vm11, %v13272_v31, %v5863_v41  ;;  %v13460_v18 = vsel %vm13364_vm7, %v5882_v39, %v5878_v46 }
 0xa24   : > { %v5909_v43 = vand.u32 2147483647, %v13133_v35  ;;  %v5926_v17 = vand.u32 2147483648, %v13136_v0  ;;  %vm5905_vm14 = vweird.f32 %v13133_v35  ;;  %v5917_v11 = vsub.f32 1.0, %v5916_v44 }
 0xa25   : > { %v5932_v50 = vsub.f32 1.0, %v5931_v25  ;;  %v5941_v15 = vand.u32 2147483648, %v13142_v10  ;;  %v5961_v6 = vmul.f32 %v13420_v40, %v13148_v63  ;;  %v13470_v31 = vsel %vm13408_vm5, %v5897_v37, %v5893_v61 }
 0xa26   : > { %v13472_v2 = vor.u32 1.1754944e-38, %v5911_v26  ;;  %vm5920_vm11 = vweird.f32 %v13136_v0  ;;  %v5924_v62 = vand.u32 2147483647, %v13136_v0  ;;  %v5976_v47 = vmul.f32 %v13441_v36, %v13154_v19 }
 0xa27   : > { %v13478_v34 = vpop.eup %7428  ;;  %v5903_v39 = vmul.f32 %v13324_v54, %v5902_v38  ;;  %vm5935_vm15 = vweird.f32 %v13142_v10  ;;  %v5939_v21 = vand.u32 2147483647, %v13142_v10  ;;  %v5947_v49 = vsub.f32 1.0, %v5946_v7 }
 0xa28   : > { %7430 = vrcp.f32 %v13160_v55  ;;  %vm5906_vm2 = vweird.f32 %v13324_v54  ;;  %v13485_v29 = vor.u32 1.1754944e-38, %v5926_v17  ;;  %v5954_v1 = vand.u32 2147483647, %v13145_v5 }
 0xa29   : > { %v5956_v24 = vand.u32 2147483648, %v13145_v5  ;;  %v5918_v58 = vmul.f32 %v13338_v59, %v5917_v11  ;;  %v5933_v41 = vmul.f32 %v13354_v20, %v5932_v50  ;;  %v5942_v53 = vor.u32 1.1754944e-38, %v5941_v15  ;;  %vm13530_vm8 = vmor %vm5905_vm14, %vm5906_vm2 }
 0xa2a   : > { %vm5950_vm3 = vweird.f32 %v13145_v5  ;;  %v5962_v14 = vsub.f32 1.0, %v5961_v6  ;;  %vm13492_vm12 = vcmp.eq.f32.partialorder %v5909_v43, 8.507059e+37  ;;  %v5969_v44 = vand.u32 2147483647, %v13148_v63 }
 0xa2b   : > { %v5971_v25 = vand.u32 2147483648, %v13148_v63  ;;  %v5977_v52 = vsub.f32 1.0, %v5976_v47  ;;  %v5991_v37 = vmul.f32 %v13478_v34, %v13157_v45  ;;  %v5904_v26 = vadd.f32 %v13324_v54, %v5903_v39 }
 0xa2c   : > { %vm13501_vm6 = vcmp.eq.f32.partialorder %v5924_v62, 8.507059e+37  ;;  %vm13505_vm13 = vcmp.eq.f32.partialorder %v5939_v21, 8.507059e+37  ;;  %v5948_v7 = vmul.f32 %v13387_v42, %v5947_v49  ;;  %vm5965_vm4 = vweird.f32 %v13148_v63 }
 0xa2d   : > { %v5986_v43 = vand.u32 2147483648, %v13154_v19  ;;  %7432 = vrcp.f32 %v13165_v33  ;;  %vm5921_vm7 = vweird.f32 %v13338_v59  ;;  %v5957_v17 = vor.u32 1.1754944e-38, %v5956_v24 }
 0xa2e   : > { %v5984_v11 = vand.u32 2147483647, %v13154_v19  ;;  %7434 = vrcp.f32 %v13168_v27  ;;  %v13516_v50 = vpop.eup %7430  ;;  %v5919_v15 = vadd.f32 %v13338_v59, %v5918_v58  ;;  %v5934_v6 = vadd.f32 %v13354_v20, %v5933_v41  ;;  %vm13543_vm5 = vmor %vm5920_vm11, %vm5921_vm7 }
 0xa2f   : > { %vm5936_vm1 = vweird.f32 %v13354_v20  ;;  %vm13521_vm0 = vcmp.eq.f32.partialorder %v5954_v1, 8.507059e+37  ;;  %v5963_v47 = vmul.f32 %v13420_v40, %v5962_v14  ;;  %v5972_v21 = vor.u32 1.1754944e-38, %v5971_v25 }
 0xa30   : > { %v5978_v49 = vmul.f32 %v13441_v36, %v5977_v52  ;;  %vm5980_vm9 = vweird.f32 %v13154_v19  ;;  %v5992_v24 = vsub.f32 1.0, %v5991_v37  ;;  %v5908_v1 = vsel %vm13530_vm8, %v13324_v54, %v5904_v26  ;;  %vm13555_vm2 = vmor %vm5935_vm15, %vm5936_vm1 }
 0xa31   : > { %v5949_v58 = vadd.f32 %v13387_v42, %v5948_v7  ;;  %vm5951_vm10 = vweird.f32 %v13387_v42  ;;  %vm13549_vm14 = vcmp.eq.f32.partialorder %v5969_v44, 8.507059e+37  ;;  %v5987_v14 = vor.u32 1.1754944e-38, %v5986_v43 }
 0xa32   : > { %vm5966_vm11 = vweird.f32 %v13420_v40  ;;  %vm13560_vm7 = vcmp.eq.f32.partialorder %v5984_v11, 8.507059e+37  ;;  %v5999_v25 = vand.u32 2147483647, %v13157_v45  ;;  %v6006_v44 = vmul.f32 %v13516_v50, %v13160_v55  ;;  %vm13584_vm15 = vmor %vm5950_vm3, %vm5951_vm10 }
 0xa33   : > { %7436 = vrcp.f32 %v13175_v51  ;;  %v13568_v52 = vpop.eup %7432  ;;  %v5923_v10 = vsel %vm13543_vm5, %v13338_v59, %v5919_v15  ;;  %v5938_v37 = vsel %vm13555_vm2, %v13354_v20, %v5934_v6  ;;  %v5964_v26 = vadd.f32 %v13420_v40, %v5963_v47 }
 0xa34   : > { %7438 = vrcp.f32 %v13178_v13  ;;  %v13578_v7 = vpop.eup %7434  ;;  %v5979_v59 = vadd.f32 %v13441_v36, %v5978_v49  ;;  %vm5981_vm1 = vweird.f32 %v13441_v36  ;;  %v5993_v20 = vmul.f32 %v13478_v34, %v5992_v24 }
 0xa35   : > { %7440 = vrcp.f32 %v13181_v4  ;;  %v13595_v11 = vsel %vm13492_vm12, %v13472_v2, %v5908_v1  ;;  %v5953_v5 = vsel %vm13584_vm15, %v13387_v42, %v5949_v58  ;;  %vm5995_vm3 = vweird.f32 %v13157_v45  ;;  %vm13615_vm12 = vmor %vm5965_vm4, %vm5966_vm11 }
 0xa36   : > { %v6001_v15 = vand.u32 2147483648, %v13157_v45  ;;  %v13605_v6 = vsel %vm13501_vm6, %v13485_v29, %v5923_v10  ;;  %v13609_v47 = vsel %vm13505_vm13, %v5942_v53, %v5938_v37  ;;  %vm13619_vm8 = vcmp.eq.f32.partialorder %v5999_v25, 8.507059e+37  ;;  %vm13628_vm6 = vmor %vm5980_vm9, %vm5981_vm1 }
 0xa37   : > { %v6007_v46 = vsub.f32 1.0, %v6006_v44  ;;  %v5968_v29 = vsel %vm13615_vm12, %v13420_v40, %v5964_v26  ;;  %vm5996_vm13 = vweird.f32 %v13478_v34  ;;  %v6021_v63 = vmul.f32 %v13568_v52, %v13165_v33 }
 0xa38   : > { %v6036_v61 = vmul.f32 %v13578_v7, %v13168_v27  ;;  %v13641_v39 = vsel %vm13521_vm0, %v5957_v17, %v5953_v5  ;;  %v5983_v19 = vsel %vm13628_vm6, %v13441_v36, %v5979_v59  ;;  %v5994_v40 = vadd.f32 %v13478_v34, %v5993_v20  ;;  %vm13670_vm0 = vmor %vm5995_vm3, %vm5996_vm13 }
 0xa39   : > { %v13637_v38 = vpop.eup %7436  ;;  %v6014_v49 = vand.u32 2147483647, %v13160_v55  ;;  %v6002_v1 = vor.u32 1.1754944e-38, %v6001_v15  ;;  %vm6010_vm4 = vweird.f32 %v13160_v55  ;;  %v6016_v35 = vand.u32 2147483648, %v13160_v55 }
 0xa3a   : > { %v13648_v24 = vpop.eup %7438  ;;  %v6029_v58 = vand.u32 2147483647, %v13165_v33  ;;  %v13657_v17 = vsel %vm13549_vm14, %v5972_v21, %v5968_v29  ;;  %v6008_v36 = vmul.f32 %v13516_v50, %v6007_v46  ;;  %v6031_v54 = vand.u32 2147483648, %v13165_v33 }
 0xa3b   : > { %v13653_v62 = vpop.eup %7440  ;;  %7442 = vrcp.f32 %v13186_v3  ;;  %v13664_v25 = vsel %vm13560_vm7, %v5987_v14, %v5983_v19  ;;  %v6022_v21 = vsub.f32 1.0, %v6021_v63  ;;  %v6037_v41 = vsub.f32 1.0, %v6036_v61 }
 0xa3c   : > { %v6051_v10 = vmul.f32 %v13637_v38, %v13175_v51  ;;  %v5998_v37 = vsel %vm13670_vm0, %v13478_v34, %v5994_v40  ;;  %vm13679_vm9 = vcmp.eq.f32.partialorder %v6014_v49, 8.507059e+37  ;;  %vm6025_vm5 = vweird.f32 %v13165_v33 }
 0xa3d   : > { %v6046_v45 = vand.u32 2147483648, %v13168_v27  ;;  %v6066_v0 = vmul.f32 %v13648_v24, %v13178_v13  ;;  %7444 = vrcp.f32 %v13193_v48  ;;  %vm6011_vm10 = vweird.f32 %v13516_v50 }
 0xa3e   : > { %v6017_v26 = vor.u32 1.1754944e-38, %v6016_v35  ;;  %v6044_v43 = vand.u32 2147483647, %v13168_v27  ;;  %v6081_v34 = vmul.f32 %v13653_v62, %v13181_v4  ;;  %v6009_v59 = vadd.f32 %v13516_v50, %v6008_v36  ;;  %vm13711_vm2 = vmor %vm6010_vm4, %vm6011_vm10 }
 0xa3f   : > { %v13693_v20 = vor.u32 1.1754944e-38, %v6031_v54  ;;  %vm6040_vm14 = vweird.f32 %v13168_v27  ;;  %v6061_v5 = vand.u32 2147483648, %v13175_v51  ;;  %v13699_v15 = vsel %vm13619_vm8, %v6002_v1, %v5998_v37 }
 0xa40   : > { %v6023_v2 = vmul.f32 %v13568_v52, %v6022_v21  ;;  %v6038_v46 = vmul.f32 %v13578_v7, %v6037_v41  ;;  %v6052_v29 = vsub.f32 1.0, %v6051_v10  ;;  %v6047_v63 = vor.u32 1.1754944e-38, %v6046_v45 }
 0xa41   : > { %v13703_v53 = vpop.eup %7442  ;;  %v6067_v61 = vsub.f32 1.0, %v6066_v0  ;;  %v6076_v19 = vand.u32 2147483648, %v13178_v13  ;;  %7446 = vrcp.f32 %v13201_v16  ;;  %vm6026_vm11 = vweird.f32 %v13568_v52 }
 0xa42   : > { %vm13716_vm7 = vcmp.eq.f32.partialorder %v6029_v58, 8.507059e+37  ;;  %vm13720_vm15 = vcmp.eq.f32.partialorder %v6044_v43, 8.507059e+37  ;;  %vm6055_vm1 = vweird.f32 %v13175_v51  ;;  %v6059_v1 = vand.u32 2147483647, %v13175_v51  ;;  %vm13751_vm8 = vmor %vm6025_vm5, %vm6026_vm11 }
 0xa43   : > { %v6074_v55 = vand.u32 2147483647, %v13178_v13  ;;  %v6082_v35 = vsub.f32 1.0, %v6081_v34  ;;  %v13727_v36 = vpop.eup %7444  ;;  %v6013_v58 = vsel %vm13711_vm2, %v13516_v50, %v6009_v59  ;;  %vm6041_vm3 = vweird.f32 %v13578_v7 }
 0xa44   : > { %v6062_v54 = vor.u32 1.1754944e-38, %v6061_v5  ;;  %vm6070_vm12 = vweird.f32 %v13178_v13  ;;  %7448 = vrcp.f32 %v13204_v12  ;;  %v6024_v44 = vadd.f32 %v13568_v52, %v6023_v2  ;;  %vm13769_vm4 = vmor %vm6040_vm14, %vm6041_vm3 }
 0xa45   : > { %v6039_v21 = vadd.f32 %v13578_v7, %v6038_v46  ;;  %v6053_v41 = vmul.f32 %v13637_v38, %v6052_v29  ;;  %v6096_v10 = vmul.f32 %v13703_v53, %v13186_v3  ;;  %v6068_v37 = vmul.f32 %v13648_v24, %v6067_v61 }
 0xa46   : > { %v6077_v45 = vor.u32 1.1754944e-38, %v6076_v19  ;;  %v6089_v50 = vand.u32 2147483647, %v13181_v4  ;;  %7450 = vrcp.f32 %v13212_v9  ;;  %v13745_v0 = vsel %vm13679_vm9, %v6017_v26, %v6013_v58 }
 0xa47   : > { %vm13755_vm6 = vcmp.eq.f32.partialorder %v6059_v1, 8.507059e+37  ;;  %v6083_v59 = vmul.f32 %v13653_v62, %v6082_v35  ;;  %vm6085_vm13 = vweird.f32 %v13181_v4  ;;  %v6111_v14 = vmul.f32 %v13727_v36, %v13193_v48  ;;  %v13763_v26 = vpop.eup %7446 }
 0xa48   : > { %vm6056_vm0 = vweird.f32 %v13637_v38  ;;  %vm13774_vm9 = vcmp.eq.f32.partialorder %v6074_v55, 8.507059e+37  ;;  %v6091_v2 = vand.u32 2147483648, %v13181_v4  ;;  %v6104_v46 = vand.u32 2147483647, %v13186_v3 }
 0xa49   : > { %7452 = vrcp.f32 %v13222_v22  ;;  %v6028_v27 = vsel %vm13751_vm8, %v13568_v52, %v6024_v44  ;;  %v6043_v29 = vsel %vm13769_vm4, %v13578_v7, %v6039_v21  ;;  %v6054_v61 = vadd.f32 %v13637_v38, %v6053_v41  ;;  %vm13817_vm11 = vmor %vm6055_vm1, %vm6056_vm0 }
 0xa4a   : > { %v6097_v19 = vsub.f32 1.0, %v6096_v10  ;;  %v13788_v42 = vpop.eup %7448  ;;  %v6069_v1 = vadd.f32 %v13648_v24, %v6068_v37  ;;  %vm6071_vm5 = vweird.f32 %v13648_v24  ;;  %vm6086_vm10 = vweird.f32 %v13653_v62 }
 0xa4b   : > { %vm13793_vm14 = vcmp.eq.f32.partialorder %v6089_v50, 8.507059e+37  ;;  %v6084_v52 = vadd.f32 %v13653_v62, %v6083_v59  ;;  %vm6100_vm2 = vweird.f32 %v13186_v3  ;;  %v6112_v7 = vsub.f32 1.0, %v6111_v14 }
 0xa4c   : > { %v6126_v35 = vmul.f32 %v13763_v26, %v13201_v16  ;;  %7454 = vrcp.f32 %v13233_v8  ;;  %v13802_v58 = vpop.eup %7450  ;;  %v13807_v44 = vsel %vm13716_vm7, %v13693_v20, %v6028_v27  ;;  %v13811_v21 = vsel %vm13720_vm15, %v6047_v63, %v6043_v29  ;;  %vm13829_vm7 = vmor %vm6070_vm12, %vm6071_vm5 }
 0xa4d   : > { %v6092_v10 = vor.u32 1.1754944e-38, %v6091_v2  ;;  %v6106_v37 = vand.u32 2147483648, %v13186_v3  ;;  %v6058_v20 = vsel %vm13817_vm11, %v13637_v38, %v6054_v61  ;;  %v6098_v51 = vmul.f32 %v13703_v53, %v6097_v19  ;;  %vm13846_vm15 = vmor %vm6085_vm13, %vm6086_vm10 }
 0xa4e   : > { %v6119_v40 = vand.u32 2147483647, %v13193_v48  ;;  %v6141_v49 = vmul.f32 %v13788_v42, %v13204_v12  ;;  %v6073_v38 = vsel %vm13829_vm7, %v13648_v24, %v6069_v1  ;;  %vm6115_vm1 = vweird.f32 %v13193_v48 }
 0xa4f   : > { %v13837_v50 = vpop.eup %7452  ;;  %v6121_v43 = vand.u32 2147483648, %v13193_v48  ;;  %v6136_v59 = vand.u32 2147483648, %v13201_v16  ;;  %v6088_v14 = vsel %vm13846_vm15, %v13653_v62, %v6084_v52  ;;  %vm13856_vm3 = vcmp.eq.f32.partialorder %v6104_v46, 8.507059e+37 }
 0xa50   : > { %v6113_v4 = vmul.f32 %v13727_v36, %v6112_v7  ;;  %v6127_v33 = vsub.f32 1.0, %v6126_v35  ;;  %v6156_v2 = vmul.f32 %v13802_v58, %v13212_v9  ;;  %v13865_v27 = vsel %vm13755_vm6, %v6062_v54, %v6058_v20 }
 0xa51   : > { %vm6101_vm12 = vweird.f32 %v13703_v53  ;;  %v6107_v29 = vor.u32 1.1754944e-38, %v6106_v37  ;;  %v6134_v61 = vand.u32 2147483647, %v13201_v16  ;;  %v13873_v46 = vsel %vm13774_vm9, %v6077_v45, %v6073_v38 }
 0xa52   : > { %v13869_v62 = vpop.eup %7454  ;;  %v6099_v19 = vadd.f32 %v13703_v53, %v6098_v51  ;;  %vm13876_vm8 = vcmp.eq.f32.partialorder %v6119_v40, 8.507059e+37  ;;  %vm6130_vm6 = vweird.f32 %v13201_v16  ;;  %v6142_v54 = vsub.f32 1.0, %v6141_v49  ;;  %vm13895_vm4 = vmor %vm6100_vm2, %vm6101_vm12 }
 0xa53   : > { %v6171_v34 = vmul.f32 %v13837_v50, %v13222_v22  ;;  %v13885_v52 = vsel %vm13793_vm14, %v6092_v10, %v6088_v14  ;;  %vm6116_vm13 = vweird.f32 %v13727_v36  ;;  %v6122_v45 = vor.u32 1.1754944e-38, %v6121_v43 }
 0xa54   : > { %v6137_v5 = vor.u32 1.1754944e-38, %v6136_v59  ;;  %v6114_v7 = vadd.f32 %v13727_v36, %v6113_v4  ;;  %v6128_v35 = vmul.f32 %v13763_v26, %v6127_v33  ;;  %v6157_v41 = vsub.f32 1.0, %v6156_v2  ;;  %vm13917_vm5 = vmor %vm6115_vm1, %vm6116_vm13 }
 0xa55   : > { %7456 = vrcp.f32 %v13241_v30  ;;  %vm6145_vm0 = vweird.f32 %v13204_v12  ;;  %v6149_v55 = vand.u32 2147483647, %v13204_v12  ;;  %v6151_v10 = vand.u32 2147483648, %v13204_v12 }
 0xa56   : > { %v6186_v20 = vmul.f32 %v13869_v62, %v13233_v8  ;;  %v6103_v63 = vsel %vm13895_vm4, %v13703_v53, %v6099_v19  ;;  %vm13907_vm9 = vcmp.eq.f32.partialorder %v6134_v61, 8.507059e+37  ;;  %v6143_v3 = vmul.f32 %v13788_v42, %v6142_v54 }
 0xa57   : > { %v6164_v40 = vand.u32 2147483647, %v13212_v9  ;;  %v6172_v49 = vsub.f32 1.0, %v6171_v34  ;;  %vm6131_vm10 = vweird.f32 %v13763_v26  ;;  %vm6160_vm14 = vweird.f32 %v13212_v9 }
 0xa58   : > { %v6166_v53 = vand.u32 2147483648, %v13212_v9  ;;  %v6181_v13 = vand.u32 2147483648, %v13222_v22  ;;  %v6118_v43 = vsel %vm13917_vm5, %v13727_v36, %v6114_v7  ;;  %v6129_v59 = vadd.f32 %v13763_v26, %v6128_v35  ;;  %vm13957_vm1 = vmor %vm6130_vm6, %vm6131_vm10  ;;  %v16621_v9 = vld [vmem:[#allocation74_spill] sm:$0xff] }
 0xa59   : > { %v6158_v48 = vmul.f32 %v13802_v58, %v6157_v41  ;;  %v6179_v14 = vand.u32 2147483647, %v13222_v22  ;;  %v13933_v4 = vsel %vm13856_vm3, %v6107_v29, %v6103_v63  ;;  %vm13935_vm2 = vcmp.eq.f32.partialorder %v6149_v55, 8.507059e+37  ;;  %v16573_v55 = vld [vmem:[#allocation56_spill] sm:$0xff]  ;;  %v16576_v63 = vld [vmem:[#allocation22_spill] sm:$0xff] }
 0xa5a   : > { %v6152_v2 = vor.u32 1.1754944e-38, %v6151_v10  ;;  %v6187_v61 = vsub.f32 1.0, %v6186_v20  ;;  %v6144_v36 = vadd.f32 %v13788_v42, %v6143_v3  ;;  %vm6146_vm11 = vweird.f32 %v13788_v42  ;;  %v16577_v3 = vld [vmem:[#allocation3_spill] sm:$0xff] }
 0xa5b   : > { %v13939_v19 = vpop.eup %7456  ;;  %vm13943_vm7 = vcmp.eq.f32.partialorder %v6164_v40, 8.507059e+37  ;;  %v6173_v24 = vmul.f32 %v13837_v50, %v6172_v49  ;;  %vm6175_vm15 = vweird.f32 %v13222_v22  ;;  %v13951_v29 = vsel %vm13876_vm8, %v6122_v45, %v6118_v43  ;;  %vm13978_vm13 = vmor %vm6145_vm0, %vm6146_vm11  ;;  %v16578_v40 = vld [vmem:[#allocation103_spill] sm:$0xff]  ;;  %v16609_v45 = vld [vmem:[#allocation113_spill] sm:$0xff] }
 0xa5c   : > { %vm6161_vm3 = vweird.f32 %v13802_v58  ;;  %v6167_v7 = vor.u32 1.1754944e-38, %v6166_v53  ;;  %v6182_v35 = vor.u32 1.1754944e-38, %v6181_v13  ;;  %v6133_v41 = vsel %vm13957_vm1, %v13763_v26, %v6129_v59  ;;  %v16579_v53 = vld [vmem:[#allocation91_spill] sm:$0xff]  ;;  %v16594_v26 = vld [vmem:[#allocation49_spill] sm:$0xff] }
 0xa5d   : > { %v6159_v1 = vadd.f32 %v13802_v58, %v6158_v48  ;;  %vm13966_vm12 = vcmp.eq.f32.partialorder %v6179_v14, 8.507059e+37  ;;  %v6194_v16 = vand.u32 2147483647, %v13233_v8  ;;  %v6196_v37 = vand.u32 2147483648, %v13233_v8  ;;  %v16580_v13 = vld [vmem:[#allocation107_spill] sm:$0xff]  ;;  %vm14004_vm11 = vmor %vm6160_vm14, %vm6161_vm3  ;;  %v16585_v14 = vld [vmem:[#allocation94_spill] sm:$0xff] }
 0xa5e   : > { %vm5731_vm8 = vcmp.ge.f32.partialorder %v12646_v56, 0.0  ;;  %vm5732_vm6 = vcmp.ge.f32.partialorder %v16573_v55, 0.0  ;;  %vm6176_vm4 = vweird.f32 %v13837_v50  ;;  %v6188_v10 = vmul.f32 %v13869_v62, %v6187_v61  ;;  %v16584_v48 = vld [vmem:[#allocation51_spill] sm:$0xff]  ;;  %v16588_v61 = vld [vmem:[#allocation10_spill] sm:$0xff] }
 0xa5f   : > { %v6201_v20 = vmul.f32 %v13939_v19, %v13241_v30  ;;  %7458 = vrcp.f32 %v16576_v63  ;;  %vm5733_vm5 = vcmp.ge.f32.partialorder %v16577_v3, 0.0  ;;  %vm5734_vm10 = vcmp.ge.f32.partialorder %v16578_v40, 0.0  ;;  %vm14031_vm3 = vmor %vm6175_vm15, %vm6176_vm4 }
 0xa60   : > { %v6148_v12 = vsel %vm13978_vm13, %v13788_v42, %v6144_v36  ;;  %v6174_v49 = vadd.f32 %v13837_v50, %v6173_v24  ;;  %v6211_v38 = vand.u32 2147483648, %v13241_v30  ;;  %7460 = vrcp.f32 %v16579_v53  ;;  %v16589_v36 = vld [vmem:[#allocation116_spill] sm:$0xff] }
 0xa61   : > { %v13998_v43 = vsel %vm13907_vm9, %v6137_v5, %v6133_v41  ;;  %vm6190_vm1 = vweird.f32 %v13233_v8  ;;  %7462 = vrcp.f32 %v16584_v48  ;;  %vm5736_vm13 = vcmp.ge.f32.partialorder %v16585_v14, 0.0 }
 0xa62   : > { %16581 = vst [vmem:[#allocation21_spill] sm:$0xff] %v13998_v43  ;;  %v6163_v5 = vsel %vm14004_vm11, %v13802_v58, %v6159_v1  ;;  %vm6191_vm9 = vweird.f32 %v13869_v62  ;;  %vm14016_vm0 = vcmp.eq.f32.partialorder %v6194_v16, 8.507059e+37  ;;  %v6226_v51 = vand.u32 2147483648, %v16576_v63  ;;  %v16593_v16 = vld [vmem:[#allocation118_spill] sm:$0xff]  ;;  %v16600_v58 = vld [vmem:[#allocation16_spill] sm:$0xff] }
 0xa63   : > { %7464 = vrcp.f32 %v16588_v61  ;;  %vm5737_vm14 = vcmp.ge.f32.partialorder %v16589_v36, 0.0  ;;  %v14025_v24 = vsel %vm13935_vm2, %v6152_v2, %v6148_v12  ;;  %v6189_v34 = vadd.f32 %v13869_v62, %v6188_v10  ;;  %v16595_v12 = vld [vmem:[#allocation97_spill] sm:$0xff]  ;;  %v16608_v43 = vld [vmem:[#allocation34_spill] sm:$0xff] }
 0xa64   : > { %16590 = vst [vmem:[#allocation120_spill] sm:$0xff] %v14025_v24  ;;  %v6197_v41 = vor.u32 1.1754944e-38, %v6196_v37  ;;  %v6202_v1 = vsub.f32 1.0, %v6201_v20  ;;  %vm5738_vm11 = vcmp.ge.f32.partialorder %v16593_v16, 0.0  ;;  %v6178_v33 = vsel %vm14031_vm3, %v13837_v50, %v6174_v49  ;;  %v16596_v24 = vld [vmem:[#allocation11_spill] sm:$0xff]  ;;  %v16598_v50 = vld [vmem:[#allocation28_spill] sm:$0xff] }
 0xa65   : > { %v14040_v2 = vor.u32 1.1754944e-38, %v6211_v38  ;;  %v6275_v22 = vmul.f32 %v16594_v26, %v13392_v32  ;;  %v6276_v59 = vmul.f32 %v16595_v12, %v13425_v23  ;;  %v14046_v42 = vpop.eup %7458  ;;  %vm5739_vm2 = vcmp.ge.f32.partialorder %v16596_v24, 0.0  ;;  %v16599_v20 = vld [vmem:[#allocation31_spill] sm:$0xff]  ;;  %v16604_v12 = vld [vmem:[#allocation122_spill] sm:$0xff] }
 0xa66   : > { %v14051_v37 = vsel %vm13943_vm7, %v6167_v7, %v6163_v5  ;;  %vm6206_vm15 = vweird.f32 %v13939_v19  ;;  %v6277_v10 = vmul.f32 %v16598_v50, %v13430_v60  ;;  %v6278_v49 = vmul.f32 %v16599_v20, %v13446_v57  ;;  %v14058_v38 = vpop.eup %7460  ;;  %vm14072_vm7 = vmor %vm6190_vm1, %vm6191_vm9  ;;  %v16607_v26 = vld [vmem:[#allocation79_spill] sm:$0xff]  ;;  %v16626_v36 = vld [vmem:[#allocation114_spill] sm:$0xff] }
 0xa67   : > { %16597 = vst [vmem:[#allocation40_spill] sm:$0xff] %v14051_v37  ;;  %vm5740_vm4 = vcmp.ge.f32.partialorder %v16600_v58, 0.0  ;;  %v14077_v5 = vor.u32 1.1754944e-38, %v6226_v51  ;;  %v6279_v50 = vmul.f32 %v16604_v12, %v13456_v28  ;;  %v14082_v20 = vpop.eup %7462  ;;  %v16605_v37 = vld [vmem:[#allocation35_spill] sm:$0xff]  ;;  %v14087_v8 = vsel %vm13966_vm12, %v6182_v35, %v6178_v33 }
 0xa68   : > { %vm5741_vm3 = vcmp.ge.f32.partialorder %v16605_v37, 0.0  ;;  %16606 = vst [vmem:[#allocation82_spill] sm:$0xff] %v14087_v8  ;;  %v6193_v7 = vsel %vm14072_vm7, %v13869_v62, %v6189_v34  ;;  %v6203_v51 = vmul.f32 %v13939_v19, %v6202_v1  ;;  %vm6205_vm1 = vweird.f32 %v13241_v30  ;;  %v16610_v1 = vld [vmem:[#allocation2_spill] sm:$0xff] }
 0xa69   : > { %16603 = vst [vmem:[#allocation61_spill] sm:$0xff] %v14077_v5  ;;  %v6280_v12 = vmul.f32 %v16607_v26, %v13460_v18  ;;  %v14096_v5 = vpop.eup %7464  ;;  %vm5742_vm9 = vcmp.ge.f32.partialorder %v16608_v43, 0.0  ;;  %v6216_v35 = vmul.f32 %v14046_v42, %v16576_v63  ;;  %v6281_v33 = vmul.f32 %v16609_v45, %v13470_v31  ;;  %v16611_v26 = vld [vmem:[#allocation69_spill] sm:$0xff] }
 0xa6a   : > { %v6307_v62 = vsel %vm5731_vm8, %v13392_v32, %v6275_v22  ;;  %v6308_v34 = vsel %vm5732_vm6, %v13425_v23, %v6276_v59  ;;  %vm5743_vm12 = vcmp.ge.f32.partialorder %v16610_v1, 0.0  ;;  %v6231_v54 = vmul.f32 %v14058_v38, %v16579_v53  ;;  %v16613_v32 = vld [vmem:[#allocation33_spill] sm:$0xff]  ;;  %v16614_v22 = vld [vmem:[#allocation42_spill] sm:$0xff] }
 0xa6b   : > { %v6282_v8 = vmul.f32 %v16611_v26, %v13595_v11  ;;  %v6309_v45 = vsel %vm5733_vm5, %v13430_v60, %v6277_v10  ;;  %v6310_v56 = vsel %vm5734_vm10, %v13446_v57, %v6278_v49  ;;  %vm16612_vm8 = vcmask 64512   ;;  %v16617_v57 = vld [vmem:[#allocation77_spill] sm:$0xff] }
 0xa6c   : > { %6339 = vst.msk [vmem:[%s14065_s28] sm:$0xff] %vm16612_vm8, %v6307_v62  ;;  %vm5744_vm6 = vcmp.ge.f32.partialorder %v16613_v32, 0.0  ;;  %v6241_v23 = vand.u32 2147483648, %v16579_v53  ;;  %v6246_v55 = vmul.f32 %v14082_v20, %v16584_v48  ;;  %v6283_v59 = vmul.f32 %v16614_v22, %v13605_v6  ;;  %vm16616_vm7 = vmmov %vm16612_vm8  ;;  %v16618_v10 = vld [vmem:[#allocation37_spill] sm:$0xff]  ;;  %v16623_v62 = vld [vmem:[#allocation83_spill] sm:$0xff] }
 0xa6d   : > { %vm16615_vm5 = vcmp.ge.f32.partialorder %v16580_v13, 0.0  ;;  %6340 = vst.msk [vmem:[%s14065_s28 + $0x8] sm:$0xff] %vm16616_vm7, %v6308_v34  ;;  %v14136_v3 = vsel %vm14016_vm0, %v6197_v41, %v6193_v7  ;;  %v6261_v40 = vmul.f32 %v14096_v5, %v16588_v61  ;;  %v6284_v49 = vmul.f32 %v16618_v10, %v13609_v47  ;;  %vm16619_vm8 = vmmov %vm16616_vm7  ;;  %v16654_v1 = vld [vmem:[#allocation17_spill] sm:$0xff]  ;;  %v16658_v32 = vld [vmem:[#allocation60_spill] sm:$0xff] }
 0xa6e   : > { %v6311_v60 = vsel %vm16615_vm5, %v13456_v28, %v6279_v50  ;;  %v6312_v13 = vsel %vm5736_vm13, %v13460_v18, %v6280_v12  ;;  %6341 = vst.msk [vmem:[%s14065_s28 + $0x10] sm:$0xff] %vm16619_vm8, %v6309_v45  ;;  %v16620_v28 = vld [vmem:[#allocation41_spill] sm:$0xff]  ;;  %v6217_v50 = vsub.f32 1.0, %v6216_v35  ;;  %vm6221_vm7 = vweird.f32 %v14046_v42  ;;  %vm16622_vm0 = vmmov %vm16619_vm8  ;;  %v16624_v12 = vld [vmem:[#allocation84_spill] sm:$0xff] }
 0xa6f   : > { %vm5746_vm5 = vcmp.ge.f32.partialorder %v16620_v28, 0.0  ;;  %v6285_v41 = vmul.f32 %v16621_v9, %v13641_v39  ;;  %v6313_v7 = vsel %vm5737_vm14, %v13470_v31, %v6281_v33  ;;  %6342 = vst.msk [vmem:[%s14065_s28 + $0x18] sm:$0xff] %vm16622_vm0, %v6310_v56  ;;  %vm5747_vm10 = vcmp.ge.f32.partialorder %v16623_v62, 0.0  ;;  %vm16625_vm13 = vmmov %vm16622_vm0 }
 0xa70   : > { %v14158_v18 = vadd.f32 %v13939_v19, %v6203_v51  ;;  %v6232_v14 = vsub.f32 1.0, %v6231_v54  ;;  %v6286_v35 = vmul.f32 %v16624_v12, %v13657_v17  ;;  %v6314_v34 = vsel %vm5738_vm11, %v13595_v11, %v6282_v8  ;;  %6343 = vst.msk [vmem:[%s14065_s28 + $0x20] sm:$0xff] %vm16625_vm13, %v6311_v60  ;;  %v16627_v51 = vld [vmem:[#allocation63_spill] sm:$0xff]  ;;  %v16628_v11 = vld [vmem:[#allocation93_spill] sm:$0xff]  ;;  %vm14199_vm11 = vmor %vm6205_vm1, %vm6206_vm15 }
 0xa71   : > { %vm6220_vm8 = vweird.f32 %v16576_v63  ;;  %v14169_v31 = vor.u32 1.1754944e-38, %v6241_v23  ;;  %v6247_v33 = vsub.f32 1.0, %v6246_v55  ;;  %v6287_v54 = vmul.f32 %v16627_v51, %v13664_v25  ;;  %6344 = vst.msk [vmem:[%s14065_s28 + $0x28] sm:$0xff] %vm16622_vm0, %v6312_v13  ;;  %v16632_v23 = vld [vmem:[#allocation89_spill] sm:$0xff]  ;;  %v16634_v55 = vld [vmem:[#allocation92_spill] sm:$0xff]  ;;  %v16640_v13 = vld [vmem:[#allocation102_spill] sm:$0xff] }
 0xa72   : > { %v6315_v26 = vsel %vm5739_vm2, %v13605_v6, %v6283_v59  ;;  %v16629_v16 = vand.u32 2147483647, %v13241_v30  ;;  %v6254_v45 = vand.u32 2147483647, %v16584_v48  ;;  %v6262_v56 = vsub.f32 1.0, %v6261_v40  ;;  %vm16633_vm2 = vmmov %vm16622_vm0  ;;  %v16639_v30 = vld [vmem:[#allocation106_spill] sm:$0xff] }
 0xa73   : > { %v6288_v24 = vmul.f32 %v16632_v23, %v13699_v15  ;;  %v6316_v6 = vsel %vm5740_vm4, %v13609_v47, %v6284_v49  ;;  %6345 = vst.msk [vmem:[%s14065_s28 + $0x30] sm:$0xff] %vm16633_vm2, %v6313_v7  ;;  %vm5750_vm0 = vcmp.ge.f32.partialorder %v16634_v55, 0.0  ;;  %v6218_v59 = vmul.f32 %v14046_v42, %v6217_v50  ;;  %v16637_v47 = vld [vmem:[#allocation43_spill] sm:$0xff]  ;;  %vm16638_vm4 = vmmov %vm16633_vm2  ;;  %v16679_v8 = vld [vmem:[#allocation101_spill] sm:$0xff] }
 0xa74   : > { %vm14181_vm13 = vcmp.eq.f32.partialorder %v16629_v16, 8.507059e+37  ;;  %vm6250_vm14 = vweird.f32 %v16584_v48  ;;  %v6256_v58 = vand.u32 2147483648, %v16584_v48  ;;  %v6289_v60 = vmul.f32 %v16637_v47, %v13745_v0  ;;  %6346 = vst.msk [vmem:[%s14065_s28 + $0x38] sm:$0xff] %vm16638_vm4, %v6314_v34  ;;  %v16646_v7 = vld [vmem:[#allocation59_spill] sm:$0xff]  ;;  %v16655_v16 = vld [vmem:[#allocation62_spill] sm:$0xff] }
 0xa75   : > { %v6317_v40 = vsel %vm5741_vm3, %v13641_v39, %v6285_v41  ;;  %vm5751_vm15 = vcmp.ge.f32.partialorder %v16639_v30, 0.0  ;;  %v6208_v10 = vsel %vm14199_vm11, %v13939_v19, %v14158_v18  ;;  %v6233_v49 = vmul.f32 %v14058_v38, %v6232_v14  ;;  %vm16641_vm3 = vmmov %vm16633_vm2  ;;  %v16642_v39 = vld [vmem:[#allocation5_spill] sm:$0xff]  ;;  %v16648_v18 = vld [vmem:[#allocation24_spill] sm:$0xff] }
 0xa76   : > { %v6290_v50 = vmul.f32 %v16640_v13, %v13807_v44  ;;  %v6318_v37 = vsel %vm5742_vm9, %v13657_v17, %v6286_v35  ;;  %6347 = vst.msk [vmem:[%s14065_s28 + $0x40] sm:$0xff] %vm16641_vm3, %v6315_v26  ;;  %v16643_v9 = vand.u32 2147483647, %v16576_v63  ;;  %v6248_v19 = vmul.f32 %v14082_v20, %v6247_v33  ;;  %vm16647_vm9 = vmmov %vm16641_vm3  ;;  %v16652_v33 = vld [vmem:[#allocation109_spill] sm:$0xff]  ;;  %v16690_v41 = vld [vmem:[#allocation64_spill] sm:$0xff] }
 0xa77   : > { %vm6265_vm11 = vweird.f32 %v16588_v61  ;;  %v6291_v43 = vmul.f32 %v16646_v7, %v13811_v21  ;;  %v6319_v17 = vsel %vm5743_vm12, %v13664_v25, %v6287_v54  ;;  %6348 = vst.msk [vmem:[%s14065_s28 + $0x48] sm:$0xff] %vm16647_vm9, %v6316_v6  ;;  %v16649_v14 = vand.u32 2147483647, %v16579_v53  ;;  %vm16653_vm12 = vmmov %vm16638_vm4  ;;  %v16687_v7 = vld [vmem:[#allocation87_spill] sm:$0xff]  ;;  %v16696_v12 = vld [vmem:[#allocation46_spill] sm:$0xff] }
 0xa78   : > { %vm14229_vm2 = vcmp.eq.f32.partialorder %v16643_v9, 8.507059e+37  ;;  %v6263_v35 = vmul.f32 %v14096_v5, %v6262_v56  ;;  %v6269_v34 = vand.u32 2147483647, %v16588_v61  ;;  %v6292_v51 = vmul.f32 %v16652_v33, %v13865_v27  ;;  %6349 = vst.msk [vmem:[%s14065_s28 + $0x50] sm:$0xff] %vm16653_vm12, %v6317_v40  ;;  %vm16657_vm1 = vmmov %vm16647_vm9  ;;  %v16683_v9 = vld [vmem:[#allocation71_spill] sm:$0xff]  ;;  %v16697_v33 = vld [vmem:[#allocation112_spill] sm:$0xff] }
 0xa79   : > { %vm14245_vm3 = vcmp.eq.f32.partialorder %v16649_v14, 8.507059e+37  ;;  %v6320_v25 = vsel %vm5744_vm6, %v13699_v15, %v6288_v24  ;;  %v6219_v54 = vadd.f32 %v14046_v42, %v6218_v59  ;;  %v6271_v26 = vand.u32 2147483648, %v16588_v61  ;;  %6350 = vst.msk [vmem:[%s14065_s28 + $0x58] sm:$0xff] %vm16657_vm1, %v6318_v37  ;;  %v16659_v24 = vld [vmem:[#allocation54_spill] sm:$0xff]  ;;  %vm16660_vm9 = vmmov %vm16657_vm1 }
 0xa7a   : > { %v6293_v56 = vmul.f32 %v16655_v16, %v13873_v46  ;;  %vm16656_vm4 = vcmp.ge.f32.partialorder %v16617_v57, 0.0  ;;  %vm5755_vm6 = vcmp.ge.f32.partialorder %v16658_v32, 0.0  ;;  %v6234_v15 = vadd.f32 %v14058_v38, %v6233_v49  ;;  %6351 = vst.msk [vmem:[%s14065_s28 + $0x60] sm:$0xff] %vm16660_vm9, %v6319_v17  ;;  %v16661_v57 = vld [vmem:[#allocation119_spill] sm:$0xff]  ;;  %v16702_v16 = vld [vmem:[#allocation30_spill] sm:$0xff] }
 0xa7b   : > { %v6321_v23 = vsel %vm16656_vm4, %v13745_v0, %v6289_v60  ;;  %vm6236_vm12 = vweird.f32 %v14058_v38  ;;  %v6294_v6 = vmul.f32 %v16659_v24, %v13885_v52  ;;  %v6322_v22 = vsel %vm5746_vm5, %v13807_v44, %v6290_v50  ;;  %vm16662_vm4 = vmmov %vm16660_vm9  ;;  %v16665_v60 = vld [vmem:[#allocation4_spill] sm:$0xff] }
 0xa7c   : > { %v6249_v0 = vadd.f32 %v14082_v20, %v6248_v19  ;;  %vm6251_vm1 = vweird.f32 %v14082_v20  ;;  %v6295_v59 = vmul.f32 %v16661_v57, %v13933_v4  ;;  %v6323_v47 = vsel %vm5747_vm10, %v13811_v21, %v6291_v43  ;;  %6352 = vst.msk [vmem:[%s14065_s28 + $0x68] sm:$0xff] %vm16662_vm4, %v6320_v25  ;;  %vm14291_vm5 = vmor %vm6220_vm8, %vm6221_vm7  ;;  %v16686_v19 = vld [vmem:[#allocation82_spill] sm:$0xff]  ;;  %v16706_v24 = vld [vmem:[#allocation44_spill] sm:$0xff] }
 0xa7d   : > { %v6264_v28 = vadd.f32 %v14096_v5, %v6263_v35  ;;  %vm6266_vm9 = vweird.f32 %v14096_v5  ;;  %v6296_v40 = vmul.f32 %v16665_v60, %v13951_v29  ;;  %vm16666_vm10 = vcmp.ge.f32.partialorder %v16626_v36, 0.0  ;;  %6353 = vst.msk [vmem:[%s14065_s28 + $0x70] sm:$0xff] %vm16662_vm4, %v6321_v23  ;;  %v16671_v36 = vld [vmem:[#allocation53_spill] sm:$0xff]  ;;  %v16718_v60 = vld [vmem:[#allocation36_spill] sm:$0xff] }
 0xa7e   : > { %v6324_v21 = vsel %vm16666_vm10, %v13865_v27, %v6292_v51  ;;  %v6213_v63 = vsel %vm14181_vm13, %v14040_v2, %v6208_v10  ;;  %v6223_v62 = vsel %vm14291_vm5, %v14046_v42, %v6219_v54  ;;  %vm16667_vm7 = vweird.f32 %v16579_v53  ;;  %v16670_v27 = vld [vmem:[#allocation21_spill] sm:$0xff]  ;;  %vm16673_vm13 = vmmov %vm16662_vm4  ;;  %6355 = vst.msk [vmem:[%s14065_s28 + $0x80] sm:$0xff] %vm16662_vm4, %v6323_v47  ;;  %v16700_v54 = vld [vmem:[#allocation32_spill] sm:$0xff] }
 0xa7f   : > { %vm14314_vm8 = vmor %vm16667_vm7, %vm6236_vm12  ;;  %v6297_v13 = vmul.f32 %v16671_v36, %v16670_v27  ;;  %vm16672_vm10 = vcmp.ge.f32.partialorder %v16628_v11, 0.0  ;;  %6354 = vst.msk [vmem:[%s14065_s28 + $0x78] sm:$0xff] %vm16673_vm13, %v6322_v22  ;;  %vm14338_vm5 = vcmp.eq.f32.partialorder %v6254_v45, 8.507059e+37  ;;  %v6257_v37 = vor.u32 1.1754944e-38, %v6256_v58  ;;  %v16682_v45 = vld [vmem:[#allocation40_spill] sm:$0xff]  ;;  %v16712_v47 = vld [vmem:[#allocation15_spill] sm:$0xff] }
 0xa80   : > { %v6325_v2 = vsel %vm16672_vm10, %v13873_v46, %v6293_v56  ;;  %v6238_v42 = vsel %vm14314_vm8, %v14058_v38, %v6234_v15  ;;  %vm14332_vm12 = vmor %vm6250_vm14, %vm6251_vm1  ;;  %v16678_v46 = vld [vmem:[#allocation120_spill] sm:$0xff]  ;;  %v6326_v38 = vsel %vm5750_vm0, %v13885_v52, %v6294_v6  ;;  %v6299_v55 = vmul.f32 %v16683_v9, %v16682_v45  ;;  %v16703_v56 = vld [vmem:[#allocation29_spill] sm:$0xff] }
 0xa81   : > { %v6298_v10 = vmul.f32 %v16679_v8, %v16678_v46  ;;  %v6253_v50 = vsel %vm14332_vm12, %v14082_v20, %v6249_v0  ;;  %vm14356_vm14 = vmor %vm6265_vm11, %vm6266_vm9  ;;  %v6327_v52 = vsel %vm5751_vm15, %v13933_v4, %v6295_v59  ;;  %v16685_v20 = vld [vmem:[#allocation61_spill] sm:$0xff]  ;;  %v6300_v43 = vmul.f32 %v16687_v7, %v16686_v19  ;;  %v16705_v15 = vld [vmem:[#allocation86_spill] sm:$0xff] }
 0xa82   : > { %vm16684_vm0 = vmmov %vm16662_vm4  ;;  %v6228_v58 = vsel %vm14229_vm2, %v16685_v20, %v6223_v62  ;;  %v6268_v61 = vsel %vm14356_vm14, %v14096_v5, %v6264_v28  ;;  %vm16688_vm11 = vcmp.ge.f32.partialorder %v16642_v39, 0.0  ;;  %v6243_v4 = vsel %vm14245_vm3, %v14169_v31, %v6238_v42  ;;  %v16693_v39 = vld [vmem:[#allocation105_spill] sm:$0xff]  ;;  %v16708_v0 = vld [vmem:[#allocation70_spill] sm:$0xff] }
 0xa83   : > { %6356 = vst.msk [vmem:[%s14065_s28 + $0x88] sm:$0xff] %vm16684_vm0, %v6324_v21  ;;  %v6328_v17 = vsel %vm16688_vm11, %v13951_v29, %v6296_v40  ;;  %vm16689_vm1 = vmmov %vm16684_vm0  ;;  %v6272_v30 = vor.u32 1.1754944e-38, %v6271_v26  ;;  %v6301_v14 = vmul.f32 %v16690_v41, %v14136_v3  ;;  %vm16691_vm15 = vcmp.ge.f32.partialorder %v16648_v18, 0.0  ;;  %v16710_v59 = vld [vmem:[#allocation121_spill] sm:$0xff]  ;;  %v16719_v21 = vld [vmem:[#allocation52_spill] sm:$0xff] }
 0xa84   : > { %6357 = vst.msk [vmem:[%s14065_s28 + $0x90] sm:$0xff] %vm16689_vm1, %v6325_v2  ;;  %v6329_v5 = vsel %vm16691_vm15, %v16670_v27, %v6297_v13  ;;  %vm16692_vm2 = vmmov %vm16684_vm0  ;;  %v6258_v29 = vsel %vm14338_vm5, %v6257_v37, %v6253_v50  ;;  %vm6270_vm9 = vcmp.eq.f32.partialorder %v6269_v34, 8.507059e+37  ;;  %v6302_v35 = vmul.f32 %v16693_v39, %v6213_v63  ;;  %v16699_v34 = vld [vmem:[#allocation7_spill] sm:$0xff]  ;;  %v16720_v62 = vld [vmem:[#allocation48_spill] sm:$0xff] }
 0xa85   : > { %6358 = vst.msk [vmem:[%s14065_s28 + $0x98] sm:$0xff] %vm16692_vm2, %v6326_v38  ;;  %vm16694_vm3 = vcmp.ge.f32.partialorder %v16654_v1, 0.0  ;;  %vm16695_vm7 = vmmov %vm16684_vm0  ;;  %vm5756_vm8 = vcmp.ge.f32.partialorder %v16696_v12, 0.0  ;;  %v6273_v18 = vsel %vm6270_vm9, %v6272_v30, %v6268_v61  ;;  %v6303_v51 = vmul.f32 %v16697_v33, %v6228_v58  ;;  %v16721_v27 = vld [vmem:[#allocation99_spill] sm:$0xff]  ;;  %v16723_v42 = vld [vmem:[#allocation96_spill] sm:$0xff] }
 0xa86   : > { %v6330_v31 = vsel %vm16694_vm3, %v16678_v46, %v6298_v10  ;;  %6359 = vst.msk [vmem:[%s14065_s28 + $0xa0] sm:$0xff] %vm16695_vm7, %v6327_v52  ;;  %v6331_v25 = vsel %vm5755_vm6, %v16682_v45, %v6299_v55  ;;  %vm16698_vm10 = vmmov %vm16684_vm0  ;;  %vm5757_vm13 = vcmp.ge.f32.partialorder %v16699_v34, 0.0  ;;  %v6304_v1 = vmul.f32 %v16700_v54, %v6243_v4  ;;  %v16722_v13 = vld [vmem:[#allocation115_spill] sm:$0xff]  ;;  %v16724_v11 = vld [vmem:[#allocation117_spill] sm:$0xff] }
 0xa87   : > { %6360 = vst.msk [vmem:[%s14065_s28 + $0xa8] sm:$0xff] %vm16698_vm10, %v6328_v17  ;;  %v6332_v26 = vsel %vm5756_vm8, %v16686_v19, %v6300_v43  ;;  %vm16701_vm12 = vmmov %vm16684_vm0  ;;  %vm5758_vm5 = vcmp.ge.f32.partialorder %v16702_v16, 0.0  ;;  %v6305_v23 = vmul.f32 %v16703_v56, %v6258_v29  ;;  %v6333_v32 = vsel %vm5757_vm13, %v14136_v3, %v6301_v14  ;;  %v16725_v8 = vld [vmem:[#allocation108_spill] sm:$0xff]  ;;  %v16726_v38 = vld [vmem:[#allocation47_spill] sm:$0xff] }
 0xa88   : > { %6361 = vst.msk [vmem:[%s14065_s28 + $0xb0] sm:$0xff] %vm16701_vm12, %v6329_v5  ;;  %vm16704_vm6 = vmmov %vm16684_vm0  ;;  %vm5759_vm4 = vcmp.ge.f32.partialorder %v16705_v15, 0.0  ;;  %v6306_v6 = vmul.f32 %v16706_v24, %v6273_v18  ;;  %v6334_v22 = vsel %vm5758_vm5, %v6213_v63, %v6302_v35  ;;  %v6403_v40 = vmul.f32 1.442695, %v16718_v60  ;;  %v16727_v37 = vld [vmem:[#allocation9_spill] sm:$0xff]  ;;  %v16729_v52 = vld [vmem:[#allocation68_spill] sm:$0xff] }
 0xa89   : > { %6362 = vst.msk [vmem:[%s14065_s28 + $0xb8] sm:$0xff] %vm16704_vm6, %v6330_v31  ;;  %vm16707_vm14 = vmmov %vm16684_vm0  ;;  %vm5760_vm0 = vcmp.ge.f32.partialorder %v16708_v0, 0.0  ;;  %v6335_v57 = vsel %vm5759_vm4, %v6228_v58, %v6303_v51  ;;  %v6405_v63 = vmul.f32 1.442695, %v16719_v21  ;;  %v6407_v49 = vmul.f32 1.442695, %v16720_v62 }
 0xa8a   : > { %6363 = vst.msk [vmem:[%s14065_s28 + $0xc0] sm:$0xff] %vm16707_vm14, %v6331_v25  ;;  %vm16709_vm11 = vmmov %vm16689_vm1  ;;  %vm5761_vm1 = vcmp.ge.f32.partialorder %v16710_v59, 0.0  ;;  %v6336_v3 = vsel %vm5760_vm0, %v6243_v4, %v6304_v1  ;;  %v6409_v36 = vmul.f32 1.442695, %v16721_v27  ;;  %7466 = vpow2.f32 %v6403_v40  ;;  %v16728_v9 = vld [vmem:[#allocation13_spill] sm:$0xff]  ;;  %v16731_v7 = vld [vmem:[#allocation50_spill] sm:$0xff] }
 0xa8b   : > { %6364 = vst.msk [vmem:[%s14065_s28 + $0xc8] sm:$0xff] %vm16709_vm11, %v6332_v26  ;;  %vm16711_vm15 = vmmov %vm16692_vm2  ;;  %vm5762_vm2 = vcmp.ge.f32.partialorder %v16712_v47, 0.0  ;;  %v6337_v44 = vsel %vm5761_vm1, %v6258_v29, %v6305_v23  ;;  %v6411_v2 = vmul.f32 1.442695, %v16722_v13  ;;  %7468 = vpow2.f32 %v6405_v63  ;;  %v16730_v61 = vld [vmem:[#allocation81_spill] sm:$0xff]  ;;  %v16732_v17 = vld [vmem:[#allocation39_spill] sm:$0xff] }
 0xa8c   : > { %6365 = vst.msk [vmem:[%s14065_s28 + $0xd0] sm:$0xff] %vm16711_vm15, %v6333_v32  ;;  %vm16713_vm9 = vmmov %vm16704_vm6  ;;  %v6338_v28 = vsel %vm5762_vm2, %v6273_v18, %v6306_v6  ;;  %v6413_v53 = vmul.f32 1.442695, %v16723_v42  ;;  %7470 = vpow2.f32 %v6407_v49  ;;  %v6415_v46 = vmul.f32 1.442695, %v16724_v11  ;;  %v16733_v41 = vld [vmem:[#allocation67_spill] sm:$0xff] }
 0xa8d   : > { %6366 = vst.msk [vmem:[%s14065_s28 + $0xd8] sm:$0xff] %vm16713_vm9, %v6334_v22  ;;  %vm16714_vm3 = vmmov %vm16704_vm6  ;;  %7472 = vpow2.f32 %v6409_v36  ;;  %v6417_v10 = vmul.f32 1.442695, %v16725_v8  ;;  %v6419_v50 = vmul.f32 1.442695, %v16726_v38  ;;  %vm6371_vm13 = vcmp.gt.f32.partialorder %v16718_v60, 0.0 }
 0xa8e   : > { %6367 = vst.msk [vmem:[%s14065_s28 + $0xe0] sm:$0xff] %vm16714_vm3, %v6335_v57  ;;  %vm16715_vm7 = vmmov %vm16714_vm3  ;;  %7474 = vpow2.f32 %v6411_v2  ;;  %v6421_v48 = vmul.f32 1.442695, %v16727_v37  ;;  %vm6372_vm12 = vcmp.gt.f32.partialorder %v16719_v21, 0.0  ;;  %v6423_v55 = vmul.f32 1.442695, %v16728_v9 }
 0xa8f   : > { %6368 = vst.msk [vmem:[%s14065_s28 + $0xe8] sm:$0xff] %vm16715_vm7, %v6336_v3  ;;  %vm16716_vm8 = vmmov %vm16714_vm3  ;;  %7476 = vpow2.f32 %v6413_v53  ;;  %v6425_v20 = vmul.f32 1.442695, %v16729_v52  ;;  %vm6373_vm5 = vcmp.gt.f32.partialorder %v16720_v62, 0.0  ;;  %v6427_v19 = vmul.f32 1.442695, %v16730_v61 }
 0xa90   : > { %6369 = vst.msk [vmem:[%s14065_s28 + $0xf0] sm:$0xff] %vm16716_vm8, %v6337_v44  ;;  %vm16717_vm10 = vmmov %vm16714_vm3  ;;  %v7467_v45 = vpop.eup %7466  ;;  %7478 = vpow2.f32 %v6415_v46  ;;  %v6429_v43 = vmul.f32 1.442695, %v16731_v7  ;;  %v6431_v4 = vmul.f32 1.442695, %v16732_v17  ;;  %vm6374_vm6 = vcmp.gt.f32.partialorder %v16721_v27, 0.0 }
 0xa91   : > { %6370 = vst.msk [vmem:[%s14065_s28 + $0xf8] sm:$0xff] %vm16717_vm10, %v6338_v28  ;;  %v7469_v58 = vpop.eup %7468  ;;  %7480 = vpow2.f32 %v6417_v10  ;;  %v6433_v14 = vmul.f32 1.442695, %v16733_v41  ;;  %v16734_v5 = vld [vmem:[#allocation85_spill] sm:$0xff]  ;;  %v16735_v39 = vld [vmem:[#allocation88_spill] sm:$0xff]  ;;  %vm6375_vm4 = vcmp.gt.f32.partialorder %v16722_v13, 0.0 }
 0xa92   : > { %v7471_v30 = vpop.eup %7470  ;;  %7482 = vpow2.f32 %v6419_v50  ;;  %v6435_v29 = vmul.f32 1.442695, %v16734_v5  ;;  %v6437_v35 = vmul.f32 1.442695, %v16735_v39  ;;  %v16736_v12 = vld [vmem:[#allocation98_spill] sm:$0xff]  ;;  %v16737_v33 = vld [vmem:[#allocation111_spill] sm:$0xff] }
 0xa93   : > { %v7473_v31 = vpop.eup %7472  ;;  %7484 = vpow2.f32 %v6421_v48  ;;  %v6439_v18 = vmul.f32 1.442695, %v16736_v12  ;;  %v14461_v51 = vmul.f32 1.442695, %v16737_v33  ;;  %v7265_v25 = vadd.f32 -1.0, %v7467_v45  ;;  %v16738_v54 = vld [vmem:[#allocation23_spill] sm:$0xff] }
 0xa94   : > { %v7475_v34 = vpop.eup %7474  ;;  %vm6376_vm14 = vcmp.gt.f32.partialorder %v16723_v42, 0.0  ;;  %7486 = vpow2.f32 %v6423_v55  ;;  %v14465_v1 = vmul.f32 1.442695, %v16738_v54  ;;  %v16739_v26 = vld [vmem:[#allocation26_spill] sm:$0xff]  ;;  %vm6377_vm0 = vcmp.gt.f32.partialorder %v16724_v11, 0.0  ;;  %v16741_v15 = vld [vmem:[#allocation25_spill] sm:$0xff] }
 0xa95   : > { %v14468_v16 = vmul.f32 1.442695, %v16739_v26  ;;  %v16740_v56 = vld [vmem:[#allocation14_spill] sm:$0xff]  ;;  %v7477_v32 = vpop.eup %7476  ;;  %v14475_v24 = vmul.f32 1.442695, %v16741_v15  ;;  %v16742_v6 = vld [vmem:[#allocation20_spill] sm:$0xff]  ;;  %7488 = vpow2.f32 %v6425_v20  ;;  %v6499_v55 = vsel %vm6371_vm13, %v16718_v60, %v7265_v25 }
 0xa96   : > { %v14471_v23 = vmul.f32 1.442695, %v16740_v56  ;;  %v14478_v22 = vmul.f32 1.442695, %v16742_v6  ;;  %v7266_v0 = vadd.f32 -1.0, %v7469_v58  ;;  %v7267_v57 = vadd.f32 -1.0, %v7471_v30  ;;  %v7479_v59 = vpop.eup %7478 }
 0xa97   : > { %vm6378_vm11 = vcmp.gt.f32.partialorder %v16725_v8, 0.0  ;;  %v16743_v3 = vld [vmem:[#allocation65_spill] sm:$0xff]  ;;  %v16744_v44 = vld [vmem:[#allocation80_spill] sm:$0xff]  ;;  %v7268_v40 = vadd.f32 -1.0, %v7473_v31  ;;  %v7481_v63 = vpop.eup %7480  ;;  %vm6379_vm1 = vcmp.gt.f32.partialorder %v16726_v38, 0.0  ;;  %7490 = vpow2.f32 %v6427_v19  ;;  %v16745_v49 = vld [vmem:[#allocation38_spill] sm:$0xff] }
 0xa98   : > { %v14482_v47 = vmul.f32 1.442695, %v16743_v3  ;;  %v14485_v28 = vmul.f32 1.442695, %v16744_v44  ;;  %v14489_v36 = vmul.f32 1.442695, %v16745_v49  ;;  %v7483_v10 = vpop.eup %7482  ;;  %7492 = vpow2.f32 %v6429_v43 }
 0xa99   : > { %v16746_v2 = vld [vmem:[#allocation75_spill] sm:$0xff]  ;;  %v7269_v46 = vadd.f32 -1.0, %v7475_v34  ;;  %vm6380_vm15 = vcmp.gt.f32.partialorder %v16727_v37, 0.0  ;;  %v16747_v50 = vld [vmem:[#allocation12_spill] sm:$0xff]  ;;  %v7270_v45 = vadd.f32 -1.0, %v7477_v32  ;;  %v7485_v20 = vpop.eup %7484  ;;  %vm6381_vm2 = vcmp.gt.f32.partialorder %v16728_v9, 0.0 }
 0xa9a   : > { %v14492_v53 = vmul.f32 1.442695, %v16746_v2  ;;  %v14496_v48 = vmul.f32 1.442695, %v16747_v50  ;;  %7494 = vpow2.f32 %v6431_v4  ;;  %v16748_v58 = vld [vmem:[#allocation6_spill] sm:$0xff]  ;;  %v7271_v30 = vadd.f32 -1.0, %v7479_v59  ;;  %v7487_v31 = vpop.eup %7486 }
 0xa9b   : > { %v14504_v19 = vmul.f32 1.442695, %v16748_v58  ;;  %v6500_v43 = vsel %vm6372_vm12, %v16719_v21, %v7266_v0  ;;  %vm6382_vm9 = vcmp.gt.f32.partialorder %v16729_v52, 0.0  ;;  %7496 = vpow2.f32 %v6433_v14  ;;  %v16749_v34 = vld [vmem:[#allocation8_spill] sm:$0xff]  ;;  %v7489_v59 = vpop.eup %7488 }
 0xa9c   : > { %v14511_v32 = vmul.f32 1.442695, %v16749_v34  ;;  %v7272_v60 = vadd.f32 -1.0, %v7481_v63  ;;  %v6501_v4 = vsel %vm6373_vm5, %v16720_v62, %v7267_v57  ;;  %vm6383_vm3 = vcmp.gt.f32.partialorder %v16730_v61, 0.0 }
 0xa9d   : > { %7498 = vpow2.f32 %v6435_v29  ;;  %v7273_v25 = vadd.f32 -1.0, %v7483_v10  ;;  %v6502_v21 = vsel %vm6374_vm6, %v16721_v27, %v7268_v40  ;;  %v6531_v0 = vpack.c.bf16 %v6499_v55, %v6499_v55  ;;  %v7491_v57 = vpop.eup %7490 }
 0xa9e   : > { %vm6384_vm7 = vcmp.gt.f32.partialorder %v16731_v7, 0.0  ;;  %7500 = vpow2.f32 %v6437_v35  ;;  %v7274_v14 = vadd.f32 -1.0, %v7485_v20  ;;  %v6503_v62 = vsel %vm6375_vm4, %v16722_v13, %v7269_v46  ;;  %v7493_v10 = vpop.eup %7492 }
 0xa9f   : > { %v6532_v29 = vpack.c.bf16 %v6500_v43, %v6500_v43  ;;  %vm6385_vm8 = vcmp.gt.f32.partialorder %v16732_v17, 0.0  ;;  %7502 = vpow2.f32 %v6439_v18  ;;  %v7275_v27 = vadd.f32 -1.0, %v7487_v31 }
 0xaa0   : > { %v6504_v40 = vsel %vm6376_vm14, %v16723_v42, %v7270_v45  ;;  %v6533_v63 = vpack.c.bf16 %v6501_v4, %v6501_v4  ;;  %vm6386_vm10 = vcmp.gt.f32.partialorder %v16733_v41, 0.0  ;;  %7504 = vpow2.f32 %v14461_v51  ;;  %v7495_v18 = vpop.eup %7494 }
 0xaa1   : > { %v6505_v13 = vsel %vm6377_vm0, %v16724_v11, %v7271_v30  ;;  %v6534_v35 = vpack.c.bf16 %v6502_v21, %v6502_v21  ;;  %vm6563_vm13 = vcmask 60416   ;;  %vm6387_vm12 = vcmp.gt.f32.partialorder %v16734_v5, 0.0  ;;  %v7497_v51 = vpop.eup %7496 }
 0xaa2   : > { %7506 = vpow2.f32 %v14465_v1  ;;  %v7276_v46 = vadd.f32 -1.0, %v7489_v59  ;;  %v6506_v42 = vsel %vm6378_vm11, %v16725_v8, %v7272_v60  ;;  %v6535_v45 = vpack.c.bf16 %v6503_v62, %v6503_v62  ;;  %6564 = vst.msk [vmem:[%s14523_s12] sm:$0xf] %vm6563_vm13, %v6531_v0 }
 0xaa3   : > { %vm6388_vm5 = vcmp.gt.f32.partialorder %v16735_v39, 0.0  ;;  %7508 = vpow2.f32 %v14468_v16  ;;  %v7277_v11 = vadd.f32 -1.0, %v7491_v57  ;;  %v6507_v55 = vsel %vm6379_vm1, %v16726_v38, %v7273_v25  ;;  %6565 = vst.msk [vmem:[%s14523_s12 + $0x4] sm:$0xf] %vm6563_vm13, %v6532_v29  ;;  %v7499_v20 = vpop.eup %7498 }
 0xaa4   : > { %v6536_v1 = vpack.c.bf16 %v6504_v40, %v6504_v40  ;;  %vm6389_vm6 = vcmp.gt.f32.partialorder %v16736_v12, 0.0  ;;  %7510 = vpow2.f32 %v14471_v23  ;;  %v7278_v8 = vadd.f32 -1.0, %v7493_v10  ;;  %6566 = vst.msk [vmem:[%s14523_s12 + $0x8] sm:$0xf] %vm6563_vm13, %v6533_v63  ;;  %v7501_v43 = vpop.eup %7500 }
 0xaa5   : > { %v6508_v16 = vsel %vm6380_vm15, %v16727_v37, %v7274_v14  ;;  %v6537_v30 = vpack.c.bf16 %v6505_v13, %v6505_v13  ;;  %vm6390_vm4 = vcmp.gt.f32.partialorder %v16737_v33, 0.0  ;;  %7512 = vpow2.f32 %v14475_v24  ;;  %6567 = vst.msk [vmem:[%s14523_s12 + $0xc] sm:$0xf] %vm6563_vm13, %v6534_v35  ;;  %v7503_v60 = vpop.eup %7502 }
 0xaa6   : > { %v7279_v38 = vadd.f32 -1.0, %v7495_v18  ;;  %v6509_v23 = vsel %vm6381_vm2, %v16728_v9, %v7275_v27  ;;  %v6538_v31 = vpack.c.bf16 %v6506_v42, %v6506_v42  ;;  %7514 = vpow2.f32 %v14478_v22  ;;  %6568 = vst.msk [vmem:[%s14523_s12 + $0x10] sm:$0xf] %vm6563_vm13, %v6535_v45  ;;  %v7505_v24 = vpop.eup %7504 }
 0xaa7   : > { %v7280_v37 = vadd.f32 -1.0, %v7497_v51  ;;  %v6510_v4 = vsel %vm6382_vm9, %v16729_v52, %v7276_v46  ;;  %v6539_v25 = vpack.c.bf16 %v6507_v55, %v6507_v55  ;;  %7516 = vpow2.f32 %v14482_v47  ;;  %6569 = vst.msk [vmem:[%s14523_s12 + $0x14] sm:$0xf] %vm6563_vm13, %v6536_v1 }
 0xaa8   : > { %v7281_v9 = vadd.f32 -1.0, %v7499_v20  ;;  %v6511_v21 = vsel %vm6383_vm3, %v16730_v61, %v7277_v11  ;;  %v6540_v0 = vpack.c.bf16 %v6508_v16, %v6508_v16  ;;  %v7507_v22 = vpop.eup %7506  ;;  %7518 = vpow2.f32 %v14485_v28  ;;  %6570 = vst.msk [vmem:[%s14523_s12 + $0x18] sm:$0xf] %vm6563_vm13, %v6537_v30 }
 0xaa9   : > { %v7282_v52 = vadd.f32 -1.0, %v7501_v43  ;;  %v6512_v59 = vsel %vm6384_vm7, %v16731_v7, %v7278_v8  ;;  %v6541_v14 = vpack.c.bf16 %v6509_v23, %v6509_v23  ;;  %v7509_v47 = vpop.eup %7508  ;;  %7520 = vpow2.f32 %v14489_v36  ;;  %6571 = vst.msk [vmem:[%s14523_s12 + $0x1c] sm:$0xf] %vm6563_vm13, %v6538_v31 }
 0xaaa   : > { %v7283_v61 = vadd.f32 -1.0, %v7503_v60  ;;  %v6513_v62 = vsel %vm6385_vm8, %v16732_v17, %v7279_v38  ;;  %v6542_v29 = vpack.c.bf16 %v6510_v4, %v6510_v4  ;;  %v7511_v28 = vpop.eup %7510  ;;  %7522 = vpow2.f32 %v14492_v53  ;;  %6572 = vst.msk [vmem:[%s14523_s12 + $0x20] sm:$0xf] %vm6563_vm13, %v6539_v25 }
 0xaab   : > { %v7284_v7 = vadd.f32 -1.0, %v7505_v24  ;;  %v6514_v57 = vsel %vm6386_vm10, %v16733_v41, %v7280_v37  ;;  %v6543_v27 = vpack.c.bf16 %v6511_v21, %v6511_v21  ;;  %v7513_v36 = vpop.eup %7512  ;;  %7524 = vpow2.f32 %v14496_v48  ;;  %6573 = vst.msk [vmem:[%s14523_s12 + $0x24] sm:$0xf] %vm6563_vm13, %v6540_v0 }
 0xaac   : > { %v7285_v17 = vadd.f32 -1.0, %v7507_v22  ;;  %v6515_v40 = vsel %vm6387_vm12, %v16734_v5, %v7281_v9  ;;  %v6544_v63 = vpack.c.bf16 %v6512_v59, %v6512_v59  ;;  %v7515_v53 = vpop.eup %7514  ;;  %7526 = vpow2.f32 %v14504_v19  ;;  %6574 = vst.msk [vmem:[%s14523_s12 + $0x28] sm:$0xf] %vm6563_vm13, %v6541_v14 }
 0xaad   : > { %v7286_v41 = vadd.f32 -1.0, %v7509_v47  ;;  %v6516_v10 = vsel %vm6388_vm5, %v16735_v39, %v7282_v52  ;;  %v6545_v13 = vpack.c.bf16 %v6513_v62, %v6513_v62  ;;  %v7517_v48 = vpop.eup %7516  ;;  %7528 = vpow2.f32 %v14511_v32  ;;  %6575 = vst.msk [vmem:[%s14523_s12 + $0x2c] sm:$0xf] %vm6563_vm13, %v6542_v29 }
 0xaae   : > { %v7287_v5 = vadd.f32 -1.0, %v7511_v28  ;;  %v6517_v35 = vsel %vm6389_vm6, %v16736_v12, %v7283_v61  ;;  %v6546_v18 = vpack.c.bf16 %v6514_v57, %v6514_v57  ;;  %v7519_v19 = vpop.eup %7518  ;;  %vm6391_vm14 = vcmp.gt.f32.partialorder %v16738_v54, 0.0  ;;  %6576 = vst.msk [vmem:[%s14523_s12 + $0x30] sm:$0xf] %vm6563_vm13, %v6543_v27 }
 0xaaf   : > { %v7288_v39 = vadd.f32 -1.0, %v7513_v36  ;;  %v6518_v46 = vsel %vm6390_vm4, %v16737_v33, %v7284_v7  ;;  %v6547_v42 = vpack.c.bf16 %v6515_v40, %v6515_v40  ;;  %v7521_v32 = vpop.eup %7520  ;;  %vm6392_vm0 = vcmp.gt.f32.partialorder %v16739_v26, 0.0  ;;  %6577 = vst.msk [vmem:[%s14523_s12 + $0x34] sm:$0xf] %vm6563_vm13, %v6544_v63 }
 0xab0   : > { %v7289_v12 = vadd.f32 -1.0, %v7515_v53  ;;  %v6519_v45 = vsel %vm6391_vm14, %v16738_v54, %v7285_v17  ;;  %v6548_v51 = vpack.c.bf16 %v6516_v10, %v6516_v10  ;;  %v7523_v11 = vpop.eup %7522  ;;  %vm6393_vm11 = vcmp.gt.f32.partialorder %v16740_v56, 0.0  ;;  %6578 = vst.msk [vmem:[%s14523_s12 + $0x38] sm:$0xf] %vm6563_vm13, %v6545_v13 }
 0xab1   : > { %v7290_v55 = vadd.f32 -1.0, %v7517_v48  ;;  %v6520_v33 = vsel %vm6392_vm0, %v16739_v26, %v7286_v41  ;;  %v6549_v1 = vpack.c.bf16 %v6517_v35, %v6517_v35  ;;  %v7525_v20 = vpop.eup %7524  ;;  %vm6394_vm1 = vcmp.gt.f32.partialorder %v16741_v15, 0.0  ;;  %6579 = vst.msk [vmem:[%s14523_s12 + $0x3c] sm:$0xf] %vm6563_vm13, %v6546_v18 }
 0xab2   : > { %v7291_v8 = vadd.f32 -1.0, %v7519_v19  ;;  %v6521_v54 = vsel %vm6393_vm11, %v16740_v56, %v7287_v5  ;;  %v6550_v16 = vpack.c.bf16 %v6518_v46, %v6518_v46  ;;  %v7527_v30 = vpop.eup %7526  ;;  %vm6395_vm15 = vcmp.gt.f32.partialorder %v16742_v6, 0.0  ;;  %6580 = vst.msk [vmem:[%s14523_s12 + $0x40] sm:$0xf] %vm6563_vm13, %v6547_v42 }
 0xab3   : > { %v7292_v43 = vadd.f32 -1.0, %v7521_v32  ;;  %v6522_v26 = vsel %vm6394_vm1, %v16741_v15, %v7288_v39  ;;  %v6551_v38 = vpack.c.bf16 %v6519_v45, %v6519_v45  ;;  %v7529_v23 = vpop.eup %7528  ;;  %vm6396_vm2 = vcmp.gt.f32.partialorder %v16743_v3, 0.0  ;;  %6581 = vst.msk [vmem:[%s14523_s12 + $0x44] sm:$0xf] %vm6563_vm13, %v6548_v51 }
 0xab4   : > { %v7293_v31 = vadd.f32 -1.0, %v7523_v11  ;;  %v6523_v56 = vsel %vm6395_vm15, %v16742_v6, %v7289_v12  ;;  %v6552_v60 = vpack.c.bf16 %v6520_v33, %v6520_v33  ;;  %vm6397_vm9 = vcmp.gt.f32.partialorder %v16744_v44, 0.0  ;;  %6582 = vst.msk [vmem:[%s14523_s12 + $0x48] sm:$0xf] %vm6563_vm13, %v6549_v1 }
 0xab5   : > { %v7294_v37 = vadd.f32 -1.0, %v7525_v20  ;;  %v6524_v4 = vsel %vm6396_vm2, %v16743_v3, %v7290_v55  ;;  %v6553_v15 = vpack.c.bf16 %v6521_v54, %v6521_v54  ;;  %vm6398_vm3 = vcmp.gt.f32.partialorder %v16745_v49, 0.0  ;;  %6583 = vst.msk [vmem:[%s14523_s12 + $0x4c] sm:$0xf] %vm6563_vm13, %v6550_v16 }
 0xab6   : > { %v7295_v25 = vadd.f32 -1.0, %v7527_v30  ;;  %v6525_v24 = vsel %vm6397_vm9, %v16744_v44, %v7291_v8  ;;  %v6554_v6 = vpack.c.bf16 %v6522_v26, %v6522_v26  ;;  %vm6399_vm7 = vcmp.gt.f32.partialorder %v16746_v2, 0.0  ;;  %6584 = vst.msk [vmem:[%s14523_s12 + $0x50] sm:$0xf] %vm6563_vm13, %v6551_v38 }
 0xab7   : > { %v7296_v9 = vadd.f32 -1.0, %v7529_v23  ;;  %v6526_v21 = vsel %vm6398_vm3, %v16745_v49, %v7292_v43  ;;  %v6555_v3 = vpack.c.bf16 %v6523_v56, %v6523_v56  ;;  %vm6400_vm8 = vcmp.gt.f32.partialorder %v16747_v50, 0.0  ;;  %6585 = vst.msk [vmem:[%s14523_s12 + $0x54] sm:$0xf] %vm6563_vm13, %v6552_v60 }
 0xab8   : > { %v6527_v0 = vsel %vm6399_vm7, %v16746_v2, %v7293_v31  ;;  %v6556_v22 = vpack.c.bf16 %v6524_v4, %v6524_v4  ;;  %vm6401_vm10 = vcmp.gt.f32.partialorder %v16748_v58, 0.0  ;;  %v6528_v44 = vsel %vm6400_vm8, %v16747_v50, %v7294_v37  ;;  %6586 = vst.msk [vmem:[%s14523_s12 + $0x58] sm:$0xf] %vm6563_vm13, %v6553_v15 }
 0xab9   : > { %v6557_v49 = vpack.c.bf16 %v6525_v24, %v6525_v24  ;;  %vm6402_vm12 = vcmp.gt.f32.partialorder %v16749_v34, 0.0  ;;  %v6529_v2 = vsel %vm6401_vm10, %v16748_v58, %v7295_v25  ;;  %v6558_v52 = vpack.c.bf16 %v6526_v21, %v6526_v21  ;;  %6587 = vst.msk [vmem:[%s14523_s12 + $0x5c] sm:$0xf] %vm6563_vm13, %v6554_v6 }
 0xaba   : > { %v6530_v59 = vsel %vm6402_vm12, %v16749_v34, %v7296_v9  ;;  %v6559_v14 = vpack.c.bf16 %v6527_v0, %v6527_v0  ;;  %6588 = vst.msk [vmem:[%s14523_s12 + $0x60] sm:$0xf] %vm6563_vm13, %v6555_v3  ;;  %v6560_v50 = vpack.c.bf16 %v6528_v44, %v6528_v44  ;;  %v6561_v47 = vpack.c.bf16 %v6529_v2, %v6529_v2 }
 0xabb   : > { %6589 = vst.msk [vmem:[%s14523_s12 + $0x64] sm:$0xf] %vm6563_vm13, %v6556_v22  ;;  %v6562_v61 = vpack.c.bf16 %v6530_v59, %v6530_v59 }
 0xabc   : > { %6590 = vst.msk [vmem:[%s14523_s12 + $0x68] sm:$0xf] %vm6563_vm13, %v6557_v49 }
 0xabd   : > { %6591 = vst.msk [vmem:[%s14523_s12 + $0x6c] sm:$0xf] %vm6563_vm13, %v6558_v52 }
 0xabe   : > { %6592 = vst.msk [vmem:[%s14523_s12 + $0x70] sm:$0xf] %vm6563_vm13, %v6559_v14 }
 0xabf   : > { %6593 = vst.msk [vmem:[%s14523_s12 + $0x74] sm:$0xf] %vm6563_vm13, %v6560_v50 }
 0xac0   : > { %6594 = vst.msk [vmem:[%s14523_s12 + $0x78] sm:$0xf] %vm6563_vm13, %v6561_v47 }
 0xac1   : > { %6595 = vst.msk [vmem:[%s14523_s12 + $0x7c] sm:$0xf] %vm6563_vm13, %v6562_v61 }
 0xac2 PF: > { %s20_s30 = sadd.s32 1, %s7589_s30  }
 0xac3   : > { %p17_p4 = scmp.ge.s32.totalorder %s20_s30, 4  }
 0xac5   :  { %19 = sbr.rel (!%p17_p4) target bundleno = 1 (0x1), region = 110 }

</bundles_post_ra>
